<compile_context>
chip_gen: v7x
topology: tpu7x:2x2x1
jax: 0.10.0
libtpu: 0.0.40
codegen_flags: <defaults>
</compile_context>

<pallas_src>
import functools

import jax
import jax.numpy as jnp
from jax import lax
from jax.experimental import pallas as pl
from jax.experimental.pallas import tpu as pltpu


_BN_EPS = 1e-5
_SLOPE = 0.2
_C = 32        # internal channel width (nfc / min_nfc); head input zero-padded to this
_K = 3         # conv kernel size


def _round_up(x, m):
    return ((x + m - 1) // m) * m


def _lrelu(x):
    return jnp.where(x >= 0, x, _SLOPE * x)


# ----------------------------------------------------------------------------
# Fused Pallas kernel: whole WDiscriminator forward, whole batch, one call.
# ----------------------------------------------------------------------------
def _wdisc_fused_kernel(x_ref, w_ref, g_ref, b_ref, wt_ref, bt_ref, mask_ref,
                        o_ref, act_ref, patches_ref, *, n_conv, Wp, Mq, G,
                        inv_count):
    """All refs in VMEM.

      x_ref      : (C, Mq)   f32   transposed, spatially padded, lane-padded input
      w_ref      : (L, C, 9C) bf16 packed head+body conv weights
      g_ref      : (L, C, 1) f32   BatchNorm gammas
      b_ref      : (L, C, 1) f32   BatchNorm betas
      wt_ref     : (8, 9C)   bf16  tail conv weight (row 0 real, rows 1..7 zero)
      bt_ref     : (1, 1)    f32   tail conv bias
      mask_ref   : (1, Mq)   f32   1.0 on valid (non-border, non-lane-pad) pixels
      o_ref      : (1, Mq)   f32   tail output over all padded positions
      act_ref    : (C, T)    f32   scratch: flat padded activation (guards both sides)
      patches_ref: (9C, Mq)  bf16  scratch: transposed shifted-row im2col matrix
    """
    C = _C
    T = act_ref.shape[1]

    # Zero only the guard bands (feedback item: don't zero the interior that is
    # immediately overwritten).  The image region [G, G+Mq) comes from the
    # pre-padded input whose 1-pixel borders are already zero; guards are never
    # written again.  All three stores are lane-aligned and full width.
    act_ref[:, :G] = jnp.zeros((C, G), jnp.float32)
    act_ref[:, G + Mq:] = jnp.zeros((C, T - G - Mq), jnp.float32)
    act_ref[:, G:G + Mq] = x_ref[...]

    mask = mask_ref[...]                                   # (1, Mq)

    def build_patches():
        # Transposed shifted-row im2col: each 3x3 tap is a constant lane
        # offset of the flat activation; the write is a 32-row (sublane
        # aligned), full-lane-width bf16 block -- no strided slices, no
        # reshapes, no masked column stores.
        for kh in range(_K):
            for kw in range(_K):
                tap = kh * _K + kw
                off = (kh - 1) * Wp + (kw - 1)
                src = act_ref[:, G + off:G + off + Mq]     # (C, Mq) f32
                patches_ref[tap * C:(tap + 1) * C, :] = src.astype(jnp.bfloat16)

    # ---- head + body : Conv3x3 (bias folded away by BN) + BN + LeakyReLU ----
    for l in range(n_conv):
        build_patches()

        # One lane-dense bf16 MXU dot per layer, f32 accumulation:
        # (C, 9C) @ (9C, Mq) -> (C, Mq).
        y = jnp.dot(w_ref[l], patches_ref[...],
                    preferred_element_type=jnp.float32)

        # BatchNorm2d training semantics over the valid pixels only, single
        # pass (sum + sum of squares).  Border columns of y hold finite
        # garbage (row wrap-around) and are excluded by the mask.
        ym = y * mask
        s1 = jnp.sum(ym, axis=1, keepdims=True)            # (C, 1)
        s2 = jnp.sum(ym * y, axis=1, keepdims=True)        # (C, 1)
        mean = s1 * inv_count
        var = s2 * inv_count - mean * mean
        scale = g_ref[l] * lax.rsqrt(var + _BN_EPS)
        shift = b_ref[l] - mean * scale
        z = _lrelu(y * scale + shift)

        # Masking restores exact zeros at the SAME-padding border positions
        # for the next conv; the write-back is a lane-aligned full-width store.
        act_ref[:, G:G + Mq] = z * mask

    # ---- tail : Conv3x3 (C -> 1) + bias + LeakyReLU --------------------------
    # Lane-dense (8, 9C) @ (9C, Mq) matvec on the MXU (rows 1..7 are zero);
    # result is already lane-dense for the output store.
    build_patches()
    t = jnp.dot(wt_ref[...], patches_ref[...],
                preferred_element_type=jnp.float32)        # (8, Mq)
    t0 = t[0:1, :] + bt_ref[...]
    o_ref[...] = _lrelu(t0)                                # border cropped in wrapper


# ----------------------------------------------------------------------------
# Wrapper: pack parameters / input into the fused-kernel layout.
# ----------------------------------------------------------------------------
def _pack_conv_weight(w, C):
    """HWIO (3, 3, cin, cout) -> (cout, 9*C), zero-padding cin up to C (exact)."""
    cin, cout = w.shape[2], w.shape[3]
    w = jnp.pad(w, ((0, 0), (0, 0), (0, C - cin), (0, 0)))          # (3,3,C,cout)
    return jnp.transpose(w, (3, 0, 1, 2)).reshape(cout, _K * _K * C)


def wdiscriminator_forward(x_nchw, params):
    """x_nchw: (N, nc_im, H, W) float32 -> (N, 1, H, W) float32."""
    C = _C
    N, cin, H, W = x_nchw.shape
    Hp, Wp = H + 2, W + 2
    Mp = N * Hp * Wp                       # flat padded pixel count
    Mq = _round_up(Mp, 128)                # lane-dense working width
    G = _round_up(Wp + 1, 128)             # aligned guard band (>= max tap offset)
    T = G + Mq + G

    # Layout plumbing on the XLA side: NCHW -> (C, flat padded pixels),
    # channels zero-padded to the internal width (matching weight rows are
    # zero-padded too, so this is exact), lane axis padded to a multiple of 128.
    x = jnp.transpose(x_nchw.astype(jnp.float32), (1, 0, 2, 3))     # (cin,N,H,W)
    x = jnp.pad(x, ((0, C - cin), (0, 0), (1, 1), (1, 1)))          # (C,N,Hp,Wp)
    x = jnp.pad(x.reshape(C, Mp), ((0, 0), (0, Mq - Mp)))           # (C, Mq)

    # Valid-pixel mask (excludes conv border positions and lane padding).
    m = jnp.pad(jnp.ones((N, H, W), jnp.float32), ((0, 0), (1, 1), (1, 1)))
    mask = jnp.pad(m.reshape(1, Mp), ((0, 0), (0, Mq - Mp)))        # (1, Mq)

    convs = [params["head"]] + list(params["body"])
    for p in convs:
        assert p["w"].shape[0] == _K and p["w"].shape[-1] == C
    assert params["tail"]["w"].shape == (_K, _K, C, 1)
    L = len(convs)

    # Conv bias for BN-followed layers is dropped: BN's mean subtraction
    # cancels a constant per-channel bias exactly.  Weights go in as bf16
    # (same as the default bf16-pass f32 matmul), activations stay f32.
    w_stack = jnp.stack([_pack_conv_weight(p["w"], C) for p in convs]
                        ).astype(jnp.bfloat16)                      # (L, C, 9C)
    g_stack = jnp.stack([p["gamma"] for p in convs])[:, :, None]    # (L, C, 1)
    b_stack = jnp.stack([p["beta"] for p in convs])[:, :, None]     # (L, C, 1)
    wt = jnp.transpose(params["tail"]["w"], (3, 0, 1, 2)).reshape(1, _K * _K * C)
    wt = jnp.pad(wt, ((0, 7), (0, 0))).astype(jnp.bfloat16)         # (8, 9C)
    bt = params["tail"]["b"].reshape(1, 1).astype(jnp.float32)      # (1, 1)

    kernel = functools.partial(_wdisc_fused_kernel, n_conv=L, Wp=Wp, Mq=Mq,
                               G=G, inv_count=1.0 / float(N * H * W))
    out = pl.pallas_call(
        kernel,
        out_shape=jax.ShapeDtypeStruct((1, Mq), jnp.float32),
        # Whole batch in a single grid point: BatchNorm needs exact batch
        # statistics, so the batch cannot be split across grid steps/cores.
        grid=(1,),
        in_specs=[
            pl.BlockSpec((C, Mq), lambda i: (0, 0)),
            pl.BlockSpec((L, C, _K * _K * C), lambda i: (0, 0, 0)),
            pl.BlockSpec((L, C, 1), lambda i: (0, 0, 0)),
            pl.BlockSpec((L, C, 1), lambda i: (0, 0, 0)),
            pl.BlockSpec((8, _K * _K * C), lambda i: (0, 0)),
            pl.BlockSpec((1, 1), lambda i: (0, 0)),
            pl.BlockSpec((1, Mq), lambda i: (0, 0)),
        ],
        out_specs=pl.BlockSpec((1, Mq), lambda i: (0, 0)),
        scratch_shapes=[
            pltpu.VMEM((C, T), jnp.float32),                  # flat padded activations
            pltpu.VMEM((_K * _K * C, Mq), jnp.bfloat16),      # transposed im2col patches
        ],
        compiler_params=pltpu.CompilerParams(
            dimension_semantics=("arbitrary",),
        ),
    )(x, w_stack, g_stack, b_stack, wt, bt, mask)

    # Crop the conv border / lane padding and restore NCHW.
    out = out[0, :Mp].reshape(N, Hp, Wp)[:, 1:H + 1, 1:W + 1]
    return out.reshape(N, 1, H, W)


# ----------------------------------------------------------------------------
# Deterministic parameter initialization (SinGAN-style: N(0, 0.02) for convs,
# N(1, 0.02) / 0 for norm affine params).
# ----------------------------------------------------------------------------
def _init_conv_block(key, cin, cout):
    kw, kb, kg = jax.random.split(key, 3)
    return {
        "w": 0.02 * jax.random.normal(kw, (3, 3, cin, cout), jnp.float32),
        "b": 0.02 * jax.random.normal(kb, (cout,), jnp.float32),
        "gamma": 1.0 + 0.02 * jax.random.normal(kg, (cout,), jnp.float32),
        "beta": jnp.zeros((cout,), jnp.float32),
    }


def _init_tail(key, cin, cout):
    kw, kb = jax.random.split(key, 2)
    return {
        "w": 0.02 * jax.random.normal(kw, (3, 3, cin, cout), jnp.float32),
        "b": 0.02 * jax.random.normal(kb, (cout,), jnp.float32),
    }


def init_wdiscriminator_params(key, *, nc_im=3, nfc=32, min_nfc=32, num_layer=5):
    keys = jax.random.split(key, num_layer)
    N = nfc
    params = {"head": _init_conv_block(keys[0], nc_im, N), "body": []}
    for i in range(num_layer - 2):
        N = int(nfc / (2 ** (i + 1)))
        cin = max(2 * N, min_nfc)
        cout = max(N, min_nfc)
        params["body"].append(_init_conv_block(keys[i + 1], cin, cout))
    params["tail"] = _init_tail(keys[-1], max(N, min_nfc), 1)
    return params


# ----------------------------------------------------------------------------
# Pure-JAX reference (sanity check of the fused Pallas path).
# ----------------------------------------------------------------------------
def _ref_conv3x3(x, w, b):
    y = lax.conv_general_dilated(
        x, w, window_strides=(1, 1), padding="SAME",
        dimension_numbers=("NHWC", "HWIO", "NHWC"))
    return y + b


def _ref_forward(x_nchw, params):
    x = jnp.transpose(x_nchw, (0, 2, 3, 1)).astype(jnp.float32)

    def block(x, p):
        y = _ref_conv3x3(x, p["w"], p["b"])
        mean = jnp.mean(y, axis=(0, 1, 2))
        var = jnp.mean(jnp.square(y - mean), axis=(0, 1, 2))
        y = (y - mean) * lax.rsqrt(var + _BN_EPS) * p["gamma"] + p["beta"]
        return jnp.where(y >= 0, y, _SLOPE * y)

    x = block(x, params["head"])
    for bp in params["body"]:
        x = block(x, bp)
    y = _ref_conv3x3(x, params["tail"]["w"], params["tail"]["b"])
    y = jnp.where(y >= 0, y, _SLOPE * y)
    return jnp.transpose(y, (0, 3, 1, 2))


# ----------------------------------------------------------------------------
if __name__ == "__main__":
    key = jax.random.PRNGKey(0)
    k_params, k_x = jax.random.split(key)

    params = init_wdiscriminator_params(
        k_params, nc_im=3, nfc=32, min_nfc=32, num_layer=5)

    # Small deterministic input, PyTorch NCHW convention.
    x = jax.random.normal(k_x, (2, 3, 16, 16), dtype=jnp.float32)

    fwd = jax.jit(wdiscriminator_forward)
    out = jax.block_until_ready(fwd(x, params))
    assert out.shape == (2, 1, 16, 16), out.shape

    # Sanity check vs. pure-JAX reference.  The kernel's bf16 MXU operands
    # match the TPU's default bf16-pass f32 matmul; tolerance reflects that
    # default matmul precision, not a kernel bug.
    ref = jax.block_until_ready(_ref_forward(x, params))
    if not jnp.allclose(out, ref, atol=2e-2, rtol=2e-2):
        err = float(jnp.max(jnp.abs(out - ref)))
        raise AssertionError(f"Pallas WDiscriminator mismatch vs reference (max |err|={err})")

    print("KERNEL_OK")
</pallas_src>

<mosaic_0001>
module attributes {stable_mosaic.version = 11 : i64} {
  func.func @_wdisc_fused_kernel(%arg0: i32, %arg1: memref<32x768xf32, #tpu.memory_space<vmem>>, %arg2: memref<4x32x288xbf16, #tpu.memory_space<vmem>>, %arg3: memref<4x32x1xf32, #tpu.memory_space<vmem>>, %arg4: memref<4x32x1xf32, #tpu.memory_space<vmem>>, %arg5: memref<8x288xbf16, #tpu.memory_space<vmem>>, %arg6: memref<1x1xf32, #tpu.memory_space<vmem>>, %arg7: memref<1x768xf32, #tpu.memory_space<vmem>>, %arg8: memref<1x768xf32, #tpu.memory_space<vmem>>, %arg9: memref<32x1024xf32, #tpu.memory_space<vmem>>, %arg10: memref<288x768xbf16, #tpu.memory_space<vmem>>) attributes {dimension_semantics = [#tpu.dimension_semantics<arbitrary>], iteration_bounds = array<i64: 1>, scalar_prefetch = 0 : i64, scratch_operands = 2 : i64, tpu.core_type = #tpu.core_type<tc>, window_params = [{pipeline_mode = #tpu.pipeline_mode<synchronous>, transform_indices = @transform_0, window_bounds = array<i64: 32, 768>}, {pipeline_mode = #tpu.pipeline_mode<synchronous>, transform_indices = @transform_1, window_bounds = array<i64: 4, 32, 288>}, {pipeline_mode = #tpu.pipeline_mode<synchronous>, transform_indices = @transform_2, window_bounds = array<i64: 4, 32, 1>}, {pipeline_mode = #tpu.pipeline_mode<synchronous>, transform_indices = @transform_3, window_bounds = array<i64: 4, 32, 1>}, {pipeline_mode = #tpu.pipeline_mode<synchronous>, transform_indices = @transform_4, window_bounds = array<i64: 8, 288>}, {pipeline_mode = #tpu.pipeline_mode<synchronous>, transform_indices = @transform_5, window_bounds = array<i64: 1, 1>}, {pipeline_mode = #tpu.pipeline_mode<synchronous>, transform_indices = @transform_6, window_bounds = array<i64: 1, 768>}, {pipeline_mode = #tpu.pipeline_mode<synchronous>, transform_indices = @transform_7, window_bounds = array<i64: 1, 768>}]} {
    %cst = arith.constant 0.000000e+00 : f32
    %0 = vector.broadcast %cst : f32 to vector<32x128xf32>
    %c0 = arith.constant 0 : index
    %c0_0 = arith.constant 0 : index
    %1 = vector.load %arg9[%c0, %c0_0] : memref<32x1024xf32, #tpu.memory_space<vmem>>, vector<32x128xf32>
    tpu.vector_store %arg9[%c0, %c0_0], %0 {strides = array<i32>} : memref<32x1024xf32, #tpu.memory_space<vmem>>, vector<32x128xf32>,
    %cst_1 = arith.constant 0.000000e+00 : f32
    %2 = vector.broadcast %cst_1 : f32 to vector<32x128xf32>
    %c0_2 = arith.constant 0 : index
    %c896 = arith.constant 896 : index
    %3 = vector.load %arg9[%c0_2, %c896] : memref<32x1024xf32, #tpu.memory_space<vmem>>, vector<32x128xf32>
    tpu.vector_store %arg9[%c0_2, %c896], %2 {strides = array<i32>} : memref<32x1024xf32, #tpu.memory_space<vmem>>, vector<32x128xf32>,
    %c0_3 = arith.constant 0 : index
    %c0_4 = arith.constant 0 : index
    %4 = vector.load %arg1[%c0_3, %c0_4] : memref<32x768xf32, #tpu.memory_space<vmem>>, vector<32x768xf32>
    %c0_5 = arith.constant 0 : index
    %c128 = arith.constant 128 : index
    %5 = vector.load %arg9[%c0_5, %c128] : memref<32x1024xf32, #tpu.memory_space<vmem>>, vector<32x768xf32>
    tpu.vector_store %arg9[%c0_5, %c128], %4 {strides = array<i32>} : memref<32x1024xf32, #tpu.memory_space<vmem>>, vector<32x768xf32>,
    %c0_6 = arith.constant 0 : index
    %c0_7 = arith.constant 0 : index
    %6 = vector.load %arg7[%c0_6, %c0_7] : memref<1x768xf32, #tpu.memory_space<vmem>>, vector<1x768xf32>
    %c0_8 = arith.constant 0 : index
    %c109 = arith.constant 109 : index
    %7 = vector.load %arg9[%c0_8, %c109] : memref<32x1024xf32, #tpu.memory_space<vmem>>, vector<32x768xf32>
    %8 = arith.truncf %7 : vector<32x768xf32> to vector<32x768xbf16>
    %c0_9 = arith.constant 0 : index
    %c0_10 = arith.constant 0 : index
    %9 = vector.load %arg10[%c0_9, %c0_10] : memref<288x768xbf16, #tpu.memory_space<vmem>>, vector<32x768xbf16>
    tpu.vector_store %arg10[%c0_9, %c0_10], %8 {strides = array<i32>} : memref<288x768xbf16, #tpu.memory_space<vmem>>, vector<32x768xbf16>,
    %c0_11 = arith.constant 0 : index
    %c110 = arith.constant 110 : index
    %10 = vector.load %arg9[%c0_11, %c110] : memref<32x1024xf32, #tpu.memory_space<vmem>>, vector<32x768xf32>
    %11 = arith.truncf %10 : vector<32x768xf32> to vector<32x768xbf16>
    %c32 = arith.constant 32 : index
    %c0_12 = arith.constant 0 : index
    %12 = vector.load %arg10[%c32, %c0_12] : memref<288x768xbf16, #tpu.memory_space<vmem>>, vector<32x768xbf16>
    tpu.vector_store %arg10[%c32, %c0_12], %11 {strides = array<i32>} : memref<288x768xbf16, #tpu.memory_space<vmem>>, vector<32x768xbf16>,
    %c0_13 = arith.constant 0 : index
    %c111 = arith.constant 111 : index
    %13 = vector.load %arg9[%c0_13, %c111] : memref<32x1024xf32, #tpu.memory_space<vmem>>, vector<32x768xf32>
    %14 = arith.truncf %13 : vector<32x768xf32> to vector<32x768xbf16>
    %c64 = arith.constant 64 : index
    %c0_14 = arith.constant 0 : index
    %15 = vector.load %arg10[%c64, %c0_14] : memref<288x768xbf16, #tpu.memory_space<vmem>>, vector<32x768xbf16>
    tpu.vector_store %arg10[%c64, %c0_14], %14 {strides = array<i32>} : memref<288x768xbf16, #tpu.memory_space<vmem>>, vector<32x768xbf16>,
    %c0_15 = arith.constant 0 : index
    %c127 = arith.constant 127 : index
    %16 = vector.load %arg9[%c0_15, %c127] : memref<32x1024xf32, #tpu.memory_space<vmem>>, vector<32x768xf32>
    %17 = arith.truncf %16 : vector<32x768xf32> to vector<32x768xbf16>
    %c96 = arith.constant 96 : index
    %c0_16 = arith.constant 0 : index
    %18 = vector.load %arg10[%c96, %c0_16] : memref<288x768xbf16, #tpu.memory_space<vmem>>, vector<32x768xbf16>
    tpu.vector_store %arg10[%c96, %c0_16], %17 {strides = array<i32>} : memref<288x768xbf16, #tpu.memory_space<vmem>>, vector<32x768xbf16>,
    %c0_17 = arith.constant 0 : index
    %c128_18 = arith.constant 128 : index
    %19 = vector.load %arg9[%c0_17, %c128_18] : memref<32x1024xf32, #tpu.memory_space<vmem>>, vector<32x768xf32>
    %20 = arith.truncf %19 : vector<32x768xf32> to vector<32x768xbf16>
    %c128_19 = arith.constant 128 : index
    %c0_20 = arith.constant 0 : index
    %21 = vector.load %arg10[%c128_19, %c0_20] : memref<288x768xbf16, #tpu.memory_space<vmem>>, vector<32x768xbf16>
    tpu.vector_store %arg10[%c128_19, %c0_20], %20 {strides = array<i32>} : memref<288x768xbf16, #tpu.memory_space<vmem>>, vector<32x768xbf16>,
    %c0_21 = arith.constant 0 : index
    %c129 = arith.constant 129 : index
    %22 = vector.load %arg9[%c0_21, %c129] : memref<32x1024xf32, #tpu.memory_space<vmem>>, vector<32x768xf32>
    %23 = arith.truncf %22 : vector<32x768xf32> to vector<32x768xbf16>
    %c160 = arith.constant 160 : index
    %c0_22 = arith.constant 0 : index
    %24 = vector.load %arg10[%c160, %c0_22] : memref<288x768xbf16, #tpu.memory_space<vmem>>, vector<32x768xbf16>
    tpu.vector_store %arg10[%c160, %c0_22], %23 {strides = array<i32>} : memref<288x768xbf16, #tpu.memory_space<vmem>>, vector<32x768xbf16>,
    %c0_23 = arith.constant 0 : index
    %c145 = arith.constant 145 : index
    %25 = vector.load %arg9[%c0_23, %c145] : memref<32x1024xf32, #tpu.memory_space<vmem>>, vector<32x768xf32>
    %26 = arith.truncf %25 : vector<32x768xf32> to vector<32x768xbf16>
    %c192 = arith.constant 192 : index
    %c0_24 = arith.constant 0 : index
    %27 = vector.load %arg10[%c192, %c0_24] : memref<288x768xbf16, #tpu.memory_space<vmem>>, vector<32x768xbf16>
    tpu.vector_store %arg10[%c192, %c0_24], %26 {strides = array<i32>} : memref<288x768xbf16, #tpu.memory_space<vmem>>, vector<32x768xbf16>,
    %c0_25 = arith.constant 0 : index
    %c146 = arith.constant 146 : index
    %28 = vector.load %arg9[%c0_25, %c146] : memref<32x1024xf32, #tpu.memory_space<vmem>>, vector<32x768xf32>
    %29 = arith.truncf %28 : vector<32x768xf32> to vector<32x768xbf16>
    %c224 = arith.constant 224 : index
    %c0_26 = arith.constant 0 : index
    %30 = vector.load %arg10[%c224, %c0_26] : memref<288x768xbf16, #tpu.memory_space<vmem>>, vector<32x768xbf16>
    tpu.vector_store %arg10[%c224, %c0_26], %29 {strides = array<i32>} : memref<288x768xbf16, #tpu.memory_space<vmem>>, vector<32x768xbf16>,
    %c0_27 = arith.constant 0 : index
    %c147 = arith.constant 147 : index
    %31 = vector.load %arg9[%c0_27, %c147] : memref<32x1024xf32, #tpu.memory_space<vmem>>, vector<32x768xf32>
    %32 = arith.truncf %31 : vector<32x768xf32> to vector<32x768xbf16>
    %c256 = arith.constant 256 : index
    %c0_28 = arith.constant 0 : index
    %33 = vector.load %arg10[%c256, %c0_28] : memref<288x768xbf16, #tpu.memory_space<vmem>>, vector<32x768xbf16>
    tpu.vector_store %arg10[%c256, %c0_28], %32 {strides = array<i32>} : memref<288x768xbf16, #tpu.memory_space<vmem>>, vector<32x768xbf16>,
    %c0_29 = arith.constant 0 : index
    %c0_30 = arith.constant 0 : index
    %c0_31 = arith.constant 0 : index
    %34 = vector.load %arg2[%c0_29, %c0_30, %c0_31] : memref<4x32x288xbf16, #tpu.memory_space<vmem>>, vector<1x32x288xbf16>
    %35 = vector.shape_cast %34 : vector<1x32x288xbf16> to vector<32x288xbf16>
    %c0_32 = arith.constant 0 : index
    %c0_33 = arith.constant 0 : index
    %36 = vector.load %arg10[%c0_32, %c0_33] : memref<288x768xbf16, #tpu.memory_space<vmem>>, vector<288x768xbf16>
    %cst_34 = arith.constant dense<0.000000e+00> : vector<32x768xf32>
    %37 = tpu.matmul %35, %36, %cst_34 {dimension_numbers = #tpu.dot_dimension_numbers<[1], [0], [0], [1], [0, 0, 1, 1], [], []>} : vector<32x288xbf16>, vector<288x768xbf16>, vector<32x768xf32> -> vector<32x768xf32>
    %38 = vector.broadcast %6 : vector<1x768xf32> to vector<32x768xf32>
    %39 = arith.mulf %37, %38 : vector<32x768xf32>
    %cst_35 = arith.constant dense<0.000000e+00> : vector<32xf32>
    %40 = vector.multi_reduction <add>, %39, %cst_35 [1] : vector<32x768xf32> to vector<32xf32>
    %41 = vector.shape_cast %40 : vector<32xf32> to vector<32x1xf32>
    %42 = arith.mulf %39, %37 : vector<32x768xf32>
    %cst_36 = arith.constant dense<0.000000e+00> : vector<32xf32>
    %43 = vector.multi_reduction <add>, %42, %cst_36 [1] : vector<32x768xf32> to vector<32xf32>
    %44 = vector.shape_cast %43 : vector<32xf32> to vector<32x1xf32>
    %cst_37 = arith.constant 0.001953125 : f32
    %45 = vector.broadcast %cst_37 : f32 to vector<32x1xf32>
    %46 = arith.mulf %41, %45 : vector<32x1xf32>
    %cst_38 = arith.constant 0.001953125 : f32
    %47 = vector.broadcast %cst_38 : f32 to vector<32x1xf32>
    %48 = arith.mulf %44, %47 : vector<32x1xf32>
    %49 = arith.mulf %46, %46 : vector<32x1xf32>
    %50 = arith.subf %48, %49 : vector<32x1xf32>
    %c0_39 = arith.constant 0 : index
    %c0_40 = arith.constant 0 : index
    %c0_41 = arith.constant 0 : index
    %51 = vector.load %arg3[%c0_39, %c0_40, %c0_41] : memref<4x32x1xf32, #tpu.memory_space<vmem>>, vector<1x32x1xf32>
    %52 = vector.shape_cast %51 : vector<1x32x1xf32> to vector<32x1xf32>
    %cst_42 = arith.constant 9.99999974E-6 : f32
    %53 = vector.broadcast %cst_42 : f32 to vector<32x1xf32>
    %54 = arith.addf %50, %53 : vector<32x1xf32>
    %55 = math.rsqrt %54 : vector<32x1xf32>
    %56 = arith.mulf %52, %55 : vector<32x1xf32>
    %c0_43 = arith.constant 0 : index
    %c0_44 = arith.constant 0 : index
    %c0_45 = arith.constant 0 : index
    %57 = vector.load %arg4[%c0_43, %c0_44, %c0_45] : memref<4x32x1xf32, #tpu.memory_space<vmem>>, vector<1x32x1xf32>
    %58 = vector.shape_cast %57 : vector<1x32x1xf32> to vector<32x1xf32>
    %59 = arith.mulf %46, %56 : vector<32x1xf32>
    %60 = arith.subf %58, %59 : vector<32x1xf32>
    %61 = vector.broadcast %56 : vector<32x1xf32> to vector<32x768xf32>
    %62 = arith.mulf %37, %61 : vector<32x768xf32>
    %63 = vector.broadcast %60 : vector<32x1xf32> to vector<32x768xf32>
    %64 = arith.addf %62, %63 : vector<32x768xf32>
    %cst_46 = arith.constant 0.000000e+00 : f32
    %65 = vector.broadcast %cst_46 : f32 to vector<32x768xf32>
    %66 = arith.cmpf oge, %64, %65 : vector<32x768xf32>
    %cst_47 = arith.constant 2.000000e-01 : f32
    %67 = vector.broadcast %cst_47 : f32 to vector<32x768xf32>
    %68 = arith.mulf %67, %64 : vector<32x768xf32>
    %69 = arith.select %66, %64, %68 : vector<32x768xi1>, vector<32x768xf32>
    %70 = vector.broadcast %6 : vector<1x768xf32> to vector<32x768xf32>
    %71 = arith.mulf %69, %70 : vector<32x768xf32>
    %c0_48 = arith.constant 0 : index
    %c128_49 = arith.constant 128 : index
    %72 = vector.load %arg9[%c0_48, %c128_49] : memref<32x1024xf32, #tpu.memory_space<vmem>>, vector<32x768xf32>
    tpu.vector_store %arg9[%c0_48, %c128_49], %71 {strides = array<i32>} : memref<32x1024xf32, #tpu.memory_space<vmem>>, vector<32x768xf32>,
    %c0_50 = arith.constant 0 : index
    %c109_51 = arith.constant 109 : index
    %73 = vector.load %arg9[%c0_50, %c109_51] : memref<32x1024xf32, #tpu.memory_space<vmem>>, vector<32x768xf32>
    %74 = arith.truncf %73 : vector<32x768xf32> to vector<32x768xbf16>
    %c0_52 = arith.constant 0 : index
    %c0_53 = arith.constant 0 : index
    %75 = vector.load %arg10[%c0_52, %c0_53] : memref<288x768xbf16, #tpu.memory_space<vmem>>, vector<32x768xbf16>
    tpu.vector_store %arg10[%c0_52, %c0_53], %74 {strides = array<i32>} : memref<288x768xbf16, #tpu.memory_space<vmem>>, vector<32x768xbf16>,
    %c0_54 = arith.constant 0 : index
    %c110_55 = arith.constant 110 : index
    %76 = vector.load %arg9[%c0_54, %c110_55] : memref<32x1024xf32, #tpu.memory_space<vmem>>, vector<32x768xf32>
    %77 = arith.truncf %76 : vector<32x768xf32> to vector<32x768xbf16>
    %c32_56 = arith.constant 32 : index
    %c0_57 = arith.constant 0 : index
    %78 = vector.load %arg10[%c32_56, %c0_57] : memref<288x768xbf16, #tpu.memory_space<vmem>>, vector<32x768xbf16>
    tpu.vector_store %arg10[%c32_56, %c0_57], %77 {strides = array<i32>} : memref<288x768xbf16, #tpu.memory_space<vmem>>, vector<32x768xbf16>,
    %c0_58 = arith.constant 0 : index
    %c111_59 = arith.constant 111 : index
    %79 = vector.load %arg9[%c0_58, %c111_59] : memref<32x1024xf32, #tpu.memory_space<vmem>>, vector<32x768xf32>
    %80 = arith.truncf %79 : vector<32x768xf32> to vector<32x768xbf16>
    %c64_60 = arith.constant 64 : index
    %c0_61 = arith.constant 0 : index
    %81 = vector.load %arg10[%c64_60, %c0_61] : memref<288x768xbf16, #tpu.memory_space<vmem>>, vector<32x768xbf16>
    tpu.vector_store %arg10[%c64_60, %c0_61], %80 {strides = array<i32>} : memref<288x768xbf16, #tpu.memory_space<vmem>>, vector<32x768xbf16>,
    %c0_62 = arith.constant 0 : index
    %c127_63 = arith.constant 127 : index
    %82 = vector.load %arg9[%c0_62, %c127_63] : memref<32x1024xf32, #tpu.memory_space<vmem>>, vector<32x768xf32>
    %83 = arith.truncf %82 : vector<32x768xf32> to vector<32x768xbf16>
    %c96_64 = arith.constant 96 : index
    %c0_65 = arith.constant 0 : index
    %84 = vector.load %arg10[%c96_64, %c0_65] : memref<288x768xbf16, #tpu.memory_space<vmem>>, vector<32x768xbf16>
    tpu.vector_store %arg10[%c96_64, %c0_65], %83 {strides = array<i32>} : memref<288x768xbf16, #tpu.memory_space<vmem>>, vector<32x768xbf16>,
    %c0_66 = arith.constant 0 : index
    %c128_67 = arith.constant 128 : index
    %85 = vector.load %arg9[%c0_66, %c128_67] : memref<32x1024xf32, #tpu.memory_space<vmem>>, vector<32x768xf32>
    %86 = arith.truncf %85 : vector<32x768xf32> to vector<32x768xbf16>
    %c128_68 = arith.constant 128 : index
    %c0_69 = arith.constant 0 : index
    %87 = vector.load %arg10[%c128_68, %c0_69] : memref<288x768xbf16, #tpu.memory_space<vmem>>, vector<32x768xbf16>
    tpu.vector_store %arg10[%c128_68, %c0_69], %86 {strides = array<i32>} : memref<288x768xbf16, #tpu.memory_space<vmem>>, vector<32x768xbf16>,
    %c0_70 = arith.constant 0 : index
    %c129_71 = arith.constant 129 : index
    %88 = vector.load %arg9[%c0_70, %c129_71] : memref<32x1024xf32, #tpu.memory_space<vmem>>, vector<32x768xf32>
    %89 = arith.truncf %88 : vector<32x768xf32> to vector<32x768xbf16>
    %c160_72 = arith.constant 160 : index
    %c0_73 = arith.constant 0 : index
    %90 = vector.load %arg10[%c160_72, %c0_73] : memref<288x768xbf16, #tpu.memory_space<vmem>>, vector<32x768xbf16>
    tpu.vector_store %arg10[%c160_72, %c0_73], %89 {strides = array<i32>} : memref<288x768xbf16, #tpu.memory_space<vmem>>, vector<32x768xbf16>,
    %c0_74 = arith.constant 0 : index
    %c145_75 = arith.constant 145 : index
    %91 = vector.load %arg9[%c0_74, %c145_75] : memref<32x1024xf32, #tpu.memory_space<vmem>>, vector<32x768xf32>
    %92 = arith.truncf %91 : vector<32x768xf32> to vector<32x768xbf16>
    %c192_76 = arith.constant 192 : index
    %c0_77 = arith.constant 0 : index
    %93 = vector.load %arg10[%c192_76, %c0_77] : memref<288x768xbf16, #tpu.memory_space<vmem>>, vector<32x768xbf16>
    tpu.vector_store %arg10[%c192_76, %c0_77], %92 {strides = array<i32>} : memref<288x768xbf16, #tpu.memory_space<vmem>>, vector<32x768xbf16>,
    %c0_78 = arith.constant 0 : index
    %c146_79 = arith.constant 146 : index
    %94 = vector.load %arg9[%c0_78, %c146_79] : memref<32x1024xf32, #tpu.memory_space<vmem>>, vector<32x768xf32>
    %95 = arith.truncf %94 : vector<32x768xf32> to vector<32x768xbf16>
    %c224_80 = arith.constant 224 : index
    %c0_81 = arith.constant 0 : index
    %96 = vector.load %arg10[%c224_80, %c0_81] : memref<288x768xbf16, #tpu.memory_space<vmem>>, vector<32x768xbf16>
    tpu.vector_store %arg10[%c224_80, %c0_81], %95 {strides = array<i32>} : memref<288x768xbf16, #tpu.memory_space<vmem>>, vector<32x768xbf16>,
    %c0_82 = arith.constant 0 : index
    %c147_83 = arith.constant 147 : index
    %97 = vector.load %arg9[%c0_82, %c147_83] : memref<32x1024xf32, #tpu.memory_space<vmem>>, vector<32x768xf32>
    %98 = arith.truncf %97 : vector<32x768xf32> to vector<32x768xbf16>
    %c256_84 = arith.constant 256 : index
    %c0_85 = arith.constant 0 : index
    %99 = vector.load %arg10[%c256_84, %c0_85] : memref<288x768xbf16, #tpu.memory_space<vmem>>, vector<32x768xbf16>
    tpu.vector_store %arg10[%c256_84, %c0_85], %98 {strides = array<i32>} : memref<288x768xbf16, #tpu.memory_space<vmem>>, vector<32x768xbf16>,
    %c1 = arith.constant 1 : index
    %c0_86 = arith.constant 0 : index
    %c0_87 = arith.constant 0 : index
    %100 = vector.load %arg2[%c1, %c0_86, %c0_87] : memref<4x32x288xbf16, #tpu.memory_space<vmem>>, vector<1x32x288xbf16>
    %101 = vector.shape_cast %100 : vector<1x32x288xbf16> to vector<32x288xbf16>
    %c0_88 = arith.constant 0 : index
    %c0_89 = arith.constant 0 : index
    %102 = vector.load %arg10[%c0_88, %c0_89] : memref<288x768xbf16, #tpu.memory_space<vmem>>, vector<288x768xbf16>
    %cst_90 = arith.constant dense<0.000000e+00> : vector<32x768xf32>
    %103 = tpu.matmul %101, %102, %cst_90 {dimension_numbers = #tpu.dot_dimension_numbers<[1], [0], [0], [1], [0, 0, 1, 1], [], []>} : vector<32x288xbf16>, vector<288x768xbf16>, vector<32x768xf32> -> vector<32x768xf32>
    %104 = vector.broadcast %6 : vector<1x768xf32> to vector<32x768xf32>
    %105 = arith.mulf %103, %104 : vector<32x768xf32>
    %cst_91 = arith.constant dense<0.000000e+00> : vector<32xf32>
    %106 = vector.multi_reduction <add>, %105, %cst_91 [1] : vector<32x768xf32> to vector<32xf32>
    %107 = vector.shape_cast %106 : vector<32xf32> to vector<32x1xf32>
    %108 = arith.mulf %105, %103 : vector<32x768xf32>
    %cst_92 = arith.constant dense<0.000000e+00> : vector<32xf32>
    %109 = vector.multi_reduction <add>, %108, %cst_92 [1] : vector<32x768xf32> to vector<32xf32>
    %110 = vector.shape_cast %109 : vector<32xf32> to vector<32x1xf32>
    %cst_93 = arith.constant 0.001953125 : f32
    %111 = vector.broadcast %cst_93 : f32 to vector<32x1xf32>
    %112 = arith.mulf %107, %111 : vector<32x1xf32>
    %cst_94 = arith.constant 0.001953125 : f32
    %113 = vector.broadcast %cst_94 : f32 to vector<32x1xf32>
    %114 = arith.mulf %110, %113 : vector<32x1xf32>
    %115 = arith.mulf %112, %112 : vector<32x1xf32>
    %116 = arith.subf %114, %115 : vector<32x1xf32>
    %c1_95 = arith.constant 1 : index
    %c0_96 = arith.constant 0 : index
    %c0_97 = arith.constant 0 : index
    %117 = vector.load %arg3[%c1_95, %c0_96, %c0_97] : memref<4x32x1xf32, #tpu.memory_space<vmem>>, vector<1x32x1xf32>
    %118 = vector.shape_cast %117 : vector<1x32x1xf32> to vector<32x1xf32>
    %cst_98 = arith.constant 9.99999974E-6 : f32
    %119 = vector.broadcast %cst_98 : f32 to vector<32x1xf32>
    %120 = arith.addf %116, %119 : vector<32x1xf32>
    %121 = math.rsqrt %120 : vector<32x1xf32>
    %122 = arith.mulf %118, %121 : vector<32x1xf32>
    %c1_99 = arith.constant 1 : index
    %c0_100 = arith.constant 0 : index
    %c0_101 = arith.constant 0 : index
    %123 = vector.load %arg4[%c1_99, %c0_100, %c0_101] : memref<4x32x1xf32, #tpu.memory_space<vmem>>, vector<1x32x1xf32>
    %124 = vector.shape_cast %123 : vector<1x32x1xf32> to vector<32x1xf32>
    %125 = arith.mulf %112, %122 : vector<32x1xf32>
    %126 = arith.subf %124, %125 : vector<32x1xf32>
    %127 = vector.broadcast %122 : vector<32x1xf32> to vector<32x768xf32>
    %128 = arith.mulf %103, %127 : vector<32x768xf32>
    %129 = vector.broadcast %126 : vector<32x1xf32> to vector<32x768xf32>
    %130 = arith.addf %128, %129 : vector<32x768xf32>
    %cst_102 = arith.constant 0.000000e+00 : f32
    %131 = vector.broadcast %cst_102 : f32 to vector<32x768xf32>
    %132 = arith.cmpf oge, %130, %131 : vector<32x768xf32>
    %cst_103 = arith.constant 2.000000e-01 : f32
    %133 = vector.broadcast %cst_103 : f32 to vector<32x768xf32>
    %134 = arith.mulf %133, %130 : vector<32x768xf32>
    %135 = arith.select %132, %130, %134 : vector<32x768xi1>, vector<32x768xf32>
    %136 = vector.broadcast %6 : vector<1x768xf32> to vector<32x768xf32>
    %137 = arith.mulf %135, %136 : vector<32x768xf32>
    %c0_104 = arith.constant 0 : index
    %c128_105 = arith.constant 128 : index
    %138 = vector.load %arg9[%c0_104, %c128_105] : memref<32x1024xf32, #tpu.memory_space<vmem>>, vector<32x768xf32>
    tpu.vector_store %arg9[%c0_104, %c128_105], %137 {strides = array<i32>} : memref<32x1024xf32, #tpu.memory_space<vmem>>, vector<32x768xf32>,
    %c0_106 = arith.constant 0 : index
    %c109_107 = arith.constant 109 : index
    %139 = vector.load %arg9[%c0_106, %c109_107] : memref<32x1024xf32, #tpu.memory_space<vmem>>, vector<32x768xf32>
    %140 = arith.truncf %139 : vector<32x768xf32> to vector<32x768xbf16>
    %c0_108 = arith.constant 0 : index
    %c0_109 = arith.constant 0 : index
    %141 = vector.load %arg10[%c0_108, %c0_109] : memref<288x768xbf16, #tpu.memory_space<vmem>>, vector<32x768xbf16>
    tpu.vector_store %arg10[%c0_108, %c0_109], %140 {strides = array<i32>} : memref<288x768xbf16, #tpu.memory_space<vmem>>, vector<32x768xbf16>,
    %c0_110 = arith.constant 0 : index
    %c110_111 = arith.constant 110 : index
    %142 = vector.load %arg9[%c0_110, %c110_111] : memref<32x1024xf32, #tpu.memory_space<vmem>>, vector<32x768xf32>
    %143 = arith.truncf %142 : vector<32x768xf32> to vector<32x768xbf16>
    %c32_112 = arith.constant 32 : index
    %c0_113 = arith.constant 0 : index
    %144 = vector.load %arg10[%c32_112, %c0_113] : memref<288x768xbf16, #tpu.memory_space<vmem>>, vector<32x768xbf16>
    tpu.vector_store %arg10[%c32_112, %c0_113], %143 {strides = array<i32>} : memref<288x768xbf16, #tpu.memory_space<vmem>>, vector<32x768xbf16>,
    %c0_114 = arith.constant 0 : index
    %c111_115 = arith.constant 111 : index
    %145 = vector.load %arg9[%c0_114, %c111_115] : memref<32x1024xf32, #tpu.memory_space<vmem>>, vector<32x768xf32>
    %146 = arith.truncf %145 : vector<32x768xf32> to vector<32x768xbf16>
    %c64_116 = arith.constant 64 : index
    %c0_117 = arith.constant 0 : index
    %147 = vector.load %arg10[%c64_116, %c0_117] : memref<288x768xbf16, #tpu.memory_space<vmem>>, vector<32x768xbf16>
    tpu.vector_store %arg10[%c64_116, %c0_117], %146 {strides = array<i32>} : memref<288x768xbf16, #tpu.memory_space<vmem>>, vector<32x768xbf16>,
    %c0_118 = arith.constant 0 : index
    %c127_119 = arith.constant 127 : index
    %148 = vector.load %arg9[%c0_118, %c127_119] : memref<32x1024xf32, #tpu.memory_space<vmem>>, vector<32x768xf32>
    %149 = arith.truncf %148 : vector<32x768xf32> to vector<32x768xbf16>
    %c96_120 = arith.constant 96 : index
    %c0_121 = arith.constant 0 : index
    %150 = vector.load %arg10[%c96_120, %c0_121] : memref<288x768xbf16, #tpu.memory_space<vmem>>, vector<32x768xbf16>
    tpu.vector_store %arg10[%c96_120, %c0_121], %149 {strides = array<i32>} : memref<288x768xbf16, #tpu.memory_space<vmem>>, vector<32x768xbf16>,
    %c0_122 = arith.constant 0 : index
    %c128_123 = arith.constant 128 : index
    %151 = vector.load %arg9[%c0_122, %c128_123] : memref<32x1024xf32, #tpu.memory_space<vmem>>, vector<32x768xf32>
    %152 = arith.truncf %151 : vector<32x768xf32> to vector<32x768xbf16>
    %c128_124 = arith.constant 128 : index
    %c0_125 = arith.constant 0 : index
    %153 = vector.load %arg10[%c128_124, %c0_125] : memref<288x768xbf16, #tpu.memory_space<vmem>>, vector<32x768xbf16>
    tpu.vector_store %arg10[%c128_124, %c0_125], %152 {strides = array<i32>} : memref<288x768xbf16, #tpu.memory_space<vmem>>, vector<32x768xbf16>,
    %c0_126 = arith.constant 0 : index
    %c129_127 = arith.constant 129 : index
    %154 = vector.load %arg9[%c0_126, %c129_127] : memref<32x1024xf32, #tpu.memory_space<vmem>>, vector<32x768xf32>
    %155 = arith.truncf %154 : vector<32x768xf32> to vector<32x768xbf16>
    %c160_128 = arith.constant 160 : index
    %c0_129 = arith.constant 0 : index
    %156 = vector.load %arg10[%c160_128, %c0_129] : memref<288x768xbf16, #tpu.memory_space<vmem>>, vector<32x768xbf16>
    tpu.vector_store %arg10[%c160_128, %c0_129], %155 {strides = array<i32>} : memref<288x768xbf16, #tpu.memory_space<vmem>>, vector<32x768xbf16>,
    %c0_130 = arith.constant 0 : index
    %c145_131 = arith.constant 145 : index
    %157 = vector.load %arg9[%c0_130, %c145_131] : memref<32x1024xf32, #tpu.memory_space<vmem>>, vector<32x768xf32>
    %158 = arith.truncf %157 : vector<32x768xf32> to vector<32x768xbf16>
    %c192_132 = arith.constant 192 : index
    %c0_133 = arith.constant 0 : index
    %159 = vector.load %arg10[%c192_132, %c0_133] : memref<288x768xbf16, #tpu.memory_space<vmem>>, vector<32x768xbf16>
    tpu.vector_store %arg10[%c192_132, %c0_133], %158 {strides = array<i32>} : memref<288x768xbf16, #tpu.memory_space<vmem>>, vector<32x768xbf16>,
    %c0_134 = arith.constant 0 : index
    %c146_135 = arith.constant 146 : index
    %160 = vector.load %arg9[%c0_134, %c146_135] : memref<32x1024xf32, #tpu.memory_space<vmem>>, vector<32x768xf32>
    %161 = arith.truncf %160 : vector<32x768xf32> to vector<32x768xbf16>
    %c224_136 = arith.constant 224 : index
    %c0_137 = arith.constant 0 : index
    %162 = vector.load %arg10[%c224_136, %c0_137] : memref<288x768xbf16, #tpu.memory_space<vmem>>, vector<32x768xbf16>
    tpu.vector_store %arg10[%c224_136, %c0_137], %161 {strides = array<i32>} : memref<288x768xbf16, #tpu.memory_space<vmem>>, vector<32x768xbf16>,
    %c0_138 = arith.constant 0 : index
    %c147_139 = arith.constant 147 : index
    %163 = vector.load %arg9[%c0_138, %c147_139] : memref<32x1024xf32, #tpu.memory_space<vmem>>, vector<32x768xf32>
    %164 = arith.truncf %163 : vector<32x768xf32> to vector<32x768xbf16>
    %c256_140 = arith.constant 256 : index
    %c0_141 = arith.constant 0 : index
    %165 = vector.load %arg10[%c256_140, %c0_141] : memref<288x768xbf16, #tpu.memory_space<vmem>>, vector<32x768xbf16>
    tpu.vector_store %arg10[%c256_140, %c0_141], %164 {strides = array<i32>} : memref<288x768xbf16, #tpu.memory_space<vmem>>, vector<32x768xbf16>,
    %c2 = arith.constant 2 : index
    %c0_142 = arith.constant 0 : index
    %c0_143 = arith.constant 0 : index
    %166 = vector.load %arg2[%c2, %c0_142, %c0_143] : memref<4x32x288xbf16, #tpu.memory_space<vmem>>, vector<1x32x288xbf16>
    %167 = vector.shape_cast %166 : vector<1x32x288xbf16> to vector<32x288xbf16>
    %c0_144 = arith.constant 0 : index
    %c0_145 = arith.constant 0 : index
    %168 = vector.load %arg10[%c0_144, %c0_145] : memref<288x768xbf16, #tpu.memory_space<vmem>>, vector<288x768xbf16>
    %cst_146 = arith.constant dense<0.000000e+00> : vector<32x768xf32>
    %169 = tpu.matmul %167, %168, %cst_146 {dimension_numbers = #tpu.dot_dimension_numbers<[1], [0], [0], [1], [0, 0, 1, 1], [], []>} : vector<32x288xbf16>, vector<288x768xbf16>, vector<32x768xf32> -> vector<32x768xf32>
    %170 = vector.broadcast %6 : vector<1x768xf32> to vector<32x768xf32>
    %171 = arith.mulf %169, %170 : vector<32x768xf32>
    %cst_147 = arith.constant dense<0.000000e+00> : vector<32xf32>
    %172 = vector.multi_reduction <add>, %171, %cst_147 [1] : vector<32x768xf32> to vector<32xf32>
    %173 = vector.shape_cast %172 : vector<32xf32> to vector<32x1xf32>
    %174 = arith.mulf %171, %169 : vector<32x768xf32>
    %cst_148 = arith.constant dense<0.000000e+00> : vector<32xf32>
    %175 = vector.multi_reduction <add>, %174, %cst_148 [1] : vector<32x768xf32> to vector<32xf32>
    %176 = vector.shape_cast %175 : vector<32xf32> to vector<32x1xf32>
    %cst_149 = arith.constant 0.001953125 : f32
    %177 = vector.broadcast %cst_149 : f32 to vector<32x1xf32>
    %178 = arith.mulf %173, %177 : vector<32x1xf32>
    %cst_150 = arith.constant 0.001953125 : f32
    %179 = vector.broadcast %cst_150 : f32 to vector<32x1xf32>
    %180 = arith.mulf %176, %179 : vector<32x1xf32>
    %181 = arith.mulf %178, %178 : vector<32x1xf32>
    %182 = arith.subf %180, %181 : vector<32x1xf32>
    %c2_151 = arith.constant 2 : index
    %c0_152 = arith.constant 0 : index
    %c0_153 = arith.constant 0 : index
    %183 = vector.load %arg3[%c2_151, %c0_152, %c0_153] : memref<4x32x1xf32, #tpu.memory_space<vmem>>, vector<1x32x1xf32>
    %184 = vector.shape_cast %183 : vector<1x32x1xf32> to vector<32x1xf32>
    %cst_154 = arith.constant 9.99999974E-6 : f32
    %185 = vector.broadcast %cst_154 : f32 to vector<32x1xf32>
    %186 = arith.addf %182, %185 : vector<32x1xf32>
    %187 = math.rsqrt %186 : vector<32x1xf32>
    %188 = arith.mulf %184, %187 : vector<32x1xf32>
    %c2_155 = arith.constant 2 : index
    %c0_156 = arith.constant 0 : index
    %c0_157 = arith.constant 0 : index
    %189 = vector.load %arg4[%c2_155, %c0_156, %c0_157] : memref<4x32x1xf32, #tpu.memory_space<vmem>>, vector<1x32x1xf32>
    %190 = vector.shape_cast %189 : vector<1x32x1xf32> to vector<32x1xf32>
    %191 = arith.mulf %178, %188 : vector<32x1xf32>
    %192 = arith.subf %190, %191 : vector<32x1xf32>
    %193 = vector.broadcast %188 : vector<32x1xf32> to vector<32x768xf32>
    %194 = arith.mulf %169, %193 : vector<32x768xf32>
    %195 = vector.broadcast %192 : vector<32x1xf32> to vector<32x768xf32>
    %196 = arith.addf %194, %195 : vector<32x768xf32>
    %cst_158 = arith.constant 0.000000e+00 : f32
    %197 = vector.broadcast %cst_158 : f32 to vector<32x768xf32>
    %198 = arith.cmpf oge, %196, %197 : vector<32x768xf32>
    %cst_159 = arith.constant 2.000000e-01 : f32
    %199 = vector.broadcast %cst_159 : f32 to vector<32x768xf32>
    %200 = arith.mulf %199, %196 : vector<32x768xf32>
    %201 = arith.select %198, %196, %200 : vector<32x768xi1>, vector<32x768xf32>
    %202 = vector.broadcast %6 : vector<1x768xf32> to vector<32x768xf32>
    %203 = arith.mulf %201, %202 : vector<32x768xf32>
    %c0_160 = arith.constant 0 : index
    %c128_161 = arith.constant 128 : index
    %204 = vector.load %arg9[%c0_160, %c128_161] : memref<32x1024xf32, #tpu.memory_space<vmem>>, vector<32x768xf32>
    tpu.vector_store %arg9[%c0_160, %c128_161], %203 {strides = array<i32>} : memref<32x1024xf32, #tpu.memory_space<vmem>>, vector<32x768xf32>,
    %c0_162 = arith.constant 0 : index
    %c109_163 = arith.constant 109 : index
    %205 = vector.load %arg9[%c0_162, %c109_163] : memref<32x1024xf32, #tpu.memory_space<vmem>>, vector<32x768xf32>
    %206 = arith.truncf %205 : vector<32x768xf32> to vector<32x768xbf16>
    %c0_164 = arith.constant 0 : index
    %c0_165 = arith.constant 0 : index
    %207 = vector.load %arg10[%c0_164, %c0_165] : memref<288x768xbf16, #tpu.memory_space<vmem>>, vector<32x768xbf16>
    tpu.vector_store %arg10[%c0_164, %c0_165], %206 {strides = array<i32>} : memref<288x768xbf16, #tpu.memory_space<vmem>>, vector<32x768xbf16>,
    %c0_166 = arith.constant 0 : index
    %c110_167 = arith.constant 110 : index
    %208 = vector.load %arg9[%c0_166, %c110_167] : memref<32x1024xf32, #tpu.memory_space<vmem>>, vector<32x768xf32>
    %209 = arith.truncf %208 : vector<32x768xf32> to vector<32x768xbf16>
    %c32_168 = arith.constant 32 : index
    %c0_169 = arith.constant 0 : index
    %210 = vector.load %arg10[%c32_168, %c0_169] : memref<288x768xbf16, #tpu.memory_space<vmem>>, vector<32x768xbf16>
    tpu.vector_store %arg10[%c32_168, %c0_169], %209 {strides = array<i32>} : memref<288x768xbf16, #tpu.memory_space<vmem>>, vector<32x768xbf16>,
    %c0_170 = arith.constant 0 : index
    %c111_171 = arith.constant 111 : index
    %211 = vector.load %arg9[%c0_170, %c111_171] : memref<32x1024xf32, #tpu.memory_space<vmem>>, vector<32x768xf32>
    %212 = arith.truncf %211 : vector<32x768xf32> to vector<32x768xbf16>
    %c64_172 = arith.constant 64 : index
    %c0_173 = arith.constant 0 : index
    %213 = vector.load %arg10[%c64_172, %c0_173] : memref<288x768xbf16, #tpu.memory_space<vmem>>, vector<32x768xbf16>
    tpu.vector_store %arg10[%c64_172, %c0_173], %212 {strides = array<i32>} : memref<288x768xbf16, #tpu.memory_space<vmem>>, vector<32x768xbf16>,
    %c0_174 = arith.constant 0 : index
    %c127_175 = arith.constant 127 : index
    %214 = vector.load %arg9[%c0_174, %c127_175] : memref<32x1024xf32, #tpu.memory_space<vmem>>, vector<32x768xf32>
    %215 = arith.truncf %214 : vector<32x768xf32> to vector<32x768xbf16>
    %c96_176 = arith.constant 96 : index
    %c0_177 = arith.constant 0 : index
    %216 = vector.load %arg10[%c96_176, %c0_177] : memref<288x768xbf16, #tpu.memory_space<vmem>>, vector<32x768xbf16>
    tpu.vector_store %arg10[%c96_176, %c0_177], %215 {strides = array<i32>} : memref<288x768xbf16, #tpu.memory_space<vmem>>, vector<32x768xbf16>,
    %c0_178 = arith.constant 0 : index
    %c128_179 = arith.constant 128 : index
    %217 = vector.load %arg9[%c0_178, %c128_179] : memref<32x1024xf32, #tpu.memory_space<vmem>>, vector<32x768xf32>
    %218 = arith.truncf %217 : vector<32x768xf32> to vector<32x768xbf16>
    %c128_180 = arith.constant 128 : index
    %c0_181 = arith.constant 0 : index
    %219 = vector.load %arg10[%c128_180, %c0_181] : memref<288x768xbf16, #tpu.memory_space<vmem>>, vector<32x768xbf16>
    tpu.vector_store %arg10[%c128_180, %c0_181], %218 {strides = array<i32>} : memref<288x768xbf16, #tpu.memory_space<vmem>>, vector<32x768xbf16>,
    %c0_182 = arith.constant 0 : index
    %c129_183 = arith.constant 129 : index
    %220 = vector.load %arg9[%c0_182, %c129_183] : memref<32x1024xf32, #tpu.memory_space<vmem>>, vector<32x768xf32>
    %221 = arith.truncf %220 : vector<32x768xf32> to vector<32x768xbf16>
    %c160_184 = arith.constant 160 : index
    %c0_185 = arith.constant 0 : index
    %222 = vector.load %arg10[%c160_184, %c0_185] : memref<288x768xbf16, #tpu.memory_space<vmem>>, vector<32x768xbf16>
    tpu.vector_store %arg10[%c160_184, %c0_185], %221 {strides = array<i32>} : memref<288x768xbf16, #tpu.memory_space<vmem>>, vector<32x768xbf16>,
    %c0_186 = arith.constant 0 : index
    %c145_187 = arith.constant 145 : index
    %223 = vector.load %arg9[%c0_186, %c145_187] : memref<32x1024xf32, #tpu.memory_space<vmem>>, vector<32x768xf32>
    %224 = arith.truncf %223 : vector<32x768xf32> to vector<32x768xbf16>
    %c192_188 = arith.constant 192 : index
    %c0_189 = arith.constant 0 : index
    %225 = vector.load %arg10[%c192_188, %c0_189] : memref<288x768xbf16, #tpu.memory_space<vmem>>, vector<32x768xbf16>
    tpu.vector_store %arg10[%c192_188, %c0_189], %224 {strides = array<i32>} : memref<288x768xbf16, #tpu.memory_space<vmem>>, vector<32x768xbf16>,
    %c0_190 = arith.constant 0 : index
    %c146_191 = arith.constant 146 : index
    %226 = vector.load %arg9[%c0_190, %c146_191] : memref<32x1024xf32, #tpu.memory_space<vmem>>, vector<32x768xf32>
    %227 = arith.truncf %226 : vector<32x768xf32> to vector<32x768xbf16>
    %c224_192 = arith.constant 224 : index
    %c0_193 = arith.constant 0 : index
    %228 = vector.load %arg10[%c224_192, %c0_193] : memref<288x768xbf16, #tpu.memory_space<vmem>>, vector<32x768xbf16>
    tpu.vector_store %arg10[%c224_192, %c0_193], %227 {strides = array<i32>} : memref<288x768xbf16, #tpu.memory_space<vmem>>, vector<32x768xbf16>,
    %c0_194 = arith.constant 0 : index
    %c147_195 = arith.constant 147 : index
    %229 = vector.load %arg9[%c0_194, %c147_195] : memref<32x1024xf32, #tpu.memory_space<vmem>>, vector<32x768xf32>
    %230 = arith.truncf %229 : vector<32x768xf32> to vector<32x768xbf16>
    %c256_196 = arith.constant 256 : index
    %c0_197 = arith.constant 0 : index
    %231 = vector.load %arg10[%c256_196, %c0_197] : memref<288x768xbf16, #tpu.memory_space<vmem>>, vector<32x768xbf16>
    tpu.vector_store %arg10[%c256_196, %c0_197], %230 {strides = array<i32>} : memref<288x768xbf16, #tpu.memory_space<vmem>>, vector<32x768xbf16>,
    %c3 = arith.constant 3 : index
    %c0_198 = arith.constant 0 : index
    %c0_199 = arith.constant 0 : index
    %232 = vector.load %arg2[%c3, %c0_198, %c0_199] : memref<4x32x288xbf16, #tpu.memory_space<vmem>>, vector<1x32x288xbf16>
    %233 = vector.shape_cast %232 : vector<1x32x288xbf16> to vector<32x288xbf16>
    %c0_200 = arith.constant 0 : index
    %c0_201 = arith.constant 0 : index
    %234 = vector.load %arg10[%c0_200, %c0_201] : memref<288x768xbf16, #tpu.memory_space<vmem>>, vector<288x768xbf16>
    %cst_202 = arith.constant dense<0.000000e+00> : vector<32x768xf32>
    %235 = tpu.matmul %233, %234, %cst_202 {dimension_numbers = #tpu.dot_dimension_numbers<[1], [0], [0], [1], [0, 0, 1, 1], [], []>} : vector<32x288xbf16>, vector<288x768xbf16>, vector<32x768xf32> -> vector<32x768xf32>
    %236 = vector.broadcast %6 : vector<1x768xf32> to vector<32x768xf32>
    %237 = arith.mulf %235, %236 : vector<32x768xf32>
    %cst_203 = arith.constant dense<0.000000e+00> : vector<32xf32>
    %238 = vector.multi_reduction <add>, %237, %cst_203 [1] : vector<32x768xf32> to vector<32xf32>
    %239 = vector.shape_cast %238 : vector<32xf32> to vector<32x1xf32>
    %240 = arith.mulf %237, %235 : vector<32x768xf32>
    %cst_204 = arith.constant dense<0.000000e+00> : vector<32xf32>
    %241 = vector.multi_reduction <add>, %240, %cst_204 [1] : vector<32x768xf32> to vector<32xf32>
    %242 = vector.shape_cast %241 : vector<32xf32> to vector<32x1xf32>
    %cst_205 = arith.constant 0.001953125 : f32
    %243 = vector.broadcast %cst_205 : f32 to vector<32x1xf32>
    %244 = arith.mulf %239, %243 : vector<32x1xf32>
    %cst_206 = arith.constant 0.001953125 : f32
    %245 = vector.broadcast %cst_206 : f32 to vector<32x1xf32>
    %246 = arith.mulf %242, %245 : vector<32x1xf32>
    %247 = arith.mulf %244, %244 : vector<32x1xf32>
    %248 = arith.subf %246, %247 : vector<32x1xf32>
    %c3_207 = arith.constant 3 : index
    %c0_208 = arith.constant 0 : index
    %c0_209 = arith.constant 0 : index
    %249 = vector.load %arg3[%c3_207, %c0_208, %c0_209] : memref<4x32x1xf32, #tpu.memory_space<vmem>>, vector<1x32x1xf32>
    %250 = vector.shape_cast %249 : vector<1x32x1xf32> to vector<32x1xf32>
    %cst_210 = arith.constant 9.99999974E-6 : f32
    %251 = vector.broadcast %cst_210 : f32 to vector<32x1xf32>
    %252 = arith.addf %248, %251 : vector<32x1xf32>
    %253 = math.rsqrt %252 : vector<32x1xf32>
    %254 = arith.mulf %250, %253 : vector<32x1xf32>
    %c3_211 = arith.constant 3 : index
    %c0_212 = arith.constant 0 : index
    %c0_213 = arith.constant 0 : index
    %255 = vector.load %arg4[%c3_211, %c0_212, %c0_213] : memref<4x32x1xf32, #tpu.memory_space<vmem>>, vector<1x32x1xf32>
    %256 = vector.shape_cast %255 : vector<1x32x1xf32> to vector<32x1xf32>
    %257 = arith.mulf %244, %254 : vector<32x1xf32>
    %258 = arith.subf %256, %257 : vector<32x1xf32>
    %259 = vector.broadcast %254 : vector<32x1xf32> to vector<32x768xf32>
    %260 = arith.mulf %235, %259 : vector<32x768xf32>
    %261 = vector.broadcast %258 : vector<32x1xf32> to vector<32x768xf32>
    %262 = arith.addf %260, %261 : vector<32x768xf32>
    %cst_214 = arith.constant 0.000000e+00 : f32
    %263 = vector.broadcast %cst_214 : f32 to vector<32x768xf32>
    %264 = arith.cmpf oge, %262, %263 : vector<32x768xf32>
    %cst_215 = arith.constant 2.000000e-01 : f32
    %265 = vector.broadcast %cst_215 : f32 to vector<32x768xf32>
    %266 = arith.mulf %265, %262 : vector<32x768xf32>
    %267 = arith.select %264, %262, %266 : vector<32x768xi1>, vector<32x768xf32>
    %268 = vector.broadcast %6 : vector<1x768xf32> to vector<32x768xf32>
    %269 = arith.mulf %267, %268 : vector<32x768xf32>
    %c0_216 = arith.constant 0 : index
    %c128_217 = arith.constant 128 : index
    %270 = vector.load %arg9[%c0_216, %c128_217] : memref<32x1024xf32, #tpu.memory_space<vmem>>, vector<32x768xf32>
    tpu.vector_store %arg9[%c0_216, %c128_217], %269 {strides = array<i32>} : memref<32x1024xf32, #tpu.memory_space<vmem>>, vector<32x768xf32>,
    %c0_218 = arith.constant 0 : index
    %c109_219 = arith.constant 109 : index
    %271 = vector.load %arg9[%c0_218, %c109_219] : memref<32x1024xf32, #tpu.memory_space<vmem>>, vector<32x768xf32>
    %272 = arith.truncf %271 : vector<32x768xf32> to vector<32x768xbf16>
    %c0_220 = arith.constant 0 : index
    %c0_221 = arith.constant 0 : index
    %273 = vector.load %arg10[%c0_220, %c0_221] : memref<288x768xbf16, #tpu.memory_space<vmem>>, vector<32x768xbf16>
    tpu.vector_store %arg10[%c0_220, %c0_221], %272 {strides = array<i32>} : memref<288x768xbf16, #tpu.memory_space<vmem>>, vector<32x768xbf16>,
    %c0_222 = arith.constant 0 : index
    %c110_223 = arith.constant 110 : index
    %274 = vector.load %arg9[%c0_222, %c110_223] : memref<32x1024xf32, #tpu.memory_space<vmem>>, vector<32x768xf32>
    %275 = arith.truncf %274 : vector<32x768xf32> to vector<32x768xbf16>
    %c32_224 = arith.constant 32 : index
    %c0_225 = arith.constant 0 : index
    %276 = vector.load %arg10[%c32_224, %c0_225] : memref<288x768xbf16, #tpu.memory_space<vmem>>, vector<32x768xbf16>
    tpu.vector_store %arg10[%c32_224, %c0_225], %275 {strides = array<i32>} : memref<288x768xbf16, #tpu.memory_space<vmem>>, vector<32x768xbf16>,
    %c0_226 = arith.constant 0 : index
    %c111_227 = arith.constant 111 : index
    %277 = vector.load %arg9[%c0_226, %c111_227] : memref<32x1024xf32, #tpu.memory_space<vmem>>, vector<32x768xf32>
    %278 = arith.truncf %277 : vector<32x768xf32> to vector<32x768xbf16>
    %c64_228 = arith.constant 64 : index
    %c0_229 = arith.constant 0 : index
    %279 = vector.load %arg10[%c64_228, %c0_229] : memref<288x768xbf16, #tpu.memory_space<vmem>>, vector<32x768xbf16>
    tpu.vector_store %arg10[%c64_228, %c0_229], %278 {strides = array<i32>} : memref<288x768xbf16, #tpu.memory_space<vmem>>, vector<32x768xbf16>,
    %c0_230 = arith.constant 0 : index
    %c127_231 = arith.constant 127 : index
    %280 = vector.load %arg9[%c0_230, %c127_231] : memref<32x1024xf32, #tpu.memory_space<vmem>>, vector<32x768xf32>
    %281 = arith.truncf %280 : vector<32x768xf32> to vector<32x768xbf16>
    %c96_232 = arith.constant 96 : index
    %c0_233 = arith.constant 0 : index
    %282 = vector.load %arg10[%c96_232, %c0_233] : memref<288x768xbf16, #tpu.memory_space<vmem>>, vector<32x768xbf16>
    tpu.vector_store %arg10[%c96_232, %c0_233], %281 {strides = array<i32>} : memref<288x768xbf16, #tpu.memory_space<vmem>>, vector<32x768xbf16>,
    %c0_234 = arith.constant 0 : index
    %c128_235 = arith.constant 128 : index
    %283 = vector.load %arg9[%c0_234, %c128_235] : memref<32x1024xf32, #tpu.memory_space<vmem>>, vector<32x768xf32>
    %284 = arith.truncf %283 : vector<32x768xf32> to vector<32x768xbf16>
    %c128_236 = arith.constant 128 : index
    %c0_237 = arith.constant 0 : index
    %285 = vector.load %arg10[%c128_236, %c0_237] : memref<288x768xbf16, #tpu.memory_space<vmem>>, vector<32x768xbf16>
    tpu.vector_store %arg10[%c128_236, %c0_237], %284 {strides = array<i32>} : memref<288x768xbf16, #tpu.memory_space<vmem>>, vector<32x768xbf16>,
    %c0_238 = arith.constant 0 : index
    %c129_239 = arith.constant 129 : index
    %286 = vector.load %arg9[%c0_238, %c129_239] : memref<32x1024xf32, #tpu.memory_space<vmem>>, vector<32x768xf32>
    %287 = arith.truncf %286 : vector<32x768xf32> to vector<32x768xbf16>
    %c160_240 = arith.constant 160 : index
    %c0_241 = arith.constant 0 : index
    %288 = vector.load %arg10[%c160_240, %c0_241] : memref<288x768xbf16, #tpu.memory_space<vmem>>, vector<32x768xbf16>
    tpu.vector_store %arg10[%c160_240, %c0_241], %287 {strides = array<i32>} : memref<288x768xbf16, #tpu.memory_space<vmem>>, vector<32x768xbf16>,
    %c0_242 = arith.constant 0 : index
    %c145_243 = arith.constant 145 : index
    %289 = vector.load %arg9[%c0_242, %c145_243] : memref<32x1024xf32, #tpu.memory_space<vmem>>, vector<32x768xf32>
    %290 = arith.truncf %289 : vector<32x768xf32> to vector<32x768xbf16>
    %c192_244 = arith.constant 192 : index
    %c0_245 = arith.constant 0 : index
    %291 = vector.load %arg10[%c192_244, %c0_245] : memref<288x768xbf16, #tpu.memory_space<vmem>>, vector<32x768xbf16>
    tpu.vector_store %arg10[%c192_244, %c0_245], %290 {strides = array<i32>} : memref<288x768xbf16, #tpu.memory_space<vmem>>, vector<32x768xbf16>,
    %c0_246 = arith.constant 0 : index
    %c146_247 = arith.constant 146 : index
    %292 = vector.load %arg9[%c0_246, %c146_247] : memref<32x1024xf32, #tpu.memory_space<vmem>>, vector<32x768xf32>
    %293 = arith.truncf %292 : vector<32x768xf32> to vector<32x768xbf16>
    %c224_248 = arith.constant 224 : index
    %c0_249 = arith.constant 0 : index
    %294 = vector.load %arg10[%c224_248, %c0_249] : memref<288x768xbf16, #tpu.memory_space<vmem>>, vector<32x768xbf16>
    tpu.vector_store %arg10[%c224_248, %c0_249], %293 {strides = array<i32>} : memref<288x768xbf16, #tpu.memory_space<vmem>>, vector<32x768xbf16>,
    %c0_250 = arith.constant 0 : index
    %c147_251 = arith.constant 147 : index
    %295 = vector.load %arg9[%c0_250, %c147_251] : memref<32x1024xf32, #tpu.memory_space<vmem>>, vector<32x768xf32>
    %296 = arith.truncf %295 : vector<32x768xf32> to vector<32x768xbf16>
    %c256_252 = arith.constant 256 : index
    %c0_253 = arith.constant 0 : index
    %297 = vector.load %arg10[%c256_252, %c0_253] : memref<288x768xbf16, #tpu.memory_space<vmem>>, vector<32x768xbf16>
    tpu.vector_store %arg10[%c256_252, %c0_253], %296 {strides = array<i32>} : memref<288x768xbf16, #tpu.memory_space<vmem>>, vector<32x768xbf16>,
    %c0_254 = arith.constant 0 : index
    %c0_255 = arith.constant 0 : index
    %298 = vector.load %arg5[%c0_254, %c0_255] : memref<8x288xbf16, #tpu.memory_space<vmem>>, vector<8x288xbf16>
    %c0_256 = arith.constant 0 : index
    %c0_257 = arith.constant 0 : index
    %299 = vector.load %arg10[%c0_256, %c0_257] : memref<288x768xbf16, #tpu.memory_space<vmem>>, vector<288x768xbf16>
    %cst_258 = arith.constant dense<0.000000e+00> : vector<8x768xf32>
    %300 = tpu.matmul %298, %299, %cst_258 {dimension_numbers = #tpu.dot_dimension_numbers<[1], [0], [0], [1], [0, 0, 1, 1], [], []>} : vector<8x288xbf16>, vector<288x768xbf16>, vector<8x768xf32> -> vector<8x768xf32>
    %301 = vector.extract_strided_slice %300 {offsets = [0, 0], sizes = [1, 768], strides = [1, 1]} : vector<8x768xf32> to vector<1x768xf32>
    %c0_259 = arith.constant 0 : index
    %c0_260 = arith.constant 0 : index
    %302 = vector.load %arg6[%c0_259, %c0_260] : memref<1x1xf32, #tpu.memory_space<vmem>>, vector<1x1xf32>
    %303 = vector.broadcast %302 : vector<1x1xf32> to vector<1x768xf32>
    %304 = arith.addf %301, %303 : vector<1x768xf32>
    %cst_261 = arith.constant 0.000000e+00 : f32
    %305 = vector.broadcast %cst_261 : f32 to vector<1x768xf32>
    %306 = arith.cmpf oge, %304, %305 : vector<1x768xf32>
    %cst_262 = arith.constant 2.000000e-01 : f32
    %307 = vector.broadcast %cst_262 : f32 to vector<1x768xf32>
    %308 = arith.mulf %307, %304 : vector<1x768xf32>
    %309 = arith.select %306, %304, %308 : vector<1x768xi1>, vector<1x768xf32>
    %c0_263 = arith.constant 0 : index
    %c0_264 = arith.constant 0 : index
    %310 = vector.load %arg8[%c0_263, %c0_264] : memref<1x768xf32, #tpu.memory_space<vmem>>, vector<1x768xf32>
    tpu.vector_store %arg8[%c0_263, %c0_264], %309 {strides = array<i32>} : memref<1x768xf32, #tpu.memory_space<vmem>>, vector<1x768xf32>,
    return
  }
  func.func @transform_0(%arg0: i32) -> (i32, i32) {
    %c0_i32 = arith.constant 0 : i32
    %c0_i32_0 = arith.constant 0 : i32
    %c0_i32_1 = arith.constant 0 : i32
    return %c0_i32, %c0_i32_0 : i32, i32
  }
  func.func @transform_1(%arg0: i32) -> (i32, i32, i32) {
    %c0_i32 = arith.constant 0 : i32
    %c0_i32_0 = arith.constant 0 : i32
    %c0_i32_1 = arith.constant 0 : i32
    %c0_i32_2 = arith.constant 0 : i32
    return %c0_i32, %c0_i32_0, %c0_i32_1 : i32, i32, i32
  }
  func.func @transform_2(%arg0: i32) -> (i32, i32, i32) {
    %c0_i32 = arith.constant 0 : i32
    %c0_i32_0 = arith.constant 0 : i32
    %c0_i32_1 = arith.constant 0 : i32
    %c0_i32_2 = arith.constant 0 : i32
    return %c0_i32, %c0_i32_0, %c0_i32_1 : i32, i32, i32
  }
  func.func @transform_3(%arg0: i32) -> (i32, i32, i32) {
    %c0_i32 = arith.constant 0 : i32
    %c0_i32_0 = arith.constant 0 : i32
    %c0_i32_1 = arith.constant 0 : i32
    %c0_i32_2 = arith.constant 0 : i32
    return %c0_i32, %c0_i32_0, %c0_i32_1 : i32, i32, i32
  }
  func.func @transform_4(%arg0: i32) -> (i32, i32) {
    %c0_i32 = arith.constant 0 : i32
    %c0_i32_0 = arith.constant 0 : i32
    %c0_i32_1 = arith.constant 0 : i32
    return %c0_i32, %c0_i32_0 : i32, i32
  }
  func.func @transform_5(%arg0: i32) -> (i32, i32) {
    %c0_i32 = arith.constant 0 : i32
    %c0_i32_0 = arith.constant 0 : i32
    %c0_i32_1 = arith.constant 0 : i32
    return %c0_i32, %c0_i32_0 : i32, i32
  }
  func.func @transform_6(%arg0: i32) -> (i32, i32) {
    %c0_i32 = arith.constant 0 : i32
    %c0_i32_0 = arith.constant 0 : i32
    %c0_i32_1 = arith.constant 0 : i32
    return %c0_i32, %c0_i32_0 : i32, i32
  }
  func.func @transform_7(%arg0: i32) -> (i32, i32) {
    %c0_i32 = arith.constant 0 : i32
    %c0_i32_0 = arith.constant 0 : i32
    %c0_i32_1 = arith.constant 0 : i32
    return %c0_i32, %c0_i32_0 : i32, i32
  }
}

</mosaic_0001>

<bundles_post_ra>
// kernel: squeeze.1
= control target key start
LH: loop header
LB: loop body
LE: loop exit
PB: predicated region body
PF: predicated region fallthrough
CT: control target
= control target key end

     0   :  { %s386_s10 = smov 118   ;;  %s387_s11 = smov 114   ;;  %vm213_vm0 = vcmask 965632   ;;  %vm227_vm1 = vcmask 982016   ;;  %vm241_vm2 = vcmask 998400   ;;  %vm255_vm3 = vcmask 1014784   ;;  %s708_s0 = inlined_call_operand.vmem [shape: f32[648], index: 0, kind: input, shape index: {}]   ;;  %s709_s1 = inlined_call_operand.vmem [shape: f32[2,18,18], index: 1, kind: output, shape index: {}]  }
   0x1   :  { %v278_v0 = vld [vmem:[%s708_s0 + $0x4] sm:$0x1]   ;;  %v282_v1 = vld [vmem:[%s708_s0 + $0x2] sm:$0x1]   ;;  %v280_v2 = vld [vmem:[%s708_s0 + $0x3] sm:$0x1]  }
   0x2   :  { %7 = vrot.lane.b32.xlu0 %v278_v0, %s386_s10  ;;  %21 = vrot.lane.b32.xlu1 %v282_v1, %s387_s11  ;;  %v284_v3 = vld [vmem:[%s708_s0 + $0x1] sm:$0x1]   ;;  %s388_s16 = smov 116   ;;  %s389_s17 = smov 112   ;;  %v33_v4 = vld [vmem:[%s708_s0] sm:$0x1]  }
   0x3   :  { %v287_v5 = vld [vmem:[%s708_s0 + $0x4] sm:$0x1]   ;;  %v333_v7 = vld [vmem:[%s708_s0 + $0x5] sm:$0x1]   ;;  %v336_v8 = vld [vmem:[%s708_s0 + $0x3] sm:$0x1]  }
   0x4   :  { %v332_v6 = vld [vmem:[%s708_s0 + $0x4] sm:$0x1]   ;;  %s390_s30 = smov 110   ;;  %s391_s2 = smov 100   ;;  %v340_v12 = vld [vmem:[%s708_s0 + $0x2] sm:$0x1]  }
   0x5   :  { %v337_v9 = vld [vmem:[%s708_s0 + $0x4] sm:$0x1]   ;;  %v214_v10 = vsel %vm213_vm0, %v333_v7, %v332_v6  ;;  %v341_v13 = vld [vmem:[%s708_s0 + $0x3] sm:$0x1]   ;;  %v344_v14 = vld [vmem:[%s708_s0 + $0x1] sm:$0x1]  }
   0x6   :  { %14 = vrot.lane.b32.xlu0 %v280_v2, %s388_s16  ;;  %28 = vrot.lane.b32.xlu1 %v284_v3, %s389_s17  ;;  %v228_v11 = vsel %vm227_vm1, %v337_v9, %v336_v8  ;;  %v345_v15 = vld [vmem:[%s708_s0 + $0x2] sm:$0x1]   ;;  %s392_s11 = smov 10   ;;  %s393_s12 = smov 8   ;;  %v242_v16 = vsel %vm241_vm2, %v341_v13, %v340_v12  ;;  %v265_v18 = vld [vmem:[%s708_s0] sm:$0x1]  }
   0x7   :  { %v256_v17 = vsel %vm255_vm3, %v345_v15, %v344_v14  ;;  %v348_v19 = vld [vmem:[%s708_s0 + $0x1] sm:$0x1]   ;;  %vm268_vm4 = vcmask 1031168   ;;  %s394_s17 = smov 6   ;;  %s395_s18 = smov 4   ;;  %vm3_vm5 = vcmask 146432  }
   0x8   :  { %v269_v20 = vsel %vm268_vm4, %v348_v19, %v265_v18  ;;  %v289_v21 = vld [vmem:[%s708_s0 + $0x3] sm:$0x1]   ;;  %s396_s21 = smov 2   ;;  %s397_s22 = smov 98   ;;  %v291_v22 = vld [vmem:[%s708_s0 + $0x2] sm:$0x1]  }
   0x9   :  { %v293_v23 = vld [vmem:[%s708_s0 + $0x1] sm:$0x1]   ;;  %s398_s27 = smov 96   ;;  %s399_s28 = smov 94   ;;  %v67_v24 = vld [vmem:[%s708_s0] sm:$0x1]  }
   0xa   :  { %34 = vrot.lane.b32.xlu0 %v33_v4, %s390_s30  ;;  %41 = vrot.lane.b32.xlu1 %v287_v5, %s391_s2  ;;  %v296_v25 = vld [vmem:[%s708_s0 + $0x4] sm:$0x1]   ;;  %s400_s4 = smov 92   ;;  %s401_s5 = smov 82   ;;  %v298_v26 = vld [vmem:[%s708_s0 + $0x3] sm:$0x1]  }
   0xb   :  { %v300_v27 = vld [vmem:[%s708_s0 + $0x2] sm:$0x1]   ;;  %s402_s10 = smov 80   ;;  %v302_v28 = vld [vmem:[%s708_s0 + $0x1] sm:$0x1]   ;;  %s404_s16 = smov 76  }
   0xc   :  { %v101_v29 = vld [vmem:[%s708_s0] sm:$0x1]   ;;  %v305_v30 = vld [vmem:[%s708_s0 + $0x4] sm:$0x1]   ;;  %v307_v31 = vld [vmem:[%s708_s0 + $0x3] sm:$0x1]  }
   0xd   :  { %s407_s23 = smov 62   ;;  %v309_v32 = vld [vmem:[%s708_s0 + $0x2] sm:$0x1]   ;;  %v311_v33 = vld [vmem:[%s708_s0 + $0x1] sm:$0x1]   ;;  %s409_s29 = smov 58  }
   0xe   :  { %215 = vrot.lane.b32.xlu0 %v214_v10, %s392_s11  ;;  %229 = vrot.lane.b32.xlu1 %v228_v11, %s393_s12  ;;  %s403_s11 = smov 78   ;;  %v135_v34 = vld [vmem:[%s708_s0] sm:$0x1]   ;;  %v314_v35 = vld [vmem:[%s708_s0 + $0x4] sm:$0x1]   ;;  %s411_s6 = smov 46  }
   0xf   :  { %v316_v36 = vld [vmem:[%s708_s0 + $0x3] sm:$0x1]   ;;  %v318_v37 = vld [vmem:[%s708_s0 + $0x2] sm:$0x1]   ;;  %s413_s12 = smov 42   ;;  %vm217_vm6 = vcmask 80896  }
  0x10   :  { %v320_v38 = vld [vmem:[%s708_s0 + $0x1] sm:$0x1]   ;;  %v169_v39 = vld [vmem:[%s708_s0] sm:$0x1]   ;;  %v323_v41 = vld [vmem:[%s708_s0 + $0x4] sm:$0x1]  }
  0x11   :  { %v2_v40 = vld [vmem:[%s708_s0] sm:$0x1]   ;;  %v325_v42 = vld [vmem:[%s708_s0 + $0x3] sm:$0x1]   ;;  %v327_v43 = vld [vmem:[%s708_s0 + $0x2] sm:$0x1]  }
  0x12   :  { %243 = vrot.lane.b32.xlu0 %v242_v16, %s394_s17  ;;  %257 = vrot.lane.b32.xlu1 %v256_v17, %s395_s18  ;;  %s405_s17 = smov 74   ;;  %4 = vst.msk [vmem:[%s709_s1] sm:$0x1] %vm3_vm5, %v2_v40   ;;  %v329_v44 = vld [vmem:[%s708_s0 + $0x1] sm:$0x1]   ;;  %vm231_vm7 = vcmask 64512  }
  0x13   :  { %v203_v45 = vld [vmem:[%s708_s0] sm:$0x1]   ;;  %s420_s0 = smov 20   ;;  %vm220_vm8 = vcmask 146512   ;;  %vm234_vm9 = vcmask 146496   ;;  %vm245_vm10 = vcmask 48128  }
  0x14   :  { %vm259_vm11 = vcmask 31744   ;;  %vm248_vm12 = vcmask 146480   ;;  %vm262_vm13 = vcmask 146464   ;;  %vm272_vm14 = vcmask 15360  }
  0x15   :  { %vm275_vm15 = vcmask 146448  }
  0x16   :  { %270 = vrot.lane.b32.xlu0 %v269_v20, %s396_s21  ;;  %48 = vrot.lane.b32.xlu1 %v289_v21, %s397_s22  ;;  %s406_s22 = smov 64   ;;  %s414_s21 = smov 40  }
  0x1a   :  { %55 = vrot.lane.b32.xlu0 %v291_v22, %s398_s27  ;;  %62 = vrot.lane.b32.xlu1 %v293_v23, %s399_s28  ;;  %s408_s28 = smov 60   ;;  %s416_s27 = smov 28  }
  0x1e   :  { %68 = vrot.lane.b32.xlu0 %v67_v24, %s400_s4  ;;  %75 = vrot.lane.b32.xlu1 %v296_v25, %s401_s5  ;;  %s410_s5 = smov 56   ;;  %s418_s4 = smov 24  }
  0x22   :  { %82 = vrot.lane.b32.xlu0 %v298_v26, %s402_s10  ;;  %89 = vrot.lane.b32.xlu1 %v300_v27, %s403_s11  ;;  %s412_s11 = smov 44  }
  0x26   :  { %96 = vrot.lane.b32.xlu0 %v302_v28, %s404_s16  ;;  %102 = vrot.lane.b32.xlu1 %v101_v29, %s405_s17 }
  0x2a   :  { %109 = vrot.lane.b32.xlu0 %v305_v30, %s406_s22  ;;  %116 = vrot.lane.b32.xlu1 %v307_v31, %s407_s23  ;;  %s415_s22 = smov 38  }
  0x2e   :  { %123 = vrot.lane.b32.xlu0 %v309_v32, %s408_s28  ;;  %130 = vrot.lane.b32.xlu1 %v311_v33, %s409_s29  ;;  %s417_s28 = smov 26  }
  0x32   :  { %136 = vrot.lane.b32.xlu0 %v135_v34, %s410_s5  ;;  %143 = vrot.lane.b32.xlu1 %v314_v35, %s411_s6  ;;  %s419_s5 = smov 22  }
  0x36   :  { %150 = vrot.lane.b32.xlu0 %v316_v36, %s412_s11  ;;  %157 = vrot.lane.b32.xlu1 %v318_v37, %s413_s12 }
  0x3a   :  { %164 = vrot.lane.b32.xlu0 %v320_v38, %s414_s21  ;;  %170 = vrot.lane.b32.xlu1 %v169_v39, %s415_s22 }
  0x3e   :  { %177 = vrot.lane.b32.xlu0 %v323_v41, %s416_s27  ;;  %184 = vrot.lane.b32.xlu1 %v325_v42, %s417_s28 }
  0x42   :  { %191 = vrot.lane.b32.xlu0 %v327_v43, %s418_s4  ;;  %198 = vrot.lane.b32.xlu1 %v329_v44, %s419_s5 }
  0x46   :  { %204 = vrot.lane.b32.xlu0 %v203_v45, %s420_s0 }
  0x74   :  { %v8_v46 = vpop.permute.xlu0 %7   ;;  %v22_v47 = vpop.permute.xlu1 %21  }
  0x75   :  { %279 = vst.msk [vmem:[%s709_s1 + $0x23] sm:$0x1] %vm3_vm5, %v8_v46   ;;  %283 = vst.msk [vmem:[%s709_s1 + $0xf] sm:$0x1] %vm3_vm5, %v22_v47  }
  0x78   :  { %v15_v48 = vpop.permute.xlu0 %14   ;;  %v29_v49 = vpop.permute.xlu1 %28  }
  0x79   :  { %281 = vst.msk [vmem:[%s709_s1 + $0x1c] sm:$0x1] %vm3_vm5, %v15_v48   ;;  %285 = vst.msk [vmem:[%s709_s1 + $0x8] sm:$0x1] %vm3_vm5, %v29_v49  }
  0x7c   :  { %v35_v50 = vpop.permute.xlu0 %34   ;;  %v42_v51 = vpop.permute.xlu1 %41  }
  0x7d   :  { %286 = vst.msk [vmem:[%s709_s1 + $0x1] sm:$0x1] %vm3_vm5, %v35_v50   ;;  %288 = vst.msk [vmem:[%s709_s1 + $0x24] sm:$0x1] %vm3_vm5, %v42_v51  }
  0x80   :  { %v216_v52 = vpop.permute.xlu0 %215   ;;  %v230_v53 = vpop.permute.xlu1 %229  }
  0x81   :  { %334 = vst.msk [vmem:[%s709_s1 + $0x29] sm:$0x1] %vm217_vm6, %v216_v52  }
  0x82   :  { %338 = vst.msk [vmem:[%s709_s1 + $0x22] sm:$0x1] %vm231_vm7, %v230_v53  }
  0x83   :  { %335 = vst.msk [vmem:[%s709_s1 + $0x29] sm:$0x1] %vm220_vm8, %v216_v52  }
  0x84   :  { %339 = vst.msk [vmem:[%s709_s1 + $0x22] sm:$0x1] %vm234_vm9, %v230_v53   ;;  %v244_v54 = vpop.permute.xlu0 %243   ;;  %v258_v55 = vpop.permute.xlu1 %257  }
  0x85   :  { %342 = vst.msk [vmem:[%s709_s1 + $0x1b] sm:$0x1] %vm245_vm10, %v244_v54  }
  0x86   :  { %346 = vst.msk [vmem:[%s709_s1 + $0xe] sm:$0x1] %vm259_vm11, %v258_v55  }
  0x87   :  { %343 = vst.msk [vmem:[%s709_s1 + $0x1b] sm:$0x1] %vm248_vm12, %v244_v54  }
  0x88   :  { %347 = vst.msk [vmem:[%s709_s1 + $0xe] sm:$0x1] %vm262_vm13, %v258_v55   ;;  %v271_v56 = vpop.permute.xlu0 %270   ;;  %v49_v57 = vpop.permute.xlu1 %48  }
  0x89   :  { %349 = vst.msk [vmem:[%s709_s1 + $0x7] sm:$0x1] %vm272_vm14, %v271_v56  }
  0x8a   :  { %290 = vst.msk [vmem:[%s709_s1 + $0x1d] sm:$0x1] %vm3_vm5, %v49_v57  }
  0x8b   :  { %350 = vst.msk [vmem:[%s709_s1 + $0x7] sm:$0x1] %vm275_vm15, %v271_v56  }
  0x8c   :  { %v56_v58 = vpop.permute.xlu0 %55   ;;  %v63_v59 = vpop.permute.xlu1 %62  }
  0x8d   :  { %292 = vst.msk [vmem:[%s709_s1 + $0x10] sm:$0x1] %vm3_vm5, %v56_v58   ;;  %294 = vst.msk [vmem:[%s709_s1 + $0x9] sm:$0x1] %vm3_vm5, %v63_v59  }
  0x90   :  { %v69_v60 = vpop.permute.xlu0 %68   ;;  %v76_v61 = vpop.permute.xlu1 %75  }
  0x91   :  { %295 = vst.msk [vmem:[%s709_s1 + $0x2] sm:$0x1] %vm3_vm5, %v69_v60   ;;  %297 = vst.msk [vmem:[%s709_s1 + $0x25] sm:$0x1] %vm3_vm5, %v76_v61  }
  0x94   :  { %v83_v62 = vpop.permute.xlu0 %82   ;;  %v90_v63 = vpop.permute.xlu1 %89  }
  0x95   :  { %299 = vst.msk [vmem:[%s709_s1 + $0x1e] sm:$0x1] %vm3_vm5, %v83_v62   ;;  %301 = vst.msk [vmem:[%s709_s1 + $0x11] sm:$0x1] %vm3_vm5, %v90_v63  }
  0x98   :  { %v97_v0 = vpop.permute.xlu0 %96   ;;  %v103_v1 = vpop.permute.xlu1 %102  }
  0x99   :  { %303 = vst.msk [vmem:[%s709_s1 + $0xa] sm:$0x1] %vm3_vm5, %v97_v0   ;;  %304 = vst.msk [vmem:[%s709_s1 + $0x3] sm:$0x1] %vm3_vm5, %v103_v1  }
  0x9c   :  { %v110_v2 = vpop.permute.xlu0 %109   ;;  %v117_v3 = vpop.permute.xlu1 %116  }
  0x9d   :  { %306 = vst.msk [vmem:[%s709_s1 + $0x26] sm:$0x1] %vm3_vm5, %v110_v2   ;;  %308 = vst.msk [vmem:[%s709_s1 + $0x1f] sm:$0x1] %vm3_vm5, %v117_v3  }
  0xa0   :  { %v124_v4 = vpop.permute.xlu0 %123   ;;  %v131_v5 = vpop.permute.xlu1 %130  }
  0xa1   :  { %310 = vst.msk [vmem:[%s709_s1 + $0x18] sm:$0x1] %vm3_vm5, %v124_v4   ;;  %312 = vst.msk [vmem:[%s709_s1 + $0xb] sm:$0x1] %vm3_vm5, %v131_v5  }
  0xa4   :  { %v137_v6 = vpop.permute.xlu0 %136   ;;  %v144_v7 = vpop.permute.xlu1 %143  }
  0xa5   :  { %313 = vst.msk [vmem:[%s709_s1 + $0x4] sm:$0x1] %vm3_vm5, %v137_v6   ;;  %315 = vst.msk [vmem:[%s709_s1 + $0x27] sm:$0x1] %vm3_vm5, %v144_v7  }
  0xa8   :  { %v151_v8 = vpop.permute.xlu0 %150   ;;  %v158_v9 = vpop.permute.xlu1 %157  }
  0xa9   :  { %317 = vst.msk [vmem:[%s709_s1 + $0x20] sm:$0x1] %vm3_vm5, %v151_v8   ;;  %319 = vst.msk [vmem:[%s709_s1 + $0x19] sm:$0x1] %vm3_vm5, %v158_v9  }
  0xac   :  { %v165_v10 = vpop.permute.xlu0 %164   ;;  %v171_v11 = vpop.permute.xlu1 %170  }
  0xad   :  { %321 = vst.msk [vmem:[%s709_s1 + $0xc] sm:$0x1] %vm3_vm5, %v165_v10   ;;  %322 = vst.msk [vmem:[%s709_s1 + $0x5] sm:$0x1] %vm3_vm5, %v171_v11  }
  0xb0   :  { %v178_v12 = vpop.permute.xlu0 %177   ;;  %v185_v13 = vpop.permute.xlu1 %184  }
  0xb1   :  { %324 = vst.msk [vmem:[%s709_s1 + $0x28] sm:$0x1] %vm3_vm5, %v178_v12   ;;  %326 = vst.msk [vmem:[%s709_s1 + $0x21] sm:$0x1] %vm3_vm5, %v185_v13  }
  0xb4   :  { %v192_v14 = vpop.permute.xlu0 %191   ;;  %v199_v15 = vpop.permute.xlu1 %198  }
  0xb5   :  { %328 = vst.msk [vmem:[%s709_s1 + $0x1a] sm:$0x1] %vm3_vm5, %v192_v14   ;;  %330 = vst.msk [vmem:[%s709_s1 + $0xd] sm:$0x1] %vm3_vm5, %v199_v15  }
  0xb8   :  { %v205_v16 = vpop.permute.xlu0 %204  }
  0xb9   :  { %331 = vst.msk [vmem:[%s709_s1 + $0x6] sm:$0x1] %vm3_vm5, %v205_v16  }

// kernel: wdiscriminator_forward.1
= control target key start
LH: loop header
LB: loop body
LE: loop exit
PB: predicated region body
PF: predicated region fallthrough
CT: control target
= control target key end

     0   :  { %v13301_v0 = vmov 0.0|0.0   ;;  %s9217_s24 = smov 19   ;;  %s9218_s18 = smov 18   ;;  %v13313_v21 = vmov 0   ;;  %vm170_vm0 = vcmask 154624   ;;  %vm291_vm1 = vcmask 146432   ;;  %s13290_s0 = inlined_call_operand.vmem [shape: f32[32,768], index: 0, kind: input, shape index: {}]   ;;  %s13291_s1 = inlined_call_operand.vmem [shape: bf16[4,32,288], index: 1, kind: input, shape index: {}]   ;;  %s13292_s6 = inlined_call_operand.vmem [shape: f32[1,768], index: 6, kind: input, shape index: {}]   ;;  %s13293_s2 = inlined_call_operand.vmem [shape: f32[4,32,1], index: 2, kind: input, shape index: {}]   ;;  %s13294_s3 = inlined_call_operand.vmem [shape: f32[4,32,1], index: 3, kind: input, shape index: {}]   ;;  %s13295_s5 = inlined_call_operand.<no memory space> [shape: f32[1,1], index: 5, kind: input, shape index: {}]   ;;  %s13296_s4 = inlined_call_operand.vmem [shape: bf16[8,288], index: 4, kind: input, shape index: {}]   ;;  %s13297_s7 = inlined_call_operand.vmem [shape: f32[1,768], index: 7, kind: output, shape index: {}]  }
   0x1   :  { %142 = vrot.lane.b32.xlu1 %v13301_v0, %s9217_s24  ;;  %v37_v1 = vld [vmem:[%s13290_s0] sm:$0xff]  ;;  %v43_v2 = vld [vmem:[%s13290_s0 + $0x30] sm:$0xff]  ;;  %v38_v6 = vld [vmem:[%s13290_s0 + $0x8] sm:$0xff]  ;;  %s9219_s19 = smov 17   ;;  %s9220_s25 = smov 1   ;;  %1340 = vmatprep.mubr.bf16.mxu1 %v13313_v21  ;;  %vm412_vm2 = vcmask 138240  }
   0x2   :  { %v49_v3 = vld [vmem:[%s13290_s0 + $0x60] sm:$0xff]  ;;  %v9278_v4 = vpack.c.bf16 %v43_v2, %v37_v1  ;;  %v55_v5 = vld [vmem:[%s13290_s0 + $0x90] sm:$0xff]  ;;  %v44_v7 = vld [vmem:[%s13290_s0 + $0x38] sm:$0xff]  ;;  %s9221_s26 = smov 109   ;;  %9148 = vset.pattern.permute.xlu0 %v13313_v21  ;;  %9147 = vset.pattern.permute.xlu1 %v13313_v21  ;;  %s9223_s16 = smov 127   ;;  %vm533_vm3 = vcmask 7168  }
   0x3   :  { %v9289_v8 = vpack.c.bf16 %v55_v5, %v49_v3  ;;  %v9293_v9 = vpack.c.bf16 %v44_v7, %v38_v6  ;;  %v50_v10 = vld [vmem:[%s13290_s0 + $0x68] sm:$0xff]  ;;  %v56_v11 = vld [vmem:[%s13290_s0 + $0x98] sm:$0xff]  ;;  %v39_v13 = vld [vmem:[%s13290_s0 + $0x10] sm:$0xff]  ;;  %s9224_s17 = smov 111   ;;  %s9225_s20 = smov 110   ;;  %vm1065_vm4 = vcmask 891904  }
   0x4   :  { %144 = vrot.lane.b32.xlu0 %v9278_v4, %s9217_s24  ;;  %v9305_v12 = vpack.c.bf16 %v56_v11, %v50_v10  ;;  %v45_v14 = vld [vmem:[%s13290_s0 + $0x40] sm:$0xff]  ;;  %v51_v16 = vld [vmem:[%s13290_s0 + $0x70] sm:$0xff]  ;;  %v40_v19 = vld [vmem:[%s13290_s0 + $0x18] sm:$0xff]  ;;  %vm13298_vm5 = vcmask 261120   ;;  %vm702_vm6 = vcmask 1039360   ;;  %vm823_vm7 = vcmask 908288  }
   0x5   :  { %158 = vrot.lane.b32.xlu1 %v9289_v8, %s9217_s24  ;;  %v9343_v15 = vpack.c.bf16 %v45_v14, %v39_v13  ;;  %v57_v17 = vld [vmem:[%s13290_s0 + $0xa0] sm:$0xff]  ;;  %v46_v20 = vld [vmem:[%s13290_s0 + $0x48] sm:$0xff]  ;;  %v52_v22 = vld [vmem:[%s13290_s0 + $0x78] sm:$0xff]  ;;  %vm944_vm8 = vcmask 900096  }
   0x6   :  { %v9363_v18 = vpack.c.bf16 %v57_v17, %v51_v16  ;;  %v58_v23 = vld [vmem:[%s13290_s0 + $0xa8] sm:$0xff]  ;;  %v9388_v24 = vpack.c.bf16 %v46_v20, %v40_v19  ;;  %v9455_v27 = vld [vmem:[%s13291_s1 + $0x4] ss:$12 sps:$4 sm:$0xff]   ;;  %v48_v32 = vld [vmem:[%s13290_s0 + $0x58] sm:$0xff] }
   0x7   :  { %v9394_v25 = vpack.c.bf16 %v58_v23, %v52_v22  ;;  %1287 = vmatprep.mubr.bf16.mxu0 %v9455_v27  ;;  %v42_v31 = vld [vmem:[%s13290_s0 + $0x28] sm:$0xff]  ;;  %v41_v37 = vld [vmem:[%s13290_s0 + $0x20] sm:$0xff]  ;;  %v47_v38 = vld [vmem:[%s13290_s0 + $0x50] sm:$0xff] }
   0x8   :  { %146 = vrot.lane.b32.xlu0 %v9293_v9, %s9217_s24  ;;  %v9477_v36 = vpack.c.bf16 %v48_v32, %v42_v31  ;;  %v54_v40 = vld [vmem:[%s13290_s0 + $0x88] sm:$0xff]  ;;  %v60_v41 = vld [vmem:[%s13290_s0 + $0xb8] sm:$0xff]  ;;  %v9500_v45 = vpack.c.bf16 %v47_v38, %v41_v37  ;;  %v53_v47 = vld [vmem:[%s13290_s0 + $0x80] sm:$0xff] }
   0x9   :  { %156 = vrot.lane.b32.xlu1 %v13301_v0, %s9217_s24  ;;  %v9504_v46 = vpack.c.bf16 %v60_v41, %v54_v40  ;;  %v59_v48 = vld [vmem:[%s13290_s0 + $0xb0] sm:$0xff] }
   0xa   :  { %v9516_v52 = vpack.c.bf16 %v59_v48, %v53_v47 }
   0xc   :  { %160 = vrot.lane.b32.xlu0 %v9305_v12, %s9217_s24 }
   0xd   :  { %267 = vrot.lane.b32.xlu1 %v9293_v9, %s9218_s18 }
  0x10   :  { %265 = vrot.lane.b32.xlu0 %v9278_v4, %s9218_s18 }
  0x11   :  { %279 = vrot.lane.b32.xlu1 %v9289_v8, %s9218_s18 }
  0x14   :  { %263 = vrot.lane.b32.xlu0 %v13301_v0, %s9218_s18 }
  0x15   :  { %277 = vrot.lane.b32.xlu1 %v13301_v0, %s9218_s18 }
  0x18   :  { %281 = vrot.lane.b32.xlu0 %v9305_v12, %s9218_s18 }
  0x19   :  { %388 = vrot.lane.b32.xlu1 %v9293_v9, %s9219_s19 }
  0x1c   :  { %386 = vrot.lane.b32.xlu0 %v9278_v4, %s9219_s19 }
  0x1d   :  { %400 = vrot.lane.b32.xlu1 %v9289_v8, %s9219_s19 }
  0x20   :  { %384 = vrot.lane.b32.xlu0 %v13301_v0, %s9219_s19 }
  0x21   :  { %398 = vrot.lane.b32.xlu1 %v13301_v0, %s9219_s19 }
  0x24   :  { %402 = vrot.lane.b32.xlu0 %v9305_v12, %s9219_s19 }
  0x25   :  { %509 = vrot.lane.b32.xlu1 %v9293_v9, %s9220_s25 }
  0x28   :  { %507 = vrot.lane.b32.xlu0 %v9278_v4, %s9220_s25 }
  0x29   :  { %1041 = vrot.lane.b32.xlu1 %v9343_v15, %s9221_s26 }
  0x2c   :  { %1039 = vrot.lane.b32.xlu0 %v9293_v9, %s9221_s26 }
  0x2d   :  { %1037 = vrot.lane.b32.xlu1 %v9278_v4, %s9221_s26 }
  0x30   :  { %505 = vrot.lane.b32.xlu0 %v13301_v0, %s9220_s25 }
  0x31   :  { %523 = vrot.lane.b32.xlu1 %v9305_v12, %s9220_s25 }
  0x34   :  { %521 = vrot.lane.b32.xlu0 %v9289_v8, %s9220_s25 }
  0x35   :  { %1055 = vrot.lane.b32.xlu1 %v9363_v18, %s9221_s26 }
  0x38   :  { %1053 = vrot.lane.b32.xlu0 %v9305_v12, %s9221_s26 }
  0x39   :  { %1051 = vrot.lane.b32.xlu1 %v9289_v8, %s9221_s26 }
  0x3c   :  { %519 = vrot.lane.b32.xlu0 %v13301_v0, %s9220_s25 }
  0x3d   :  { %150 = vrot.lane.b32.xlu1 %v9388_v24, %s9217_s24 }
  0x40   :  { %148 = vrot.lane.b32.xlu0 %v9343_v15, %s9217_s24 }
  0x41   :  { %164 = vrot.lane.b32.xlu1 %v9394_v25, %s9217_s24 }
  0x44   :  { %162 = vrot.lane.b32.xlu0 %v9363_v18, %s9217_s24 }
  0x45   :  { %271 = vrot.lane.b32.xlu1 %v9388_v24, %s9218_s18 }
  0x48   :  { %269 = vrot.lane.b32.xlu0 %v9343_v15, %s9218_s18 }
  0x49   :  { %678 = vrot.lane.b32.xlu1 %v9343_v15, %s9223_s16 }
  0x4c   :  { %676 = vrot.lane.b32.xlu0 %v9293_v9, %s9223_s16 }
  0x4d   :  { %283 = vrot.lane.b32.xlu1 %v9363_v18, %s9218_s18 }
  0x50   :  { %674 = vrot.lane.b32.xlu0 %v9278_v4, %s9223_s16 }
  0x51   :  { %690 = vrot.lane.b32.xlu1 %v9305_v12, %s9223_s16 }
  0x54   :  { %285 = vrot.lane.b32.xlu0 %v9394_v25, %s9218_s18 }
  0x55   :  { %688 = vrot.lane.b32.xlu1 %v9289_v8, %s9223_s16 }
  0x58   :  { %692 = vrot.lane.b32.xlu0 %v9363_v18, %s9223_s16 }
  0x59   :  { %392 = vrot.lane.b32.xlu1 %v9388_v24, %s9219_s19 }
  0x5c   :  { %390 = vrot.lane.b32.xlu0 %v9343_v15, %s9219_s19 }
  0x5d   :  { %799 = vrot.lane.b32.xlu1 %v9343_v15, %s9224_s17 }
  0x60   :  { %797 = vrot.lane.b32.xlu0 %v9293_v9, %s9224_s17 }
  0x61   :  { %404 = vrot.lane.b32.xlu1 %v9363_v18, %s9219_s19 }
  0x64   :  { %795 = vrot.lane.b32.xlu0 %v9278_v4, %s9224_s17 }
  0x65   :  { %811 = vrot.lane.b32.xlu1 %v9305_v12, %s9224_s17 }
  0x68   :  { %406 = vrot.lane.b32.xlu0 %v9394_v25, %s9219_s19 }
  0x69   :  { %809 = vrot.lane.b32.xlu1 %v9289_v8, %s9224_s17 }
  0x6c   :  { %813 = vrot.lane.b32.xlu0 %v9363_v18, %s9224_s17 }
  0x6d   :  { %513 = vrot.lane.b32.xlu1 %v9388_v24, %s9220_s25 }
  0x70   :  { %511 = vrot.lane.b32.xlu0 %v9343_v15, %s9220_s25 }
  0x71   :  { %920 = vrot.lane.b32.xlu1 %v9343_v15, %s9225_s20 }
  0x73   :  { %v143_v26 = vpop.permute.xlu1 %142 }
  0x74   :  { %918 = vrot.lane.b32.xlu0 %v9293_v9, %s9225_s20 }
  0x75   :  { %525 = vrot.lane.b32.xlu1 %v9363_v18, %s9220_s25 }
  0x76   :  { %v145_v28 = vpop.permute.xlu0 %144 }
  0x77   :  { %v159_v29 = vpop.permute.xlu1 %158  ;;  %v171_v35 = vsel %vm170_vm0, %v143_v26, %v145_v28 }
  0x78   :  { %916 = vrot.lane.b32.xlu0 %v9278_v4, %s9225_s20 }
  0x79   :  { %932 = vrot.lane.b32.xlu1 %v9305_v12, %s9225_s20 }
  0x7a   :  { %v9462_v30 = vpop.permute.xlu0 %146 }
  0x7b   :  { %v157_v33 = vpop.permute.xlu1 %156  ;;  %v172_v34 = vsel %vm170_vm0, %v145_v28, %v9462_v30 }
  0x7c   :  { %527 = vrot.lane.b32.xlu0 %v9394_v25, %s9220_s25  ;;  %1255 = vmatprep.subr.bf16.mxu0 %v172_v34  ;;  %v177_v44 = vsel %vm170_vm0, %v157_v33, %v159_v29 }
  0x7d   :  { %930 = vrot.lane.b32.xlu1 %v9289_v8, %s9225_s20  ;;  %1256 = vmatpush1.bf16.msra.mxu0 %v171_v35  ;;  %v9598_v35 = vld [vmem:[%s13291_s1 + $0x8] ss:$12 sps:$4 sm:$0xff]  }
  0x7e   :  { %v9485_v39 = vpop.permute.xlu0 %160 }
  0x7f   :  { %v9493_v42 = vpop.permute.xlu1 %267  ;;  %v178_v43 = vsel %vm170_vm0, %v159_v29, %v9485_v39 }
  0x80   :  { %934 = vrot.lane.b32.xlu0 %v9363_v18, %s9225_s20  ;;  %1257 = vmatprep.subr.bf16.mxu0 %v178_v43 }
  0x81   :  { %1258 = vmatpush1.bf16.msra.mxu0 %v177_v44  ;;  %154 = vrot.lane.b32.xlu1 %v9477_v36, %s9217_s24 }
  0x82   :  { %v266_v49 = vpop.permute.xlu0 %265 }
  0x83   :  { %v280_v50 = vpop.permute.xlu1 %279  ;;  %v293_v51 = vsel %vm291_vm1, %v266_v49, %v9493_v42 }
  0x84   :  { %152 = vrot.lane.b32.xlu0 %v9500_v45, %s9217_s24  ;;  %1259 = vmatprep.subr.bf16.mxu0 %v293_v51 }
  0x85   :  { %168 = vrot.lane.b32.xlu1 %v9504_v46, %s9217_s24 }
  0x86   :  { %v264_v53 = vpop.permute.xlu0 %263 }
  0x87   :  { %v278_v54 = vpop.permute.xlu1 %277  ;;  %v292_v55 = vsel %vm291_vm1, %v264_v53, %v266_v49 }
  0x88   :  { %166 = vrot.lane.b32.xlu0 %v9516_v52, %s9217_s24  ;;  %1260 = vmatpush1.bf16.msra.mxu0 %v292_v55  ;;  %v298_v59 = vsel %vm291_vm1, %v278_v54, %v280_v50 }
  0x89   :  { %275 = vrot.lane.b32.xlu1 %v9477_v36, %s9218_s18 }
  0x8a   :  { %v9525_v56 = vpop.permute.xlu0 %281 }
  0x8b   :  { %v9527_v57 = vpop.permute.xlu1 %388  ;;  %v299_v58 = vsel %vm291_vm1, %v280_v50, %v9525_v56 }
  0x8c   :  { %273 = vrot.lane.b32.xlu0 %v9500_v45, %s9218_s18  ;;  %1261 = vmatprep.subr.bf16.mxu0 %v299_v58 }
  0x8d   :  { %1262 = vmatpush1.bf16.msra.mxu0 %v298_v59  ;;  %682 = vrot.lane.b32.xlu1 %v9500_v45, %s9223_s16 }
  0x8e   :  { %v387_v60 = vpop.permute.xlu0 %386 }
  0x8f   :  { %v401_v61 = vpop.permute.xlu1 %400  ;;  %v414_v62 = vsel %vm412_vm2, %v387_v60, %v9527_v57 }
  0x90   :  { %680 = vrot.lane.b32.xlu0 %v9388_v24, %s9223_s16  ;;  %1263 = vmatprep.subr.bf16.mxu0 %v414_v62 }
  0x91   :  { %289 = vrot.lane.b32.xlu1 %v9504_v46, %s9218_s18 }
  0x92   :  { %v385_v63 = vpop.permute.xlu0 %384 }
  0x93   :  { %v399_v1 = vpop.permute.xlu1 %398  ;;  %v413_v2 = vsel %vm412_vm2, %v385_v63, %v387_v60 }
  0x94   :  { %287 = vrot.lane.b32.xlu0 %v9516_v52, %s9218_s18  ;;  %1264 = vmatpush1.bf16.msra.mxu0 %v413_v2  ;;  %v419_v7 = vsel %vm412_vm2, %v399_v1, %v401_v61 }
  0x95   :  { %696 = vrot.lane.b32.xlu1 %v9516_v52, %s9223_s16 }
  0x96   :  { %v9547_v3 = vpop.permute.xlu0 %402 }
  0x97   :  { %v9549_v5 = vpop.permute.xlu1 %509  ;;  %v420_v6 = vsel %vm412_vm2, %v401_v61, %v9547_v3 }
  0x98   :  { %694 = vrot.lane.b32.xlu0 %v9394_v25, %s9223_s16  ;;  %1265 = vmatprep.subr.bf16.mxu0 %v420_v6 }
  0x99   :  { %1266 = vmatpush1.bf16.msra.mxu0 %v419_v7  ;;  %396 = vrot.lane.b32.xlu1 %v9477_v36, %s9219_s19 }
  0x9a   :  { %v508_v10 = vpop.permute.xlu0 %507 }
  0x9b   :  { %v9558_v11 = vpop.permute.xlu1 %1041  ;;  %v535_v13 = vsel %vm533_vm3, %v508_v10, %v9549_v5 }
  0x9c   :  { %394 = vrot.lane.b32.xlu0 %v9500_v45, %s9219_s19  ;;  %1267 = vmatprep.subr.bf16.mxu0 %v535_v13 }
  0x9d   :  { %803 = vrot.lane.b32.xlu1 %v9500_v45, %s9224_s17 }
  0x9e   :  { %v1040_v14 = vpop.permute.xlu0 %1039 }
  0x9f   :  { %v1038_v16 = vpop.permute.xlu1 %1037  ;;  %v1067_v17 = vsel %vm1065_vm4, %v1040_v14, %v9558_v11 }
  0xa0   :  { %801 = vrot.lane.b32.xlu0 %v9388_v24, %s9224_s17  ;;  %1308 = vmatprep.subr.bf16.mxu1 %v1067_v17  ;;  %v1066_v19 = vsel %vm1065_vm4, %v1038_v16, %v1040_v14 }
  0xa1   :  { %1309 = vmatpush1.bf16.msra.mxu1 %v1066_v19  ;;  %410 = vrot.lane.b32.xlu1 %v9504_v46, %s9219_s19 }
  0xa2   :  { %v506_v20 = vpop.permute.xlu0 %505 }
  0xa3   :  { %v9573_v22 = vpop.permute.xlu1 %523  ;;  %v534_v23 = vsel %vm533_vm3, %v506_v20, %v508_v10 }
  0xa4   :  { %408 = vrot.lane.b32.xlu0 %v9516_v52, %s9219_s19  ;;  %1268 = vmatpush1.bf16.msra.mxu0 %v534_v23 }
  0xa5   :  { %817 = vrot.lane.b32.xlu1 %v9516_v52, %s9224_s17 }
  0xa6   :  { %v522_v26 = vpop.permute.xlu0 %521 }
  0xa7   :  { %v9580_v28 = vpop.permute.xlu1 %1055  ;;  %v541_v29 = vsel %vm533_vm3, %v522_v26, %v9573_v22 }
  0xa8   :  { %815 = vrot.lane.b32.xlu0 %v9394_v25, %s9224_s17  ;;  %1269 = vmatprep.subr.bf16.mxu0 %v541_v29 }
  0xa9   :  { %517 = vrot.lane.b32.xlu1 %v9477_v36, %s9220_s25 }
  0xaa   :  { %v1054_v31 = vpop.permute.xlu0 %1053 }
  0xab   :  { %v1052_v32 = vpop.permute.xlu1 %1051  ;;  %v1073_v33 = vsel %vm1065_vm4, %v1054_v31, %v9580_v28 }
  0xac   :  { %515 = vrot.lane.b32.xlu0 %v9500_v45, %s9220_s25  ;;  %1310 = vmatprep.subr.bf16.mxu1 %v1073_v33  ;;  %v1072_v34 = vsel %vm1065_vm4, %v1052_v32, %v1054_v31 }
  0xad   :  { %1311 = vmatpush1.bf16.msra.mxu1 %v1072_v34  ;;  %924 = vrot.lane.b32.xlu1 %v9500_v45, %s9225_s20 }
  0xae   :  { %v520_v37 = vpop.permute.xlu0 %519 }
  0xaf   :  { %v9600_v38 = vpop.permute.xlu1 %150  ;;  %v540_v40 = vsel %vm533_vm3, %v520_v37, %v522_v26 }
  0xb0   :  { %922 = vrot.lane.b32.xlu0 %v9388_v24, %s9225_s20  ;;  %1270 = vmatpush1.bf16.msra.mxu0 %v540_v40 }
  0xb1   :  { %531 = vrot.lane.b32.xlu1 %v9504_v46, %s9220_s25  ;;  %8944 = vmatmul.mubr.msk.bf16.vlgmr.msra.gmra.mrb[0].mxu1 %vm13298_vm5, %v9598_v35 }
  0xb2   :  { %v149_v41 = vpop.permute.xlu0 %148  ;;  %1271 = vmatprep.subr.bf16.mxu0 %v9293_v9  ;;  %1350 = vmatprep.mubr.bf16.mxu1 %v13313_v21  ;;  %v9625_v9 = vld [vmem:[%s13291_s1 + $0x20] ss:$12 sps:$4 sm:$0xff]  }
  0xb3   :  { %v9611_v43 = vpop.permute.xlu1 %164  ;;  %v174_v44 = vsel %vm170_vm0, %v149_v41, %v9600_v38  ;;  %v173_v47 = vsel %vm170_vm0, %v9462_v30, %v149_v41 }
  0xb4   :  { %529 = vrot.lane.b32.xlu0 %v9516_v52, %s9220_s25  ;;  %1361 = vmatprep.subr.bf16.mxu1 %v174_v44 }
  0xb5   :  { %1362 = vmatpush1.bf16.msra.mxu1 %v173_v47  ;;  %938 = vrot.lane.b32.xlu1 %v9516_v52, %s9225_s20 }
  0xb6   :  { %v163_v48 = vpop.permute.xlu0 %162  ;;  %1272 = vmatpush1.bf16.msra.mxu0 %v9278_v4 }
  0xb7   :  { %v9627_v49 = vpop.permute.xlu1 %271  ;;  %v180_v30 = vsel %vm170_vm0, %v163_v48, %v9611_v43  ;;  %v179_v50 = vsel %vm170_vm0, %v9485_v39, %v163_v48  ;;  %1273 = vmatprep.subr.bf16.mxu0 %v9305_v12 }
  0xb8   :  { %936 = vrot.lane.b32.xlu0 %v9394_v25, %s9225_s20  ;;  %1363 = vmatprep.subr.bf16.mxu1 %v180_v30 }
  0xb9   :  { %1364 = vmatpush1.bf16.msra.mxu1 %v179_v50  ;;  %686 = vrot.lane.b32.xlu1 %v13301_v0, %s9223_s16 }
  0xba   :  { %v270_v4 = vpop.permute.xlu0 %269  ;;  %1274 = vmatpush1.bf16.msra.mxu0 %v9289_v8  ;;  %8945 = vmatmul.mubr.msk.bf16.gmra.mrb[4].mxu1 %vm13298_vm5, %v9625_v9 }
  0xbb   :  { %v9641_v51 = vpop.permute.xlu1 %678  ;;  %v295_v39 = vsel %vm291_vm1, %v270_v4, %v9627_v49  ;;  %v294_v12 = vsel %vm291_vm1, %v9493_v42, %v270_v4  ;;  %1393 = vmatprep.mubr.bf16.mxu1 %v9455_v27 }
  0xbc   :  { %684 = vrot.lane.b32.xlu0 %v9477_v36, %s9223_s16  ;;  %1365 = vmatprep.subr.bf16.mxu1 %v295_v39 }
  0xbd   :  { %1366 = vmatpush1.bf16.msra.mxu1 %v294_v12  ;;  %1045 = vrot.lane.b32.xlu1 %v9500_v45, %s9221_s26 }
  0xbe   :  { %v677_v8 = vpop.permute.xlu0 %676 }
  0xbf   :  { %v284_v53 = vpop.permute.xlu1 %283  ;;  %v704_v54 = vsel %vm702_vm6, %v677_v8, %v9641_v51 }
  0xc0   :  { %1043 = vrot.lane.b32.xlu0 %v9388_v24, %s9221_s26  ;;  %1275 = vmatprep.subr.bf16.mxu0 %v704_v54  ;;  %v300_v62 = vsel %vm291_vm1, %v9525_v56, %v284_v53 }
  0xc1   :  { %700 = vrot.lane.b32.xlu1 %v13301_v0, %s9223_s16 }
  0xc2   :  { %v675_v42 = vpop.permute.xlu0 %674 }
  0xc3   :  { %v691_v55 = vpop.permute.xlu1 %690  ;;  %v703_v58 = vsel %vm702_vm6, %v675_v42, %v677_v8 }
  0xc4   :  { %698 = vrot.lane.b32.xlu0 %v9504_v46, %s9223_s16  ;;  %1276 = vmatpush1.bf16.msra.mxu0 %v703_v58 }
  0xc5   :  { %1059 = vrot.lane.b32.xlu1 %v9516_v52, %s9221_s26 }
  0xc6   :  { %v9663_v59 = vpop.permute.xlu0 %285 }
  0xc7   :  { %v689_v60 = vpop.permute.xlu1 %688  ;;  %v301_v61 = vsel %vm291_vm1, %v284_v53, %v9663_v59 }
  0xc8   :  { %1057 = vrot.lane.b32.xlu0 %v9394_v25, %s9221_s26  ;;  %1367 = vmatprep.subr.bf16.mxu1 %v301_v61  ;;  %v709_v6 = vsel %vm702_vm6, %v689_v60, %v691_v55  ;;  %v9748_v60 = vld [vmem:[%s13291_s1] ss:$12 sps:$4 sm:$0xff]  }
  0xc9   :  { %1368 = vmatpush1.bf16.msra.mxu1 %v300_v62  ;;  %807 = vrot.lane.b32.xlu1 %v13301_v0, %s9224_s17 }
  0xca   :  { %v9673_v63 = vpop.permute.xlu0 %692 }
  0xcb   :  { %v9675_v1 = vpop.permute.xlu1 %392  ;;  %v710_v2 = vsel %vm702_vm6, %v691_v55, %v9673_v63 }
  0xcc   :  { %805 = vrot.lane.b32.xlu0 %v9477_v36, %s9224_s17  ;;  %1277 = vmatprep.subr.bf16.mxu0 %v710_v2 }
  0xcd   :  { %1278 = vmatpush1.bf16.msra.mxu0 %v709_v6  ;;  %821 = vrot.lane.b32.xlu1 %v13301_v0, %s9224_s17 }
  0xce   :  { %v391_v56 = vpop.permute.xlu0 %390 }
  0xcf   :  { %v9684_v7 = vpop.permute.xlu1 %799  ;;  %v416_v10 = vsel %vm412_vm2, %v391_v56, %v9675_v1  ;;  %v415_v13 = vsel %vm412_vm2, %v9527_v57, %v391_v56 }
  0xd0   :  { %819 = vrot.lane.b32.xlu0 %v9504_v46, %s9224_s17  ;;  %1369 = vmatprep.subr.bf16.mxu1 %v416_v10 }
  0xd1   :  { %1370 = vmatpush1.bf16.msra.mxu1 %v415_v13  ;;  %928 = vrot.lane.b32.xlu1 %v13301_v0, %s9225_s20 }
  0xd2   :  { %v798_v14 = vpop.permute.xlu0 %797 }
  0xd3   :  { %v405_v16 = vpop.permute.xlu1 %404  ;;  %v825_v17 = vsel %vm823_vm7, %v798_v14, %v9684_v7 }
  0xd4   :  { %926 = vrot.lane.b32.xlu0 %v9477_v36, %s9225_s20  ;;  %1279 = vmatprep.subr.bf16.mxu0 %v825_v17  ;;  %v421_v31 = vsel %vm412_vm2, %v9547_v3, %v405_v16 }
  0xd5   :  { %1049 = vrot.lane.b32.xlu1 %v13301_v0, %s9221_s26 }
  0xd6   :  { %v796_v57 = vpop.permute.xlu0 %795 }
  0xd7   :  { %v812_v19 = vpop.permute.xlu1 %811  ;;  %v824_v20 = vsel %vm823_vm7, %v796_v57, %v798_v14 }
  0xd8   :  { %1047 = vrot.lane.b32.xlu0 %v9477_v36, %s9221_s26  ;;  %1280 = vmatpush1.bf16.msra.mxu0 %v824_v20 }
  0xd9   :  { %942 = vrot.lane.b32.xlu1 %v13301_v0, %s9225_s20 }
  0xda   :  { %v9705_v23 = vpop.permute.xlu0 %406 }
  0xdb   :  { %v810_v26 = vpop.permute.xlu1 %809  ;;  %v422_v29 = vsel %vm412_vm2, %v405_v16, %v9705_v23 }
  0xdc   :  { %940 = vrot.lane.b32.xlu0 %v9504_v46, %s9225_s20  ;;  %1371 = vmatprep.subr.bf16.mxu1 %v422_v29  ;;  %v830_v37 = vsel %vm823_vm7, %v810_v26, %v812_v19 }
  0xdd   :  { %1372 = vmatpush1.bf16.msra.mxu1 %v421_v31  ;;  %1063 = vrot.lane.b32.xlu1 %v13301_v0, %s9221_s26 }
  0xde   :  { %v9715_v32 = vpop.permute.xlu0 %813 }
  0xdf   :  { %v9717_v33 = vpop.permute.xlu1 %513  ;;  %v831_v34 = vsel %vm823_vm7, %v812_v19, %v9715_v32 }
  0xe0   :  { %1061 = vrot.lane.b32.xlu0 %v9504_v46, %s9221_s26  ;;  %1281 = vmatprep.subr.bf16.mxu0 %v831_v34 }
  0xe1   :  { %1282 = vmatpush1.bf16.msra.mxu0 %v830_v37 }
  0xe2   :  { %v512_v40 = vpop.permute.xlu0 %511 }
  0xe3   :  { %v9724_v3 = vpop.permute.xlu1 %920  ;;  %v537_v41 = vsel %vm533_vm3, %v512_v40, %v9717_v33  ;;  %v536_v44 = vsel %vm533_vm3, %v9549_v5, %v512_v40 }
  0xe4   :  { %1373 = vmatprep.subr.bf16.mxu1 %v537_v41 }
  0xe5   :  { %1374 = vmatpush1.bf16.msra.mxu1 %v536_v44 }
  0xe6   :  { %v919_v47 = vpop.permute.xlu0 %918 }
  0xe7   :  { %v526_v48 = vpop.permute.xlu1 %525  ;;  %v946_v30 = vsel %vm944_vm8, %v919_v47, %v9724_v3 }
  0xe8   :  { %1283 = vmatprep.subr.bf16.mxu0 %v946_v30  ;;  %v542_v53 = vsel %vm533_vm3, %v9573_v22, %v526_v48 }
  0xea   :  { %v917_v50 = vpop.permute.xlu0 %916 }
  0xeb   :  { %v933_v4 = vpop.permute.xlu1 %932  ;;  %v945_v39 = vsel %vm944_vm8, %v917_v50, %v919_v47 }
  0xec   :  { %1284 = vmatpush1.bf16.msra.mxu0 %v945_v39 }
  0xee   :  { %v9733_v12 = vpop.permute.xlu0 %527 }
  0xef   :  { %v931_v8 = vpop.permute.xlu1 %930  ;;  %v543_v5 = vsel %vm533_vm3, %v526_v48, %v9733_v12 }
  0xf0   :  { %1375 = vmatprep.subr.bf16.mxu1 %v543_v5  ;;  %v951_v58 = vsel %vm944_vm8, %v931_v8, %v933_v4 }
  0xf1   :  { %1376 = vmatpush1.bf16.msra.mxu1 %v542_v53 }
  0xf2   :  { %v9739_v54 = vpop.permute.xlu0 %934  ;;  %1377 = vmatprep.subr.bf16.mxu1 %v9388_v24  ;;  %v9755_v24 = vld [vmem:[%s13291_s1 + $0x1c] ss:$12 sps:$4 sm:$0xff]  }
  0xf3   :  { %v952_v42 = vsel %vm944_vm8, %v933_v4, %v9739_v54  ;;  %v155_v55 = vpop.permute.xlu1 %154 }
  0xf4   :  { %1285 = vmatprep.subr.bf16.mxu0 %v952_v42 }
  0xf5   :  { %1286 = vmatpush1.bf16.msra.mxu0 %v951_v58  ;;  %1378 = vmatpush1.bf16.msra.mxu1 %v9343_v15 }
  0xf6   :  { %v153_v22 = vpop.permute.xlu0 %152  ;;  %1379 = vmatprep.subr.bf16.mxu1 %v9394_v25 }
  0xf7   :  { %v176_v61 = vsel %vm170_vm0, %v153_v22, %v155_v55  ;;  %v175_v62 = vsel %vm170_vm0, %v9600_v38, %v153_v22  ;;  %v169_v2 = vpop.permute.xlu1 %168  ;;  %v9769_v38 = vld [vmem:[%s13291_s1 + $0x18] ss:$12 sps:$4 sm:$0xff]  }
  0xf8   :  { %1288 = vmatmul.mubr.bf16.vlgmr.msra.gmra.mrb[0].mxu0 %v9748_v60  ;;  %1467 = vmatprep.subr.bf16.mxu0 %v176_v61 }
  0xf9   :  { %1468 = vmatpush1.bf16.msra.mxu0 %v175_v62  ;;  %1380 = vmatpush1.bf16.msra.mxu1 %v9363_v18 }
  0xfa   :  { %v167_v15 = vpop.permute.xlu0 %166  ;;  %1297 = vmatprep.mubr.bf16.mxu0 %v9755_v24 }
  0xfb   :  { %v182_v25 = vsel %vm170_vm0, %v167_v15, %v169_v2  ;;  %v181_v6 = vsel %vm170_vm0, %v9611_v43, %v167_v15  ;;  %v276_v56 = vpop.permute.xlu1 %275 }
  0xfc   :  { %1469 = vmatprep.subr.bf16.mxu0 %v182_v25 }
  0xfd   :  { %1470 = vmatpush1.bf16.msra.mxu0 %v181_v6 }
  0xfe   :  { %v274_v10 = vpop.permute.xlu0 %273 }
  0xff   :  { %v297_v13 = vsel %vm291_vm1, %v274_v10, %v276_v56  ;;  %v296_v18 = vsel %vm291_vm1, %v9627_v49, %v274_v10  ;;  %v9774_v14 = vpop.permute.xlu1 %682 }
 0x100   :  { %1471 = vmatprep.subr.bf16.mxu0 %v297_v13  ;;  %1298 = vmatmul.mubr.bf16.gmra.mrb[4].mxu0 %v9769_v38 }
 0x101   :  { %1472 = vmatpush1.bf16.msra.mxu0 %v296_v18  ;;  %1499 = vmatprep.mubr.bf16.mxu0 %v9455_v27 }
 0x102   :  { %v681_v43 = vpop.permute.xlu0 %680 }
 0x103   :  { %v706_v16 = vsel %vm702_vm6, %v681_v43, %v9774_v14  ;;  %v705_v17 = vsel %vm702_vm6, %v9641_v51, %v681_v43  ;;  %v290_v57 = vpop.permute.xlu1 %289 }
 0x104   :  { %1381 = vmatprep.subr.bf16.mxu1 %v706_v16 }
 0x105   :  { %1382 = vmatpush1.bf16.msra.mxu1 %v705_v17 }
 0x106   :  { %v288_v19 = vpop.permute.xlu0 %287 }
 0x107   :  { %v303_v49 = vsel %vm291_vm1, %v288_v19, %v290_v57  ;;  %v302_v20 = vsel %vm291_vm1, %v9663_v59, %v288_v19  ;;  %v9785_v26 = vpop.permute.xlu1 %696 }
 0x108   :  { %1473 = vmatprep.subr.bf16.mxu0 %v303_v49 }
 0x109   :  { %1474 = vmatpush1.bf16.msra.mxu0 %v302_v20 }
 0x10a   :  { %v695_v27 = vpop.permute.xlu0 %694 }
 0x10b   :  { %v712_v29 = vsel %vm702_vm6, %v695_v27, %v9785_v26  ;;  %v711_v51 = vsel %vm702_vm6, %v9673_v63, %v695_v27  ;;  %v397_v31 = vpop.permute.xlu1 %396 }
 0x10c   :  { %1383 = vmatprep.subr.bf16.mxu1 %v712_v29 }
 0x10d   :  { %1384 = vmatpush1.bf16.msra.mxu1 %v711_v51 }
 0x10e   :  { %v395_v34 = vpop.permute.xlu0 %394 }
 0x10f   :  { %v418_v37 = vsel %vm412_vm2, %v395_v34, %v397_v31  ;;  %v417_v59 = vsel %vm412_vm2, %v9675_v1, %v395_v34  ;;  %v9794_v40 = vpop.permute.xlu1 %803 }
 0x110   :  { %1475 = vmatprep.subr.bf16.mxu0 %v418_v37 }
 0x111   :  { %1476 = vmatpush1.bf16.msra.mxu0 %v417_v59 }
 0x112   :  { %v802_v41 = vpop.permute.xlu0 %801 }
 0x113   :  { %v827_v44 = vsel %vm823_vm7, %v802_v41, %v9794_v40  ;;  %v826_v63 = vsel %vm823_vm7, %v9684_v7, %v802_v41  ;;  %v411_v47 = vpop.permute.xlu1 %410 }
 0x114   :  { %1385 = vmatprep.subr.bf16.mxu1 %v827_v44 }
 0x115   :  { %1386 = vmatpush1.bf16.msra.mxu1 %v826_v63 }
 0x116   :  { %v409_v48 = vpop.permute.xlu0 %408 }
 0x117   :  { %v424_v30 = vsel %vm412_vm2, %v409_v48, %v411_v47  ;;  %v423_v1 = vsel %vm412_vm2, %v9705_v23, %v409_v48  ;;  %v9803_v50 = vpop.permute.xlu1 %817 }
 0x118   :  { %1477 = vmatprep.subr.bf16.mxu0 %v424_v30 }
 0x119   :  { %1478 = vmatpush1.bf16.msra.mxu0 %v423_v1 }
 0x11a   :  { %v816_v4 = vpop.permute.xlu0 %815 }
 0x11b   :  { %v833_v39 = vsel %vm823_vm7, %v816_v4, %v9803_v50  ;;  %v832_v7 = vsel %vm823_vm7, %v9715_v32, %v816_v4  ;;  %v518_v8 = vpop.permute.xlu1 %517 }
 0x11c   :  { %1387 = vmatprep.subr.bf16.mxu1 %v833_v39 }
 0x11d   :  { %1388 = vmatpush1.bf16.msra.mxu1 %v832_v7 }
 0x11e   :  { %v516_v5 = vpop.permute.xlu0 %515 }
 0x11f   :  { %v539_v53 = vsel %vm533_vm3, %v516_v5, %v518_v8  ;;  %v538_v23 = vsel %vm533_vm3, %v9717_v33, %v516_v5  ;;  %v9812_v42 = vpop.permute.xlu1 %924 }
 0x120   :  { %1479 = vmatprep.subr.bf16.mxu0 %v539_v53 }
 0x121   :  { %1480 = vmatpush1.bf16.msra.mxu0 %v538_v23 }
 0x122   :  { %v923_v55 = vpop.permute.xlu0 %922 }
 0x123   :  { %v948_v58 = vsel %vm944_vm8, %v923_v55, %v9812_v42  ;;  %v947_v32 = vsel %vm944_vm8, %v9724_v3, %v923_v55  ;;  %v532_v22 = vpop.permute.xlu1 %531 }
 0x124   :  { %1389 = vmatprep.subr.bf16.mxu1 %v948_v58 }
 0x125   :  { %1390 = vmatpush1.bf16.msra.mxu1 %v947_v32 }
 0x126   :  { %v530_v61 = vpop.permute.xlu0 %529 }
 0x127   :  { %v545_v62 = vsel %vm533_vm3, %v530_v61, %v532_v22  ;;  %v544_v33 = vsel %vm533_vm3, %v9733_v12, %v530_v61  ;;  %v9821_v2 = vpop.permute.xlu1 %938 }
 0x128   :  { %1481 = vmatprep.subr.bf16.mxu0 %v545_v62 }
 0x129   :  { %1482 = vmatpush1.bf16.msra.mxu0 %v544_v33 }
 0x12a   :  { %v937_v15 = vpop.permute.xlu0 %936  ;;  %1483 = vmatprep.subr.bf16.mxu0 %v9477_v36 }
 0x12b   :  { %v954_v25 = vsel %vm944_vm8, %v937_v15, %v9821_v2  ;;  %v953_v3 = vsel %vm944_vm8, %v9739_v54, %v937_v15  ;;  %v687_v6 = vpop.permute.xlu1 %686 }
 0x12c   :  { %1391 = vmatprep.subr.bf16.mxu1 %v954_v25 }
 0x12d   :  { %1392 = vmatpush1.bf16.msra.mxu1 %v953_v3  ;;  %1484 = vmatpush1.bf16.msra.mxu0 %v9500_v45 }
 0x12e   :  { %v685_v56 = vpop.permute.xlu0 %684  ;;  %1485 = vmatprep.subr.bf16.mxu0 %v9504_v46 }
 0x12f   :  { %v1046_v12 = vpop.permute.xlu1 %1045  ;;  %v708_v36 = vsel %vm702_vm6, %v685_v56, %v687_v6  ;;  %v707_v46 = vsel %vm702_vm6, %v9774_v14, %v685_v56 }
 0x130   :  { %1394 = vmatmul.mubr.bf16.vlgmr.msra.gmra.mrb[8].mxu1 %v9748_v60 }
 0x131   :  { %1486 = vmatpush1.bf16.msra.mxu0 %v9516_v52  ;;  %1403 = vmatprep.mubr.bf16.mxu1 %v9755_v24 }
 0x132   :  { %1487 = vmatprep.subr.bf16.mxu0 %v708_v36  ;;  %v1044_v10 = vpop.permute.xlu0 %1043 }
 0x133   :  { %v1069_v54 = vsel %vm1065_vm4, %v1044_v10, %v1046_v12  ;;  %v1068_v13 = vsel %vm1065_vm4, %v9558_v11, %v1044_v10  ;;  %v701_v45 = vpop.permute.xlu1 %700 }
 0x134   :  { %1414 = vmatprep.subr.bf16.mxu1 %v1069_v54 }
 0x135   :  { %1415 = vmatpush1.bf16.msra.mxu1 %v1068_v13  ;;  %1488 = vmatpush1.bf16.msra.mxu0 %v707_v46  ;;  %v9901_v13 = vld [vmem:[%s13292_s6] sm:$0x3f] }
 0x136   :  { %v699_v18 = vpop.permute.xlu0 %698 }
 0x137   :  { %v714_v52 = vsel %vm702_vm6, %v699_v18, %v701_v45  ;;  %v713_v43 = vsel %vm702_vm6, %v9785_v26, %v699_v18  ;;  %v1060_v16 = vpop.permute.xlu1 %1059 }
 0x138   :  { %1404 = vmatmul.mubr.bf16.gmra.mrb[12].mxu1 %v9769_v38  ;;  %1489 = vmatprep.subr.bf16.mxu0 %v714_v52 }
 0x139   :  { %1490 = vmatpush1.bf16.msra.mxu0 %v713_v43  ;;  %1446 = vmatprep.mubr.bf16.mxu1 %v13313_v21 }
 0x13a   :  { %v1058_v11 = vpop.permute.xlu0 %1057 }
 0x13b   :  { %v1075_v17 = vsel %vm1065_vm4, %v1058_v11, %v1060_v16  ;;  %v1074_v14 = vsel %vm1065_vm4, %v9580_v28, %v1058_v11  ;;  %v808_v57 = vpop.permute.xlu1 %807 }
 0x13c   :  { %1416 = vmatprep.subr.bf16.mxu1 %v1075_v17 }
 0x13d   :  { %1417 = vmatpush1.bf16.msra.mxu1 %v1074_v14 }
 0x13e   :  { %v806_v19 = vpop.permute.xlu0 %805 }
 0x13f   :  { %v829_v49 = vsel %vm823_vm7, %v806_v19, %v808_v57  ;;  %v828_v20 = vsel %vm823_vm7, %v9794_v40, %v806_v19  ;;  %v822_v26 = vpop.permute.xlu1 %821 }
 0x140   :  { %8946 = vmatmul.mubr.msk.bf16.vlgmr.msra.gmra.mrb[8].mxu1 %vm13298_vm5, %v9598_v35  ;;  %1491 = vmatprep.subr.bf16.mxu0 %v829_v49 }
 0x141   :  { %1492 = vmatpush1.bf16.msra.mxu0 %v828_v20  ;;  %1456 = vmatprep.mubr.bf16.mxu1 %v13313_v21 }
 0x142   :  { %v820_v27 = vpop.permute.xlu0 %819 }
 0x143   :  { %v835_v28 = vsel %vm823_vm7, %v820_v27, %v822_v26  ;;  %v834_v29 = vsel %vm823_vm7, %v9803_v50, %v820_v27  ;;  %v929_v51 = vpop.permute.xlu1 %928 }
 0x144   :  { %1493 = vmatprep.subr.bf16.mxu0 %v835_v28 }
 0x145   :  { %1494 = vmatpush1.bf16.msra.mxu0 %v834_v29 }
 0x146   :  { %v927_v31 = vpop.permute.xlu0 %926 }
 0x147   :  { %v950_v34 = vsel %vm944_vm8, %v927_v31, %v929_v51  ;;  %v949_v37 = vsel %vm944_vm8, %v9812_v42, %v927_v31  ;;  %v1050_v59 = vpop.permute.xlu1 %1049 }
 0x148   :  { %8947 = vmatmul.mubr.msk.bf16.gmra.mrb[12].mxu1 %vm13298_vm5, %v9625_v9  ;;  %1495 = vmatprep.subr.bf16.mxu0 %v950_v34 }
 0x149   :  { %1496 = vmatpush1.bf16.msra.mxu0 %v949_v37  ;;  %1552 = vmatprep.mubr.bf16.mxu1 %v13313_v21 }
 0x14a   :  { %v1048_v40 = vpop.permute.xlu0 %1047 }
 0x14b   :  { %v1071_v41 = vsel %vm1065_vm4, %v1048_v40, %v1050_v59  ;;  %v1070_v44 = vsel %vm1065_vm4, %v1046_v12, %v1048_v40  ;;  %v943_v63 = vpop.permute.xlu1 %942  ;;  %v13299_v12 = vlaneseq }
 0x14c   :  { %1520 = vmatprep.subr.bf16.mxu1 %v1071_v41 }
 0x14d   :  { %1521 = vmatpush1.bf16.msra.mxu1 %v1070_v44  ;;  %v9894_v36 = vshrl.u32 %v13299_v12, 7 }
 0x14e   :  { %v941_v47 = vpop.permute.xlu0 %940 }
 0x14f   :  { %v956_v48 = vsel %vm944_vm8, %v941_v47, %v943_v63  ;;  %v955_v30 = vsel %vm944_vm8, %v9821_v2, %v941_v47  ;;  %v1064_v1 = vpop.permute.xlu1 %1063  ;;  %13324 = vst [vmem:[#allocation5_spill] sm:$0xff] %v9894_v36  ;;  %v13300_v10 = vsub.s32 0, %v9894_v36  ;;  %v1580_v54 = vsub.s32 1, %v9894_v36 }
 0x150   :  { %1497 = vmatprep.subr.bf16.mxu0 %v956_v48  ;;  %v1584_v43 = vsub.s32 2, %v9894_v36 }
 0x151   :  { %1498 = vmatpush1.bf16.msra.mxu0 %v955_v30  ;;  %v9906_v45 = vrot.slane %v9901_v13, %v13300_v10  ;;  %v9909_v46 = vrot.slane %v9901_v13, %v1580_v54 }
 0x152   :  { %v1062_v50 = vpop.permute.xlu0 %1061  ;;  %v9924_v19 = vrot.slane %v9901_v13, %v1584_v43 }
 0x153   :  { %v1077_v4 = vsel %vm1065_vm4, %v1062_v50, %v1064_v1  ;;  %v1076_v39 = vsel %vm1065_vm4, %v1060_v16, %v1062_v50  ;;  %v1588_v16 = vsub.s32 3, %v9894_v36 }
 0x154   :  { %1522 = vmatprep.subr.bf16.mxu1 %v1077_v4  ;;  %1500 = vmatmul.mubr.bf16.vlgmr.msra.gmra.mrb[8].mxu0 %v9748_v60  ;;  %13325 = vst [vmem:[#allocation6_spill] sm:$0xff] %v9924_v19 }
 0x155   :  { %1523 = vmatpush1.bf16.msra.mxu1 %v1076_v39  ;;  %1509 = vmatprep.mubr.bf16.mxu0 %v9755_v24  ;;  %v9927_v49 = vrot.slane %v9901_v13, %v1588_v16 }
 0x157   :  { %13326 = vst [vmem:[#allocation7_spill] sm:$0xff] %v9927_v49 }
 0x158   :  { %8948 = vmatmul.mubr.msk.bf16.vlgmr.msra.gmra.mrb[16].mxu1 %vm13298_vm5, %v9598_v35 }
 0x159   :  { %1562 = vmatprep.mubr.bf16.mxu1 %v13313_v21 }
 0x15c   :  { %1510 = vmatmul.mubr.bf16.gmra.mrb[12].mxu0 %v9769_v38 }
 0x160   :  { %8949 = vmatmul.mubr.msk.bf16.gmra.mrb[20].mxu1 %vm13298_vm5, %v9625_v9 }
 0x184   :  { %v1342_v7 = vpop.f32.mrb[0].mxu1 }
 0x185   :  { %v1344_v8 = vpop.f32.mrb[1].mxu1 }
 0x186   :  { %v1346_v5 = vpop.f32.mrb[2].mxu1 }
 0x187   :  { %v1348_v53 = vpop.f32.mrb[3].mxu1 }
 0x18d   :  { %v1352_v23 = vpop.f32.mrb[4].mxu1 }
 0x18e   :  { %v1354_v42 = vpop.f32.mrb[5].mxu1 }
 0x18f   :  { %v1356_v60 = vpop.f32.mrb[6].mxu1 }
 0x190   :  { %v1358_v55 = vpop.f32.mrb[7].mxu1 }
 0x1cb   :  { %v1289_v58 = vpop.f32.mrb[0].mxu0 }
 0x1cc   :  { %v9877_v24 = vadd.f32 %v1342_v7, %v1289_v58  ;;  %v1291_v32 = vpop.f32.mrb[1].mxu0 }
 0x1cd   :  { %v9879_v35 = vadd.f32 %v1344_v8, %v1291_v32  ;;  %v1293_v22 = vpop.f32.mrb[2].mxu0 }
 0x1ce   :  { %v9881_v61 = vadd.f32 %v1346_v5, %v1293_v22  ;;  %v1295_v38 = vpop.f32.mrb[3].mxu0  ;;  %v1604_v18 = vmul.f32 %v9906_v45, %v9877_v24 }
 0x1cf   :  { %v9883_v62 = vadd.f32 %v1348_v53, %v1295_v38  ;;  %v1605_v52 = vmul.f32 %v9909_v46, %v9879_v35 }
 0x1d0   :  { %v1610_v11 = vmul.f32 %v9906_v45, %v9881_v61  ;;  %v1656_v14 = vmul.f32 %v1604_v18, %v9877_v24 }
 0x1d1   :  { %v1611_v17 = vmul.f32 %v9909_v46, %v9883_v62  ;;  %v1657_v57 = vmul.f32 %v1605_v52, %v9879_v35  ;;  %v1628_v28 = vadd.f32 %v1605_v52, %v1604_v18 }
 0x1d2   :  { %v1662_v20 = vmul.f32 %v1610_v11, %v9881_v61 }
 0x1d3   :  { %v1299_v9 = vpop.f32.mrb[4].mxu0  ;;  %v1663_v26 = vmul.f32 %v1611_v17, %v9883_v62  ;;  %v1680_v29 = vadd.f32 %v1657_v57, %v1656_v14  ;;  %v1635_v34 = vadd.f32 %v1611_v17, %v1610_v11 }
 0x1d4   :  { %v9885_v33 = vadd.f32 %v1352_v23, %v1299_v9  ;;  %v1301_v2 = vpop.f32.mrb[5].mxu0 }
 0x1d5   :  { %v9887_v15 = vadd.f32 %v1354_v42, %v1301_v2  ;;  %v1303_v25 = vpop.f32.mrb[6].mxu0  ;;  %v1687_v44 = vadd.f32 %v1663_v26, %v1662_v20 }
 0x1d6   :  { %v9889_v3 = vadd.f32 %v1356_v60, %v1303_v25  ;;  %v1305_v6 = vpop.f32.mrb[7].mxu0  ;;  %v1616_v37 = vmul.f32 %v9906_v45, %v9885_v33 }
 0x1d7   :  { %v9891_v56 = vadd.f32 %v1358_v55, %v1305_v6  ;;  %v1617_v59 = vmul.f32 %v9909_v46, %v9887_v15 }
 0x1d8   :  { %v1622_v1 = vmul.f32 %v9906_v45, %v9889_v3  ;;  %v1668_v23 = vmul.f32 %v1616_v37, %v9885_v33 }
 0x1d9   :  { %v1623_v50 = vmul.f32 %v9909_v46, %v9891_v56  ;;  %v1669_v42 = vmul.f32 %v1617_v59, %v9887_v15  ;;  %v1642_v2 = vadd.f32 %v1617_v59, %v1616_v37 }
 0x1da   :  { %v1674_v22 = vmul.f32 %v1622_v1, %v9889_v3 }
 0x1db   :  { %v1675_v38 = vmul.f32 %v1623_v50, %v9891_v56  ;;  %v1694_v18 = vadd.f32 %v1669_v42, %v1668_v23  ;;  %v1649_v16 = vadd.f32 %v1623_v50, %v1622_v1  ;;  %v1596_v50 = vsub.s32 5, %v9894_v36 }
 0x1dd   :  { %v1701_v20 = vadd.f32 %v1675_v38, %v1674_v22  ;;  %v9991_v23 = vrot.slane %v9901_v13, %v1596_v50 }
 0x1df   :  { %13328 = vst [vmem:[#allocation9_spill] sm:$0xff] %v9991_v23 }
 0x213   :  { %v9931_v27 = vpop.f32.mrb[8].mxu1 }
 0x214   :  { %v1606_v51 = vmul.f32 %v9924_v19, %v9931_v27  ;;  %v9935_v31 = vpop.f32.mrb[9].mxu1 }
 0x215   :  { %v1607_v40 = vmul.f32 %v9927_v49, %v9935_v31  ;;  %v9943_v41 = vpop.f32.mrb[10].mxu1 }
 0x216   :  { %v1629_v63 = vadd.f32 %v1628_v28, %v1606_v51  ;;  %v1658_v47 = vmul.f32 %v1606_v51, %v9931_v27  ;;  %v1612_v48 = vmul.f32 %v9924_v19, %v9943_v41  ;;  %v9948_v30 = vpop.f32.mrb[11].mxu1 }
 0x217   :  { %v1659_v4 = vmul.f32 %v1607_v40, %v9935_v31  ;;  %v1613_v39 = vmul.f32 %v9927_v49, %v9948_v30 }
 0x218   :  { %v1681_v7 = vadd.f32 %v1680_v29, %v1658_v47  ;;  %v1630_v8 = vadd.f32 %v1629_v63, %v1607_v40  ;;  %v1636_v5 = vadd.f32 %v1635_v34, %v1612_v48  ;;  %v1664_v53 = vmul.f32 %v1612_v48, %v9943_v41 }
 0x219   :  { %v1665_v60 = vmul.f32 %v1613_v39, %v9948_v30  ;;  %v1592_v48 = vsub.s32 4, %v9894_v36  ;;  %v10642_v36 = vld [vmem:[%s13291_s1 + $0x38] ss:$12 sps:$4 sm:$0xff]  }
 0x21a   :  { %v1682_v55 = vadd.f32 %v1681_v7, %v1659_v4  ;;  %v1688_v58 = vadd.f32 %v1687_v44, %v1664_v53  ;;  %v1637_v32 = vadd.f32 %v1636_v5, %v1613_v39 }
 0x21b   :  { %v9963_v9 = vpop.f32.mrb[12].mxu1  ;;  %v9988_v5 = vrot.slane %v9901_v13, %v1592_v48 }
 0x21c   :  { %v1689_v25 = vadd.f32 %v1688_v58, %v1665_v60  ;;  %v1618_v6 = vmul.f32 %v9924_v19, %v9963_v9  ;;  %v9967_v54 = vpop.f32.mrb[13].mxu1 }
 0x21d   :  { %v1619_v52 = vmul.f32 %v9927_v49, %v9967_v54  ;;  %v9971_v43 = vpop.f32.mrb[14].mxu1  ;;  %13327 = vst [vmem:[#allocation8_spill] sm:$0xff] %v9988_v5 }
 0x21e   :  { %v1643_v11 = vadd.f32 %v1642_v2, %v1618_v6  ;;  %v1670_v17 = vmul.f32 %v1618_v6, %v9963_v9  ;;  %v1624_v14 = vmul.f32 %v9924_v19, %v9971_v43  ;;  %v9976_v57 = vpop.f32.mrb[15].mxu1 }
 0x21f   :  { %v1671_v26 = vmul.f32 %v1619_v52, %v9967_v54  ;;  %v1625_v28 = vmul.f32 %v9927_v49, %v9976_v57 }
 0x220   :  { %v1695_v29 = vadd.f32 %v1694_v18, %v1670_v17  ;;  %v1644_v51 = vadd.f32 %v1643_v11, %v1619_v52  ;;  %v1650_v34 = vadd.f32 %v1649_v16, %v1624_v14  ;;  %v1676_v37 = vmul.f32 %v1624_v14, %v9971_v43 }
 0x221   :  { %v1677_v59 = vmul.f32 %v1625_v28, %v9976_v57 }
 0x222   :  { %v1696_v40 = vadd.f32 %v1695_v29, %v1671_v26  ;;  %v1702_v44 = vadd.f32 %v1701_v20, %v1676_v37  ;;  %v1651_v63 = vadd.f32 %v1650_v34, %v1625_v28 }
 0x224   :  { %v9983_v47 = vadd.f32 %v1702_v44, %v1677_v59 }
 0x227   :  { %v1501_v1 = vpop.f32.mrb[8].mxu0 }
 0x228   :  { %v1503_v4 = vpop.f32.mrb[9].mxu0 }
 0x229   :  { %v1505_v39 = vpop.f32.mrb[10].mxu0 }
 0x22a   :  { %v1507_v7 = vpop.f32.mrb[11].mxu0 }
 0x22b   :  { %v1554_v53 = vpop.f32.mrb[16].mxu1 }
 0x22c   :  { %v9993_v42 = vadd.f32 %v1554_v53, %v1501_v1  ;;  %v1556_v60 = vpop.f32.mrb[17].mxu1 }
 0x22d   :  { %v9995_v58 = vadd.f32 %v1556_v60, %v1503_v4  ;;  %v1558_v22 = vpop.f32.mrb[18].mxu1 }
 0x22e   :  { %v1608_v38 = vmul.f32 %v9988_v5, %v9993_v42  ;;  %v9999_v2 = vadd.f32 %v1558_v22, %v1505_v39  ;;  %v1560_v6 = vpop.f32.mrb[19].mxu1 }
 0x22f   :  { %v1609_v18 = vmul.f32 %v9991_v23, %v9995_v58  ;;  %v10003_v52 = vadd.f32 %v1560_v6, %v1507_v7  ;;  %v1511_v16 = vpop.f32.mrb[12].mxu0 }
 0x230   :  { %v1660_v13 = vmul.f32 %v1608_v38, %v9993_v42  ;;  %v1614_v11 = vmul.f32 %v9988_v5, %v9999_v2  ;;  %v1513_v17 = vpop.f32.mrb[13].mxu0  ;;  %v1631_v14 = vadd.f32 %v1630_v8, %v1608_v38 }
 0x231   :  { %v1661_v20 = vmul.f32 %v1609_v18, %v9995_v58  ;;  %v1615_v26 = vmul.f32 %v9991_v23, %v10003_v52  ;;  %v1515_v28 = vpop.f32.mrb[14].mxu0 }
 0x232   :  { %v1666_v29 = vmul.f32 %v1614_v11, %v9999_v2  ;;  %v1632_v34 = vadd.f32 %v1631_v14, %v1609_v18  ;;  %v1638_v37 = vadd.f32 %v1637_v32, %v1614_v11  ;;  %v1517_v59 = vpop.f32.mrb[15].mxu0  ;;  %v1683_v44 = vadd.f32 %v1682_v55, %v1660_v13 }
 0x233   :  { %v1564_v48 = vpop.f32.mrb[20].mxu1  ;;  %v1667_v8 = vmul.f32 %v1615_v26, %v10003_v52 }
 0x234   :  { %v10012_v1 = vadd.f32 %v1564_v48, %v1511_v16  ;;  %v1566_v50 = vpop.f32.mrb[21].mxu1  ;;  %1633 = vadd.xlane.f32.xlu0 %v1632_v34  ;;  %v1639_v4 = vadd.f32 %v1638_v37, %v1615_v26  ;;  %v1690_v53 = vadd.f32 %v1689_v25, %v1666_v29  ;;  %v1684_v55 = vadd.f32 %v1683_v44, %v1661_v20 }
 0x235   :  { %v10015_v39 = vadd.f32 %v1566_v50, %v1513_v17  ;;  %v1568_v7 = vpop.f32.mrb[22].mxu1 }
 0x236   :  { %v1620_v60 = vmul.f32 %v9988_v5, %v10012_v1  ;;  %v10019_v22 = vadd.f32 %v1568_v7, %v1515_v28  ;;  %1640 = vadd.xlane.f32.xlu1 %v1639_v4  ;;  %v1570_v32 = vpop.f32.mrb[23].mxu1  ;;  %v1691_v17 = vadd.f32 %v1690_v53, %v1667_v8 }
 0x237   :  { %v1621_v38 = vmul.f32 %v9991_v23, %v10015_v39  ;;  %v10023_v6 = vadd.f32 %v1570_v32, %v1517_v59 }
 0x238   :  { %v1672_v18 = vmul.f32 %v1620_v60, %v10012_v1  ;;  %v1626_v16 = vmul.f32 %v9988_v5, %v10019_v22  ;;  %1685 = vadd.xlane.f32.xlu0 %v1684_v55  ;;  %v1645_v25 = vadd.f32 %v1644_v51, %v1620_v60 }
 0x239   :  { %v1673_v13 = vmul.f32 %v1621_v38, %v10015_v39  ;;  %v1627_v11 = vmul.f32 %v9991_v23, %v10023_v6 }
 0x23a   :  { %v1678_v14 = vmul.f32 %v1626_v16, %v10019_v22  ;;  %v1646_v20 = vadd.f32 %v1645_v25, %v1621_v38  ;;  %v1697_v26 = vadd.f32 %v1696_v40, %v1672_v18  ;;  %v1652_v28 = vadd.f32 %v1651_v63, %v1626_v16 }
 0x23b   :  { %v1679_v29 = vmul.f32 %v1627_v11, %v10023_v6 }
 0x23c   :  { %1647 = vadd.xlane.f32.xlu1 %v1646_v20  ;;  %1692 = vadd.xlane.f32.xlu0 %v1691_v17  ;;  %v1698_v34 = vadd.f32 %v1697_v26, %v1673_v13  ;;  %v1653_v37 = vadd.f32 %v1652_v28, %v1627_v11  ;;  %v1704_v59 = vadd.f32 %v9983_v47, %v1678_v14 }
 0x23e   :  { %v1705_v51 = vadd.f32 %v1704_v59, %v1679_v29  ;;  %v1724_v59 = vld [vmem:[%s13293_s2] sm:$0xff] }
 0x240   :  { %1699 = vadd.xlane.f32.xlu1 %v1698_v34  ;;  %1654 = vadd.xlane.f32.xlu0 %v1653_v37 }
 0x244   :  { %1706 = vadd.xlane.f32.xlu0 %v1705_v51 }
 0x2c1   :  { %v1634_v44 = vpop.xlane.xlu0 %1633 }
 0x2c2   :  { %v1708_v48 = vmul.f32 0.001953125, %v1634_v44 }
 0x2c3   :  { %v1641_v50 = vpop.xlane.xlu1 %1640 }
 0x2c4   :  { %v1716_v8 = vmul.f32 %v1708_v48, %v1708_v48  ;;  %v1709_v7 = vmul.f32 0.001953125, %v1641_v50 }
 0x2c5   :  { %v1686_v4 = vpop.xlane.xlu0 %1685 }
 0x2c6   :  { %v1712_v40 = vmul.f32 0.001953125, %v1686_v4  ;;  %v1717_v32 = vmul.f32 %v1709_v7, %v1709_v7  ;;  %v1740_v4 = vld [vmem:[%s13294_s3] sm:$0xff] }
 0x2c8   :  { %v1720_v63 = vsub.f32 %v1712_v40, %v1716_v8  ;;  %v1725_v8 = vld [vmem:[%s13293_s2 + $0x8] sm:$0xff] }
 0x2c9   :  { %v1648_v53 = vpop.xlane.xlu1 %1647  ;;  %v1693_v60 = vpop.xlane.xlu0 %1692 }
 0x2ca   :  { %v1728_v55 = vadd.f32 1e-05, %v1720_v63  ;;  %v1710_v38 = vmul.f32 0.001953125, %v1648_v53  ;;  %v1713_v18 = vmul.f32 0.001953125, %v1693_v60 }
 0x2cc   :  { %9184 = vrsqrt.f32 %v1728_v55  ;;  %v1721_v47 = vsub.f32 %v1713_v18, %v1717_v32  ;;  %v1718_v13 = vmul.f32 %v1710_v38, %v1710_v38  ;;  %v1741_v32 = vld [vmem:[%s13294_s3 + $0x8] sm:$0xff] }
 0x2cd   :  { %v1700_v16 = vpop.xlane.xlu1 %1699  ;;  %v1655_v25 = vpop.xlane.xlu0 %1654 }
 0x2ce   :  { %v1729_v11 = vadd.f32 1e-05, %v1721_v47  ;;  %v1714_v17 = vmul.f32 0.001953125, %v1700_v16  ;;  %v1711_v14 = vmul.f32 0.001953125, %v1655_v25  ;;  %v1726_v16 = vld [vmem:[%s13293_s2 + $0x10] sm:$0xff] }
 0x2d0   :  { %9186 = vrsqrt.f32 %v1729_v11  ;;  %v1722_v20 = vsub.f32 %v1714_v17, %v1718_v13  ;;  %v1719_v29 = vmul.f32 %v1711_v14, %v1711_v14  ;;  %v1727_v13 = vld [vmem:[%s13293_s2 + $0x18] sm:$0xff]  ;;  %v1742_v17 = vld [vmem:[%s13294_s3 + $0x10] sm:$0xff] }
 0x2d1   :  { %v1707_v26 = vpop.xlane.xlu0 %1706 }
 0x2d2   :  { %v1730_v28 = vadd.f32 1e-05, %v1722_v20  ;;  %v1715_v34 = vmul.f32 0.001953125, %v1707_v26 }
 0x2d4   :  { %v1723_v37 = vsub.f32 %v1715_v34, %v1719_v29  ;;  %9188 = vrsqrt.f32 %v1730_v28  ;;  %v1743_v28 = vld [vmem:[%s13294_s3 + $0x18] sm:$0xff] }
 0x2d6   :  { %v9185_v51 = vpop.eup %9184  ;;  %v1731_v44 = vadd.f32 1e-05, %v1723_v37 }
 0x2d7   :  { %v1736_v50 = vmul.f32 %v9185_v51, %v1724_v59 }
 0x2d8   :  { %9190 = vrsqrt.f32 %v1731_v44 }
 0x2d9   :  { %1754 = vperm.xlu1 %9147, %v1736_v50   ;;  %v1744_v40 = vmul.f32 %v1736_v50, %v1708_v48 }
 0x2da   :  { %v9187_v63 = vpop.eup %9186 }
 0x2db   :  { %v1748_v53 = vsub.f32 %v1740_v4, %v1744_v40  ;;  %v1737_v60 = vmul.f32 %v9187_v63, %v1725_v8 }
 0x2dd   :  { %1798 = vperm.xlu1 %9147, %v1748_v53   ;;  %1759 = vperm.xlu0 %9148, %v1737_v60   ;;  %v1745_v55 = vmul.f32 %v1737_v60, %v1709_v7 }
 0x2de   :  { %v9189_v47 = vpop.eup %9188 }
 0x2df   :  { %v1749_v18 = vsub.f32 %v1741_v32, %v1745_v55  ;;  %v1738_v48 = vmul.f32 %v9189_v47, %v1726_v16 }
 0x2e1   :  { %1803 = vperm.xlu1 %9147, %v1749_v18   ;;  %2016 = vrot.lane.b32.xlu0 %v13301_v0, %s9217_s24  ;;  %v1746_v11 = vmul.f32 %v1738_v48, %v1710_v38 }
 0x2e2   :  { %v9191_v25 = vpop.eup %9190 }
 0x2e3   :  { %v1739_v7 = vmul.f32 %v9191_v25, %v1727_v13  ;;  %v1750_v20 = vsub.f32 %v1742_v17, %v1746_v11 }
 0x2e5   :  { %1764 = vperm.xlu1 %9147, %v1738_v48   ;;  %2136 = vrot.lane.b32.xlu0 %v13301_v0, %s9218_s18  ;;  %v1747_v26 = vmul.f32 %v1739_v7, %v1711_v14 }
 0x2e7   :  { %v1751_v29 = vsub.f32 %v1743_v28, %v1747_v26 }
 0x2e9   :  { %1769 = vperm.xlu1 %9147, %v1739_v7   ;;  %2256 = vrot.lane.b32.xlu0 %v13301_v0, %s9219_s19 }
 0x2ed   :  { %1808 = vperm.xlu1 %9147, %v1750_v20   ;;  %2376 = vrot.lane.b32.xlu0 %v13301_v0, %s9220_s25 }
 0x2f1   :  { %1813 = vperm.xlu1 %9147, %v1751_v29  }
 0x2f5   :  { %2030 = vrot.lane.b32.xlu1 %v13301_v0, %s9217_s24 }
 0x2f9   :  { %2150 = vrot.lane.b32.xlu1 %v13301_v0, %s9218_s18 }
 0x2fd   :  { %2270 = vrot.lane.b32.xlu1 %v13301_v0, %s9219_s19 }
 0x301   :  { %2390 = vrot.lane.b32.xlu1 %v13301_v0, %s9220_s25 }
 0x358   :  { %v10074_v38 = vpop.permute.xlu1 %1754 }
 0x359   :  { %v1772_v34 = vmul.f32 %v10074_v38, %v9877_v24  ;;  %v1774_v37 = vmul.f32 %v10074_v38, %v9931_v27  ;;  %v1775_v59 = vmul.f32 %v10074_v38, %v9935_v31  ;;  %v1773_v4 = vmul.f32 %v10074_v38, %v9879_v35 }
 0x35c   :  { %v10076_v14 = vpop.permute.xlu1 %1798  ;;  %v10085_v44 = vpop.permute.xlu0 %1759 }
 0x35d   :  { %v1816_v51 = vadd.f32 %v10076_v14, %v1772_v34  ;;  %v1818_v8 = vadd.f32 %v10076_v14, %v1774_v37  ;;  %v1819_v40 = vadd.f32 %v10076_v14, %v1775_v59  ;;  %v1817_v24 = vadd.f32 %v10076_v14, %v1773_v4 }
 0x35e   :  { %v1778_v27 = vmul.f32 %v10085_v44, %v9881_v61  ;;  %v1779_v31 = vmul.f32 %v10085_v44, %v9883_v62  ;;  %v1780_v53 = vmul.f32 %v10085_v44, %v9943_v41  ;;  %v1781_v60 = vmul.f32 %v10085_v44, %v9948_v30 }
 0x35f   :  { %v1864_v63 = vmul.f32 0.2, %v1816_v51  ;;  %vm1840_vm9 = vcmp.ge.f32.partialorder %v1816_v51, 0.0  ;;  %v1866_v32 = vmul.f32 0.2, %v1818_v8  ;;  %vm1842_vm10 = vcmp.ge.f32.partialorder %v1818_v8, 0.0 }
 0x360   :  { %v10087_v50 = vpop.permute.xlu1 %1803  ;;  %v1867_v55 = vmul.f32 0.2, %v1819_v40  ;;  %vm1843_vm11 = vcmp.ge.f32.partialorder %v1819_v40, 0.0  ;;  %v1865_v62 = vmul.f32 0.2, %v1817_v24  ;;  %vm1841_vm5 = vcmp.ge.f32.partialorder %v1817_v24, 0.0 }
 0x361   :  { %v1822_v18 = vadd.f32 %v10087_v50, %v1778_v27  ;;  %v1823_v47 = vadd.f32 %v10087_v50, %v1779_v31  ;;  %v1824_v61 = vadd.f32 %v10087_v50, %v1780_v53  ;;  %v1825_v16 = vadd.f32 %v10087_v50, %v1781_v60 }
 0x362   :  { %v1888_v41 = vsel %vm1840_vm9, %v1816_v51, %v1864_v63  ;;  %v1890_v13 = vsel %vm1842_vm10, %v1818_v8, %v1866_v32  ;;  %v1891_v7 = vsel %vm1843_vm11, %v1819_v40, %v1867_v55  ;;  %v1889_v40 = vsel %vm1841_vm5, %v1817_v24, %v1865_v62 }
 0x363   :  { %vm1846_vm12 = vcmp.ge.f32.partialorder %v1822_v18, 0.0  ;;  %vm1847_vm13 = vcmp.ge.f32.partialorder %v1823_v47, 0.0  ;;  %vm1848_vm14 = vcmp.ge.f32.partialorder %v1824_v61, 0.0  ;;  %vm1849_vm15 = vcmp.ge.f32.partialorder %v1825_v16, 0.0 }
 0x364   :  { %v10102_v35 = vpop.permute.xlu1 %1764  ;;  %v1870_v30 = vmul.f32 0.2, %v1822_v18  ;;  %v1871_v48 = vmul.f32 0.2, %v1823_v47  ;;  %v1872_v11 = vmul.f32 0.2, %v1824_v61  ;;  %v1912_v20 = vmul.f32 %v1888_v41, %v9906_v45 }
 0x365   :  { %v1873_v17 = vmul.f32 0.2, %v1825_v16  ;;  %v1914_v59 = vmul.f32 %v1890_v13, %v9924_v19  ;;  %v1915_v51 = vmul.f32 %v1891_v7, %v9927_v49  ;;  %v1913_v32 = vmul.f32 %v1889_v40, %v9909_v46 }
 0x366   :  { %v1894_v26 = vsel %vm1846_vm12, %v1822_v18, %v1870_v30  ;;  %v1895_v28 = vsel %vm1847_vm13, %v1823_v47, %v1871_v48  ;;  %v1896_v29 = vsel %vm1848_vm14, %v1824_v61, %v1872_v11  ;;  %v1786_v24 = vmul.f32 %v10102_v35, %v9963_v9 }
 0x367   :  { %v1897_v34 = vsel %vm1849_vm15, %v1825_v16, %v1873_v17  ;;  %v1918_v37 = vmul.f32 %v1894_v26, %v9906_v45  ;;  %v1920_v4 = vmul.f32 %v1896_v29, %v9924_v19  ;;  %v1919_v63 = vmul.f32 %v1895_v28, %v9909_v46 }
 0x368   :  { %v10108_v25 = vpop.permute.xlu1 %1769  ;;  %v1921_v8 = vmul.f32 %v1897_v34, %v9927_v49  ;;  %v1787_v18 = vmul.f32 %v10102_v35, %v9967_v54 }
 0x369   :  { %v10116_v27 = vpack.c.bf16 %v1918_v37, %v1912_v20  ;;  %v10119_v31 = vpack.c.bf16 %v1920_v4, %v1914_v59  ;;  %v10130_v55 = vpack.c.bf16 %v1919_v63, %v1913_v32  ;;  %v1792_v62 = vmul.f32 %v10108_v25, %v9971_v43 }
 0x36a   :  { %v10121_v53 = vpack.c.bf16 %v1921_v8, %v1915_v51  ;;  %v1793_v9 = vmul.f32 %v10108_v25, %v9976_v57  ;;  %v1790_v59 = vmul.f32 %v10108_v25, %v9889_v3  ;;  %v1784_v51 = vmul.f32 %v10102_v35, %v9885_v33 }
 0x36b   :  { %2138 = vrot.lane.b32.xlu0 %v10116_v27, %s9218_s18  ;;  %2018 = vrot.lane.b32.xlu1 %v10116_v27, %s9217_s24  ;;  %v1783_v8 = vmul.f32 %v10085_v44, %v10003_v52  ;;  %v1777_v63 = vmul.f32 %v10074_v38, %v9995_v58  ;;  %v1791_v33 = vmul.f32 %v10108_v25, %v9891_v56 }
 0x36c   :  { %v10123_v60 = vpop.permute.xlu1 %1808  ;;  %v1782_v56 = vmul.f32 %v10085_v44, %v9999_v2 }
 0x36d   :  { %v1830_v47 = vadd.f32 %v10123_v60, %v1786_v24  ;;  %v1831_v61 = vadd.f32 %v10123_v60, %v1787_v18  ;;  %v1828_v40 = vadd.f32 %v10123_v60, %v1784_v51  ;;  %v1827_v3 = vadd.f32 %v10087_v50, %v1783_v8 }
 0x36e   :  { %v1821_v52 = vadd.f32 %v10076_v14, %v1777_v63  ;;  %v1785_v18 = vmul.f32 %v10102_v35, %v9887_v15  ;;  %v1776_v15 = vmul.f32 %v10074_v38, %v9993_v42  ;;  %v2017_v63 = vpop.permute.xlu0 %2016 }
 0x36f   :  { %2258 = vrot.lane.b32.xlu0 %v10116_v27, %s9219_s19  ;;  %2020 = vrot.lane.b32.xlu1 %v10130_v55, %s9217_s24  ;;  %v1878_v30 = vmul.f32 0.2, %v1830_v47  ;;  %v1879_v48 = vmul.f32 0.2, %v1831_v61  ;;  %vm1854_vm5 = vcmp.ge.f32.partialorder %v1830_v47, 0.0  ;;  %vm1855_vm9 = vcmp.ge.f32.partialorder %v1831_v61, 0.0 }
 0x370   :  { %v10142_v16 = vpop.permute.xlu1 %1813  ;;  %v1876_v24 = vmul.f32 0.2, %v1828_v40  ;;  %vm1852_vm13 = vcmp.ge.f32.partialorder %v1828_v40, 0.0  ;;  %vm1851_vm14 = vcmp.ge.f32.partialorder %v1827_v3, 0.0  ;;  %vm1845_vm15 = vcmp.ge.f32.partialorder %v1821_v52, 0.0 }
 0x371   :  { %v1836_v54 = vadd.f32 %v10142_v16, %v1792_v62  ;;  %v1837_v41 = vadd.f32 %v10142_v16, %v1793_v9  ;;  %v1902_v43 = vsel %vm1854_vm5, %v1830_v47, %v1878_v30  ;;  %v1903_v57 = vsel %vm1855_vm9, %v1831_v61, %v1879_v48 }
 0x372   :  { %v1926_v20 = vmul.f32 %v1902_v43, %v9924_v19  ;;  %v1927_v26 = vmul.f32 %v1903_v57, %v9927_v49  ;;  %v1834_v4 = vadd.f32 %v10142_v16, %v1790_v59  ;;  %v1835_v58 = vadd.f32 %v10142_v16, %v1791_v33 }
 0x373   :  { %2378 = vrot.lane.b32.xlu0 %v10116_v27, %s9220_s25  ;;  %2140 = vrot.lane.b32.xlu1 %v10130_v55, %s9218_s18  ;;  %vm1860_vm10 = vcmp.ge.f32.partialorder %v1836_v54, 0.0  ;;  %vm1861_vm11 = vcmp.ge.f32.partialorder %v1837_v41, 0.0  ;;  %v1884_v13 = vmul.f32 0.2, %v1836_v54  ;;  %v1885_v7 = vmul.f32 0.2, %v1837_v41 }
 0x374   :  { %v1882_v32 = vmul.f32 0.2, %v1834_v4  ;;  %vm1858_vm12 = vcmp.ge.f32.partialorder %v1834_v4, 0.0  ;;  %v1875_v47 = vmul.f32 0.2, %v1827_v3  ;;  %v1829_v62 = vadd.f32 %v10123_v60, %v1785_v18 }
 0x375   :  { %v1908_v11 = vsel %vm1860_vm10, %v1836_v54, %v1884_v13  ;;  %v1909_v17 = vsel %vm1861_vm11, %v1837_v41, %v1885_v7  ;;  %v1869_v9 = vmul.f32 0.2, %v1821_v52  ;;  %v1900_v54 = vsel %vm1852_vm13, %v1828_v40, %v1876_v24  ;;  %v10305_v24 = vld [vmem:[%s13291_s1 + $0x34] ss:$12 sps:$4 sm:$0xff]  }
 0x376   :  { %v1932_v28 = vmul.f32 %v1908_v11, %v9924_v19  ;;  %v1933_v29 = vmul.f32 %v1909_v17, %v9927_v49  ;;  %v1906_v61 = vsel %vm1858_vm12, %v1834_v4, %v1882_v32  ;;  %v1826_v41 = vadd.f32 %v10087_v50, %v1782_v56  ;;  %v10290_v32 = vpop.permute.xlu0 %2136  ;;  %3153 = vmatprep.mubr.bf16.mxu1 %v10305_v24 }
 0x377   :  { %2546 = vrot.lane.b32.xlu0 %v10130_v55, %s9223_s16  ;;  %2260 = vrot.lane.b32.xlu1 %v10130_v55, %s9219_s19  ;;  %v1883_v30 = vmul.f32 0.2, %v1835_v58  ;;  %v1930_v48 = vmul.f32 %v1906_v61, %v9906_v45  ;;  %v1899_v43 = vsel %vm1851_vm14, %v1827_v3, %v1875_v47  ;;  %vm1859_vm5 = vcmp.ge.f32.partialorder %v1835_v58, 0.0  ;;  %v10282_v3 = vpop.permute.xlu1 %2030 }
 0x378   :  { %v10166_v34 = vpack.c.bf16 %v1932_v28, %v1926_v20  ;;  %v10168_v37 = vpack.c.bf16 %v1933_v29, %v1927_v26  ;;  %v1820_v2 = vadd.f32 %v10076_v14, %v1776_v15  ;;  %v1877_v44 = vmul.f32 0.2, %v1829_v62  ;;  %3259 = vmatprep.mubr.bf16.mxu0 %v10305_v24 }
 0x379   :  { %v1924_v57 = vmul.f32 %v1900_v54, %v9906_v45  ;;  %v1893_v42 = vsel %vm1845_vm15, %v1821_v52, %v1869_v9  ;;  %vm1853_vm9 = vcmp.ge.f32.partialorder %v1829_v62, 0.0  ;;  %v1874_v38 = vmul.f32 0.2, %v1826_v41 }
 0x37a   :  { %v1923_v50 = vmul.f32 %v1899_v43, %v9991_v23  ;;  %v1907_v13 = vsel %vm1859_vm5, %v1835_v58, %v1883_v30  ;;  %vm1850_vm10 = vcmp.ge.f32.partialorder %v1826_v41, 0.0  ;;  %v1868_v11 = vmul.f32 0.2, %v1820_v2  ;;  %v10300_v52 = vpop.permute.xlu0 %2256 }
 0x37b   :  { %2544 = vrot.lane.b32.xlu0 %v10116_v27, %s9223_s16  ;;  %2380 = vrot.lane.b32.xlu1 %v10130_v55, %s9220_s25  ;;  %v10217_v7 = vpack.c.bf16 %v1930_v48, %v1924_v57  ;;  %v1917_v14 = vmul.f32 %v1893_v42, %v9991_v23  ;;  %v1901_v17 = vsel %vm1853_vm9, %v1829_v62, %v1877_v44  ;;  %vm1844_vm11 = vcmp.ge.f32.partialorder %v1820_v2, 0.0  ;;  %v10294_v33 = vpop.permute.xlu1 %2150 }
 0x37c   :  { %v1931_v20 = vmul.f32 %v1907_v13, %v9909_v46  ;;  %v1898_v26 = vsel %vm1850_vm10, %v1826_v41, %v1874_v38  ;;  %v1925_v29 = vmul.f32 %v1901_v17, %v9909_v46  ;;  %v1892_v59 = vsel %vm1844_vm11, %v1820_v2, %v1868_v11 }
 0x37d   :  { %v10225_v28 = vpack.c.bf16 %v1923_v50, %v1917_v14  ;;  %v1922_v51 = vmul.f32 %v1898_v26, %v9988_v5  ;;  %v1916_v8 = vmul.f32 %v1892_v59, %v9988_v5  ;;  %v1794_v47 = vmul.f32 %v10108_v25, %v10019_v22 }
 0x37e   :  { %v10233_v4 = vpack.c.bf16 %v1931_v20, %v1925_v29  ;;  %v10317_v58 = vpop.permute.xlu0 %2376  ;;  %v1788_v56 = vmul.f32 %v10102_v35, %v10012_v1  ;;  %v1795_v1 = vmul.f32 %v10108_v25, %v10023_v6  ;;  %v1789_v2 = vmul.f32 %v10102_v35, %v10015_v39 }
 0x37f   :  { %2666 = vrot.lane.b32.xlu0 %v10130_v55, %s9224_s17  ;;  %2548 = vrot.lane.b32.xlu1 %v10119_v31, %s9223_s16  ;;  %v10240_v40 = vpack.c.bf16 %v1922_v51, %v1916_v8  ;;  %v10307_v18 = vpop.permute.xlu1 %2270  ;;  %v1838_v62 = vadd.f32 %v10142_v16, %v1794_v47  ;;  %vm13329_vm5 = vcmask 261120  }
 0x380   :  { %v1832_v15 = vadd.f32 %v10123_v60, %v1788_v56  ;;  %v1839_v44 = vadd.f32 %v10142_v16, %v1795_v1  ;;  %v1833_v25 = vadd.f32 %v10123_v60, %v1789_v2  ;;  %vm13330_vm9 = vmmov %vm13329_vm5 }
 0x381   :  { %v1886_v22 = vmul.f32 0.2, %v1838_v62  ;;  %vm1862_vm12 = vcmp.ge.f32.partialorder %v1838_v62, 0.0  ;;  %vm13331_vm10 = vmmov %vm13329_vm5 }
 0x382   :  { %v1880_v41 = vmul.f32 0.2, %v1832_v15  ;;  %vm1856_vm13 = vcmp.ge.f32.partialorder %v1832_v15, 0.0  ;;  %v1887_v50 = vmul.f32 0.2, %v1839_v44  ;;  %vm1863_vm14 = vcmp.ge.f32.partialorder %v1839_v44, 0.0  ;;  %vm13332_vm11 = vmmov %vm13329_vm5 }
 0x383   :  { %2664 = vrot.lane.b32.xlu0 %v10116_v27, %s9224_s17  ;;  %2668 = vrot.lane.b32.xlu1 %v10119_v31, %s9224_s17  ;;  %v10323_v61 = vpop.permute.xlu1 %2390  ;;  %v1910_v48 = vsel %vm1862_vm12, %v1838_v62, %v1886_v22  ;;  %v1881_v13 = vmul.f32 0.2, %v1833_v25  ;;  %vm1857_vm15 = vcmp.ge.f32.partialorder %v1833_v25, 0.0  ;;  %vm13333_vm12 = vmmov %vm13329_vm5 }
 0x384   :  { %v1904_v42 = vsel %vm1856_vm13, %v1832_v15, %v1880_v41  ;;  %v1934_v38 = vmul.f32 %v1910_v48, %v9988_v5  ;;  %v1911_v17 = vsel %vm1863_vm14, %v1839_v44, %v1887_v50  ;;  %vm13334_vm13 = vmmov %vm13329_vm5 }
 0x385   :  { %v1928_v16 = vmul.f32 %v1904_v42, %v9988_v5  ;;  %v1905_v20 = vsel %vm1857_vm15, %v1833_v25, %v1881_v13  ;;  %v1935_v29 = vmul.f32 %v1911_v17, %v9991_v23 }
 0x386   :  { %v1929_v51 = vmul.f32 %v1905_v20, %v9991_v23 }
 0x387   :  { %2786 = vrot.lane.b32.xlu0 %v10130_v55, %s9225_s20  ;;  %2788 = vrot.lane.b32.xlu1 %v10119_v31, %s9225_s20  ;;  %v10366_v11 = vpack.c.bf16 %v1934_v38, %v1928_v16 }
 0x38b   :  { %2784 = vrot.lane.b32.xlu0 %v10116_v27, %s9225_s20  ;;  %2908 = vrot.lane.b32.xlu1 %v10119_v31, %s9221_s26 }
 0x38f   :  { %2906 = vrot.lane.b32.xlu0 %v10130_v55, %s9221_s26  ;;  %2022 = vrot.lane.b32.xlu1 %v10119_v31, %s9217_s24 }
 0x393   :  { %2904 = vrot.lane.b32.xlu0 %v10116_v27, %s9221_s26  ;;  %2032 = vrot.lane.b32.xlu1 %v10217_v7, %s9217_s24 }
 0x397   :  { %2024 = vrot.lane.b32.xlu0 %v10121_v53, %s9217_s24  ;;  %2028 = vrot.lane.b32.xlu1 %v10225_v28, %s9217_s24 }
 0x39b   :  { %2034 = vrot.lane.b32.xlu0 %v10233_v4, %s9217_s24  ;;  %2152 = vrot.lane.b32.xlu1 %v10217_v7, %s9218_s18 }
 0x39f   :  { %2026 = vrot.lane.b32.xlu0 %v10240_v40, %s9217_s24  ;;  %2144 = vrot.lane.b32.xlu1 %v10121_v53, %s9218_s18 }
 0x3a3   :  { %2154 = vrot.lane.b32.xlu0 %v10233_v4, %s9218_s18  ;;  %2272 = vrot.lane.b32.xlu1 %v10217_v7, %s9219_s19 }
 0x3a7   :  { %2142 = vrot.lane.b32.xlu0 %v10119_v31, %s9218_s18  ;;  %2148 = vrot.lane.b32.xlu1 %v10225_v28, %s9218_s18 }
 0x3ab   :  { %2274 = vrot.lane.b32.xlu0 %v10233_v4, %s9219_s19  ;;  %2392 = vrot.lane.b32.xlu1 %v10217_v7, %s9220_s25 }
 0x3af   :  { %2146 = vrot.lane.b32.xlu0 %v10240_v40, %s9218_s18  ;;  %2264 = vrot.lane.b32.xlu1 %v10121_v53, %s9219_s19 }
 0x3b3   :  { %2394 = vrot.lane.b32.xlu0 %v10233_v4, %s9220_s25  ;;  %2268 = vrot.lane.b32.xlu1 %v10225_v28, %s9219_s19 }
 0x3b7   :  { %2262 = vrot.lane.b32.xlu0 %v10119_v31, %s9219_s19  ;;  %2384 = vrot.lane.b32.xlu1 %v10121_v53, %s9220_s25 }
 0x3bb   :  { %2266 = vrot.lane.b32.xlu0 %v10240_v40, %s9219_s19  ;;  %2560 = vrot.lane.b32.xlu1 %v10233_v4, %s9223_s16 }
 0x3bf   :  { %2382 = vrot.lane.b32.xlu0 %v10119_v31, %s9220_s25  ;;  %2388 = vrot.lane.b32.xlu1 %v10225_v28, %s9220_s25 }
 0x3c3   :  { %2562 = vrot.lane.b32.xlu0 %v10166_v34, %s9223_s16  ;;  %2558 = vrot.lane.b32.xlu1 %v10217_v7, %s9223_s16 }
 0x3c7   :  { %2386 = vrot.lane.b32.xlu0 %v10240_v40, %s9220_s25  ;;  %2680 = vrot.lane.b32.xlu1 %v10233_v4, %s9224_s17 }
 0x3cb   :  { %2682 = vrot.lane.b32.xlu0 %v10166_v34, %s9224_s17  ;;  %2552 = vrot.lane.b32.xlu1 %v10240_v40, %s9223_s16 }
 0x3cf   :  { %2550 = vrot.lane.b32.xlu0 %v10121_v53, %s9223_s16  ;;  %2678 = vrot.lane.b32.xlu1 %v10217_v7, %s9224_s17 }
 0x3d3   :  { %2802 = vrot.lane.b32.xlu0 %v10166_v34, %s9225_s20  ;;  %2800 = vrot.lane.b32.xlu1 %v10233_v4, %s9225_s20 }
 0x3d7   :  { %2554 = vrot.lane.b32.xlu0 %v10225_v28, %s9223_s16  ;;  %2556 = vrot.lane.b32.xlu1 %v13301_v0, %s9223_s16 }
 0x3db   :  { %2670 = vrot.lane.b32.xlu0 %v10121_v53, %s9224_s17  ;;  %2798 = vrot.lane.b32.xlu1 %v10217_v7, %s9225_s20 }
 0x3dd   :  { %v10333_v9 = vpop.permute.xlu0 %2138  ;;  %v2019_v54 = vpop.permute.xlu1 %2018 }
 0x3de   :  { %v2044_v6 = vsel %vm170_vm0, %v2017_v63, %v2019_v54  ;;  %v10388_v63 = vpack.c.bf16 %v1935_v29, %v1929_v51 }
 0x3df   :  { %2674 = vrot.lane.b32.xlu0 %v10225_v28, %s9224_s17  ;;  %2570 = vrot.lane.b32.xlu1 %v13301_v0, %s9223_s16 }
 0x3e1   :  { %v10341_v30 = vpop.permute.xlu0 %2258  ;;  %v10343_v43 = vpop.permute.xlu1 %2020 }
 0x3e2   :  { %v2045_v57 = vsel %vm170_vm0, %v2019_v54, %v10343_v43 }
 0x3e3   :  { %2922 = vrot.lane.b32.xlu0 %v10166_v34, %s9221_s26  ;;  %2672 = vrot.lane.b32.xlu1 %v10240_v40, %s9224_s17 }
 0x3e4   :  { %3121 = vmatprep.subr.bf16.mxu1 %v2045_v57 }
 0x3e5   :  { %3122 = vmatpush1.bf16.msra.mxu1 %v2044_v6  ;;  %v10357_v39 = vpop.permute.xlu0 %2378  ;;  %v10359_v35 = vpop.permute.xlu1 %2140 }
 0x3e7   :  { %2036 = vrot.lane.b32.xlu0 %v10166_v34, %s9217_s24  ;;  %2920 = vrot.lane.b32.xlu1 %v10233_v4, %s9221_s26 }
 0x3e9   :  { %v10368_v60 = vpop.permute.xlu0 %2546  ;;  %v10370_v14 = vpop.permute.xlu1 %2260 }
 0x3eb   :  { %2040 = vrot.lane.b32.xlu0 %v10366_v11, %s9217_s24  ;;  %2918 = vrot.lane.b32.xlu1 %v10217_v7, %s9221_s26 }
 0x3ed   :  { %v10376_v26 = vpop.permute.xlu0 %2544  ;;  %v10379_v59 = vpop.permute.xlu1 %2380 }
 0x3ef   :  { %2156 = vrot.lane.b32.xlu0 %v10166_v34, %s9218_s18  ;;  %2038 = vrot.lane.b32.xlu1 %v10168_v37, %s9217_s24 }
 0x3f1   :  { %v10386_v8 = vpop.permute.xlu0 %2666  ;;  %v10390_v47 = vpop.permute.xlu1 %2548 }
 0x3f3   :  { %2160 = vrot.lane.b32.xlu0 %v10366_v11, %s9218_s18  ;;  %2042 = vrot.lane.b32.xlu1 %v10388_v63, %s9217_s24 }
 0x3f5   :  { %v10396_v56 = vpop.permute.xlu0 %2664  ;;  %v10398_v62 = vpop.permute.xlu1 %2668 }
 0x3f7   :  { %2276 = vrot.lane.b32.xlu0 %v10166_v34, %s9219_s19  ;;  %2158 = vrot.lane.b32.xlu1 %v10168_v37, %s9218_s18 }
 0x3f9   :  { %v10404_v15 = vpop.permute.xlu0 %2786  ;;  %v10406_v22 = vpop.permute.xlu1 %2788 }
 0x3fb   :  { %2280 = vrot.lane.b32.xlu0 %v10366_v11, %s9219_s19  ;;  %2162 = vrot.lane.b32.xlu1 %v10388_v63, %s9218_s18 }
 0x3fd   :  { %v10412_v54 = vpop.permute.xlu0 %2784  ;;  %v10414_v41 = vpop.permute.xlu1 %2908 }
 0x3ff   :  { %2396 = vrot.lane.b32.xlu0 %v10166_v34, %s9220_s25  ;;  %2278 = vrot.lane.b32.xlu1 %v10168_v37, %s9219_s19 }
 0x401   :  { %v10420_v1 = vpop.permute.xlu0 %2906  ;;  %v2023_v48 = vpop.permute.xlu1 %2022 }
 0x402   :  { %v2046_v25 = vsel %vm170_vm0, %v10343_v43, %v2023_v48  ;;  %v2165_v43 = vsel %vm291_vm1, %v10333_v9, %v10359_v35 }
 0x403   :  { %2400 = vrot.lane.b32.xlu0 %v10366_v11, %s9220_s25  ;;  %2282 = vrot.lane.b32.xlu1 %v10388_v63, %s9219_s19 }
 0x405   :  { %v10426_v2 = vpop.permute.xlu0 %2904  ;;  %v2033_v44 = vpop.permute.xlu1 %2032 }
 0x406   :  { %v2050_v13 = vsel %vm170_vm0, %v10282_v3, %v2033_v44  ;;  %v2164_v3 = vsel %vm291_vm1, %v10290_v32, %v10333_v9  ;;  %v2285_v32 = vsel %vm412_vm2, %v10341_v30, %v10370_v14 }
 0x407   :  { %2790 = vrot.lane.b32.xlu0 %v10121_v53, %s9225_s20  ;;  %2398 = vrot.lane.b32.xlu1 %v10168_v37, %s9220_s25 }
 0x409   :  { %v10432_v57 = vpop.permute.xlu0 %2024  ;;  %v10434_v42 = vpop.permute.xlu1 %2028 }
 0x40a   :  { %v2047_v6 = vsel %vm170_vm0, %v2023_v48, %v10432_v57 }
 0x40b   :  { %2564 = vrot.lane.b32.xlu0 %v10168_v37, %s9223_s16  ;;  %3227 = vmatprep.subr.bf16.mxu0 %v2047_v6 }
 0x40c   :  { %2402 = vrot.lane.b32.xlu1 %v10388_v63, %s9220_s25  ;;  %3228 = vmatpush1.bf16.msra.mxu0 %v2046_v25 }
 0x40d   :  { %v10444_v38 = vpop.permute.xlu0 %2034  ;;  %v2153_v16 = vpop.permute.xlu1 %2152 }
 0x40e   :  { %v2051_v50 = vsel %vm170_vm0, %v2033_v44, %v10444_v38  ;;  %v2170_v44 = vsel %vm291_vm1, %v10294_v33, %v2153_v16  ;;  %v2284_v33 = vsel %vm412_vm2, %v10300_v52, %v10341_v30  ;;  %v2405_v52 = vsel %vm533_vm3, %v10357_v39, %v10379_v59 }
 0x40f   :  { %2794 = vrot.lane.b32.xlu0 %v10225_v28, %s9225_s20  ;;  %3123 = vmatprep.subr.bf16.mxu1 %v2051_v50 }
 0x410   :  { %2676 = vrot.lane.b32.xlu1 %v13301_v0, %s9224_s17  ;;  %3124 = vmatpush1.bf16.msra.mxu1 %v2050_v13 }
 0x411   :  { %3125 = vmatprep.subr.bf16.mxu1 %v2165_v43  ;;  %v10457_v17 = vpop.permute.xlu0 %2026  ;;  %v10459_v20 = vpop.permute.xlu1 %2144 }
 0x412   :  { %v2049_v23 = vsel %vm170_vm0, %v10457_v17, %v10434_v42 }
 0x413   :  { %2568 = vrot.lane.b32.xlu0 %v10388_v63, %s9223_s16 }
 0x414   :  { %2690 = vrot.lane.b32.xlu1 %v13301_v0, %s9224_s17  ;;  %3126 = vmatpush1.bf16.msra.mxu1 %v2164_v3 }
 0x415   :  { %v10468_v29 = vpop.permute.xlu0 %2154  ;;  %v2273_v51 = vpop.permute.xlu1 %2272 }
 0x416   :  { %v2171_v48 = vsel %vm291_vm1, %v2153_v16, %v10468_v29  ;;  %v2290_v13 = vsel %vm412_vm2, %v10307_v18, %v2273_v51  ;;  %v2404_v18 = vsel %vm533_vm3, %v10317_v58, %v10357_v39 }
 0x417   :  { %2684 = vrot.lane.b32.xlu0 %v10168_v37, %s9224_s17  ;;  %3127 = vmatprep.subr.bf16.mxu1 %v2171_v48 }
 0x418   :  { %2566 = vrot.lane.b32.xlu1 %v10366_v11, %s9223_s16  ;;  %3128 = vmatpush1.bf16.msra.mxu1 %v2170_v44 }
 0x419   :  { %3129 = vmatprep.subr.bf16.mxu1 %v2285_v32  ;;  %v10481_v9 = vpop.permute.xlu0 %2142  ;;  %v10483_v6 = vpop.permute.xlu1 %2148 }
 0x41b   :  { %2688 = vrot.lane.b32.xlu0 %v10388_v63, %s9224_s17 }
 0x41c   :  { %2792 = vrot.lane.b32.xlu1 %v10240_v40, %s9225_s20  ;;  %3130 = vmatpush1.bf16.msra.mxu1 %v2284_v33 }
 0x41d   :  { %v10492_v25 = vpop.permute.xlu0 %2274  ;;  %v2393_v16 = vpop.permute.xlu1 %2392 }
 0x41e   :  { %v2291_v50 = vsel %vm412_vm2, %v2273_v51, %v10492_v25  ;;  %v2410_v44 = vsel %vm533_vm3, %v10323_v61, %v2393_v16 }
 0x41f   :  { %2804 = vrot.lane.b32.xlu0 %v10168_v37, %s9225_s20  ;;  %3131 = vmatprep.subr.bf16.mxu1 %v2291_v50 }
 0x420   :  { %2686 = vrot.lane.b32.xlu1 %v10366_v11, %s9224_s17  ;;  %3132 = vmatpush1.bf16.msra.mxu1 %v2290_v13 }
 0x421   :  { %3133 = vmatprep.subr.bf16.mxu1 %v2405_v52  ;;  %v10505_v30 = vpop.permute.xlu0 %2146  ;;  %v10507_v43 = vpop.permute.xlu1 %2264 }
 0x423   :  { %2808 = vrot.lane.b32.xlu0 %v10388_v63, %s9225_s20 }
 0x424   :  { %2796 = vrot.lane.b32.xlu1 %v13301_v0, %s9225_s20  ;;  %3134 = vmatpush1.bf16.msra.mxu1 %v2404_v18  ;;  %v2692_v18 = vsel %vm823_vm7, %v10396_v56, %v10386_v8 }
 0x425   :  { %v10516_v3 = vpop.permute.xlu0 %2394  ;;  %v10518_v51 = vpop.permute.xlu1 %2268 }
 0x426   :  { %v2411_v48 = vsel %vm533_vm3, %v2393_v16, %v10516_v3 }
 0x427   :  { %2910 = vrot.lane.b32.xlu0 %v10121_v53, %s9221_s26  ;;  %3135 = vmatprep.subr.bf16.mxu1 %v2411_v48 }
 0x428   :  { %2806 = vrot.lane.b32.xlu1 %v10366_v11, %s9225_s20  ;;  %3136 = vmatpush1.bf16.msra.mxu1 %v2410_v44 }
 0x429   :  { %3137 = vmatprep.subr.bf16.mxu1 %v10130_v55  ;;  %v10529_v58 = vpop.permute.xlu0 %2262  ;;  %v10531_v39 = vpop.permute.xlu1 %2384  ;;  %v2573_v55 = vsel %vm702_vm6, %v10368_v60, %v10390_v47 }
 0x42b   :  { %2914 = vrot.lane.b32.xlu0 %v10225_v28, %s9221_s26 }
 0x42c   :  { %2810 = vrot.lane.b32.xlu1 %v13301_v0, %s9225_s20  ;;  %3138 = vmatpush1.bf16.msra.mxu1 %v10116_v27 }
 0x42d   :  { %3139 = vmatprep.subr.bf16.mxu1 %v10233_v4  ;;  %v10539_v61 = vpop.permute.xlu0 %2266  ;;  %v2561_v32 = vpop.permute.xlu1 %2560  ;;  %v2572_v4 = vsel %vm702_vm6, %v10376_v26, %v10368_v60  ;;  %v2693_v60 = vsel %vm823_vm7, %v10386_v8, %v10398_v62  ;;  %v2813_v8 = vsel %vm944_vm8, %v10404_v15, %v10406_v22 }
 0x42f   :  { %2924 = vrot.lane.b32.xlu0 %v10168_v37, %s9221_s26 }
 0x430   :  { %2912 = vrot.lane.b32.xlu1 %v10240_v40, %s9221_s26  ;;  %3140 = vmatpush1.bf16.msra.mxu1 %v10217_v7 }
 0x431   :  { %3141 = vmatprep.subr.bf16.mxu1 %v2573_v55  ;;  %v10549_v33 = vpop.permute.xlu0 %2382  ;;  %v10551_v27 = vpop.permute.xlu1 %2388 }
 0x433   :  { %2928 = vrot.lane.b32.xlu0 %v10388_v63, %s9221_s26 }
 0x434   :  { %2916 = vrot.lane.b32.xlu1 %v13301_v0, %s9221_s26  ;;  %3142 = vmatpush1.bf16.msra.mxu1 %v2572_v4 }
 0x435   :  { %v10560_v7 = vpop.permute.xlu0 %2562  ;;  %v2559_v16 = vpop.permute.xlu1 %2558 }
 0x436   :  { %v2579_v50 = vsel %vm702_vm6, %v2561_v32, %v10560_v7  ;;  %v2578_v13 = vsel %vm702_vm6, %v2559_v16, %v2561_v32 }
 0x437   :  { %3143 = vmatprep.subr.bf16.mxu1 %v2579_v50 }
 0x438   :  { %2926 = vrot.lane.b32.xlu1 %v10366_v11, %s9221_s26  ;;  %3144 = vmatpush1.bf16.msra.mxu1 %v2578_v13  ;;  %v2812_v13 = vsel %vm944_vm8, %v10412_v54, %v10404_v15  ;;  %v2933_v15 = vsel %vm1065_vm4, %v10420_v1, %v10414_v41  ;;  %v10614_v54 = vld [vmem:[%s13291_s1 + $0x4c] ss:$12 sps:$4 sm:$0xff]  }
 0x439   :  { %3145 = vmatprep.subr.bf16.mxu1 %v2693_v60  ;;  %v10570_v26 = vpop.permute.xlu0 %2386  ;;  %v2681_v52 = vpop.permute.xlu1 %2680 }
 0x43c   :  { %2930 = vrot.lane.b32.xlu1 %v13301_v0, %s9221_s26  ;;  %3146 = vmatpush1.bf16.msra.mxu1 %v2692_v18 }
 0x43d   :  { %v10577_v48 = vpop.permute.xlu0 %2682  ;;  %v10579_v44 = vpop.permute.xlu1 %2552 }
 0x43e   :  { %v2699_v32 = vsel %vm823_vm7, %v2681_v52, %v10577_v48 }
 0x43f   :  { %3147 = vmatprep.subr.bf16.mxu1 %v2699_v32 }
 0x441   :  { %v10583_v55 = vpop.permute.xlu0 %2550  ;;  %v2679_v4 = vpop.permute.xlu1 %2678 }
 0x442   :  { %v2698_v16 = vsel %vm823_vm7, %v2679_v4, %v2681_v52 }
 0x443   :  { %3148 = vmatpush1.bf16.msra.mxu1 %v2698_v16 }
 0x444   :  { %3149 = vmatprep.subr.bf16.mxu1 %v2813_v8  ;;  %v10606_v8 = vld [vmem:[%s13291_s1 + $0x30] ss:$12 sps:$4 sm:$0xff]  }
 0x445   :  { %v10589_v56 = vpop.permute.xlu0 %2802  ;;  %v2801_v50 = vpop.permute.xlu1 %2800 }
 0x446   :  { %v2819_v60 = vsel %vm944_vm8, %v2801_v50, %v10589_v56 }
 0x447   :  { %3150 = vmatpush1.bf16.msra.mxu1 %v2812_v13 }
 0x448   :  { %3151 = vmatprep.subr.bf16.mxu1 %v2819_v60 }
 0x449   :  { %v10596_v18 = vpop.permute.xlu0 %2554  ;;  %v10598_v52 = vpop.permute.xlu1 %2556 }
 0x44d   :  { %v10600_v32 = vpop.permute.xlu0 %2670  ;;  %v2799_v4 = vpop.permute.xlu1 %2798 }
 0x44e   :  { %v2818_v16 = vsel %vm944_vm8, %v2799_v4, %v2801_v50  ;;  %v2932_v50 = vsel %vm1065_vm4, %v10426_v2, %v10420_v1 }
 0x44f   :  { %3152 = vmatpush1.bf16.msra.mxu1 %v2818_v16 }
 0x450   :  { %3174 = vmatprep.subr.bf16.mxu1 %v2933_v15  ;;  %v10632_v15 = vld [vmem:[%s13291_s1 + $0x48] ss:$12 sps:$4 sm:$0xff]  }
 0x451   :  { %v10616_v13 = vpop.permute.xlu0 %2674  ;;  %v10618_v60 = vpop.permute.xlu1 %2570 }
 0x452   :  { %3154 = vmatmul.mubr.bf16.vlgmr.msra.gmra.mrb[24].mxu1 %v10606_v8 }
 0x453   :  { %3175 = vmatpush1.bf16.msra.mxu1 %v2932_v50  ;;  %3163 = vmatprep.mubr.bf16.mxu1 %v10614_v54 }
 0x455   :  { %v10625_v4 = vpop.permute.xlu0 %2922  ;;  %v10627_v16 = vpop.permute.xlu1 %2672 }
 0x459   :  { %v2037_v12 = vpop.permute.xlu0 %2036  ;;  %v2921_v10 = vpop.permute.xlu1 %2920 }
 0x45a   :  { %3164 = vmatmul.mubr.bf16.gmra.mrb[28].mxu1 %v10632_v15  ;;  %v2939_v1 = vsel %vm1065_vm4, %v2921_v10, %v10625_v4 }
 0x45b   :  { %3176 = vmatprep.subr.bf16.mxu1 %v2939_v1  ;;  %3206 = vmatprep.mubr.bf16.mxu1 %v13313_v21 }
 0x45d   :  { %v2041_v2 = vpop.permute.xlu0 %2040  ;;  %v2919_v50 = vpop.permute.xlu1 %2918 }
 0x45e   :  { %v2938_v0 = vsel %vm1065_vm4, %v2919_v50, %v2921_v10  ;;  %v2048_v10 = vsel %vm170_vm0, %v10432_v57, %v10457_v17  ;;  %v10663_v57 = vld [vmem:[%s13291_s1 + $0x50] ss:$12 sps:$4 sm:$0xff]   ;;  %v2169_v17 = vsel %vm291_vm1, %v10505_v30, %v10483_v6 }
 0x45f   :  { %3177 = vmatpush1.bf16.msra.mxu1 %v2938_v0  ;;  %v2052_v0 = vsel %vm170_vm0, %v10444_v38, %v2037_v12 }
 0x460   :  { %3333 = vmatprep.subr.bf16.mxu1 %v2049_v23  ;;  %v2167_v23 = vsel %vm291_vm1, %v10481_v9, %v10459_v20 }
 0x461   :  { %v2157_v5 = vpop.permute.xlu0 %2156  ;;  %v2039_v49 = vpop.permute.xlu1 %2038 }
 0x462   :  { %8964 = vmatmul.mubr.msk.bf16.vlgmr.msra.gmra.mrb[24].mxu1 %vm13329_vm5, %v10642_v36  ;;  %v2053_v1 = vsel %vm170_vm0, %v2037_v12, %v2039_v49  ;;  %v2166_v12 = vsel %vm291_vm1, %v10359_v35, %v10481_v9  ;;  %v2054_v38 = vsel %vm170_vm0, %v2039_v49, %v2041_v2  ;;  %v2172_v35 = vsel %vm291_vm1, %v10468_v29, %v2157_v5 }
 0x463   :  { %3229 = vmatprep.subr.bf16.mxu0 %v2053_v1  ;;  %3334 = vmatpush1.bf16.msra.mxu1 %v2048_v10  ;;  %v2168_v49 = vsel %vm291_vm1, %v10459_v20, %v10505_v30  ;;  %v2287_v9 = vsel %vm412_vm2, %v10529_v58, %v10507_v43 }
 0x464   :  { %3230 = vmatpush1.bf16.msra.mxu0 %v2052_v0  ;;  %3216 = vmatprep.mubr.bf16.mxu1 %v13313_v21 }
 0x465   :  { %v2161_v42 = vpop.permute.xlu0 %2160  ;;  %v2043_v50 = vpop.permute.xlu1 %2042  ;;  %3231 = vmatprep.subr.bf16.mxu0 %v2167_v23 }
 0x466   :  { %v2055_v19 = vsel %vm170_vm0, %v2041_v2, %v2043_v50 }
 0x467   :  { %3335 = vmatprep.subr.bf16.mxu1 %v2055_v19 }
 0x468   :  { %3232 = vmatpush1.bf16.msra.mxu0 %v2166_v12  ;;  %3336 = vmatpush1.bf16.msra.mxu1 %v2054_v38 }
 0x469   :  { %v2277_v1 = vpop.permute.xlu0 %2276  ;;  %v2159_v10 = vpop.permute.xlu1 %2158  ;;  %3337 = vmatprep.subr.bf16.mxu1 %v2169_v17 }
 0x46a   :  { %8965 = vmatmul.mubr.msk.bf16.gmra.mrb[28].mxu1 %vm13330_vm9, %v10663_v57  ;;  %v2173_v19 = vsel %vm291_vm1, %v2157_v5, %v2159_v10  ;;  %v2286_v5 = vsel %vm412_vm2, %v10370_v14, %v10529_v58  ;;  %v2174_v20 = vsel %vm291_vm1, %v2159_v10, %v2161_v42  ;;  %v2292_v50 = vsel %vm412_vm2, %v10492_v25, %v2277_v1 }
 0x46b   :  { %3233 = vmatprep.subr.bf16.mxu0 %v2173_v19  ;;  %3365 = vmatprep.mubr.bf16.mxu1 %v10305_v24  ;;  %v2289_v24 = vsel %vm412_vm2, %v10539_v61, %v10518_v51  ;;  %v2288_v14 = vsel %vm412_vm2, %v10507_v43, %v10539_v61  ;;  %v2407_v58 = vsel %vm533_vm3, %v10549_v33, %v10531_v39 }
 0x46c   :  { %3234 = vmatpush1.bf16.msra.mxu0 %v2172_v35  ;;  %3338 = vmatpush1.bf16.msra.mxu1 %v2168_v49  ;;  %v2406_v25 = vsel %vm533_vm3, %v10379_v59, %v10549_v33  ;;  %v2409_v43 = vsel %vm533_vm3, %v10570_v26, %v10551_v27  ;;  %v2408_v59 = vsel %vm533_vm3, %v10531_v39, %v10570_v26 }
 0x46d   :  { %v2281_v6 = vpop.permute.xlu0 %2280  ;;  %v2163_v2 = vpop.permute.xlu1 %2162  ;;  %3235 = vmatprep.subr.bf16.mxu0 %v2287_v9 }
 0x46e   :  { %v2175_v0 = vsel %vm291_vm1, %v2161_v42, %v2163_v2 }
 0x46f   :  { %3339 = vmatprep.subr.bf16.mxu1 %v2175_v0 }
 0x470   :  { %3236 = vmatpush1.bf16.msra.mxu0 %v2286_v5  ;;  %3340 = vmatpush1.bf16.msra.mxu1 %v2174_v20 }
 0x471   :  { %v2397_v29 = vpop.permute.xlu0 %2396  ;;  %v2279_v30 = vpop.permute.xlu1 %2278  ;;  %3341 = vmatprep.subr.bf16.mxu1 %v2289_v24 }
 0x472   :  { %v2293_v23 = vsel %vm412_vm2, %v2277_v1, %v2279_v30  ;;  %v2294_v38 = vsel %vm412_vm2, %v2279_v30, %v2281_v6  ;;  %v2412_v10 = vsel %vm533_vm3, %v10516_v3, %v2397_v29 }
 0x473   :  { %3237 = vmatprep.subr.bf16.mxu0 %v2293_v23 }
 0x474   :  { %3238 = vmatpush1.bf16.msra.mxu0 %v2292_v50  ;;  %3342 = vmatpush1.bf16.msra.mxu1 %v2288_v14 }
 0x475   :  { %v2401_v51 = vpop.permute.xlu0 %2400  ;;  %v2283_v42 = vpop.permute.xlu1 %2282  ;;  %3239 = vmatprep.subr.bf16.mxu0 %v2407_v58 }
 0x476   :  { %v2295_v12 = vsel %vm412_vm2, %v2281_v6, %v2283_v42 }
 0x477   :  { %3343 = vmatprep.subr.bf16.mxu1 %v2295_v12 }
 0x478   :  { %3240 = vmatpush1.bf16.msra.mxu0 %v2406_v25  ;;  %3344 = vmatpush1.bf16.msra.mxu1 %v2294_v38 }
 0x479   :  { %v10709_v61 = vpop.permute.xlu0 %2790  ;;  %v2399_v17 = vpop.permute.xlu1 %2398  ;;  %3345 = vmatprep.subr.bf16.mxu1 %v2409_v43 }
 0x47a   :  { %v2413_v1 = vsel %vm533_vm3, %v2397_v29, %v2399_v17  ;;  %v2414_v35 = vsel %vm533_vm3, %v2399_v17, %v2401_v51  ;;  %v2814_v29 = vsel %vm944_vm8, %v10406_v22, %v10709_v61 }
 0x47b   :  { %3241 = vmatprep.subr.bf16.mxu0 %v2413_v1 }
 0x47c   :  { %3242 = vmatpush1.bf16.msra.mxu0 %v2412_v10  ;;  %3346 = vmatpush1.bf16.msra.mxu1 %v2408_v59 }
 0x47d   :  { %v2565_v33 = vpop.permute.xlu0 %2564  ;;  %3243 = vmatprep.subr.bf16.mxu0 %v10121_v53  ;;  %v2575_v53 = vsel %vm702_vm6, %v10583_v55, %v10579_v44 }
 0x47e   :  { %v2403_v19 = vpop.permute.xlu1 %2402 }
 0x47f   :  { %v2415_v27 = vsel %vm533_vm3, %v2401_v51, %v2403_v19 }
 0x480   :  { %3347 = vmatprep.subr.bf16.mxu1 %v2415_v27  ;;  %3244 = vmatpush1.bf16.msra.mxu0 %v10119_v31  ;;  %v2574_v31 = vsel %vm702_vm6, %v10390_v47, %v10583_v55  ;;  %v2576_v47 = vsel %vm702_vm6, %v10579_v44, %v10596_v18 }
 0x481   :  { %3348 = vmatpush1.bf16.msra.mxu1 %v2414_v35  ;;  %v2795_v49 = vpop.permute.xlu0 %2794  ;;  %3245 = vmatprep.subr.bf16.mxu0 %v10168_v37 }
 0x482   :  { %v2677_v3 = vpop.permute.xlu1 %2676  ;;  %3349 = vmatprep.subr.bf16.mxu1 %v10225_v28 }
 0x483   :  { %v2697_v44 = vsel %vm823_vm7, %v10616_v13, %v2677_v3 }
 0x484   :  { %3246 = vmatpush1.bf16.msra.mxu0 %v10166_v34  ;;  %v2577_v34 = vsel %vm702_vm6, %v10596_v18, %v10598_v52 }
 0x485   :  { %3350 = vmatpush1.bf16.msra.mxu1 %v10240_v40  ;;  %v2569_v39 = vpop.permute.xlu0 %2568  ;;  %3247 = vmatprep.subr.bf16.mxu0 %v2575_v53 }
 0x486   :  { %v2691_v26 = vpop.permute.xlu1 %2690  ;;  %3351 = vmatprep.subr.bf16.mxu1 %v10388_v63  ;;  %v2580_v63 = vsel %vm702_vm6, %v10560_v7, %v2565_v33  ;;  %v2583_v55 = vsel %vm702_vm6, %v2569_v39, %v10618_v60  ;;  %v2694_v7 = vsel %vm823_vm7, %v10398_v62, %v10600_v32  ;;  %v2696_v62 = vsel %vm823_vm7, %v10627_v16, %v10616_v13 }
 0x488   :  { %3248 = vmatpush1.bf16.msra.mxu0 %v2574_v31 }
 0x489   :  { %3352 = vmatpush1.bf16.msra.mxu1 %v10366_v11  ;;  %v2685_v37 = vpop.permute.xlu0 %2684  ;;  %v2695_v11 = vsel %vm823_vm7, %v10600_v32, %v10627_v16 }
 0x48a   :  { %v2567_v28 = vpop.permute.xlu1 %2566  ;;  %3353 = vmatprep.subr.bf16.mxu1 %v2577_v34  ;;  %v2700_v0 = vsel %vm823_vm7, %v10577_v48, %v2685_v37 }
 0x48b   :  { %v2581_v40 = vsel %vm702_vm6, %v2565_v33, %v2567_v28  ;;  %v2582_v6 = vsel %vm702_vm6, %v2567_v28, %v2569_v39 }
 0x48c   :  { %3249 = vmatprep.subr.bf16.mxu0 %v2581_v40 }
 0x48d   :  { %3250 = vmatpush1.bf16.msra.mxu0 %v2580_v63  ;;  %3354 = vmatpush1.bf16.msra.mxu1 %v2576_v47  ;;  %v2689_v52 = vpop.permute.xlu0 %2688 }
 0x48e   :  { %v2793_v9 = vpop.permute.xlu1 %2792  ;;  %3251 = vmatprep.subr.bf16.mxu0 %v2695_v11  ;;  %3355 = vmatprep.subr.bf16.mxu1 %v2583_v55  ;;  %v2703_v5 = vsel %vm823_vm7, %v2689_v52, %v2691_v26 }
 0x48f   :  { %v2815_v32 = vsel %vm944_vm8, %v10709_v61, %v2793_v9  ;;  %v2816_v14 = vsel %vm944_vm8, %v2793_v9, %v2795_v49 }
 0x491   :  { %3252 = vmatpush1.bf16.msra.mxu0 %v2694_v7  ;;  %3356 = vmatpush1.bf16.msra.mxu1 %v2582_v6  ;;  %v2805_v18 = vpop.permute.xlu0 %2804 }
 0x492   :  { %v2687_v2 = vpop.permute.xlu1 %2686  ;;  %3357 = vmatprep.subr.bf16.mxu1 %v2697_v44  ;;  %v2820_v50 = vsel %vm944_vm8, %v10589_v56, %v2805_v18 }
 0x493   :  { %v2701_v60 = vsel %vm823_vm7, %v2685_v37, %v2687_v2  ;;  %v2702_v48 = vsel %vm823_vm7, %v2687_v2, %v2689_v52 }
 0x494   :  { %3253 = vmatprep.subr.bf16.mxu0 %v2701_v60 }
 0x495   :  { %3254 = vmatpush1.bf16.msra.mxu0 %v2700_v0  ;;  %3358 = vmatpush1.bf16.msra.mxu1 %v2696_v62  ;;  %v2809_v24 = vpop.permute.xlu0 %2808 }
 0x496   :  { %v2797_v20 = vpop.permute.xlu1 %2796  ;;  %3255 = vmatprep.subr.bf16.mxu0 %v2815_v32  ;;  %3359 = vmatprep.subr.bf16.mxu1 %v2703_v5 }
 0x497   :  { %v2817_v13 = vsel %vm944_vm8, %v2795_v49, %v2797_v20  ;;  %v13335_v20 = vld [vmem:[#allocation6_spill] sm:$0xff] }
 0x499   :  { %3256 = vmatpush1.bf16.msra.mxu0 %v2814_v29  ;;  %3360 = vmatpush1.bf16.msra.mxu1 %v2702_v48  ;;  %v2911_v23 = vpop.permute.xlu0 %2910  ;;  %v13336_v48 = vld [vmem:[#allocation7_spill] sm:$0xff] }
 0x49a   :  { %v2807_v16 = vpop.permute.xlu1 %2806  ;;  %3361 = vmatprep.subr.bf16.mxu1 %v2817_v13  ;;  %v2934_v56 = vsel %vm1065_vm4, %v10414_v41, %v2911_v23 }
 0x49b   :  { %v2821_v30 = vsel %vm944_vm8, %v2805_v18, %v2807_v16  ;;  %v2822_v51 = vsel %vm944_vm8, %v2807_v16, %v2809_v24 }
 0x49c   :  { %3257 = vmatprep.subr.bf16.mxu0 %v2821_v30 }
 0x49d   :  { %3258 = vmatpush1.bf16.msra.mxu0 %v2820_v50  ;;  %3362 = vmatpush1.bf16.msra.mxu1 %v2816_v14  ;;  %v2915_v42 = vpop.permute.xlu0 %2914 }
 0x49e   :  { %v2811_v22 = vpop.permute.xlu1 %2810 }
 0x49f   :  { %v2823_v58 = vsel %vm944_vm8, %v2809_v24, %v2811_v22 }
 0x4a0   :  { %3260 = vmatmul.mubr.bf16.vlgmr.msra.gmra.mrb[16].mxu0 %v10606_v8  ;;  %3363 = vmatprep.subr.bf16.mxu1 %v2823_v58 }
 0x4a1   :  { %3364 = vmatpush1.bf16.msra.mxu1 %v2822_v51  ;;  %3269 = vmatprep.mubr.bf16.mxu0 %v10614_v54  ;;  %v2925_v61 = vpop.permute.xlu0 %2924 }
 0x4a2   :  { %v2913_v12 = vpop.permute.xlu1 %2912  ;;  %v2940_v41 = vsel %vm1065_vm4, %v10625_v4, %v2925_v61 }
 0x4a3   :  { %v2935_v25 = vsel %vm1065_vm4, %v2911_v23, %v2913_v12  ;;  %v2936_v17 = vsel %vm1065_vm4, %v2913_v12, %v2915_v42 }
 0x4a4   :  { %3280 = vmatprep.subr.bf16.mxu0 %v2935_v25  ;;  %3366 = vmatmul.mubr.bf16.vlgmr.msra.gmra.mrb[32].mxu1 %v10606_v8 }
 0x4a5   :  { %3281 = vmatpush1.bf16.msra.mxu0 %v2934_v56  ;;  %3375 = vmatprep.mubr.bf16.mxu1 %v10614_v54  ;;  %v2929_v54 = vpop.permute.xlu0 %2928 }
 0x4a6   :  { %v2917_v38 = vpop.permute.xlu1 %2916 }
 0x4a7   :  { %v2937_v43 = vsel %vm1065_vm4, %v2915_v42, %v2917_v38 }
 0x4a8   :  { %3270 = vmatmul.mubr.bf16.gmra.mrb[20].mxu0 %v10632_v15  ;;  %3386 = vmatprep.subr.bf16.mxu1 %v2937_v43 }
 0x4a9   :  { %3387 = vmatpush1.bf16.msra.mxu1 %v2936_v17  ;;  %3312 = vmatprep.mubr.bf16.mxu0 %v13313_v21 }
 0x4aa   :  { %v2927_v1 = vpop.permute.xlu1 %2926 }
 0x4ab   :  { %v2941_v8 = vsel %vm1065_vm4, %v2925_v61, %v2927_v1  ;;  %v2942_v33 = vsel %vm1065_vm4, %v2927_v1, %v2929_v54  ;;  %v13337_v61 = vld [vmem:[#allocation8_spill] sm:$0xff]  ;;  %v13338_v1 = vld [vmem:[#allocation9_spill] sm:$0xff] }
 0x4ac   :  { %3282 = vmatprep.subr.bf16.mxu0 %v2941_v8  ;;  %3376 = vmatmul.mubr.bf16.gmra.mrb[36].mxu1 %v10632_v15 }
 0x4ad   :  { %3283 = vmatpush1.bf16.msra.mxu0 %v2940_v41  ;;  %3418 = vmatprep.mubr.bf16.mxu1 %v13313_v21 }
 0x4ae   :  { %v2931_v10 = vpop.permute.xlu1 %2930 }
 0x4af   :  { %v2943_v59 = vsel %vm1065_vm4, %v2929_v54, %v2931_v10 }
 0x4b0   :  { %8966 = vmatmul.mubr.msk.bf16.vlgmr.msra.gmra.mrb[16].mxu0 %vm13331_vm10, %v10642_v36  ;;  %3388 = vmatprep.subr.bf16.mxu1 %v2943_v59 }
 0x4b1   :  { %3389 = vmatpush1.bf16.msra.mxu1 %v2942_v33  ;;  %3322 = vmatprep.mubr.bf16.mxu0 %v13313_v21 }
 0x4b4   :  { %8968 = vmatmul.mubr.msk.bf16.vlgmr.msra.gmra.mrb[32].mxu1 %vm13332_vm11, %v10642_v36 }
 0x4b5   :  { %3428 = vmatprep.mubr.bf16.mxu1 %v13313_v21 }
 0x4b8   :  { %8967 = vmatmul.mubr.msk.bf16.gmra.mrb[20].mxu0 %vm13333_vm12, %v10663_v57 }
 0x4bc   :  { %8969 = vmatmul.mubr.msk.bf16.gmra.mrb[36].mxu1 %vm13334_vm13, %v10663_v57 }
 0x535   :  { %v10801_v4 = vpop.f32.mrb[24].mxu1 }
 0x536   :  { %v3439_v15 = vmul.f32 %v10801_v4, %v9906_v45  ;;  %v10805_v19 = vpop.f32.mrb[25].mxu1 }
 0x537   :  { %v3440_v27 = vmul.f32 %v10805_v19, %v9909_v46  ;;  %v10809_v35 = vpop.f32.mrb[26].mxu1 }
 0x538   :  { %v3491_v36 = vmul.f32 %v3439_v15, %v10801_v4  ;;  %v3445_v49 = vmul.f32 %v10809_v35, %v9906_v45  ;;  %v10814_v3 = vpop.f32.mrb[27].mxu1 }
 0x539   :  { %v3463_v57 = vadd.f32 %v3440_v27, %v3439_v15  ;;  %v3492_v53 = vmul.f32 %v3440_v27, %v10805_v19  ;;  %v3446_v39 = vmul.f32 %v10814_v3, %v9909_v46 }
 0x53a   :  { %v3497_v26 = vmul.f32 %v3445_v49, %v10809_v35 }
 0x53b   :  { %v3515_v31 = vadd.f32 %v3492_v53, %v3491_v36  ;;  %v3470_v34 = vadd.f32 %v3446_v39, %v3445_v49  ;;  %v3498_v37 = vmul.f32 %v3446_v39, %v10814_v3 }
 0x53d   :  { %v3522_v28 = vadd.f32 %v3498_v37, %v3497_v26  ;;  %v10821_v40 = vpop.f32.mrb[28].mxu1 }
 0x53e   :  { %v3451_v63 = vmul.f32 %v10821_v40, %v9906_v45  ;;  %v10825_v47 = vpop.f32.mrb[29].mxu1 }
 0x53f   :  { %v3452_v11 = vmul.f32 %v10825_v47, %v9909_v46  ;;  %v10829_v55 = vpop.f32.mrb[30].mxu1 }
 0x540   :  { %v3503_v52 = vmul.f32 %v3451_v63, %v10821_v40  ;;  %v3457_v9 = vmul.f32 %v10829_v55, %v9906_v45  ;;  %v10834_v7 = vpop.f32.mrb[31].mxu1 }
 0x541   :  { %v3477_v6 = vadd.f32 %v3452_v11, %v3451_v63  ;;  %v3504_v44 = vmul.f32 %v3452_v11, %v10825_v47  ;;  %v3458_v18 = vmul.f32 %v10834_v7, %v9909_v46 }
 0x542   :  { %v3509_v2 = vmul.f32 %v3457_v9, %v10829_v55 }
 0x543   :  { %v3529_v60 = vadd.f32 %v3504_v44, %v3503_v52  ;;  %v3484_v0 = vadd.f32 %v3458_v18, %v3457_v9  ;;  %v3510_v62 = vmul.f32 %v3458_v18, %v10834_v7 }
 0x545   :  { %v10841_v32 = vadd.f32 %v3510_v62, %v3509_v2 }
 0x583   :  { %v10843_v5 = vpop.f32.mrb[16].mxu0 }
 0x584   :  { %v3441_v24 = vmul.f32 %v10843_v5, %v13335_v20  ;;  %v10847_v29 = vpop.f32.mrb[17].mxu0 }
 0x585   :  { %v3442_v13 = vmul.f32 %v10847_v29, %v13336_v48  ;;  %v10851_v16 = vpop.f32.mrb[18].mxu0 }
 0x586   :  { %v3464_v30 = vadd.f32 %v3463_v57, %v3441_v24  ;;  %v3493_v23 = vmul.f32 %v3441_v24, %v10843_v5  ;;  %v3447_v50 = vmul.f32 %v10851_v16, %v13335_v20  ;;  %v10856_v14 = vpop.f32.mrb[19].mxu0 }
 0x587   :  { %v3494_v22 = vmul.f32 %v3442_v13, %v10847_v29  ;;  %v3448_v58 = vmul.f32 %v10856_v14, %v13336_v48  ;;  %v10861_v51 = vpop.f32.mrb[32].mxu1 }
 0x588   :  { %v3516_v42 = vadd.f32 %v3515_v31, %v3493_v23  ;;  %v3465_v12 = vadd.f32 %v3464_v30, %v3442_v13  ;;  %v3471_v25 = vadd.f32 %v3470_v34, %v3447_v50  ;;  %v3499_v56 = vmul.f32 %v3447_v50, %v10851_v16  ;;  %v10864_v38 = vpop.f32.mrb[33].mxu1 }
 0x589   :  { %v3500_v43 = vmul.f32 %v3448_v58, %v10856_v14  ;;  %v3443_v17 = vmul.f32 %v10861_v51, %v13337_v61  ;;  %v3444_v8 = vmul.f32 %v10864_v38, %v13338_v1  ;;  %v10871_v41 = vpop.f32.mrb[34].mxu1 }
 0x58a   :  { %v3517_v54 = vadd.f32 %v3516_v42, %v3494_v22  ;;  %v3523_v10 = vadd.f32 %v3522_v28, %v3499_v56  ;;  %v3472_v59 = vadd.f32 %v3471_v25, %v3448_v58  ;;  %v3449_v33 = vmul.f32 %v10871_v41, %v13337_v61  ;;  %v10875_v15 = vpop.f32.mrb[35].mxu1 }
 0x58b   :  { %v3466_v27 = vadd.f32 %v3465_v12, %v3443_v17  ;;  %v3495_v36 = vmul.f32 %v3443_v17, %v10861_v51  ;;  %v3496_v49 = vmul.f32 %v3444_v8, %v10864_v38  ;;  %v3450_v57 = vmul.f32 %v10875_v15, %v13338_v1  ;;  %v10881_v53 = vpop.f32.mrb[20].mxu0 }
 0x58c   :  { %v3524_v39 = vadd.f32 %v3523_v10, %v3500_v43  ;;  %v3473_v26 = vadd.f32 %v3472_v59, %v3449_v33  ;;  %v3501_v31 = vmul.f32 %v3449_v33, %v10871_v41  ;;  %v3453_v34 = vmul.f32 %v10881_v53, %v13335_v20  ;;  %v10886_v37 = vpop.f32.mrb[21].mxu0 }
 0x58d   :  { %v3518_v28 = vadd.f32 %v3517_v54, %v3495_v36  ;;  %v3502_v63 = vmul.f32 %v3450_v57, %v10875_v15  ;;  %v3454_v11 = vmul.f32 %v10886_v37, %v13336_v48  ;;  %v10891_v52 = vpop.f32.mrb[22].mxu0  ;;  %v3467_v9 = vadd.f32 %v3466_v27, %v3444_v8 }
 0x58e   :  { %v3525_v44 = vadd.f32 %v3524_v39, %v3501_v31  ;;  %v3478_v18 = vadd.f32 %v3477_v6, %v3453_v34  ;;  %v3505_v2 = vmul.f32 %v3453_v34, %v10881_v53  ;;  %v3459_v62 = vmul.f32 %v10891_v52, %v13335_v20  ;;  %v10896_v24 = vpop.f32.mrb[23].mxu0 }
 0x58f   :  { %v3506_v13 = vmul.f32 %v3454_v11, %v10886_v37  ;;  %v3460_v30 = vmul.f32 %v10896_v24, %v13336_v48  ;;  %3468 = vadd.xlane.f32.xlu0 %v3467_v9  ;;  %v10901_v23 = vpop.f32.mrb[36].mxu1  ;;  %v3474_v50 = vadd.f32 %v3473_v26, %v3450_v57  ;;  %v3519_v22 = vadd.f32 %v3518_v28, %v3496_v49 }
 0x590   :  { %v3530_v58 = vadd.f32 %v3529_v60, %v3505_v2  ;;  %v3479_v42 = vadd.f32 %v3478_v18, %v3454_v11  ;;  %v3485_v6 = vadd.f32 %v3484_v0, %v3459_v62  ;;  %v3511_v12 = vmul.f32 %v3459_v62, %v10891_v52  ;;  %v10904_v25 = vpop.f32.mrb[37].mxu1 }
 0x591   :  { %v3512_v56 = vmul.f32 %v3460_v30, %v10896_v24  ;;  %v3455_v43 = vmul.f32 %v10901_v23, %v13337_v61  ;;  %3475 = vadd.xlane.f32.xlu1 %v3474_v50  ;;  %v3456_v17 = vmul.f32 %v10904_v25, %v13338_v1  ;;  %v10911_v8 = vpop.f32.mrb[38].mxu1  ;;  %v3526_v54 = vadd.f32 %v3525_v44, %v3502_v63 }
 0x592   :  { %v3531_v10 = vadd.f32 %v3530_v58, %v3506_v13  ;;  %v3537_v60 = vadd.f32 %v10841_v32, %v3511_v12  ;;  %v3486_v0 = vadd.f32 %v3485_v6, %v3460_v30  ;;  %v3461_v59 = vmul.f32 %v10911_v8, %v13337_v61  ;;  %v10916_v33 = vpop.f32.mrb[39].mxu1 }
 0x593   :  { %v3480_v27 = vadd.f32 %v3479_v42, %v3455_v43  ;;  %v3507_v36 = vmul.f32 %v3455_v43, %v10901_v23  ;;  %v3508_v49 = vmul.f32 %v3456_v17, %v10904_v25  ;;  %3520 = vadd.xlane.f32.xlu0 %v3519_v22  ;;  %v3462_v57 = vmul.f32 %v10916_v33, %v13338_v1 }
 0x594   :  { %v3538_v39 = vadd.f32 %v3537_v60, %v3512_v56  ;;  %v3487_v26 = vadd.f32 %v3486_v0, %v3461_v59  ;;  %v3513_v31 = vmul.f32 %v3461_v59, %v10911_v8 }
 0x595   :  { %v3532_v32 = vadd.f32 %v3531_v10, %v3507_v36  ;;  %v3514_v34 = vmul.f32 %v3462_v57, %v10916_v33  ;;  %v3481_v28 = vadd.f32 %v3480_v27, %v3456_v17 }
 0x596   :  { %v3539_v63 = vadd.f32 %v3538_v39, %v3513_v31  ;;  %v3488_v11 = vadd.f32 %v3487_v26, %v3462_v57 }
 0x597   :  { %3527 = vadd.xlane.f32.xlu0 %v3526_v54  ;;  %3482 = vadd.xlane.f32.xlu1 %v3481_v28  ;;  %v3533_v9 = vadd.f32 %v3532_v32, %v3508_v49 }
 0x598   :  { %v3540_v44 = vadd.f32 %v3539_v63, %v3514_v34  ;;  %v8970_v34 = vld [vmem:[%s13293_s2 + $0x20] sm:$0xff] }
 0x59b   :  { %3534 = vadd.xlane.f32.xlu1 %v3533_v9  ;;  %3489 = vadd.xlane.f32.xlu0 %v3488_v11  ;;  %v8974_v9 = vld [vmem:[%s13294_s3 + $0x20] sm:$0xff] }
 0x59f   :  { %3541 = vadd.xlane.f32.xlu0 %v3540_v44  ;;  %v8971_v44 = vld [vmem:[%s13293_s2 + $0x28] sm:$0xff] }
 0x61c   :  { %v3469_v18 = vpop.xlane.xlu0 %3468 }
 0x61d   :  { %v3543_v2 = vmul.f32 0.001953125, %v3469_v18 }
 0x61e   :  { %v3476_v62 = vpop.xlane.xlu1 %3475 }
 0x61f   :  { %v3551_v30 = vmul.f32 %v3543_v2, %v3543_v2  ;;  %v3544_v50 = vmul.f32 0.001953125, %v3476_v62 }
 0x620   :  { %v3521_v13 = vpop.xlane.xlu0 %3520 }
 0x621   :  { %v3547_v22 = vmul.f32 0.001953125, %v3521_v13  ;;  %v3552_v12 = vmul.f32 %v3544_v50, %v3544_v50 }
 0x623   :  { %v3555_v58 = vsub.f32 %v3547_v22, %v3551_v30  ;;  %v8975_v22 = vld [vmem:[%s13294_s3 + $0x28] sm:$0xff] }
 0x624   :  { %v3528_v42 = vpop.xlane.xlu0 %3527  ;;  %v3483_v6 = vpop.xlane.xlu1 %3482 }
 0x625   :  { %v3564_v56 = vadd.f32 1e-05, %v3555_v58  ;;  %v3548_v43 = vmul.f32 0.001953125, %v3528_v42  ;;  %v3545_v17 = vmul.f32 0.001953125, %v3483_v6  ;;  %v8972_v58 = vld [vmem:[%s13293_s2 + $0x30] sm:$0xff] }
 0x627   :  { %9192 = vrsqrt.f32 %v3564_v56  ;;  %v3556_v54 = vsub.f32 %v3548_v43, %v3552_v12  ;;  %v3553_v59 = vmul.f32 %v3545_v17, %v3545_v17  ;;  %v8973_v43 = vld [vmem:[%s13293_s2 + $0x38] sm:$0xff] }
 0x628   :  { %v3535_v10 = vpop.xlane.xlu1 %3534  ;;  %v3490_v60 = vpop.xlane.xlu0 %3489 }
 0x629   :  { %v3565_v0 = vadd.f32 1e-05, %v3556_v54  ;;  %v3549_v27 = vmul.f32 0.001953125, %v3535_v10  ;;  %v3546_v36 = vmul.f32 0.001953125, %v3490_v60 }
 0x62b   :  { %9194 = vrsqrt.f32 %v3565_v0  ;;  %v3557_v49 = vsub.f32 %v3549_v27, %v3553_v59  ;;  %v3554_v26 = vmul.f32 %v3546_v36, %v3546_v36 }
 0x62c   :  { %v3542_v57 = vpop.xlane.xlu0 %3541 }
 0x62d   :  { %v3566_v39 = vadd.f32 1e-05, %v3557_v49  ;;  %v3550_v31 = vmul.f32 0.001953125, %v3542_v57  ;;  %v13339_v49 = vmov 0.0|0.0  }
 0x62f   :  { %9196 = vrsqrt.f32 %v3566_v39  ;;  %v3558_v32 = vsub.f32 %v3550_v31, %v3554_v26 }
 0x631   :  { %v9193_v28 = vpop.eup %9192  ;;  %v3567_v63 = vadd.f32 1e-05, %v3558_v32 }
 0x632   :  { %v3572_v11 = vmul.f32 %v9193_v28, %v8970_v34 }
 0x633   :  { %9198 = vrsqrt.f32 %v3567_v63 }
 0x634   :  { %3591 = vperm.xlu1 %9147, %v3572_v11   ;;  %v3581_v18 = vmul.f32 %v3572_v11, %v3543_v2  ;;  %v8976_v2 = vld [vmem:[%s13294_s3 + $0x30] sm:$0xff] }
 0x635   :  { %v9195_v62 = vpop.eup %9194 }
 0x636   :  { %v3585_v13 = vsub.f32 %v8974_v9, %v3581_v18  ;;  %v3573_v30 = vmul.f32 %v9195_v62, %v8971_v44 }
 0x638   :  { %3635 = vperm.xlu1 %9147, %v3585_v13   ;;  %3596 = vperm.xlu0 %9148, %v3573_v30   ;;  %v3582_v42 = vmul.f32 %v3573_v30, %v3544_v50  ;;  %v8977_v50 = vld [vmem:[%s13294_s3 + $0x38] sm:$0xff] }
 0x639   :  { %v9197_v6 = vpop.eup %9196 }
 0x63a   :  { %v3586_v12 = vsub.f32 %v8975_v22, %v3582_v42  ;;  %v3574_v56 = vmul.f32 %v9197_v6, %v8972_v58 }
 0x63c   :  { %3640 = vperm.xlu1 %9147, %v3586_v12   ;;  %3601 = vperm.xlu0 %9148, %v3574_v56   ;;  %v3583_v54 = vmul.f32 %v3574_v56, %v3545_v17 }
 0x63d   :  { %v9199_v10 = vpop.eup %9198 }
 0x63e   :  { %v3587_v60 = vsub.f32 %v8976_v2, %v3583_v54  ;;  %v3575_v0 = vmul.f32 %v9199_v10, %v8973_v43 }
 0x640   :  { %3645 = vperm.xlu0 %9148, %v3587_v60   ;;  %3606 = vperm.xlu1 %9147, %v3575_v0   ;;  %v3584_v59 = vmul.f32 %v3575_v0, %v3546_v36 }
 0x642   :  { %v3588_v27 = vsub.f32 %v8977_v50, %v3584_v59 }
 0x644   :  { %3650 = vperm.xlu1 %9147, %v3588_v27   ;;  %3853 = vrot.lane.b32.xlu0 %v13339_v49, %s9217_s24 }
 0x648   :  { %3867 = vrot.lane.b32.xlu1 %v13339_v49, %s9217_s24  ;;  %3973 = vrot.lane.b32.xlu0 %v13339_v49, %s9218_s18 }
 0x64c   :  { %3987 = vrot.lane.b32.xlu1 %v13339_v49, %s9218_s18  ;;  %4093 = vrot.lane.b32.xlu0 %v13339_v49, %s9219_s19 }
 0x650   :  { %4107 = vrot.lane.b32.xlu1 %v13339_v49, %s9219_s19  ;;  %4213 = vrot.lane.b32.xlu0 %v13339_v49, %s9220_s25 }
 0x654   :  { %4227 = vrot.lane.b32.xlu1 %v13339_v49, %s9220_s25 }
 0x6b3   :  { %v3592_v17 = vpop.permute.xlu1 %3591 }
 0x6b4   :  { %v3609_v36 = vmul.f32 %v3592_v17, %v10801_v4  ;;  %v3610_v57 = vmul.f32 %v3592_v17, %v10805_v19  ;;  %v3611_v39 = vmul.f32 %v3592_v17, %v10843_v5  ;;  %v3612_v26 = vmul.f32 %v3592_v17, %v10847_v29 }
 0x6b5   :  { %v3613_v31 = vmul.f32 %v3592_v17, %v10861_v51  ;;  %v3614_v32 = vmul.f32 %v3592_v17, %v10864_v38 }
 0x6b7   :  { %v3636_v34 = vpop.permute.xlu1 %3635  ;;  %v3597_v62 = vpop.permute.xlu0 %3596 }
 0x6b8   :  { %v3653_v28 = vadd.f32 %v3636_v34, %v3609_v36  ;;  %v3654_v63 = vadd.f32 %v3636_v34, %v3610_v57  ;;  %v3655_v11 = vadd.f32 %v3636_v34, %v3611_v39  ;;  %v3656_v9 = vadd.f32 %v3636_v34, %v3612_v26 }
 0x6b9   :  { %v3657_v44 = vadd.f32 %v3636_v34, %v3613_v31  ;;  %v3658_v18 = vadd.f32 %v3636_v34, %v3614_v32  ;;  %v3615_v38 = vmul.f32 %v3597_v62, %v10809_v35  ;;  %v3616_v58 = vmul.f32 %v3597_v62, %v10814_v3 }
 0x6ba   :  { %vm3677_vm14 = vcmp.ge.f32.partialorder %v3653_v28, 0.0  ;;  %vm3678_vm15 = vcmp.ge.f32.partialorder %v3654_v63, 0.0  ;;  %vm3679_vm5 = vcmp.ge.f32.partialorder %v3655_v11, 0.0  ;;  %vm3680_vm9 = vcmp.ge.f32.partialorder %v3656_v9, 0.0 }
 0x6bb   :  { %vm3681_vm10 = vcmp.ge.f32.partialorder %v3657_v44, 0.0  ;;  %vm3682_vm11 = vcmp.ge.f32.partialorder %v3658_v18, 0.0  ;;  %v3701_v4 = vmul.f32 0.2, %v3653_v28  ;;  %v3702_v19 = vmul.f32 0.2, %v3654_v63  ;;  %v3641_v2 = vpop.permute.xlu1 %3640  ;;  %v3602_v26 = vpop.permute.xlu0 %3601 }
 0x6bc   :  { %v3703_v5 = vmul.f32 0.2, %v3655_v11  ;;  %v3704_v29 = vmul.f32 0.2, %v3656_v9  ;;  %v3705_v51 = vmul.f32 0.2, %v3657_v44  ;;  %v3617_v12 = vmul.f32 %v3597_v62, %v10851_v16 }
 0x6bd   :  { %v3706_v13 = vmul.f32 0.2, %v3658_v18  ;;  %v3725_v30 = vsel %vm3677_vm14, %v3653_v28, %v3701_v4  ;;  %v3726_v22 = vsel %vm3678_vm15, %v3654_v63, %v3702_v19  ;;  %v3618_v56 = vmul.f32 %v3597_v62, %v10856_v14 }
 0x6be   :  { %v3727_v42 = vsel %vm3679_vm5, %v3655_v11, %v3703_v5  ;;  %v3728_v6 = vsel %vm3680_vm9, %v3656_v9, %v3704_v29  ;;  %v3729_v43 = vsel %vm3681_vm10, %v3657_v44, %v3705_v51  ;;  %v3749_v10 = vmul.f32 %v3725_v30, %v9906_v45 }
 0x6bf   :  { %v3730_v54 = vsel %vm3682_vm11, %v3658_v18, %v3706_v13  ;;  %v3750_v35 = vmul.f32 %v3726_v22, %v9909_v46  ;;  %v3751_v60 = vmul.f32 %v3727_v42, %v13335_v20  ;;  %v3752_v0 = vmul.f32 %v3728_v6, %v13336_v48  ;;  %v3607_v63 = vpop.permute.xlu1 %3606 }
 0x6c0   :  { %v3619_v3 = vmul.f32 %v3597_v62, %v10871_v41  ;;  %v3620_v50 = vmul.f32 %v3597_v62, %v10875_v15  ;;  %v3659_v16 = vadd.f32 %v3641_v2, %v3615_v38  ;;  %v3660_v59 = vadd.f32 %v3641_v2, %v3616_v58 }
 0x6c1   :  { %v3661_v14 = vadd.f32 %v3641_v2, %v3617_v12  ;;  %v3662_v27 = vadd.f32 %v3641_v2, %v3618_v56  ;;  %v3753_v17 = vmul.f32 %v3729_v43, %v13337_v61  ;;  %v3754_v36 = vmul.f32 %v3730_v54, %v13338_v1  ;;  %v3646_v56 = vpop.permute.xlu0 %3645 }
 0x6c2   :  { %v3663_v57 = vadd.f32 %v3641_v2, %v3619_v3  ;;  %v3664_v39 = vadd.f32 %v3641_v2, %v3620_v50  ;;  %vm3683_vm12 = vcmp.ge.f32.partialorder %v3659_v16, 0.0  ;;  %vm3684_vm13 = vcmp.ge.f32.partialorder %v3660_v59, 0.0 }
 0x6c3   :  { %vm3685_vm14 = vcmp.ge.f32.partialorder %v3661_v14, 0.0  ;;  %vm3686_vm15 = vcmp.ge.f32.partialorder %v3662_v27, 0.0  ;;  %v3707_v41 = vmul.f32 0.2, %v3659_v16  ;;  %v3708_v31 = vmul.f32 0.2, %v3660_v59  ;;  %v3651_v3 = vpop.permute.xlu1 %3650 }
 0x6c4   :  { %vm3687_vm5 = vcmp.ge.f32.partialorder %v3663_v57, 0.0  ;;  %vm3688_vm9 = vcmp.ge.f32.partialorder %v3664_v39, 0.0  ;;  %v3709_v15 = vmul.f32 0.2, %v3661_v14  ;;  %v3710_v32 = vmul.f32 0.2, %v3662_v27 }
 0x6c5   :  { %v3711_v34 = vmul.f32 0.2, %v3663_v57  ;;  %v3621_v28 = vmul.f32 %v3602_v26, %v10821_v40  ;;  %v3712_v11 = vmul.f32 0.2, %v3664_v39  ;;  %v3731_v9 = vsel %vm3683_vm12, %v3659_v16, %v3707_v41 }
 0x6c6   :  { %v3732_v44 = vsel %vm3684_vm13, %v3660_v59, %v3708_v31  ;;  %v3622_v18 = vmul.f32 %v3602_v26, %v10825_v47  ;;  %v3733_v62 = vsel %vm3685_vm14, %v3661_v14, %v3709_v15  ;;  %v3734_v4 = vsel %vm3686_vm15, %v3662_v27, %v3710_v32 }
 0x6c7   :  { %v3735_v19 = vsel %vm3687_vm5, %v3663_v57, %v3711_v34  ;;  %v3755_v5 = vmul.f32 %v3731_v9, %v9906_v45  ;;  %v3736_v29 = vsel %vm3688_vm9, %v3664_v39, %v3712_v11  ;;  %v3756_v51 = vmul.f32 %v3732_v44, %v9909_v46 }
 0x6c8   :  { %v3757_v38 = vmul.f32 %v3733_v62, %v13335_v20  ;;  %v3758_v13 = vmul.f32 %v3734_v4, %v13336_v48  ;;  %v3759_v40 = vmul.f32 %v3735_v19, %v13337_v61  ;;  %v3760_v30 = vmul.f32 %v3736_v29, %v13338_v1 }
 0x6c9   :  { %v10993_v22 = vpack.c.bf16 %v3755_v5, %v3749_v10  ;;  %v3623_v47 = vmul.f32 %v3602_v26, %v10881_v53  ;;  %v10996_v58 = vpack.c.bf16 %v3756_v51, %v3750_v35  ;;  %v3624_v12 = vmul.f32 %v3602_v26, %v10886_v37 }
 0x6ca   :  { %v10998_v42 = vpack.c.bf16 %v3757_v38, %v3751_v60  ;;  %v11000_v6 = vpack.c.bf16 %v3758_v13, %v3752_v0  ;;  %v11003_v2 = vpack.c.bf16 %v3759_v40, %v3753_v17  ;;  %v11005_v43 = vpack.c.bf16 %v3760_v30, %v3754_v36 }
 0x6cb   :  { %v3625_v54 = vmul.f32 %v3602_v26, %v10901_v23  ;;  %v3626_v10 = vmul.f32 %v3602_v26, %v10904_v25  ;;  %3855 = vrot.lane.b32.xlu0 %v10993_v22, %s9217_s24  ;;  %v3627_v53 = vmul.f32 %v3607_v63, %v10829_v55  ;;  %v3628_v35 = vmul.f32 %v3607_v63, %v10834_v7 }
 0x6cc   :  { %v3629_v60 = vmul.f32 %v3607_v63, %v10891_v52  ;;  %v3630_v37 = vmul.f32 %v3607_v63, %v10896_v24  ;;  %3857 = vrot.lane.b32.xlu1 %v10996_v58, %s9217_s24  ;;  %v3665_v0 = vadd.f32 %v3646_v56, %v3621_v28  ;;  %v3666_v50 = vadd.f32 %v3646_v56, %v3622_v18 }
 0x6cd   :  { %v3667_v23 = vadd.f32 %v3646_v56, %v3623_v47  ;;  %v3668_v16 = vadd.f32 %v3646_v56, %v3624_v12  ;;  %v3669_v25 = vadd.f32 %v3646_v56, %v3625_v54  ;;  %v3670_v59 = vadd.f32 %v3646_v56, %v3626_v10 }
 0x6ce   :  { %v3671_v14 = vadd.f32 %v3651_v3, %v3627_v53  ;;  %v3672_v27 = vadd.f32 %v3651_v3, %v3628_v35  ;;  %vm3689_vm10 = vcmp.ge.f32.partialorder %v3665_v0, 0.0  ;;  %vm3690_vm11 = vcmp.ge.f32.partialorder %v3666_v50, 0.0 }
 0x6cf   :  { %vm3691_vm12 = vcmp.ge.f32.partialorder %v3667_v23, 0.0  ;;  %vm3692_vm13 = vcmp.ge.f32.partialorder %v3668_v16, 0.0  ;;  %3975 = vrot.lane.b32.xlu0 %v10993_v22, %s9218_s18  ;;  %vm3693_vm14 = vcmp.ge.f32.partialorder %v3669_v25, 0.0  ;;  %vm3694_vm15 = vcmp.ge.f32.partialorder %v3670_v59, 0.0 }
 0x6d0   :  { %v3713_v55 = vmul.f32 0.2, %v3665_v0  ;;  %v3714_v7 = vmul.f32 0.2, %v3666_v50  ;;  %3977 = vrot.lane.b32.xlu1 %v10996_v58, %s9218_s18  ;;  %v3715_v52 = vmul.f32 0.2, %v3667_v23  ;;  %v3673_v36 = vadd.f32 %v3651_v3, %v3629_v60 }
 0x6d1   :  { %v3716_v24 = vmul.f32 0.2, %v3668_v16  ;;  %v3717_v17 = vmul.f32 0.2, %v3669_v25  ;;  %v3718_v57 = vmul.f32 0.2, %v3670_v59  ;;  %v3674_v41 = vadd.f32 %v3651_v3, %v3630_v37 }
 0x6d2   :  { %v3737_v39 = vsel %vm3689_vm10, %v3665_v0, %v3713_v55  ;;  %v3738_v26 = vsel %vm3690_vm11, %v3666_v50, %v3714_v7  ;;  %v3631_v31 = vmul.f32 %v3607_v63, %v10911_v8  ;;  %v3632_v15 = vmul.f32 %v3607_v63, %v10916_v33 }
 0x6d3   :  { %v3739_v32 = vsel %vm3691_vm12, %v3667_v23, %v3715_v52  ;;  %4095 = vrot.lane.b32.xlu0 %v10993_v22, %s9219_s19  ;;  %v3740_v34 = vsel %vm3692_vm13, %v3668_v16, %v3716_v24  ;;  %v3741_v28 = vsel %vm3693_vm14, %v3669_v25, %v3717_v17  ;;  %v3742_v11 = vsel %vm3694_vm15, %v3670_v59, %v3718_v57  ;;  %v11158_v52 = vld [vmem:[%s13291_s1 + $0x64] ss:$12 sps:$4 sm:$0xff]  }
 0x6d4   :  { %v3761_v9 = vmul.f32 %v3737_v39, %v9906_v45  ;;  %4097 = vrot.lane.b32.xlu1 %v10996_v58, %s9219_s19  ;;  %v3762_v8 = vmul.f32 %v3738_v26, %v9909_v46  ;;  %v3763_v33 = vmul.f32 %v3739_v32, %v13335_v20  ;;  %v3675_v63 = vadd.f32 %v3651_v3, %v3631_v31 }
 0x6d5   :  { %v3676_v44 = vadd.f32 %v3651_v3, %v3632_v15  ;;  %vm3695_vm5 = vcmp.ge.f32.partialorder %v3671_v14, 0.0  ;;  %vm3696_vm9 = vcmp.ge.f32.partialorder %v3672_v27, 0.0  ;;  %vm3697_vm10 = vcmp.ge.f32.partialorder %v3673_v36, 0.0  ;;  %4990 = vmatprep.mubr.bf16.mxu0 %v11158_v52  ;;  %5096 = vmatprep.mubr.bf16.mxu1 %v11158_v52 }
 0x6d6   :  { %vm3698_vm11 = vcmp.ge.f32.partialorder %v3674_v41, 0.0  ;;  %vm3699_vm12 = vcmp.ge.f32.partialorder %v3675_v63, 0.0  ;;  %v3719_v18 = vmul.f32 0.2, %v3671_v14  ;;  %v3720_v62 = vmul.f32 0.2, %v3672_v27 }
 0x6d7   :  { %vm3700_vm13 = vcmp.ge.f32.partialorder %v3676_v44, 0.0  ;;  %4215 = vrot.lane.b32.xlu0 %v10993_v22, %s9220_s25  ;;  %v3764_v4 = vmul.f32 %v3740_v34, %v13336_v48  ;;  %v3721_v19 = vmul.f32 0.2, %v3673_v36  ;;  %v3722_v5 = vmul.f32 0.2, %v3674_v41 }
 0x6d8   :  { %v3723_v29 = vmul.f32 0.2, %v3675_v63  ;;  %4217 = vrot.lane.b32.xlu1 %v10996_v58, %s9220_s25  ;;  %v3765_v51 = vmul.f32 %v3741_v28, %v13337_v61  ;;  %v3724_v38 = vmul.f32 0.2, %v3676_v44  ;;  %v3743_v13 = vsel %vm3695_vm5, %v3671_v14, %v3719_v18  ;;  %v3854_v14 = vpop.permute.xlu0 %3853 }
 0x6d9   :  { %v3744_v40 = vsel %vm3696_vm9, %v3672_v27, %v3720_v62  ;;  %v3745_v30 = vsel %vm3697_vm10, %v3673_v36, %v3721_v19  ;;  %v3746_v47 = vsel %vm3698_vm11, %v3674_v41, %v3722_v5  ;;  %v3767_v56 = vmul.f32 %v3743_v13, %v9906_v45  ;;  %v11141_v27 = vpop.permute.xlu1 %3867 }
 0x6da   :  { %v3747_v12 = vsel %vm3699_vm12, %v3675_v63, %v3723_v29  ;;  %v3748_v54 = vsel %vm3700_vm13, %v3676_v44, %v3724_v38  ;;  %v3768_v10 = vmul.f32 %v3744_v40, %v9909_v46  ;;  %v3769_v3 = vmul.f32 %v3745_v30, %v13335_v20 }
 0x6db   :  { %v3770_v53 = vmul.f32 %v3746_v47, %v13336_v48  ;;  %4383 = vrot.lane.b32.xlu0 %v10996_v58, %s9223_s16  ;;  %v3766_v35 = vmul.f32 %v3742_v11, %v13338_v1  ;;  %v3771_v60 = vmul.f32 %v3747_v12, %v13337_v61  ;;  %v3772_v37 = vmul.f32 %v3748_v54, %v13338_v1 }
 0x6dc   :  { %v11055_v0 = vpack.c.bf16 %v3767_v56, %v3761_v9  ;;  %4385 = vrot.lane.b32.xlu1 %v10998_v42, %s9223_s16  ;;  %v11059_v50 = vpack.c.bf16 %v3768_v10, %v3762_v8  ;;  %v11061_v23 = vpack.c.bf16 %v3769_v3, %v3763_v33  ;;  %v11149_v55 = vpop.permute.xlu0 %3973  ;;  %vm13340_vm14 = vcmask 261120  }
 0x6dd   :  { %v11063_v16 = vpack.c.bf16 %v3770_v53, %v3764_v4  ;;  %v11065_v25 = vpack.c.bf16 %v3771_v60, %v3765_v51  ;;  %v11067_v59 = vpack.c.bf16 %v3772_v37, %v3766_v35  ;;  %v11153_v7 = vpop.permute.xlu1 %3987  ;;  %vm13342_vm15 = vmmov %vm13340_vm14 }
 0x6de   :  { %vm13343_vm5 = vmmov %vm13340_vm14 }
 0x6df   :  { %4381 = vrot.lane.b32.xlu0 %v10993_v22, %s9223_s16  ;;  %vm13344_vm9 = vmmov %vm13343_vm5 }
 0x6e0   :  { %4505 = vrot.lane.b32.xlu1 %v10998_v42, %s9224_s17  ;;  %v11165_v24 = vpop.permute.xlu0 %4093  ;;  %vm13345_vm10 = vmmov %vm13343_vm5 }
 0x6e1   :  { %v11168_v17 = vpop.permute.xlu1 %4107  ;;  %vm13346_vm11 = vmmov %vm13343_vm5 }
 0x6e3   :  { %4503 = vrot.lane.b32.xlu0 %v10996_v58, %s9224_s17 }
 0x6e4   :  { %4625 = vrot.lane.b32.xlu1 %v10998_v42, %s9225_s20  ;;  %v11176_v36 = vpop.permute.xlu0 %4213 }
 0x6e5   :  { %v11180_v57 = vpop.permute.xlu1 %4227 }
 0x6e7   :  { %4501 = vrot.lane.b32.xlu0 %v10993_v22, %s9224_s17 }
 0x6e8   :  { %4745 = vrot.lane.b32.xlu1 %v10998_v42, %s9221_s26 }
 0x6eb   :  { %4623 = vrot.lane.b32.xlu0 %v10996_v58, %s9225_s20 }
 0x6ec   :  { %3859 = vrot.lane.b32.xlu1 %v10998_v42, %s9217_s24 }
 0x6ef   :  { %4621 = vrot.lane.b32.xlu0 %v10993_v22, %s9225_s20 }
 0x6f0   :  { %3869 = vrot.lane.b32.xlu1 %v11055_v0, %s9217_s24 }
 0x6f3   :  { %4743 = vrot.lane.b32.xlu0 %v10996_v58, %s9221_s26 }
 0x6f4   :  { %3865 = vrot.lane.b32.xlu1 %v11005_v43, %s9217_s24 }
 0x6f7   :  { %4741 = vrot.lane.b32.xlu0 %v10993_v22, %s9221_s26 }
 0x6f8   :  { %3989 = vrot.lane.b32.xlu1 %v11055_v0, %s9218_s18 }
 0x6fb   :  { %3861 = vrot.lane.b32.xlu0 %v11000_v6, %s9217_s24 }
 0x6fc   :  { %3981 = vrot.lane.b32.xlu1 %v11000_v6, %s9218_s18 }
 0x6ff   :  { %3871 = vrot.lane.b32.xlu0 %v11059_v50, %s9217_s24 }
 0x700   :  { %4109 = vrot.lane.b32.xlu1 %v11055_v0, %s9219_s19 }
 0x703   :  { %3863 = vrot.lane.b32.xlu0 %v11003_v2, %s9217_s24 }
 0x704   :  { %3985 = vrot.lane.b32.xlu1 %v11005_v43, %s9218_s18 }
 0x707   :  { %3991 = vrot.lane.b32.xlu0 %v11059_v50, %s9218_s18 }
 0x708   :  { %4229 = vrot.lane.b32.xlu1 %v11055_v0, %s9220_s25 }
 0x70b   :  { %3979 = vrot.lane.b32.xlu0 %v10998_v42, %s9218_s18 }
 0x70c   :  { %4101 = vrot.lane.b32.xlu1 %v11000_v6, %s9219_s19 }
 0x70f   :  { %4111 = vrot.lane.b32.xlu0 %v11059_v50, %s9219_s19 }
 0x710   :  { %4105 = vrot.lane.b32.xlu1 %v11005_v43, %s9219_s19 }
 0x713   :  { %3983 = vrot.lane.b32.xlu0 %v11003_v2, %s9218_s18 }
 0x714   :  { %4221 = vrot.lane.b32.xlu1 %v11000_v6, %s9220_s25 }
 0x717   :  { %4231 = vrot.lane.b32.xlu0 %v11059_v50, %s9220_s25 }
 0x718   :  { %4397 = vrot.lane.b32.xlu1 %v11059_v50, %s9223_s16 }
 0x71b   :  { %4099 = vrot.lane.b32.xlu0 %v10998_v42, %s9219_s19 }
 0x71c   :  { %4225 = vrot.lane.b32.xlu1 %v11005_v43, %s9220_s25 }
 0x71f   :  { %4103 = vrot.lane.b32.xlu0 %v11003_v2, %s9219_s19 }
 0x720   :  { %4395 = vrot.lane.b32.xlu1 %v11055_v0, %s9223_s16 }
 0x723   :  { %4219 = vrot.lane.b32.xlu0 %v10998_v42, %s9220_s25 }
 0x724   :  { %4517 = vrot.lane.b32.xlu1 %v11059_v50, %s9224_s17 }
 0x727   :  { %4399 = vrot.lane.b32.xlu0 %v11061_v23, %s9223_s16 }
 0x728   :  { %4389 = vrot.lane.b32.xlu1 %v11003_v2, %s9223_s16 }
 0x72b   :  { %4223 = vrot.lane.b32.xlu0 %v11003_v2, %s9220_s25 }
 0x72c   :  { %4515 = vrot.lane.b32.xlu1 %v11055_v0, %s9224_s17 }
 0x72f   :  { %4519 = vrot.lane.b32.xlu0 %v11061_v23, %s9224_s17 }
 0x730   :  { %4637 = vrot.lane.b32.xlu1 %v11059_v50, %s9225_s20 }
 0x733   :  { %4387 = vrot.lane.b32.xlu0 %v11000_v6, %s9223_s16 }
 0x734   :  { %4393 = vrot.lane.b32.xlu1 %v13339_v49, %s9223_s16 }
 0x737   :  { %4639 = vrot.lane.b32.xlu0 %v11061_v23, %s9225_s20 }
 0x738   :  { %4635 = vrot.lane.b32.xlu1 %v11055_v0, %s9225_s20 }
 0x73b   :  { %4391 = vrot.lane.b32.xlu0 %v11005_v43, %s9223_s16 }
 0x73c   :  { %4407 = vrot.lane.b32.xlu1 %v13339_v49, %s9223_s16 }
 0x73d   :  { %v3856_v39 = vpop.permute.xlu0 %3855 }
 0x73e   :  { %v3858_v26 = vpop.permute.xlu1 %3857  ;;  %v3881_v41 = vsel %vm170_vm0, %v3854_v14, %v3856_v39 }
 0x73f   :  { %4507 = vrot.lane.b32.xlu0 %v11000_v6, %s9224_s17  ;;  %v3882_v31 = vsel %vm170_vm0, %v3856_v39, %v3858_v26 }
 0x740   :  { %4509 = vrot.lane.b32.xlu1 %v11003_v2, %s9224_s17  ;;  %4958 = vmatprep.subr.bf16.mxu0 %v3882_v31 }
 0x741   :  { %4959 = vmatpush1.bf16.msra.mxu0 %v3881_v41  ;;  %v11192_v15 = vpop.permute.xlu0 %3975 }
 0x742   :  { %v11194_v32 = vpop.permute.xlu1 %3977 }
 0x743   :  { %4511 = vrot.lane.b32.xlu0 %v11005_v43, %s9224_s17  ;;  %v4002_v37 = vsel %vm291_vm1, %v11192_v15, %v11194_v32 }
 0x744   :  { %4757 = vrot.lane.b32.xlu1 %v11059_v50, %s9221_s26 }
 0x745   :  { %v11200_v34 = vpop.permute.xlu0 %4095 }
 0x746   :  { %v11202_v28 = vpop.permute.xlu1 %4097 }
 0x747   :  { %4759 = vrot.lane.b32.xlu0 %v11061_v23, %s9221_s26 }
 0x748   :  { %4755 = vrot.lane.b32.xlu1 %v11055_v0, %s9221_s26 }
 0x749   :  { %v11208_v11 = vpop.permute.xlu0 %4215 }
 0x74a   :  { %v11210_v9 = vpop.permute.xlu1 %4217 }
 0x74b   :  { %3873 = vrot.lane.b32.xlu0 %v11061_v23, %s9217_s24 }
 0x74c   :  { %3875 = vrot.lane.b32.xlu1 %v11063_v16, %s9217_s24 }
 0x74d   :  { %v11216_v8 = vpop.permute.xlu0 %4383 }
 0x74e   :  { %v11218_v33 = vpop.permute.xlu1 %4385 }
 0x74f   :  { %3877 = vrot.lane.b32.xlu0 %v11065_v25, %s9217_s24 }
 0x750   :  { %3879 = vrot.lane.b32.xlu1 %v11067_v59, %s9217_s24 }
 0x751   :  { %v11224_v63 = vpop.permute.xlu0 %4381 }
 0x752   :  { %v11226_v44 = vpop.permute.xlu1 %4505 }
 0x753   :  { %3993 = vrot.lane.b32.xlu0 %v11061_v23, %s9218_s18 }
 0x754   :  { %3995 = vrot.lane.b32.xlu1 %v11063_v16, %s9218_s18 }
 0x755   :  { %v11232_v18 = vpop.permute.xlu0 %4503 }
 0x756   :  { %v11234_v62 = vpop.permute.xlu1 %4625 }
 0x757   :  { %3997 = vrot.lane.b32.xlu0 %v11065_v25, %s9218_s18 }
 0x758   :  { %3999 = vrot.lane.b32.xlu1 %v11067_v59, %s9218_s18 }
 0x759   :  { %v11240_v4 = vpop.permute.xlu0 %4501 }
 0x75a   :  { %v11242_v19 = vpop.permute.xlu1 %4745 }
 0x75b   :  { %4113 = vrot.lane.b32.xlu0 %v11061_v23, %s9219_s19 }
 0x75c   :  { %4115 = vrot.lane.b32.xlu1 %v11063_v16, %s9219_s19 }
 0x75d   :  { %v11248_v5 = vpop.permute.xlu0 %4623 }
 0x75e   :  { %v3860_v29 = vpop.permute.xlu1 %3859 }
 0x75f   :  { %4117 = vrot.lane.b32.xlu0 %v11065_v25, %s9219_s19  ;;  %v3883_v10 = vsel %vm170_vm0, %v3858_v26, %v3860_v29 }
 0x760   :  { %4119 = vrot.lane.b32.xlu1 %v11067_v59, %s9219_s19 }
 0x761   :  { %v11254_v51 = vpop.permute.xlu0 %4621 }
 0x762   :  { %v3870_v38 = vpop.permute.xlu1 %3869 }
 0x763   :  { %4233 = vrot.lane.b32.xlu0 %v11061_v23, %s9220_s25  ;;  %v3887_v60 = vsel %vm170_vm0, %v11141_v27, %v3870_v38  ;;  %v4001_v27 = vsel %vm291_vm1, %v11149_v55, %v11192_v15  ;;  %v4122_v55 = vsel %vm412_vm2, %v11200_v34, %v11202_v28 }
 0x764   :  { %4235 = vrot.lane.b32.xlu1 %v11063_v16, %s9220_s25 }
 0x765   :  { %v11260_v13 = vpop.permute.xlu0 %4743 }
 0x766   :  { %v11262_v40 = vpop.permute.xlu1 %3865 }
 0x767   :  { %4237 = vrot.lane.b32.xlu0 %v11065_v25, %s9220_s25 }
 0x768   :  { %4239 = vrot.lane.b32.xlu1 %v11067_v59, %s9220_s25 }
 0x769   :  { %v11268_v30 = vpop.permute.xlu0 %4741 }
 0x76a   :  { %v3990_v47 = vpop.permute.xlu1 %3989 }
 0x76b   :  { %4627 = vrot.lane.b32.xlu0 %v11000_v6, %s9225_s20 }
 0x76c   :  { %4513 = vrot.lane.b32.xlu1 %v13339_v49, %s9224_s17 }
 0x76d   :  { %v11274_v12 = vpop.permute.xlu0 %3861 }
 0x76e   :  { %v11276_v56 = vpop.permute.xlu1 %3981  ;;  %v3884_v54 = vsel %vm170_vm0, %v3860_v29, %v11274_v12  ;;  %v4007_v29 = vsel %vm291_vm1, %v11153_v7, %v3990_v47  ;;  %v4121_v7 = vsel %vm412_vm2, %v11165_v24, %v11200_v34  ;;  %v4242_v24 = vsel %vm533_vm3, %v11208_v11, %v11210_v9 }
 0x76f   :  { %4401 = vrot.lane.b32.xlu0 %v11063_v16, %s9223_s16  ;;  %5064 = vmatprep.subr.bf16.mxu1 %v3884_v54 }
 0x770   :  { %4527 = vrot.lane.b32.xlu1 %v13339_v49, %s9224_s17  ;;  %5065 = vmatpush1.bf16.msra.mxu1 %v3883_v10 }
 0x771   :  { %v11285_v3 = vpop.permute.xlu0 %3871 }
 0x772   :  { %v4110_v53 = vpop.permute.xlu1 %4109  ;;  %v3888_v35 = vsel %vm170_vm0, %v3870_v38, %v11285_v3 }
 0x773   :  { %4631 = vrot.lane.b32.xlu0 %v11005_v43, %s9225_s20  ;;  %4960 = vmatprep.subr.bf16.mxu0 %v3888_v35  ;;  %v4127_v35 = vsel %vm412_vm2, %v11168_v17, %v4110_v53  ;;  %v4241_v17 = vsel %vm533_vm3, %v11176_v36, %v11208_v11 }
 0x774   :  { %4403 = vrot.lane.b32.xlu1 %v11065_v25, %s9223_s16  ;;  %4961 = vmatpush1.bf16.msra.mxu0 %v3887_v60 }
 0x775   :  { %4962 = vmatprep.subr.bf16.mxu0 %v4002_v37  ;;  %v11298_v14 = vpop.permute.xlu0 %3863 }
 0x776   :  { %v11300_v39 = vpop.permute.xlu1 %3985 }
 0x777   :  { %4405 = vrot.lane.b32.xlu0 %v11067_v59, %s9223_s16 }
 0x778   :  { %4629 = vrot.lane.b32.xlu1 %v11003_v2, %s9225_s20  ;;  %4963 = vmatpush1.bf16.msra.mxu0 %v4001_v27 }
 0x779   :  { %v11309_v26 = vpop.permute.xlu0 %3991 }
 0x77a   :  { %v4230_v41 = vpop.permute.xlu1 %4229  ;;  %v4008_v31 = vsel %vm291_vm1, %v3990_v47, %v11309_v26 }
 0x77b   :  { %4521 = vrot.lane.b32.xlu0 %v11063_v16, %s9224_s17  ;;  %4964 = vmatprep.subr.bf16.mxu0 %v4008_v31  ;;  %v4247_v31 = vsel %vm533_vm3, %v11180_v57, %v4230_v41 }
 0x77c   :  { %4523 = vrot.lane.b32.xlu1 %v11065_v25, %s9224_s17  ;;  %4965 = vmatpush1.bf16.msra.mxu0 %v4007_v29 }
 0x77d   :  { %4966 = vmatprep.subr.bf16.mxu0 %v4122_v55  ;;  %v11322_v15 = vpop.permute.xlu0 %3979 }
 0x77e   :  { %v11324_v38 = vpop.permute.xlu1 %4101 }
 0x77f   :  { %4525 = vrot.lane.b32.xlu0 %v11067_v59, %s9224_s17 }
 0x780   :  { %4633 = vrot.lane.b32.xlu1 %v13339_v49, %s9225_s20  ;;  %4967 = vmatpush1.bf16.msra.mxu0 %v4121_v7 }
 0x781   :  { %v11333_v47 = vpop.permute.xlu0 %4111 }
 0x782   :  { %v11335_v54 = vpop.permute.xlu1 %4105  ;;  %v4128_v10 = vsel %vm412_vm2, %v4110_v53, %v11333_v47 }
 0x783   :  { %4641 = vrot.lane.b32.xlu0 %v11063_v16, %s9225_s20  ;;  %4968 = vmatprep.subr.bf16.mxu0 %v4128_v10 }
 0x784   :  { %4643 = vrot.lane.b32.xlu1 %v11065_v25, %s9225_s20  ;;  %4969 = vmatpush1.bf16.msra.mxu0 %v4127_v35 }
 0x785   :  { %4970 = vmatprep.subr.bf16.mxu0 %v4242_v24  ;;  %v11348_v34 = vpop.permute.xlu0 %3983  ;;  %v4529_v24 = vsel %vm823_vm7, %v11240_v4, %v11232_v18 }
 0x786   :  { %v11350_v60 = vpop.permute.xlu1 %4221 }
 0x787   :  { %4645 = vrot.lane.b32.xlu0 %v11067_v59, %s9225_s20 }
 0x788   :  { %4647 = vrot.lane.b32.xlu1 %v13339_v49, %s9225_s20  ;;  %4971 = vmatpush1.bf16.msra.mxu0 %v4241_v17 }
 0x789   :  { %v11359_v53 = vpop.permute.xlu0 %4231 }
 0x78a   :  { %v4398_v37 = vpop.permute.xlu1 %4397  ;;  %v4248_v27 = vsel %vm533_vm3, %v4230_v41, %v11359_v53 }
 0x78b   :  { %4747 = vrot.lane.b32.xlu0 %v11000_v6, %s9221_s26  ;;  %4972 = vmatprep.subr.bf16.mxu0 %v4248_v27 }
 0x78c   :  { %4749 = vrot.lane.b32.xlu1 %v11003_v2, %s9221_s26  ;;  %4973 = vmatpush1.bf16.msra.mxu0 %v4247_v31 }
 0x78d   :  { %4974 = vmatprep.subr.bf16.mxu0 %v10996_v58  ;;  %v11370_v36 = vpop.permute.xlu0 %4099  ;;  %v4410_v58 = vsel %vm702_vm6, %v11216_v8, %v11218_v33 }
 0x78e   :  { %v11372_v11 = vpop.permute.xlu1 %4225 }
 0x78f   :  { %4751 = vrot.lane.b32.xlu0 %v11005_v43, %s9221_s26 }
 0x790   :  { %4753 = vrot.lane.b32.xlu1 %v13339_v49, %s9221_s26  ;;  %4975 = vmatpush1.bf16.msra.mxu0 %v10993_v22 }
 0x791   :  { %4976 = vmatprep.subr.bf16.mxu0 %v11059_v50  ;;  %v11380_v57 = vpop.permute.xlu0 %4103  ;;  %v4409_v50 = vsel %vm702_vm6, %v11224_v63, %v11216_v8  ;;  %v4530_v8 = vsel %vm823_vm7, %v11232_v18, %v11226_v44  ;;  %v4649_v18 = vsel %vm944_vm8, %v11254_v51, %v11248_v5  ;;  %v11445_v51 = vld [vmem:[%s13291_s1 + $0x7c] ss:$12 sps:$4 sm:$0xff]  }
 0x792   :  { %v4396_v41 = vpop.permute.xlu1 %4395 }
 0x793   :  { %4761 = vrot.lane.b32.xlu0 %v11063_v16, %s9221_s26  ;;  %v4415_v10 = vsel %vm702_vm6, %v4396_v41, %v4398_v37  ;;  %v4650_v41 = vsel %vm944_vm8, %v11248_v5, %v11234_v62  ;;  %v4770_v5 = vsel %vm1065_vm4, %v11260_v13, %v11242_v19 }
 0x794   :  { %4763 = vrot.lane.b32.xlu1 %v11065_v25, %s9221_s26  ;;  %4977 = vmatpush1.bf16.msra.mxu0 %v11055_v0 }
 0x795   :  { %4978 = vmatprep.subr.bf16.mxu0 %v4410_v58  ;;  %v11390_v29 = vpop.permute.xlu0 %4219 }
 0x796   :  { %v4518_v22 = vpop.permute.xlu1 %4517 }
 0x797   :  { %4765 = vrot.lane.b32.xlu0 %v11067_v59, %s9221_s26 }
 0x798   :  { %4767 = vrot.lane.b32.xlu1 %v13339_v49, %s9221_s26  ;;  %4979 = vmatpush1.bf16.msra.mxu0 %v4409_v50 }
 0x799   :  { %v11399_v0 = vpop.permute.xlu0 %4399 }
 0x79a   :  { %v11401_v55 = vpop.permute.xlu1 %4389  ;;  %v4416_v7 = vsel %vm702_vm6, %v4398_v37, %v11399_v0 }
 0x79b   :  { %4980 = vmatprep.subr.bf16.mxu0 %v4416_v7 }
 0x79c   :  { %4981 = vmatpush1.bf16.msra.mxu0 %v4415_v10 }
 0x79d   :  { %4982 = vmatprep.subr.bf16.mxu0 %v4530_v8  ;;  %v11409_v63 = vpop.permute.xlu0 %4223  ;;  %v11437_v8 = vld [vmem:[%s13291_s1 + $0x60] ss:$12 sps:$4 sm:$0xff]  }
 0x79e   :  { %v4516_v35 = vpop.permute.xlu1 %4515 }
 0x79f   :  { %v4535_v31 = vsel %vm823_vm7, %v4516_v35, %v4518_v22 }
 0x7a0   :  { %4983 = vmatpush1.bf16.msra.mxu0 %v4529_v24 }
 0x7a1   :  { %v11414_v17 = vpop.permute.xlu0 %4519 }
 0x7a2   :  { %v4638_v27 = vpop.permute.xlu1 %4637  ;;  %v4536_v37 = vsel %vm823_vm7, %v4518_v22, %v11414_v17 }
 0x7a3   :  { %4984 = vmatprep.subr.bf16.mxu0 %v4536_v37 }
 0x7a4   :  { %4985 = vmatpush1.bf16.msra.mxu0 %v4535_v31 }
 0x7a5   :  { %4986 = vmatprep.subr.bf16.mxu0 %v4650_v41  ;;  %v11422_v58 = vpop.permute.xlu0 %4387  ;;  %v11463_v41 = vld [vmem:[%s13291_s1 + $0x78] ss:$12 sps:$4 sm:$0xff]  }
 0x7a6   :  { %v11424_v50 = vpop.permute.xlu1 %4393 }
 0x7a8   :  { %4987 = vmatpush1.bf16.msra.mxu0 %v4649_v18 }
 0x7a9   :  { %v11429_v4 = vpop.permute.xlu0 %4639 }
 0x7aa   :  { %v4636_v7 = vpop.permute.xlu1 %4635  ;;  %v4656_v22 = vsel %vm944_vm8, %v4638_v27, %v11429_v4 }
 0x7ab   :  { %v4655_v10 = vsel %vm944_vm8, %v4636_v7, %v4638_v27  ;;  %4988 = vmatprep.subr.bf16.mxu0 %v4656_v22  ;;  %v4769_v27 = vsel %vm1065_vm4, %v11268_v30, %v11260_v13 }
 0x7ac   :  { %4989 = vmatpush1.bf16.msra.mxu0 %v4655_v10 }
 0x7ad   :  { %5011 = vmatprep.subr.bf16.mxu0 %v4770_v5  ;;  %v11447_v35 = vpop.permute.xlu0 %4391  ;;  %v11477_v5 = vld [vmem:[%s13291_s1 + $0x68] ss:$12 sps:$4 sm:$0xff]  }
 0x7ae   :  { %v11449_v24 = vpop.permute.xlu1 %4407 }
 0x7af   :  { %4991 = vmatmul.mubr.bf16.vlgmr.msra.gmra.mrb[24].mxu0 %v11437_v8 }
 0x7b0   :  { %5012 = vmatpush1.bf16.msra.mxu0 %v4769_v27  ;;  %5000 = vmatprep.mubr.bf16.mxu0 %v11445_v51  ;;  %v3886_v27 = vsel %vm170_vm0, %v11298_v14, %v11262_v40  ;;  %v4004_v40 = vsel %vm291_vm1, %v11322_v15, %v11276_v56 }
 0x7b1   :  { %v11456_v37 = vpop.permute.xlu0 %4507 }
 0x7b2   :  { %v11458_v31 = vpop.permute.xlu1 %4509 }
 0x7b5   :  { %v11465_v18 = vpop.permute.xlu0 %4511 }
 0x7b6   :  { %v4758_v7 = vpop.permute.xlu1 %4757 }
 0x7b7   :  { %5001 = vmatmul.mubr.bf16.gmra.mrb[28].mxu0 %v11463_v41 }
 0x7b8   :  { %5043 = vmatprep.mubr.bf16.mxu0 %v13313_v21 }
 0x7b9   :  { %v11469_v13 = vpop.permute.xlu0 %4759 }
 0x7ba   :  { %v4756_v30 = vpop.permute.xlu1 %4755  ;;  %v4776_v22 = vsel %vm1065_vm4, %v4758_v7, %v11469_v13 }
 0x7bb   :  { %v4775_v10 = vsel %vm1065_vm4, %v4756_v30, %v4758_v7  ;;  %5013 = vmatprep.subr.bf16.mxu0 %v4776_v22  ;;  %v3885_v30 = vsel %vm170_vm0, %v11274_v12, %v11298_v14  ;;  %v11499_v12 = vld [vmem:[%s13291_s1 + $0x80] ss:$12 sps:$4 sm:$0xff]   ;;  %v4006_v14 = vsel %vm291_vm1, %v11348_v34, %v11300_v39  ;;  %v4124_v39 = vsel %vm412_vm2, %v11370_v36, %v11324_v38 }
 0x7bc   :  { %5014 = vmatpush1.bf16.msra.mxu0 %v4775_v10  ;;  %v13341_v10 = vmov 0  }
 0x7bd   :  { %5170 = vmatprep.subr.bf16.mxu0 %v3886_v27  ;;  %v3874_v21 = vpop.permute.xlu0 %3873 }
 0x7be   :  { %v3876_v49 = vpop.permute.xlu1 %3875  ;;  %v3889_v1 = vsel %vm170_vm0, %v11285_v3, %v3874_v21 }
 0x7bf   :  { %8992 = vmatmul.mubr.msk.bf16.vlgmr.msra.gmra.mrb[24].mxu0 %vm13340_vm14, %v11477_v5  ;;  %v3890_v7 = vsel %vm170_vm0, %v3874_v21, %v3876_v49 }
 0x7c0   :  { %5066 = vmatprep.subr.bf16.mxu1 %v3890_v7  ;;  %5171 = vmatpush1.bf16.msra.mxu0 %v3885_v30 }
 0x7c1   :  { %5067 = vmatpush1.bf16.msra.mxu1 %v3889_v1  ;;  %v3878_v22 = vpop.permute.xlu0 %3877  ;;  %5053 = vmatprep.mubr.bf16.mxu0 %v13341_v10  ;;  %v4003_v1 = vsel %vm291_vm1, %v11194_v32, %v11322_v15  ;;  %v4005_v32 = vsel %vm291_vm1, %v11276_v56, %v11348_v34  ;;  %v4123_v56 = vsel %vm412_vm2, %v11202_v28, %v11370_v36 }
 0x7c2   :  { %v3880_v3 = vpop.permute.xlu1 %3879  ;;  %5068 = vmatprep.subr.bf16.mxu1 %v4004_v40  ;;  %v3891_v27 = vsel %vm170_vm0, %v3876_v49, %v3878_v22  ;;  %v4244_v28 = vsel %vm533_vm3, %v11390_v29, %v11350_v60 }
 0x7c3   :  { %v3892_v21 = vsel %vm170_vm0, %v3878_v22, %v3880_v3 }
 0x7c4   :  { %5172 = vmatprep.subr.bf16.mxu0 %v3892_v21 }
 0x7c5   :  { %5069 = vmatpush1.bf16.msra.mxu1 %v4003_v1  ;;  %5173 = vmatpush1.bf16.msra.mxu0 %v3891_v27  ;;  %v3994_v7 = vpop.permute.xlu0 %3993 }
 0x7c6   :  { %v3996_v49 = vpop.permute.xlu1 %3995  ;;  %5174 = vmatprep.subr.bf16.mxu0 %v4006_v14  ;;  %v4009_v30 = vsel %vm291_vm1, %v11309_v26, %v3994_v7  ;;  %v4125_v14 = vsel %vm412_vm2, %v11324_v38, %v11380_v57  ;;  %v4246_v38 = vsel %vm533_vm3, %v11409_v63, %v11372_v11 }
 0x7c7   :  { %8993 = vmatmul.mubr.msk.bf16.gmra.mrb[28].mxu0 %vm13342_vm15, %v11499_v12  ;;  %v4010_v40 = vsel %vm291_vm1, %v3994_v7, %v3996_v49 }
 0x7c8   :  { %5070 = vmatprep.subr.bf16.mxu1 %v4010_v40  ;;  %5202 = vmatprep.mubr.bf16.mxu0 %v11158_v52  ;;  %v4126_v52 = vsel %vm412_vm2, %v11380_v57, %v11335_v54 }
 0x7c9   :  { %5071 = vmatpush1.bf16.msra.mxu1 %v4009_v30  ;;  %5175 = vmatpush1.bf16.msra.mxu0 %v4005_v32  ;;  %v3998_v15 = vpop.permute.xlu0 %3997 }
 0x7ca   :  { %v4000_v26 = vpop.permute.xlu1 %3999  ;;  %5072 = vmatprep.subr.bf16.mxu1 %v4124_v39  ;;  %v4011_v22 = vsel %vm291_vm1, %v3996_v49, %v3998_v15  ;;  %v4243_v49 = vsel %vm533_vm3, %v11210_v9, %v11390_v29  ;;  %v4245_v39 = vsel %vm533_vm3, %v11350_v60, %v11409_v63 }
 0x7cb   :  { %v4012_v3 = vsel %vm291_vm1, %v3998_v15, %v4000_v26 }
 0x7cc   :  { %5176 = vmatprep.subr.bf16.mxu0 %v4012_v3 }
 0x7cd   :  { %5073 = vmatpush1.bf16.msra.mxu1 %v4123_v56  ;;  %5177 = vmatpush1.bf16.msra.mxu0 %v4011_v22  ;;  %v4114_v34 = vpop.permute.xlu0 %4113 }
 0x7ce   :  { %v4116_v27 = vpop.permute.xlu1 %4115  ;;  %5178 = vmatprep.subr.bf16.mxu0 %v4126_v52  ;;  %v4129_v21 = vsel %vm412_vm2, %v11333_v47, %v4114_v34 }
 0x7cf   :  { %v4130_v1 = vsel %vm412_vm2, %v4114_v34, %v4116_v27  ;;  %v4533_v34 = vsel %vm823_vm7, %v11458_v31, %v11465_v18 }
 0x7d0   :  { %5074 = vmatprep.subr.bf16.mxu1 %v4130_v1 }
 0x7d1   :  { %5075 = vmatpush1.bf16.msra.mxu1 %v4129_v21  ;;  %5179 = vmatpush1.bf16.msra.mxu0 %v4125_v14  ;;  %v4118_v54 = vpop.permute.xlu0 %4117 }
 0x7d2   :  { %v4120_v36 = vpop.permute.xlu1 %4119  ;;  %5076 = vmatprep.subr.bf16.mxu1 %v4244_v28  ;;  %v4131_v7 = vsel %vm412_vm2, %v4116_v27, %v4118_v54 }
 0x7d3   :  { %v4132_v47 = vsel %vm412_vm2, %v4118_v54, %v4120_v36 }
 0x7d4   :  { %5180 = vmatprep.subr.bf16.mxu0 %v4132_v47 }
 0x7d5   :  { %5077 = vmatpush1.bf16.msra.mxu1 %v4243_v49  ;;  %5181 = vmatpush1.bf16.msra.mxu0 %v4131_v7  ;;  %v4234_v57 = vpop.permute.xlu0 %4233 }
 0x7d6   :  { %v4236_v30 = vpop.permute.xlu1 %4235  ;;  %5182 = vmatprep.subr.bf16.mxu0 %v4246_v38  ;;  %v4249_v40 = vsel %vm533_vm3, %v11359_v53, %v4234_v57 }
 0x7d7   :  { %v4250_v32 = vsel %vm533_vm3, %v4234_v57, %v4236_v30 }
 0x7d8   :  { %5078 = vmatprep.subr.bf16.mxu1 %v4250_v32 }
 0x7d9   :  { %5079 = vmatpush1.bf16.msra.mxu1 %v4249_v40  ;;  %5183 = vmatpush1.bf16.msra.mxu0 %v4245_v39  ;;  %v4238_v9 = vpop.permute.xlu0 %4237 }
 0x7da   :  { %v4240_v29 = vpop.permute.xlu1 %4239  ;;  %5080 = vmatprep.subr.bf16.mxu1 %v11000_v6  ;;  %v4251_v11 = vsel %vm533_vm3, %v4236_v30, %v4238_v9  ;;  %v4412_v6 = vsel %vm702_vm6, %v11422_v58, %v11401_v55 }
 0x7db   :  { %v4252_v15 = vsel %vm533_vm3, %v4238_v9, %v4240_v29 }
 0x7dc   :  { %5184 = vmatprep.subr.bf16.mxu0 %v4252_v15 }
 0x7dd   :  { %5081 = vmatpush1.bf16.msra.mxu1 %v10998_v42  ;;  %5185 = vmatpush1.bf16.msra.mxu0 %v4251_v11  ;;  %v4628_v53 = vpop.permute.xlu0 %4627  ;;  %v4411_v42 = vsel %vm702_vm6, %v11218_v33, %v11422_v58  ;;  %v4413_v33 = vsel %vm702_vm6, %v11401_v55, %v11447_v35 }
 0x7de   :  { %v4514_v26 = vpop.permute.xlu1 %4513  ;;  %5082 = vmatprep.subr.bf16.mxu1 %v11063_v16  ;;  %5186 = vmatprep.subr.bf16.mxu0 %v11005_v43 }
 0x7df   :  { %v4534_v55 = vsel %vm823_vm7, %v11465_v18, %v4514_v26 }
 0x7e1   :  { %5083 = vmatpush1.bf16.msra.mxu1 %v11061_v23  ;;  %5187 = vmatpush1.bf16.msra.mxu0 %v11003_v2  ;;  %v4402_v60 = vpop.permute.xlu0 %4401  ;;  %v4414_v2 = vsel %vm702_vm6, %v11447_v35, %v11424_v50 }
 0x7e2   :  { %v4528_v63 = vpop.permute.xlu1 %4527  ;;  %5084 = vmatprep.subr.bf16.mxu1 %v4412_v6  ;;  %5188 = vmatprep.subr.bf16.mxu0 %v11067_v59  ;;  %v4417_v59 = vsel %vm702_vm6, %v11399_v0, %v4402_v60  ;;  %v4531_v0 = vsel %vm823_vm7, %v11226_v44, %v11456_v37 }
 0x7e5   :  { %5085 = vmatpush1.bf16.msra.mxu1 %v4411_v42  ;;  %5189 = vmatpush1.bf16.msra.mxu0 %v11065_v25  ;;  %v4632_v43 = vpop.permute.xlu0 %4631  ;;  %v4532_v25 = vsel %vm823_vm7, %v11456_v37, %v11458_v31 }
 0x7e6   :  { %v4404_v23 = vpop.permute.xlu1 %4403  ;;  %5190 = vmatprep.subr.bf16.mxu0 %v4414_v2 }
 0x7e7   :  { %v4418_v16 = vsel %vm702_vm6, %v4402_v60, %v4404_v23 }
 0x7e8   :  { %5086 = vmatprep.subr.bf16.mxu1 %v4418_v16 }
 0x7e9   :  { %5087 = vmatpush1.bf16.msra.mxu1 %v4417_v59  ;;  %5191 = vmatpush1.bf16.msra.mxu0 %v4413_v33  ;;  %v4406_v58 = vpop.permute.xlu0 %4405 }
 0x7ea   :  { %v4630_v50 = vpop.permute.xlu1 %4629  ;;  %5088 = vmatprep.subr.bf16.mxu1 %v4532_v25  ;;  %v4420_v22 = vsel %vm702_vm6, %v4406_v58, %v11449_v24  ;;  %v4419_v3 = vsel %vm702_vm6, %v4404_v23, %v4406_v58 }
 0x7eb   :  { %5192 = vmatprep.subr.bf16.mxu0 %v4420_v22  ;;  %v4652_v44 = vsel %vm944_vm8, %v4628_v53, %v4630_v50  ;;  %v4653_v36 = vsel %vm944_vm8, %v4630_v50, %v4632_v43 }
 0x7ed   :  { %5089 = vmatpush1.bf16.msra.mxu1 %v4531_v0  ;;  %5193 = vmatpush1.bf16.msra.mxu0 %v4419_v3  ;;  %v4522_v35 = vpop.permute.xlu0 %4521 }
 0x7ee   :  { %v4524_v56 = vpop.permute.xlu1 %4523  ;;  %5194 = vmatprep.subr.bf16.mxu0 %v4534_v55  ;;  %v4537_v52 = vsel %vm823_vm7, %v11414_v17, %v4522_v35  ;;  %v4651_v17 = vsel %vm944_vm8, %v11234_v62, %v4628_v53 }
 0x7ef   :  { %v4538_v24 = vsel %vm823_vm7, %v4522_v35, %v4524_v56 }
 0x7f0   :  { %5090 = vmatprep.subr.bf16.mxu1 %v4538_v24 }
 0x7f1   :  { %5091 = vmatpush1.bf16.msra.mxu1 %v4537_v52  ;;  %5195 = vmatpush1.bf16.msra.mxu0 %v4533_v34  ;;  %v4526_v37 = vpop.permute.xlu0 %4525 }
 0x7f2   :  { %v4634_v27 = vpop.permute.xlu1 %4633  ;;  %5092 = vmatprep.subr.bf16.mxu1 %v4652_v44  ;;  %v4540_v21 = vsel %vm823_vm7, %v4526_v37, %v4528_v63  ;;  %v4539_v1 = vsel %vm823_vm7, %v4524_v56, %v4526_v37 }
 0x7f3   :  { %5196 = vmatprep.subr.bf16.mxu0 %v4540_v21  ;;  %v4654_v14 = vsel %vm944_vm8, %v4632_v43, %v4634_v27 }
 0x7f5   :  { %5093 = vmatpush1.bf16.msra.mxu1 %v4651_v17  ;;  %5197 = vmatpush1.bf16.msra.mxu0 %v4539_v1  ;;  %v4642_v31 = vpop.permute.xlu0 %4641 }
 0x7f6   :  { %v4644_v18 = vpop.permute.xlu1 %4643  ;;  %5198 = vmatprep.subr.bf16.mxu0 %v4654_v14  ;;  %v4657_v28 = vsel %vm944_vm8, %v11429_v4, %v4642_v31 }
 0x7f7   :  { %v4658_v54 = vsel %vm944_vm8, %v4642_v31, %v4644_v18 }
 0x7f8   :  { %5094 = vmatprep.subr.bf16.mxu1 %v4658_v54 }
 0x7f9   :  { %5095 = vmatpush1.bf16.msra.mxu1 %v4657_v28  ;;  %5199 = vmatpush1.bf16.msra.mxu0 %v4653_v36  ;;  %v4646_v7 = vpop.permute.xlu0 %4645 }
 0x7fa   :  { %v4648_v47 = vpop.permute.xlu1 %4647  ;;  %v4659_v62 = vsel %vm944_vm8, %v4644_v18, %v4646_v7 }
 0x7fb   :  { %v4660_v49 = vsel %vm944_vm8, %v4646_v7, %v4648_v47 }
 0x7fc   :  { %5097 = vmatmul.mubr.bf16.vlgmr.msra.gmra.mrb[40].mxu1 %v11437_v8  ;;  %5200 = vmatprep.subr.bf16.mxu0 %v4660_v49 }
 0x7fd   :  { %5201 = vmatpush1.bf16.msra.mxu0 %v4659_v62  ;;  %v4748_v38 = vpop.permute.xlu0 %4747  ;;  %5106 = vmatprep.mubr.bf16.mxu1 %v11445_v51 }
 0x7fe   :  { %v4750_v4 = vpop.permute.xlu1 %4749  ;;  %v4771_v57 = vsel %vm1065_vm4, %v11242_v19, %v4748_v38 }
 0x7ff   :  { %v4772_v30 = vsel %vm1065_vm4, %v4748_v38, %v4750_v4 }
 0x800   :  { %5117 = vmatprep.subr.bf16.mxu1 %v4772_v30  ;;  %5203 = vmatmul.mubr.bf16.vlgmr.msra.gmra.mrb[32].mxu0 %v11437_v8 }
 0x801   :  { %5118 = vmatpush1.bf16.msra.mxu1 %v4771_v57  ;;  %v4752_v40 = vpop.permute.xlu0 %4751  ;;  %5212 = vmatprep.mubr.bf16.mxu0 %v11445_v51 }
 0x802   :  { %v4754_v32 = vpop.permute.xlu1 %4753  ;;  %v4773_v39 = vsel %vm1065_vm4, %v4750_v4, %v4752_v40 }
 0x803   :  { %v4774_v9 = vsel %vm1065_vm4, %v4752_v40, %v4754_v32 }
 0x804   :  { %5107 = vmatmul.mubr.bf16.gmra.mrb[44].mxu1 %v11463_v41  ;;  %5223 = vmatprep.subr.bf16.mxu0 %v4774_v9 }
 0x805   :  { %5224 = vmatpush1.bf16.msra.mxu0 %v4773_v39  ;;  %v4762_v29 = vpop.permute.xlu0 %4761  ;;  %5149 = vmatprep.mubr.bf16.mxu1 %v13341_v10 }
 0x806   :  { %v4764_v19 = vpop.permute.xlu1 %4763  ;;  %v4777_v8 = vsel %vm1065_vm4, %v11469_v13, %v4762_v29 }
 0x807   :  { %v4778_v11 = vsel %vm1065_vm4, %v4762_v29, %v4764_v19 }
 0x808   :  { %5119 = vmatprep.subr.bf16.mxu1 %v4778_v11  ;;  %5213 = vmatmul.mubr.bf16.gmra.mrb[36].mxu0 %v11463_v41 }
 0x809   :  { %5120 = vmatpush1.bf16.msra.mxu1 %v4777_v8  ;;  %v4766_v51 = vpop.permute.xlu0 %4765  ;;  %5255 = vmatprep.mubr.bf16.mxu0 %v13341_v10 }
 0x80a   :  { %v4768_v15 = vpop.permute.xlu1 %4767  ;;  %v4779_v53 = vsel %vm1065_vm4, %v4764_v19, %v4766_v51  ;;  %v13347_v19 = vld [vmem:[#allocation9_spill] sm:$0xff] }
 0x80b   :  { %v4780_v26 = vsel %vm1065_vm4, %v4766_v51, %v4768_v15 }
 0x80c   :  { %8994 = vmatmul.mubr.msk.bf16.vlgmr.msra.gmra.mrb[40].mxu1 %vm13343_vm5, %v11477_v5  ;;  %5225 = vmatprep.subr.bf16.mxu0 %v4780_v26 }
 0x80d   :  { %5226 = vmatpush1.bf16.msra.mxu0 %v4779_v53  ;;  %5159 = vmatprep.mubr.bf16.mxu1 %v13341_v10 }
 0x810   :  { %8996 = vmatmul.mubr.msk.bf16.vlgmr.msra.gmra.mrb[32].mxu0 %vm13344_vm9, %v11477_v5 }
 0x811   :  { %5265 = vmatprep.mubr.bf16.mxu0 %v13341_v10 }
 0x814   :  { %8995 = vmatmul.mubr.msk.bf16.gmra.mrb[44].mxu1 %vm13345_vm10, %v11499_v12 }
 0x818   :  { %8997 = vmatmul.mubr.msk.bf16.gmra.mrb[36].mxu0 %vm13346_vm11, %v11499_v12 }
 0x892   :  { %v11632_v41 = vpop.f32.mrb[24].mxu0 }
 0x893   :  { %v5276_v13 = vmul.f32 %v11632_v41, %v9906_v45  ;;  %v11636_v6 = vpop.f32.mrb[25].mxu0 }
 0x894   :  { %v5277_v60 = vmul.f32 %v11636_v6, %v9909_v46  ;;  %v11640_v63 = vpop.f32.mrb[26].mxu0 }
 0x895   :  { %v5328_v5 = vmul.f32 %v5276_v13, %v11632_v41  ;;  %v5282_v42 = vmul.f32 %v11640_v63, %v9906_v45  ;;  %v11645_v2 = vpop.f32.mrb[27].mxu0 }
 0x896   :  { %v5300_v12 = vadd.f32 %v5277_v60, %v5276_v13  ;;  %v5329_v43 = vmul.f32 %v5277_v60, %v11636_v6  ;;  %v5283_v23 = vmul.f32 %v11645_v2, %v9909_v46 }
 0x897   :  { %v5334_v16 = vmul.f32 %v5282_v42, %v11640_v63 }
 0x898   :  { %v5352_v59 = vadd.f32 %v5329_v43, %v5328_v5  ;;  %v5307_v33 = vadd.f32 %v5283_v23, %v5282_v42  ;;  %v5335_v25 = vmul.f32 %v5283_v23, %v11645_v2 }
 0x89a   :  { %v5359_v58 = vadd.f32 %v5335_v25, %v5334_v16  ;;  %v11652_v50 = vpop.f32.mrb[28].mxu0 }
 0x89b   :  { %v5288_v22 = vmul.f32 %v11652_v50, %v9906_v45  ;;  %v11656_v3 = vpop.f32.mrb[29].mxu0 }
 0x89c   :  { %v5289_v0 = vmul.f32 %v11656_v3, %v9909_v46  ;;  %v11660_v55 = vpop.f32.mrb[30].mxu0 }
 0x89d   :  { %v5340_v35 = vmul.f32 %v5288_v22, %v11652_v50  ;;  %v5294_v56 = vmul.f32 %v11660_v55, %v9906_v45  ;;  %v11665_v52 = vpop.f32.mrb[31].mxu0 }
 0x89e   :  { %v5314_v24 = vadd.f32 %v5289_v0, %v5288_v22  ;;  %v5341_v34 = vmul.f32 %v5289_v0, %v11656_v3  ;;  %v5295_v44 = vmul.f32 %v11665_v52, %v9909_v46 }
 0x89f   :  { %v5346_v37 = vmul.f32 %v5294_v56, %v11660_v55 }
 0x8a0   :  { %v5366_v27 = vadd.f32 %v5341_v34, %v5340_v35  ;;  %v5321_v21 = vadd.f32 %v5295_v44, %v5294_v56  ;;  %v5347_v1 = vmul.f32 %v5295_v44, %v11665_v52 }
 0x8a2   :  { %v11672_v17 = vadd.f32 %v5347_v1, %v5346_v37 }
 0x8df   :  { %v11674_v14 = vpop.f32.mrb[40].mxu1 }
 0x8e0   :  { %v5278_v31 = vmul.f32 %v11674_v14, %v13335_v20  ;;  %v11678_v18 = vpop.f32.mrb[41].mxu1 }
 0x8e1   :  { %v5279_v28 = vmul.f32 %v11678_v18, %v13336_v48  ;;  %v11682_v54 = vpop.f32.mrb[42].mxu1 }
 0x8e2   :  { %v5301_v36 = vadd.f32 %v5300_v12, %v5278_v31  ;;  %v5330_v7 = vmul.f32 %v5278_v31, %v11674_v14  ;;  %v5284_v47 = vmul.f32 %v11682_v54, %v13335_v20  ;;  %v11687_v62 = vpop.f32.mrb[43].mxu1 }
 0x8e3   :  { %v5331_v49 = vmul.f32 %v5279_v28, %v11678_v18  ;;  %v5285_v38 = vmul.f32 %v11687_v62, %v13336_v48  ;;  %v11692_v4 = vpop.f32.mrb[32].mxu0 }
 0x8e4   :  { %v5353_v57 = vadd.f32 %v5352_v59, %v5330_v7  ;;  %v5302_v30 = vadd.f32 %v5301_v36, %v5279_v28  ;;  %v5308_v40 = vadd.f32 %v5307_v33, %v5284_v47  ;;  %v5336_v32 = vmul.f32 %v5284_v47, %v11682_v54  ;;  %v11695_v39 = vpop.f32.mrb[33].mxu0 }
 0x8e5   :  { %v5337_v9 = vmul.f32 %v5285_v38, %v11687_v62  ;;  %v5280_v29 = vmul.f32 %v11692_v4, %v13337_v61  ;;  %v5281_v8 = vmul.f32 %v11695_v39, %v13347_v19  ;;  %v11702_v11 = vpop.f32.mrb[34].mxu0 }
 0x8e6   :  { %v5354_v51 = vadd.f32 %v5353_v57, %v5331_v49  ;;  %v5360_v15 = vadd.f32 %v5359_v58, %v5336_v32  ;;  %v5309_v53 = vadd.f32 %v5308_v40, %v5285_v38  ;;  %v5286_v26 = vmul.f32 %v11702_v11, %v13337_v61  ;;  %v11706_v13 = vpop.f32.mrb[35].mxu0 }
 0x8e7   :  { %v5303_v60 = vadd.f32 %v5302_v30, %v5280_v29  ;;  %v5332_v5 = vmul.f32 %v5280_v29, %v11692_v4  ;;  %v5333_v42 = vmul.f32 %v5281_v8, %v11695_v39  ;;  %v5287_v12 = vmul.f32 %v11706_v13, %v13347_v19  ;;  %v11712_v43 = vpop.f32.mrb[44].mxu1 }
 0x8e8   :  { %v5361_v23 = vadd.f32 %v5360_v15, %v5337_v9  ;;  %v5310_v16 = vadd.f32 %v5309_v53, %v5286_v26  ;;  %v5338_v59 = vmul.f32 %v5286_v26, %v11702_v11  ;;  %v5290_v33 = vmul.f32 %v11712_v43, %v13335_v20  ;;  %v11717_v25 = vpop.f32.mrb[45].mxu1 }
 0x8e9   :  { %v5355_v58 = vadd.f32 %v5354_v51, %v5332_v5  ;;  %v5339_v22 = vmul.f32 %v5287_v12, %v11706_v13  ;;  %v5291_v0 = vmul.f32 %v11717_v25, %v13336_v48  ;;  %v11722_v35 = vpop.f32.mrb[46].mxu1  ;;  %v5304_v56 = vadd.f32 %v5303_v60, %v5281_v8 }
 0x8ea   :  { %v5362_v34 = vadd.f32 %v5361_v23, %v5338_v59  ;;  %v5315_v44 = vadd.f32 %v5314_v24, %v5290_v33  ;;  %v5342_v37 = vmul.f32 %v5290_v33, %v11712_v43  ;;  %v5296_v1 = vmul.f32 %v11722_v35, %v13335_v20  ;;  %v11727_v31 = vpop.f32.mrb[47].mxu1 }
 0x8eb   :  { %v5343_v28 = vmul.f32 %v5291_v0, %v11717_v25  ;;  %v5297_v36 = vmul.f32 %v11727_v31, %v13336_v48  ;;  %5305 = vadd.xlane.f32.xlu0 %v5304_v56  ;;  %v11732_v7 = vpop.f32.mrb[36].mxu0  ;;  %v5311_v47 = vadd.f32 %v5310_v16, %v5287_v12  ;;  %v5356_v49 = vadd.f32 %v5355_v58, %v5333_v42 }
 0x8ec   :  { %v5367_v38 = vadd.f32 %v5366_v27, %v5342_v37  ;;  %v5316_v57 = vadd.f32 %v5315_v44, %v5291_v0  ;;  %v5322_v24 = vadd.f32 %v5321_v21, %v5296_v1  ;;  %v5348_v30 = vmul.f32 %v5296_v1, %v11722_v35  ;;  %v11735_v40 = vpop.f32.mrb[37].mxu0 }
 0x8ed   :  { %v5349_v32 = vmul.f32 %v5297_v36, %v11727_v31  ;;  %v5292_v9 = vmul.f32 %v11732_v7, %v13337_v61  ;;  %5312 = vadd.xlane.f32.xlu1 %v5311_v47  ;;  %v5293_v29 = vmul.f32 %v11735_v40, %v13347_v19  ;;  %v11742_v8 = vpop.f32.mrb[38].mxu0  ;;  %v5363_v51 = vadd.f32 %v5362_v34, %v5339_v22 }
 0x8ee   :  { %v5368_v15 = vadd.f32 %v5367_v38, %v5343_v28  ;;  %v5374_v27 = vadd.f32 %v11672_v17, %v5348_v30  ;;  %v5323_v21 = vadd.f32 %v5322_v24, %v5297_v36  ;;  %v5298_v53 = vmul.f32 %v11742_v8, %v13337_v61  ;;  %v11747_v26 = vpop.f32.mrb[39].mxu0 }
 0x8ef   :  { %v5317_v60 = vadd.f32 %v5316_v57, %v5292_v9  ;;  %v5344_v5 = vmul.f32 %v5292_v9, %v11732_v7  ;;  %v5345_v42 = vmul.f32 %v5293_v29, %v11735_v40  ;;  %5357 = vadd.xlane.f32.xlu0 %v5356_v49  ;;  %v5299_v12 = vmul.f32 %v11747_v26, %v13347_v19 }
 0x8f0   :  { %v5375_v23 = vadd.f32 %v5374_v27, %v5349_v32  ;;  %v5324_v16 = vadd.f32 %v5323_v21, %v5298_v53  ;;  %v5350_v59 = vmul.f32 %v5298_v53, %v11742_v8 }
 0x8f1   :  { %v5369_v17 = vadd.f32 %v5368_v15, %v5344_v5  ;;  %v5351_v33 = vmul.f32 %v5299_v12, %v11747_v26  ;;  %v5318_v58 = vadd.f32 %v5317_v60, %v5293_v29 }
 0x8f2   :  { %v5376_v22 = vadd.f32 %v5375_v23, %v5350_v59  ;;  %v5325_v0 = vadd.f32 %v5324_v16, %v5299_v12 }
 0x8f3   :  { %5364 = vadd.xlane.f32.xlu0 %v5363_v51  ;;  %5319 = vadd.xlane.f32.xlu1 %v5318_v58  ;;  %v5370_v56 = vadd.f32 %v5369_v17, %v5345_v42 }
 0x8f4   :  { %v5377_v34 = vadd.f32 %v5376_v22, %v5351_v33  ;;  %v8998_v33 = vld [vmem:[%s13293_s2 + $0x40] sm:$0xff] }
 0x8f7   :  { %5371 = vadd.xlane.f32.xlu1 %v5370_v56  ;;  %5326 = vadd.xlane.f32.xlu0 %v5325_v0  ;;  %v9002_v56 = vld [vmem:[%s13294_s3 + $0x40] sm:$0xff] }
 0x8fb   :  { %5378 = vadd.xlane.f32.xlu0 %v5377_v34  ;;  %v8999_v34 = vld [vmem:[%s13293_s2 + $0x48] sm:$0xff] }
 0x978   :  { %v5306_v44 = vpop.xlane.xlu0 %5305 }
 0x979   :  { %v5380_v37 = vmul.f32 0.001953125, %v5306_v44 }
 0x97a   :  { %v5313_v1 = vpop.xlane.xlu1 %5312 }
 0x97b   :  { %v5388_v36 = vmul.f32 %v5380_v37, %v5380_v37  ;;  %v5381_v47 = vmul.f32 0.001953125, %v5313_v1 }
 0x97c   :  { %v5358_v28 = vpop.xlane.xlu0 %5357 }
 0x97d   :  { %v5384_v49 = vmul.f32 0.001953125, %v5358_v28  ;;  %v5389_v30 = vmul.f32 %v5381_v47, %v5381_v47 }
 0x97f   :  { %v5392_v38 = vsub.f32 %v5384_v49, %v5388_v36  ;;  %v9003_v49 = vld [vmem:[%s13294_s3 + $0x48] sm:$0xff] }
 0x980   :  { %v5365_v57 = vpop.xlane.xlu0 %5364  ;;  %v5320_v24 = vpop.xlane.xlu1 %5319 }
 0x981   :  { %v5401_v32 = vadd.f32 1e-05, %v5392_v38  ;;  %v5385_v9 = vmul.f32 0.001953125, %v5365_v57  ;;  %v5382_v29 = vmul.f32 0.001953125, %v5320_v24  ;;  %v9000_v38 = vld [vmem:[%s13293_s2 + $0x50] sm:$0xff] }
 0x983   :  { %9200 = vrsqrt.f32 %v5401_v32  ;;  %v5393_v51 = vsub.f32 %v5385_v9, %v5389_v30  ;;  %v5390_v53 = vmul.f32 %v5382_v29, %v5382_v29  ;;  %v9001_v9 = vld [vmem:[%s13293_s2 + $0x58] sm:$0xff] }
 0x984   :  { %v5372_v15 = vpop.xlane.xlu1 %5371  ;;  %v5327_v27 = vpop.xlane.xlu0 %5326 }
 0x985   :  { %v5402_v21 = vadd.f32 1e-05, %v5393_v51  ;;  %v5386_v60 = vmul.f32 0.001953125, %v5372_v15  ;;  %v5383_v5 = vmul.f32 0.001953125, %v5327_v27 }
 0x987   :  { %9202 = vrsqrt.f32 %v5402_v21  ;;  %v5394_v42 = vsub.f32 %v5386_v60, %v5390_v53  ;;  %v5391_v16 = vmul.f32 %v5383_v5, %v5383_v5 }
 0x988   :  { %v5379_v12 = vpop.xlane.xlu0 %5378 }
 0x989   :  { %v5403_v23 = vadd.f32 1e-05, %v5394_v42  ;;  %v5387_v59 = vmul.f32 0.001953125, %v5379_v12  ;;  %v13348_v42 = vmov 0.0|0.0  }
 0x98b   :  { %9204 = vrsqrt.f32 %v5403_v23  ;;  %v5395_v17 = vsub.f32 %v5387_v59, %v5391_v16 }
 0x98d   :  { %v9201_v58 = vpop.eup %9200  ;;  %v5404_v22 = vadd.f32 1e-05, %v5395_v17 }
 0x98e   :  { %v5409_v0 = vmul.f32 %v9201_v58, %v8998_v33 }
 0x98f   :  { %9206 = vrsqrt.f32 %v5404_v22 }
 0x990   :  { %5428 = vperm.xlu1 %9147, %v5409_v0   ;;  %v5418_v44 = vmul.f32 %v5409_v0, %v5380_v37  ;;  %v9004_v37 = vld [vmem:[%s13294_s3 + $0x50] sm:$0xff] }
 0x991   :  { %v9203_v1 = vpop.eup %9202 }
 0x992   :  { %v5422_v28 = vsub.f32 %v9002_v56, %v5418_v44  ;;  %v5410_v36 = vmul.f32 %v9203_v1, %v8999_v34 }
 0x994   :  { %5472 = vperm.xlu1 %9147, %v5422_v28   ;;  %5433 = vperm.xlu0 %9148, %v5410_v36   ;;  %v5419_v57 = vmul.f32 %v5410_v36, %v5381_v47  ;;  %v9005_v47 = vld [vmem:[%s13294_s3 + $0x58] sm:$0xff] }
 0x995   :  { %v9205_v24 = vpop.eup %9204 }
 0x996   :  { %v5423_v30 = vsub.f32 %v9003_v49, %v5419_v57  ;;  %v5411_v32 = vmul.f32 %v9205_v24, %v9000_v38 }
 0x998   :  { %5477 = vperm.xlu1 %9147, %v5423_v30   ;;  %5438 = vperm.xlu0 %9148, %v5411_v32   ;;  %v5420_v51 = vmul.f32 %v5411_v32, %v5382_v29 }
 0x999   :  { %v9207_v15 = vpop.eup %9206 }
 0x99a   :  { %v5424_v27 = vsub.f32 %v9004_v37, %v5420_v51  ;;  %v5412_v21 = vmul.f32 %v9207_v15, %v9001_v9 }
 0x99c   :  { %5482 = vperm.xlu0 %9148, %v5424_v27   ;;  %5443 = vperm.xlu1 %9147, %v5412_v21   ;;  %v5421_v53 = vmul.f32 %v5412_v21, %v5383_v5 }
 0x99e   :  { %v5425_v60 = vsub.f32 %v9005_v47, %v5421_v53 }
 0x9a0   :  { %5487 = vperm.xlu1 %9147, %v5425_v60   ;;  %5690 = vrot.lane.b32.xlu0 %v13348_v42, %s9217_s24 }
 0x9a4   :  { %5704 = vrot.lane.b32.xlu1 %v13348_v42, %s9217_s24  ;;  %5810 = vrot.lane.b32.xlu0 %v13348_v42, %s9218_s18 }
 0x9a8   :  { %5824 = vrot.lane.b32.xlu1 %v13348_v42, %s9218_s18  ;;  %5930 = vrot.lane.b32.xlu0 %v13348_v42, %s9219_s19 }
 0x9ac   :  { %5944 = vrot.lane.b32.xlu1 %v13348_v42, %s9219_s19  ;;  %6050 = vrot.lane.b32.xlu0 %v13348_v42, %s9220_s25 }
 0x9b0   :  { %6064 = vrot.lane.b32.xlu1 %v13348_v42, %s9220_s25 }
 0xa0f   :  { %v5429_v29 = vpop.permute.xlu1 %5428 }
 0xa10   :  { %v5446_v5 = vmul.f32 %v5429_v29, %v11632_v41  ;;  %v5447_v12 = vmul.f32 %v5429_v29, %v11636_v6  ;;  %v5448_v23 = vmul.f32 %v5429_v29, %v11674_v14  ;;  %v5449_v16 = vmul.f32 %v5429_v29, %v11678_v18 }
 0xa11   :  { %v5450_v59 = vmul.f32 %v5429_v29, %v11692_v4  ;;  %v5451_v17 = vmul.f32 %v5429_v29, %v11695_v39 }
 0xa13   :  { %v5473_v33 = vpop.permute.xlu1 %5472  ;;  %v5434_v1 = vpop.permute.xlu0 %5433 }
 0xa14   :  { %v5490_v58 = vadd.f32 %v5473_v33, %v5446_v5  ;;  %v5491_v22 = vadd.f32 %v5473_v33, %v5447_v12  ;;  %v5492_v0 = vadd.f32 %v5473_v33, %v5448_v23  ;;  %v5493_v56 = vadd.f32 %v5473_v33, %v5449_v16 }
 0xa15   :  { %v5494_v34 = vadd.f32 %v5473_v33, %v5450_v59  ;;  %v5495_v44 = vadd.f32 %v5473_v33, %v5451_v17  ;;  %v5452_v39 = vmul.f32 %v5434_v1, %v11640_v63  ;;  %v5453_v38 = vmul.f32 %v5434_v1, %v11645_v2 }
 0xa16   :  { %vm5514_vm12 = vcmp.ge.f32.partialorder %v5490_v58, 0.0  ;;  %vm5515_vm13 = vcmp.ge.f32.partialorder %v5491_v22, 0.0  ;;  %vm5516_vm14 = vcmp.ge.f32.partialorder %v5492_v0, 0.0  ;;  %vm5517_vm15 = vcmp.ge.f32.partialorder %v5493_v56, 0.0 }
 0xa17   :  { %vm5518_vm5 = vcmp.ge.f32.partialorder %v5494_v34, 0.0  ;;  %vm5519_vm9 = vcmp.ge.f32.partialorder %v5495_v44, 0.0  ;;  %v5538_v41 = vmul.f32 0.2, %v5490_v58  ;;  %v5539_v6 = vmul.f32 0.2, %v5491_v22  ;;  %v5478_v37 = vpop.permute.xlu1 %5477  ;;  %v5439_v16 = vpop.permute.xlu0 %5438 }
 0xa18   :  { %v5540_v14 = vmul.f32 0.2, %v5492_v0  ;;  %v5541_v18 = vmul.f32 0.2, %v5493_v56  ;;  %v5542_v4 = vmul.f32 0.2, %v5494_v34  ;;  %v5454_v30 = vmul.f32 %v5434_v1, %v11682_v54 }
 0xa19   :  { %v5543_v28 = vmul.f32 0.2, %v5495_v44  ;;  %v5562_v36 = vsel %vm5514_vm12, %v5490_v58, %v5538_v41  ;;  %v5563_v49 = vsel %vm5515_vm13, %v5491_v22, %v5539_v6  ;;  %v5455_v32 = vmul.f32 %v5434_v1, %v11687_v62 }
 0xa1a   :  { %v5564_v57 = vsel %vm5516_vm14, %v5492_v0, %v5540_v14  ;;  %v5565_v24 = vsel %vm5517_vm15, %v5493_v56, %v5541_v18  ;;  %v5566_v9 = vsel %vm5518_vm5, %v5494_v34, %v5542_v4  ;;  %v5586_v15 = vmul.f32 %v5562_v36, %v9906_v45 }
 0xa1b   :  { %v5567_v51 = vsel %vm5519_vm9, %v5495_v44, %v5543_v28  ;;  %v5587_v63 = vmul.f32 %v5563_v49, %v9909_v46  ;;  %v5588_v27 = vmul.f32 %v5564_v57, %v13335_v20  ;;  %v5589_v21 = vmul.f32 %v5565_v24, %v13336_v48  ;;  %v5444_v22 = vpop.permute.xlu1 %5443 }
 0xa1c   :  { %v5456_v2 = vmul.f32 %v5434_v1, %v11702_v11  ;;  %v5457_v47 = vmul.f32 %v5434_v1, %v11706_v13  ;;  %v5496_v54 = vadd.f32 %v5478_v37, %v5452_v39  ;;  %v5497_v53 = vadd.f32 %v5478_v37, %v5453_v38 }
 0xa1d   :  { %v5498_v62 = vadd.f32 %v5478_v37, %v5454_v30  ;;  %v5499_v60 = vadd.f32 %v5478_v37, %v5455_v32  ;;  %v5590_v29 = vmul.f32 %v5566_v9, %v13337_v61  ;;  %v5591_v5 = vmul.f32 %v5567_v51, %v13347_v19  ;;  %v5483_v32 = vpop.permute.xlu0 %5482 }
 0xa1e   :  { %v5500_v12 = vadd.f32 %v5478_v37, %v5456_v2  ;;  %v5501_v23 = vadd.f32 %v5478_v37, %v5457_v47  ;;  %vm5520_vm10 = vcmp.ge.f32.partialorder %v5496_v54, 0.0  ;;  %vm5521_vm11 = vcmp.ge.f32.partialorder %v5497_v53, 0.0 }
 0xa1f   :  { %vm5522_vm12 = vcmp.ge.f32.partialorder %v5498_v62, 0.0  ;;  %vm5523_vm13 = vcmp.ge.f32.partialorder %v5499_v60, 0.0  ;;  %v5544_v11 = vmul.f32 0.2, %v5496_v54  ;;  %v5545_v59 = vmul.f32 0.2, %v5497_v53  ;;  %v5488_v2 = vpop.permute.xlu1 %5487 }
 0xa20   :  { %vm5524_vm14 = vcmp.ge.f32.partialorder %v5500_v12, 0.0  ;;  %vm5525_vm15 = vcmp.ge.f32.partialorder %v5501_v23, 0.0  ;;  %v5546_v13 = vmul.f32 0.2, %v5498_v62  ;;  %v5547_v17 = vmul.f32 0.2, %v5499_v60 }
 0xa21   :  { %v5548_v33 = vmul.f32 0.2, %v5500_v12  ;;  %v5458_v58 = vmul.f32 %v5439_v16, %v11652_v50  ;;  %v5549_v0 = vmul.f32 0.2, %v5501_v23  ;;  %v5568_v56 = vsel %vm5520_vm10, %v5496_v54, %v5544_v11 }
 0xa22   :  { %v5569_v34 = vsel %vm5521_vm11, %v5497_v53, %v5545_v59  ;;  %v5459_v44 = vmul.f32 %v5439_v16, %v11656_v3  ;;  %v5570_v1 = vsel %vm5522_vm12, %v5498_v62, %v5546_v13  ;;  %v5571_v41 = vsel %vm5523_vm13, %v5499_v60, %v5547_v17 }
 0xa23   :  { %v5572_v6 = vsel %vm5524_vm14, %v5500_v12, %v5548_v33  ;;  %v5592_v14 = vmul.f32 %v5568_v56, %v9906_v45  ;;  %v5573_v18 = vsel %vm5525_vm15, %v5501_v23, %v5549_v0  ;;  %v5593_v4 = vmul.f32 %v5569_v34, %v9909_v46 }
 0xa24   :  { %v5594_v39 = vmul.f32 %v5570_v1, %v13335_v20  ;;  %v5595_v28 = vmul.f32 %v5571_v41, %v13336_v48  ;;  %v5596_v50 = vmul.f32 %v5572_v6, %v13337_v61  ;;  %v5597_v36 = vmul.f32 %v5573_v18, %v13347_v19 }
 0xa25   :  { %v11824_v49 = vpack.c.bf16 %v5592_v14, %v5586_v15  ;;  %v5460_v3 = vmul.f32 %v5439_v16, %v11712_v43  ;;  %v11827_v38 = vpack.c.bf16 %v5593_v4, %v5587_v63  ;;  %v5461_v30 = vmul.f32 %v5439_v16, %v11717_v25 }
 0xa26   :  { %v11829_v57 = vpack.c.bf16 %v5594_v39, %v5588_v27  ;;  %v11831_v24 = vpack.c.bf16 %v5595_v28, %v5589_v21  ;;  %v11834_v37 = vpack.c.bf16 %v5596_v50, %v5590_v29  ;;  %v11836_v9 = vpack.c.bf16 %v5597_v36, %v5591_v5 }
 0xa27   :  { %v5462_v51 = vmul.f32 %v5439_v16, %v11732_v7  ;;  %v5463_v15 = vmul.f32 %v5439_v16, %v11735_v40  ;;  %5692 = vrot.lane.b32.xlu0 %v11824_v49, %s9217_s24  ;;  %v5464_v43 = vmul.f32 %v5444_v22, %v11660_v55  ;;  %v5465_v63 = vmul.f32 %v5444_v22, %v11665_v52 }
 0xa28   :  { %v5466_v27 = vmul.f32 %v5444_v22, %v11722_v35  ;;  %v5467_v25 = vmul.f32 %v5444_v22, %v11727_v31  ;;  %5694 = vrot.lane.b32.xlu1 %v11827_v38, %s9217_s24  ;;  %v5502_v21 = vadd.f32 %v5483_v32, %v5458_v58  ;;  %v5503_v47 = vadd.f32 %v5483_v32, %v5459_v44 }
 0xa29   :  { %v5504_v7 = vadd.f32 %v5483_v32, %v5460_v3  ;;  %v5505_v54 = vadd.f32 %v5483_v32, %v5461_v30  ;;  %v5506_v40 = vadd.f32 %v5483_v32, %v5462_v51  ;;  %v5507_v53 = vadd.f32 %v5483_v32, %v5463_v15 }
 0xa2a   :  { %v5508_v62 = vadd.f32 %v5488_v2, %v5464_v43  ;;  %v5509_v60 = vadd.f32 %v5488_v2, %v5465_v63  ;;  %vm5526_vm5 = vcmp.ge.f32.partialorder %v5502_v21, 0.0  ;;  %vm5527_vm9 = vcmp.ge.f32.partialorder %v5503_v47, 0.0 }
 0xa2b   :  { %vm5528_vm10 = vcmp.ge.f32.partialorder %v5504_v7, 0.0  ;;  %vm5529_vm11 = vcmp.ge.f32.partialorder %v5505_v54, 0.0  ;;  %5812 = vrot.lane.b32.xlu0 %v11824_v49, %s9218_s18  ;;  %vm5530_vm12 = vcmp.ge.f32.partialorder %v5506_v40, 0.0  ;;  %vm5531_vm13 = vcmp.ge.f32.partialorder %v5507_v53, 0.0 }
 0xa2c   :  { %v5550_v55 = vmul.f32 0.2, %v5502_v21  ;;  %v5551_v52 = vmul.f32 0.2, %v5503_v47  ;;  %5814 = vrot.lane.b32.xlu1 %v11827_v38, %s9218_s18  ;;  %v5552_v35 = vmul.f32 0.2, %v5504_v7  ;;  %v5510_v5 = vadd.f32 %v5488_v2, %v5466_v27 }
 0xa2d   :  { %v5553_v31 = vmul.f32 0.2, %v5505_v54  ;;  %v5554_v29 = vmul.f32 0.2, %v5506_v40  ;;  %v5555_v12 = vmul.f32 0.2, %v5507_v53  ;;  %v5511_v11 = vadd.f32 %v5488_v2, %v5467_v25 }
 0xa2e   :  { %v5574_v23 = vsel %vm5526_vm5, %v5502_v21, %v5550_v55  ;;  %v5575_v16 = vsel %vm5527_vm9, %v5503_v47, %v5551_v52  ;;  %v5468_v59 = vmul.f32 %v5444_v22, %v11742_v8  ;;  %v5469_v13 = vmul.f32 %v5444_v22, %v11747_v26 }
 0xa2f   :  { %v5576_v17 = vsel %vm5528_vm10, %v5504_v7, %v5552_v35  ;;  %5932 = vrot.lane.b32.xlu0 %v11824_v49, %s9219_s19  ;;  %v5577_v33 = vsel %vm5529_vm11, %v5505_v54, %v5553_v31  ;;  %v5578_v58 = vsel %vm5530_vm12, %v5506_v40, %v5554_v29  ;;  %v5579_v0 = vsel %vm5531_vm13, %v5507_v53, %v5555_v12  ;;  %v11989_v35 = vld [vmem:[%s13291_s1 + $0x94] ss:$12 sps:$4 sm:$0xff]  }
 0xa30   :  { %v5598_v56 = vmul.f32 %v5574_v23, %v9906_v45  ;;  %5934 = vrot.lane.b32.xlu1 %v11827_v38, %s9219_s19  ;;  %v5599_v8 = vmul.f32 %v5575_v16, %v9909_v46  ;;  %v5600_v26 = vmul.f32 %v5576_v17, %v13335_v20  ;;  %v5512_v22 = vadd.f32 %v5488_v2, %v5468_v59 }
 0xa31   :  { %v5513_v34 = vadd.f32 %v5488_v2, %v5469_v13  ;;  %vm5532_vm14 = vcmp.ge.f32.partialorder %v5508_v62, 0.0  ;;  %vm5533_vm15 = vcmp.ge.f32.partialorder %v5509_v60, 0.0  ;;  %vm5534_vm5 = vcmp.ge.f32.partialorder %v5510_v5, 0.0  ;;  %6827 = vmatprep.mubr.bf16.mxu1 %v11989_v35  ;;  %6933 = vmatprep.mubr.bf16.mxu0 %v11989_v35 }
 0xa32   :  { %vm5535_vm9 = vcmp.ge.f32.partialorder %v5511_v11, 0.0  ;;  %vm5536_vm10 = vcmp.ge.f32.partialorder %v5512_v22, 0.0  ;;  %v5556_v44 = vmul.f32 0.2, %v5508_v62  ;;  %v5557_v1 = vmul.f32 0.2, %v5509_v60 }
 0xa33   :  { %vm5537_vm11 = vcmp.ge.f32.partialorder %v5513_v34, 0.0  ;;  %6052 = vrot.lane.b32.xlu0 %v11824_v49, %s9220_s25  ;;  %v5601_v41 = vmul.f32 %v5577_v33, %v13336_v48  ;;  %v5558_v6 = vmul.f32 0.2, %v5510_v5  ;;  %v5559_v14 = vmul.f32 0.2, %v5511_v11 }
 0xa34   :  { %v5560_v18 = vmul.f32 0.2, %v5512_v22  ;;  %6054 = vrot.lane.b32.xlu1 %v11827_v38, %s9220_s25  ;;  %v5602_v4 = vmul.f32 %v5578_v58, %v13337_v61  ;;  %v5561_v39 = vmul.f32 0.2, %v5513_v34  ;;  %v5580_v28 = vsel %vm5532_vm14, %v5508_v62, %v5556_v44  ;;  %v5691_v62 = vpop.permute.xlu0 %5690 }
 0xa35   :  { %v5581_v50 = vsel %vm5533_vm15, %v5509_v60, %v5557_v1  ;;  %v5582_v36 = vsel %vm5534_vm5, %v5510_v5, %v5558_v6  ;;  %v5583_v3 = vsel %vm5535_vm9, %v5511_v11, %v5559_v14  ;;  %v5604_v32 = vmul.f32 %v5580_v28, %v9906_v45  ;;  %v11972_v60 = vpop.permute.xlu1 %5704 }
 0xa36   :  { %v5584_v30 = vsel %vm5536_vm10, %v5512_v22, %v5560_v18  ;;  %v5585_v51 = vsel %vm5537_vm11, %v5513_v34, %v5561_v39  ;;  %v5605_v15 = vmul.f32 %v5581_v50, %v9909_v46  ;;  %v5606_v2 = vmul.f32 %v5582_v36, %v13335_v20 }
 0xa37   :  { %v5607_v43 = vmul.f32 %v5583_v3, %v13336_v48  ;;  %6220 = vrot.lane.b32.xlu0 %v11827_v38, %s9223_s16  ;;  %v5603_v63 = vmul.f32 %v5579_v0, %v13347_v19  ;;  %v5608_v27 = vmul.f32 %v5584_v30, %v13337_v61  ;;  %v5609_v25 = vmul.f32 %v5585_v51, %v13347_v19 }
 0xa38   :  { %v11886_v21 = vpack.c.bf16 %v5604_v32, %v5598_v56  ;;  %6222 = vrot.lane.b32.xlu1 %v11829_v57, %s9223_s16  ;;  %v11890_v47 = vpack.c.bf16 %v5605_v15, %v5599_v8  ;;  %v11892_v7 = vpack.c.bf16 %v5606_v2, %v5600_v26  ;;  %v11980_v55 = vpop.permute.xlu0 %5810  ;;  %vm13349_vm12 = vcmask 261120  }
 0xa39   :  { %v11894_v54 = vpack.c.bf16 %v5607_v43, %v5601_v41  ;;  %v11896_v40 = vpack.c.bf16 %v5608_v27, %v5602_v4  ;;  %v11898_v53 = vpack.c.bf16 %v5609_v25, %v5603_v63  ;;  %v11984_v52 = vpop.permute.xlu1 %5824  ;;  %vm13350_vm13 = vmmov %vm13349_vm12 }
 0xa3a   :  { %vm13351_vm14 = vmmov %vm13349_vm12 }
 0xa3b   :  { %6218 = vrot.lane.b32.xlu0 %v11824_v49, %s9223_s16  ;;  %vm13352_vm15 = vmmov %vm13349_vm12 }
 0xa3c   :  { %6342 = vrot.lane.b32.xlu1 %v11829_v57, %s9224_s17  ;;  %v11996_v31 = vpop.permute.xlu0 %5930  ;;  %vm13353_vm5 = vmmov %vm13349_vm12 }
 0xa3d   :  { %v11999_v29 = vpop.permute.xlu1 %5944  ;;  %vm13354_vm9 = vmmov %vm13353_vm5 }
 0xa3f   :  { %6340 = vrot.lane.b32.xlu0 %v11827_v38, %s9224_s17 }
 0xa40   :  { %6462 = vrot.lane.b32.xlu1 %v11829_v57, %s9225_s20  ;;  %v12007_v5 = vpop.permute.xlu0 %6050 }
 0xa41   :  { %v12011_v12 = vpop.permute.xlu1 %6064 }
 0xa43   :  { %6338 = vrot.lane.b32.xlu0 %v11824_v49, %s9224_s17 }
 0xa44   :  { %6582 = vrot.lane.b32.xlu1 %v11829_v57, %s9221_s26 }
 0xa47   :  { %6460 = vrot.lane.b32.xlu0 %v11827_v38, %s9225_s20 }
 0xa48   :  { %5696 = vrot.lane.b32.xlu1 %v11829_v57, %s9217_s24 }
 0xa4b   :  { %6458 = vrot.lane.b32.xlu0 %v11824_v49, %s9225_s20 }
 0xa4c   :  { %5706 = vrot.lane.b32.xlu1 %v11886_v21, %s9217_s24 }
 0xa4f   :  { %6580 = vrot.lane.b32.xlu0 %v11827_v38, %s9221_s26 }
 0xa50   :  { %5702 = vrot.lane.b32.xlu1 %v11836_v9, %s9217_s24 }
 0xa53   :  { %6578 = vrot.lane.b32.xlu0 %v11824_v49, %s9221_s26 }
 0xa54   :  { %5826 = vrot.lane.b32.xlu1 %v11886_v21, %s9218_s18 }
 0xa57   :  { %5698 = vrot.lane.b32.xlu0 %v11831_v24, %s9217_s24 }
 0xa58   :  { %5818 = vrot.lane.b32.xlu1 %v11831_v24, %s9218_s18 }
 0xa5b   :  { %5708 = vrot.lane.b32.xlu0 %v11890_v47, %s9217_s24 }
 0xa5c   :  { %5946 = vrot.lane.b32.xlu1 %v11886_v21, %s9219_s19 }
 0xa5f   :  { %5700 = vrot.lane.b32.xlu0 %v11834_v37, %s9217_s24 }
 0xa60   :  { %5822 = vrot.lane.b32.xlu1 %v11836_v9, %s9218_s18 }
 0xa63   :  { %5828 = vrot.lane.b32.xlu0 %v11890_v47, %s9218_s18 }
 0xa64   :  { %6066 = vrot.lane.b32.xlu1 %v11886_v21, %s9220_s25 }
 0xa67   :  { %5816 = vrot.lane.b32.xlu0 %v11829_v57, %s9218_s18 }
 0xa68   :  { %5938 = vrot.lane.b32.xlu1 %v11831_v24, %s9219_s19 }
 0xa6b   :  { %5948 = vrot.lane.b32.xlu0 %v11890_v47, %s9219_s19 }
 0xa6c   :  { %5942 = vrot.lane.b32.xlu1 %v11836_v9, %s9219_s19 }
 0xa6f   :  { %5820 = vrot.lane.b32.xlu0 %v11834_v37, %s9218_s18 }
 0xa70   :  { %6058 = vrot.lane.b32.xlu1 %v11831_v24, %s9220_s25 }
 0xa73   :  { %6068 = vrot.lane.b32.xlu0 %v11890_v47, %s9220_s25 }
 0xa74   :  { %6234 = vrot.lane.b32.xlu1 %v11890_v47, %s9223_s16 }
 0xa77   :  { %5936 = vrot.lane.b32.xlu0 %v11829_v57, %s9219_s19 }
 0xa78   :  { %6062 = vrot.lane.b32.xlu1 %v11836_v9, %s9220_s25 }
 0xa7b   :  { %5940 = vrot.lane.b32.xlu0 %v11834_v37, %s9219_s19 }
 0xa7c   :  { %6232 = vrot.lane.b32.xlu1 %v11886_v21, %s9223_s16 }
 0xa7f   :  { %6056 = vrot.lane.b32.xlu0 %v11829_v57, %s9220_s25 }
 0xa80   :  { %6354 = vrot.lane.b32.xlu1 %v11890_v47, %s9224_s17 }
 0xa83   :  { %6236 = vrot.lane.b32.xlu0 %v11892_v7, %s9223_s16 }
 0xa84   :  { %6226 = vrot.lane.b32.xlu1 %v11834_v37, %s9223_s16 }
 0xa87   :  { %6060 = vrot.lane.b32.xlu0 %v11834_v37, %s9220_s25 }
 0xa88   :  { %6352 = vrot.lane.b32.xlu1 %v11886_v21, %s9224_s17 }
 0xa8b   :  { %6356 = vrot.lane.b32.xlu0 %v11892_v7, %s9224_s17 }
 0xa8c   :  { %6474 = vrot.lane.b32.xlu1 %v11890_v47, %s9225_s20 }
 0xa8f   :  { %6224 = vrot.lane.b32.xlu0 %v11831_v24, %s9223_s16 }
 0xa90   :  { %6230 = vrot.lane.b32.xlu1 %v13348_v42, %s9223_s16 }
 0xa93   :  { %6476 = vrot.lane.b32.xlu0 %v11892_v7, %s9225_s20 }
 0xa94   :  { %6472 = vrot.lane.b32.xlu1 %v11886_v21, %s9225_s20 }
 0xa97   :  { %6228 = vrot.lane.b32.xlu0 %v11836_v9, %s9223_s16 }
 0xa98   :  { %6244 = vrot.lane.b32.xlu1 %v13348_v42, %s9223_s16 }
 0xa99   :  { %v5693_v23 = vpop.permute.xlu0 %5692 }
 0xa9a   :  { %v5695_v16 = vpop.permute.xlu1 %5694  ;;  %v5718_v11 = vsel %vm170_vm0, %v5691_v62, %v5693_v23 }
 0xa9b   :  { %6344 = vrot.lane.b32.xlu0 %v11831_v24, %s9224_s17  ;;  %v5719_v59 = vsel %vm170_vm0, %v5693_v23, %v5695_v16 }
 0xa9c   :  { %6346 = vrot.lane.b32.xlu1 %v11834_v37, %s9224_s17  ;;  %6795 = vmatprep.subr.bf16.mxu1 %v5719_v59 }
 0xa9d   :  { %6796 = vmatpush1.bf16.msra.mxu1 %v5718_v11  ;;  %v12023_v13 = vpop.permute.xlu0 %5812 }
 0xa9e   :  { %v12025_v17 = vpop.permute.xlu1 %5814 }
 0xa9f   :  { %6348 = vrot.lane.b32.xlu0 %v11836_v9, %s9224_s17  ;;  %v5839_v25 = vsel %vm291_vm1, %v12023_v13, %v12025_v17 }
 0xaa0   :  { %6594 = vrot.lane.b32.xlu1 %v11890_v47, %s9221_s26 }
 0xaa1   :  { %v12031_v33 = vpop.permute.xlu0 %5932 }
 0xaa2   :  { %v12033_v58 = vpop.permute.xlu1 %5934 }
 0xaa3   :  { %6596 = vrot.lane.b32.xlu0 %v11892_v7, %s9221_s26 }
 0xaa4   :  { %6592 = vrot.lane.b32.xlu1 %v11886_v21, %s9221_s26 }
 0xaa5   :  { %v12039_v0 = vpop.permute.xlu0 %6052 }
 0xaa6   :  { %v12041_v56 = vpop.permute.xlu1 %6054 }
 0xaa7   :  { %5710 = vrot.lane.b32.xlu0 %v11892_v7, %s9217_s24 }
 0xaa8   :  { %5712 = vrot.lane.b32.xlu1 %v11894_v54, %s9217_s24 }
 0xaa9   :  { %v12047_v8 = vpop.permute.xlu0 %6220 }
 0xaaa   :  { %v12049_v26 = vpop.permute.xlu1 %6222 }
 0xaab   :  { %5714 = vrot.lane.b32.xlu0 %v11896_v40, %s9217_s24 }
 0xaac   :  { %5716 = vrot.lane.b32.xlu1 %v11898_v53, %s9217_s24 }
 0xaad   :  { %v12055_v22 = vpop.permute.xlu0 %6218 }
 0xaae   :  { %v12057_v34 = vpop.permute.xlu1 %6342 }
 0xaaf   :  { %5830 = vrot.lane.b32.xlu0 %v11892_v7, %s9218_s18 }
 0xab0   :  { %5832 = vrot.lane.b32.xlu1 %v11894_v54, %s9218_s18 }
 0xab1   :  { %v12063_v44 = vpop.permute.xlu0 %6340 }
 0xab2   :  { %v12065_v1 = vpop.permute.xlu1 %6462 }
 0xab3   :  { %5834 = vrot.lane.b32.xlu0 %v11896_v40, %s9218_s18 }
 0xab4   :  { %5836 = vrot.lane.b32.xlu1 %v11898_v53, %s9218_s18 }
 0xab5   :  { %v12071_v41 = vpop.permute.xlu0 %6338 }
 0xab6   :  { %v12073_v6 = vpop.permute.xlu1 %6582 }
 0xab7   :  { %5950 = vrot.lane.b32.xlu0 %v11892_v7, %s9219_s19 }
 0xab8   :  { %5952 = vrot.lane.b32.xlu1 %v11894_v54, %s9219_s19 }
 0xab9   :  { %v12079_v14 = vpop.permute.xlu0 %6460 }
 0xaba   :  { %v5697_v18 = vpop.permute.xlu1 %5696 }
 0xabb   :  { %5954 = vrot.lane.b32.xlu0 %v11896_v40, %s9219_s19  ;;  %v5720_v15 = vsel %vm170_vm0, %v5695_v16, %v5697_v18 }
 0xabc   :  { %5956 = vrot.lane.b32.xlu1 %v11898_v53, %s9219_s19 }
 0xabd   :  { %v12085_v4 = vpop.permute.xlu0 %6458 }
 0xabe   :  { %v5707_v39 = vpop.permute.xlu1 %5706 }
 0xabf   :  { %6070 = vrot.lane.b32.xlu0 %v11892_v7, %s9220_s25  ;;  %v5724_v27 = vsel %vm170_vm0, %v11972_v60, %v5707_v39  ;;  %v5838_v60 = vsel %vm291_vm1, %v11980_v55, %v12023_v13  ;;  %v5959_v55 = vsel %vm412_vm2, %v12031_v33, %v12033_v58 }
 0xac0   :  { %6072 = vrot.lane.b32.xlu1 %v11894_v54, %s9220_s25 }
 0xac1   :  { %v12091_v28 = vpop.permute.xlu0 %6580 }
 0xac2   :  { %v12093_v50 = vpop.permute.xlu1 %5702 }
 0xac3   :  { %6074 = vrot.lane.b32.xlu0 %v11896_v40, %s9220_s25 }
 0xac4   :  { %6076 = vrot.lane.b32.xlu1 %v11898_v53, %s9220_s25 }
 0xac5   :  { %v12099_v36 = vpop.permute.xlu0 %6578 }
 0xac6   :  { %v5827_v3 = vpop.permute.xlu1 %5826 }
 0xac7   :  { %6464 = vrot.lane.b32.xlu0 %v11831_v24, %s9225_s20 }
 0xac8   :  { %6350 = vrot.lane.b32.xlu1 %v13348_v42, %s9224_s17 }
 0xac9   :  { %v12105_v30 = vpop.permute.xlu0 %5698 }
 0xaca   :  { %v12107_v32 = vpop.permute.xlu1 %5818  ;;  %v5721_v51 = vsel %vm170_vm0, %v5697_v18, %v12105_v30  ;;  %v5844_v18 = vsel %vm291_vm1, %v11984_v52, %v5827_v3  ;;  %v5958_v52 = vsel %vm412_vm2, %v11996_v31, %v12031_v33  ;;  %v6079_v31 = vsel %vm533_vm3, %v12039_v0, %v12041_v56 }
 0xacb   :  { %6238 = vrot.lane.b32.xlu0 %v11894_v54, %s9223_s16  ;;  %6901 = vmatprep.subr.bf16.mxu0 %v5721_v51 }
 0xacc   :  { %6364 = vrot.lane.b32.xlu1 %v13348_v42, %s9224_s17  ;;  %6902 = vmatpush1.bf16.msra.mxu0 %v5720_v15 }
 0xacd   :  { %v12116_v2 = vpop.permute.xlu0 %5708 }
 0xace   :  { %v5947_v43 = vpop.permute.xlu1 %5946  ;;  %v5725_v63 = vsel %vm170_vm0, %v5707_v39, %v12116_v2 }
 0xacf   :  { %6468 = vrot.lane.b32.xlu0 %v11836_v9, %s9225_s20  ;;  %6797 = vmatprep.subr.bf16.mxu1 %v5725_v63  ;;  %v5964_v63 = vsel %vm412_vm2, %v11999_v29, %v5947_v43  ;;  %v6078_v29 = vsel %vm533_vm3, %v12007_v5, %v12039_v0 }
 0xad0   :  { %6240 = vrot.lane.b32.xlu1 %v11896_v40, %s9223_s16  ;;  %6798 = vmatpush1.bf16.msra.mxu1 %v5724_v27 }
 0xad1   :  { %6799 = vmatprep.subr.bf16.mxu1 %v5839_v25  ;;  %v12129_v62 = vpop.permute.xlu0 %5700 }
 0xad2   :  { %v12131_v23 = vpop.permute.xlu1 %5822 }
 0xad3   :  { %6242 = vrot.lane.b32.xlu0 %v11898_v53, %s9223_s16 }
 0xad4   :  { %6466 = vrot.lane.b32.xlu1 %v11834_v37, %s9225_s20  ;;  %6800 = vmatpush1.bf16.msra.mxu1 %v5838_v60 }
 0xad5   :  { %v12140_v16 = vpop.permute.xlu0 %5828 }
 0xad6   :  { %v6067_v11 = vpop.permute.xlu1 %6066  ;;  %v5845_v59 = vsel %vm291_vm1, %v5827_v3, %v12140_v16 }
 0xad7   :  { %6358 = vrot.lane.b32.xlu0 %v11894_v54, %s9224_s17  ;;  %6801 = vmatprep.subr.bf16.mxu1 %v5845_v59  ;;  %v6084_v59 = vsel %vm533_vm3, %v12011_v12, %v6067_v11 }
 0xad8   :  { %6360 = vrot.lane.b32.xlu1 %v11896_v40, %s9224_s17  ;;  %6802 = vmatpush1.bf16.msra.mxu1 %v5844_v18 }
 0xad9   :  { %6803 = vmatprep.subr.bf16.mxu1 %v5959_v55  ;;  %v12153_v13 = vpop.permute.xlu0 %5816 }
 0xada   :  { %v12155_v39 = vpop.permute.xlu1 %5938 }
 0xadb   :  { %6362 = vrot.lane.b32.xlu0 %v11898_v53, %s9224_s17 }
 0xadc   :  { %6470 = vrot.lane.b32.xlu1 %v13348_v42, %s9225_s20  ;;  %6804 = vmatpush1.bf16.msra.mxu1 %v5958_v52 }
 0xadd   :  { %v12164_v3 = vpop.permute.xlu0 %5948 }
 0xade   :  { %v12166_v51 = vpop.permute.xlu1 %5942  ;;  %v5965_v15 = vsel %vm412_vm2, %v5947_v43, %v12164_v3 }
 0xadf   :  { %6478 = vrot.lane.b32.xlu0 %v11894_v54, %s9225_s20  ;;  %6805 = vmatprep.subr.bf16.mxu1 %v5965_v15 }
 0xae0   :  { %6480 = vrot.lane.b32.xlu1 %v11896_v40, %s9225_s20  ;;  %6806 = vmatpush1.bf16.msra.mxu1 %v5964_v63 }
 0xae1   :  { %6807 = vmatprep.subr.bf16.mxu1 %v6079_v31  ;;  %v12179_v33 = vpop.permute.xlu0 %5820  ;;  %v6366_v31 = vsel %vm823_vm7, %v12071_v41, %v12063_v44 }
 0xae2   :  { %v12181_v27 = vpop.permute.xlu1 %6058 }
 0xae3   :  { %6482 = vrot.lane.b32.xlu0 %v11898_v53, %s9225_s20 }
 0xae4   :  { %6484 = vrot.lane.b32.xlu1 %v13348_v42, %s9225_s20  ;;  %6808 = vmatpush1.bf16.msra.mxu1 %v6078_v29 }
 0xae5   :  { %v12190_v43 = vpop.permute.xlu0 %6068 }
 0xae6   :  { %v6235_v25 = vpop.permute.xlu1 %6234  ;;  %v6085_v60 = vsel %vm533_vm3, %v6067_v11, %v12190_v43 }
 0xae7   :  { %6584 = vrot.lane.b32.xlu0 %v11831_v24, %s9221_s26  ;;  %6809 = vmatprep.subr.bf16.mxu1 %v6085_v60 }
 0xae8   :  { %6586 = vrot.lane.b32.xlu1 %v11834_v37, %s9221_s26  ;;  %6810 = vmatpush1.bf16.msra.mxu1 %v6084_v59 }
 0xae9   :  { %6811 = vmatprep.subr.bf16.mxu1 %v11827_v38  ;;  %v12201_v5 = vpop.permute.xlu0 %5936  ;;  %v6247_v38 = vsel %vm702_vm6, %v12047_v8, %v12049_v26 }
 0xaea   :  { %v12203_v0 = vpop.permute.xlu1 %6062 }
 0xaeb   :  { %6588 = vrot.lane.b32.xlu0 %v11836_v9, %s9221_s26 }
 0xaec   :  { %6590 = vrot.lane.b32.xlu1 %v13348_v42, %s9221_s26  ;;  %6812 = vmatpush1.bf16.msra.mxu1 %v11824_v49 }
 0xaed   :  { %6813 = vmatprep.subr.bf16.mxu1 %v11890_v47  ;;  %v12211_v12 = vpop.permute.xlu0 %5940  ;;  %v6246_v47 = vsel %vm702_vm6, %v12055_v22, %v12047_v8  ;;  %v6367_v8 = vsel %vm823_vm7, %v12063_v44, %v12057_v34  ;;  %v6486_v44 = vsel %vm944_vm8, %v12085_v4, %v12079_v14  ;;  %v12276_v4 = vld [vmem:[%s13291_s1 + $0xac] ss:$12 sps:$4 sm:$0xff]  }
 0xaee   :  { %v6233_v11 = vpop.permute.xlu1 %6232 }
 0xaef   :  { %6598 = vrot.lane.b32.xlu0 %v11894_v54, %s9221_s26  ;;  %v6252_v15 = vsel %vm702_vm6, %v6233_v11, %v6235_v25  ;;  %v6487_v11 = vsel %vm944_vm8, %v12079_v14, %v12065_v1  ;;  %v6607_v14 = vsel %vm1065_vm4, %v12091_v28, %v12073_v6 }
 0xaf0   :  { %6600 = vrot.lane.b32.xlu1 %v11896_v40, %s9221_s26  ;;  %6814 = vmatpush1.bf16.msra.mxu1 %v11886_v21 }
 0xaf1   :  { %6815 = vmatprep.subr.bf16.mxu1 %v6247_v38  ;;  %v12221_v18 = vpop.permute.xlu0 %6056 }
 0xaf2   :  { %v6355_v49 = vpop.permute.xlu1 %6354 }
 0xaf3   :  { %6602 = vrot.lane.b32.xlu0 %v11898_v53, %s9221_s26 }
 0xaf4   :  { %6604 = vrot.lane.b32.xlu1 %v13348_v42, %s9221_s26  ;;  %6816 = vmatpush1.bf16.msra.mxu1 %v6246_v47 }
 0xaf5   :  { %v12230_v21 = vpop.permute.xlu0 %6236 }
 0xaf6   :  { %v12232_v55 = vpop.permute.xlu1 %6226  ;;  %v6253_v52 = vsel %vm702_vm6, %v6235_v25, %v12230_v21 }
 0xaf7   :  { %6817 = vmatprep.subr.bf16.mxu1 %v6253_v52 }
 0xaf8   :  { %6818 = vmatpush1.bf16.msra.mxu1 %v6252_v15 }
 0xaf9   :  { %6819 = vmatprep.subr.bf16.mxu1 %v6367_v8  ;;  %v12240_v22 = vpop.permute.xlu0 %6060  ;;  %v12268_v8 = vld [vmem:[%s13291_s1 + $0x90] ss:$12 sps:$4 sm:$0xff]  }
 0xafa   :  { %v6353_v63 = vpop.permute.xlu1 %6352 }
 0xafb   :  { %v6372_v59 = vsel %vm823_vm7, %v6353_v63, %v6355_v49 }
 0xafc   :  { %6820 = vmatpush1.bf16.msra.mxu1 %v6366_v31 }
 0xafd   :  { %v12245_v29 = vpop.permute.xlu0 %6356 }
 0xafe   :  { %v6475_v60 = vpop.permute.xlu1 %6474  ;;  %v6373_v25 = vsel %vm823_vm7, %v6355_v49, %v12245_v29 }
 0xaff   :  { %6821 = vmatprep.subr.bf16.mxu1 %v6373_v25 }
 0xb00   :  { %6822 = vmatpush1.bf16.msra.mxu1 %v6372_v59 }
 0xb01   :  { %6823 = vmatprep.subr.bf16.mxu1 %v6487_v11  ;;  %v12253_v38 = vpop.permute.xlu0 %6224  ;;  %v12294_v11 = vld [vmem:[%s13291_s1 + $0xa8] ss:$12 sps:$4 sm:$0xff]  }
 0xb02   :  { %v12255_v47 = vpop.permute.xlu1 %6230 }
 0xb04   :  { %6824 = vmatpush1.bf16.msra.mxu1 %v6486_v44 }
 0xb05   :  { %v12260_v41 = vpop.permute.xlu0 %6476 }
 0xb06   :  { %v6473_v52 = vpop.permute.xlu1 %6472  ;;  %v6493_v49 = vsel %vm944_vm8, %v6475_v60, %v12260_v41 }
 0xb07   :  { %v6492_v15 = vsel %vm944_vm8, %v6473_v52, %v6475_v60  ;;  %6825 = vmatprep.subr.bf16.mxu1 %v6493_v49  ;;  %v6606_v60 = vsel %vm1065_vm4, %v12099_v36, %v12091_v28 }
 0xb08   :  { %6826 = vmatpush1.bf16.msra.mxu1 %v6492_v15 }
 0xb09   :  { %6848 = vmatprep.subr.bf16.mxu1 %v6607_v14  ;;  %v12278_v63 = vpop.permute.xlu0 %6228  ;;  %v12308_v14 = vld [vmem:[%s13291_s1 + $0x98] ss:$12 sps:$4 sm:$0xff]  }
 0xb0a   :  { %v12280_v31 = vpop.permute.xlu1 %6244 }
 0xb0b   :  { %6828 = vmatmul.mubr.bf16.vlgmr.msra.gmra.mrb[48].mxu1 %v12268_v8 }
 0xb0c   :  { %6849 = vmatpush1.bf16.msra.mxu1 %v6606_v60  ;;  %6837 = vmatprep.mubr.bf16.mxu1 %v12276_v4  ;;  %v5723_v60 = vsel %vm170_vm0, %v12129_v62, %v12093_v50  ;;  %v5841_v50 = vsel %vm291_vm1, %v12153_v13, %v12107_v32 }
 0xb0d   :  { %v12287_v25 = vpop.permute.xlu0 %6344 }
 0xb0e   :  { %v12289_v59 = vpop.permute.xlu1 %6346 }
 0xb11   :  { %v12296_v44 = vpop.permute.xlu0 %6348 }
 0xb12   :  { %v6595_v52 = vpop.permute.xlu1 %6594 }
 0xb13   :  { %6838 = vmatmul.mubr.bf16.gmra.mrb[52].mxu1 %v12294_v11 }
 0xb14   :  { %6880 = vmatprep.mubr.bf16.mxu1 %v13341_v10 }
 0xb15   :  { %v12300_v28 = vpop.permute.xlu0 %6596 }
 0xb16   :  { %v6593_v36 = vpop.permute.xlu1 %6592  ;;  %v6613_v49 = vsel %vm1065_vm4, %v6595_v52, %v12300_v28 }
 0xb17   :  { %v6612_v15 = vsel %vm1065_vm4, %v6593_v36, %v6595_v52  ;;  %6850 = vmatprep.subr.bf16.mxu1 %v6613_v49  ;;  %v5722_v36 = vsel %vm170_vm0, %v12105_v30, %v12129_v62  ;;  %v12330_v30 = vld [vmem:[%s13291_s1 + $0xb0] ss:$12 sps:$4 sm:$0xff]   ;;  %v5843_v62 = vsel %vm291_vm1, %v12179_v33, %v12131_v23  ;;  %v5961_v23 = vsel %vm412_vm2, %v12201_v5, %v12155_v39 }
 0xb18   :  { %6851 = vmatpush1.bf16.msra.mxu1 %v6612_v15 }
 0xb19   :  { %7007 = vmatprep.subr.bf16.mxu1 %v5723_v60  ;;  %v5711_v42 = vpop.permute.xlu0 %5710 }
 0xb1a   :  { %v5713_v19 = vpop.permute.xlu1 %5712  ;;  %v5726_v61 = vsel %vm170_vm0, %v12116_v2, %v5711_v42 }
 0xb1b   :  { %9020 = vmatmul.mubr.msk.bf16.vlgmr.msra.gmra.mrb[48].mxu1 %vm13349_vm12, %v12308_v14  ;;  %v5727_v52 = vsel %vm170_vm0, %v5711_v42, %v5713_v19 }
 0xb1c   :  { %6903 = vmatprep.subr.bf16.mxu0 %v5727_v52  ;;  %7008 = vmatpush1.bf16.msra.mxu1 %v5722_v36 }
 0xb1d   :  { %6904 = vmatpush1.bf16.msra.mxu0 %v5726_v61  ;;  %v5715_v49 = vpop.permute.xlu0 %5714  ;;  %6890 = vmatprep.mubr.bf16.mxu1 %v13341_v10  ;;  %v5840_v61 = vsel %vm291_vm1, %v12025_v17, %v12153_v13  ;;  %v5842_v17 = vsel %vm291_vm1, %v12107_v32, %v12179_v33  ;;  %v5960_v32 = vsel %vm412_vm2, %v12033_v58, %v12201_v5 }
 0xb1e   :  { %v5717_v2 = vpop.permute.xlu1 %5716  ;;  %6905 = vmatprep.subr.bf16.mxu0 %v5841_v50  ;;  %v5728_v15 = vsel %vm170_vm0, %v5713_v19, %v5715_v49  ;;  %v6081_v58 = vsel %vm533_vm3, %v12221_v18, %v12181_v27 }
 0xb1f   :  { %v5729_v42 = vsel %vm170_vm0, %v5715_v49, %v5717_v2 }
 0xb20   :  { %7009 = vmatprep.subr.bf16.mxu1 %v5729_v42 }
 0xb21   :  { %6906 = vmatpush1.bf16.msra.mxu0 %v5840_v61  ;;  %7010 = vmatpush1.bf16.msra.mxu1 %v5728_v15  ;;  %v5831_v60 = vpop.permute.xlu0 %5830  ;;  %v5962_v61 = vsel %vm412_vm2, %v12155_v39, %v12211_v12  ;;  %v6083_v39 = vsel %vm533_vm3, %v12240_v22, %v12203_v0 }
 0xb22   :  { %v5833_v19 = vpop.permute.xlu1 %5832  ;;  %7011 = vmatprep.subr.bf16.mxu1 %v5843_v62  ;;  %v5846_v52 = vsel %vm291_vm1, %v12140_v16, %v5831_v60 }
 0xb23   :  { %9021 = vmatmul.mubr.msk.bf16.gmra.mrb[52].mxu1 %vm13350_vm13, %v12330_v30  ;;  %v5847_v36 = vsel %vm291_vm1, %v5831_v60, %v5833_v19  ;;  %v6080_v60 = vsel %vm533_vm3, %v12041_v56, %v12221_v18 }
 0xb24   :  { %6907 = vmatprep.subr.bf16.mxu0 %v5847_v36  ;;  %7039 = vmatprep.mubr.bf16.mxu1 %v11989_v35  ;;  %v5963_v35 = vsel %vm412_vm2, %v12211_v12, %v12166_v51 }
 0xb25   :  { %6908 = vmatpush1.bf16.msra.mxu0 %v5846_v52  ;;  %7012 = vmatpush1.bf16.msra.mxu1 %v5842_v17  ;;  %v5835_v13 = vpop.permute.xlu0 %5834  ;;  %v6082_v17 = vsel %vm533_vm3, %v12181_v27, %v12240_v22 }
 0xb26   :  { %v5837_v16 = vpop.permute.xlu1 %5836  ;;  %6909 = vmatprep.subr.bf16.mxu0 %v5961_v23  ;;  %v5848_v50 = vsel %vm291_vm1, %v5833_v19, %v5835_v13 }
 0xb27   :  { %v5849_v49 = vsel %vm291_vm1, %v5835_v13, %v5837_v16 }
 0xb28   :  { %7013 = vmatprep.subr.bf16.mxu1 %v5849_v49 }
 0xb29   :  { %6910 = vmatpush1.bf16.msra.mxu0 %v5960_v32  ;;  %7014 = vmatpush1.bf16.msra.mxu1 %v5848_v50  ;;  %v5951_v33 = vpop.permute.xlu0 %5950 }
 0xb2a   :  { %v5953_v2 = vpop.permute.xlu1 %5952  ;;  %7015 = vmatprep.subr.bf16.mxu1 %v5963_v35  ;;  %v5966_v15 = vsel %vm412_vm2, %v12164_v3, %v5951_v33  ;;  %v6370_v35 = vsel %vm823_vm7, %v12289_v59, %v12296_v44 }
 0xb2b   :  { %v5967_v42 = vsel %vm412_vm2, %v5951_v33, %v5953_v2 }
 0xb2c   :  { %6911 = vmatprep.subr.bf16.mxu0 %v5967_v42 }
 0xb2d   :  { %6912 = vmatpush1.bf16.msra.mxu0 %v5966_v15  ;;  %7016 = vmatpush1.bf16.msra.mxu1 %v5962_v61  ;;  %v5955_v51 = vpop.permute.xlu0 %5954 }
 0xb2e   :  { %v5957_v5 = vpop.permute.xlu1 %5956  ;;  %6913 = vmatprep.subr.bf16.mxu0 %v6081_v58  ;;  %v5968_v62 = vsel %vm412_vm2, %v5953_v2, %v5955_v51 }
 0xb2f   :  { %v5969_v3 = vsel %vm412_vm2, %v5955_v51, %v5957_v5 }
 0xb30   :  { %7017 = vmatprep.subr.bf16.mxu1 %v5969_v3 }
 0xb31   :  { %6914 = vmatpush1.bf16.msra.mxu0 %v6080_v60  ;;  %7018 = vmatpush1.bf16.msra.mxu1 %v5968_v62  ;;  %v6071_v12 = vpop.permute.xlu0 %6070 }
 0xb32   :  { %v6073_v19 = vpop.permute.xlu1 %6072  ;;  %7019 = vmatprep.subr.bf16.mxu1 %v6083_v39  ;;  %v6086_v52 = vsel %vm533_vm3, %v12190_v43, %v6071_v12 }
 0xb33   :  { %v6087_v36 = vsel %vm533_vm3, %v6071_v12, %v6073_v19 }
 0xb34   :  { %6915 = vmatprep.subr.bf16.mxu0 %v6087_v36 }
 0xb35   :  { %6916 = vmatpush1.bf16.msra.mxu0 %v6086_v52  ;;  %7020 = vmatpush1.bf16.msra.mxu1 %v6082_v17  ;;  %v6075_v56 = vpop.permute.xlu0 %6074 }
 0xb36   :  { %v6077_v18 = vpop.permute.xlu1 %6076  ;;  %6917 = vmatprep.subr.bf16.mxu0 %v11831_v24  ;;  %v6088_v0 = vsel %vm533_vm3, %v6073_v19, %v6075_v56  ;;  %v6249_v24 = vsel %vm702_vm6, %v12253_v38, %v12232_v55 }
 0xb37   :  { %v6089_v23 = vsel %vm533_vm3, %v6075_v56, %v6077_v18 }
 0xb38   :  { %7021 = vmatprep.subr.bf16.mxu1 %v6089_v23 }
 0xb39   :  { %6918 = vmatpush1.bf16.msra.mxu0 %v11829_v57  ;;  %7022 = vmatpush1.bf16.msra.mxu1 %v6088_v0  ;;  %v6465_v43 = vpop.permute.xlu0 %6464  ;;  %v6248_v57 = vsel %vm702_vm6, %v12049_v26, %v12253_v38  ;;  %v6250_v26 = vsel %vm702_vm6, %v12232_v55, %v12278_v63 }
 0xb3a   :  { %v6351_v13 = vpop.permute.xlu1 %6350  ;;  %6919 = vmatprep.subr.bf16.mxu0 %v11894_v54  ;;  %7023 = vmatprep.subr.bf16.mxu1 %v11836_v9 }
 0xb3b   :  { %v6371_v55 = vsel %vm823_vm7, %v12296_v44, %v6351_v13 }
 0xb3d   :  { %6920 = vmatpush1.bf16.msra.mxu0 %v11892_v7  ;;  %7024 = vmatpush1.bf16.msra.mxu1 %v11834_v37  ;;  %v6239_v27 = vpop.permute.xlu0 %6238  ;;  %v6251_v37 = vsel %vm702_vm6, %v12278_v63, %v12255_v47 }
 0xb3e   :  { %v6365_v22 = vpop.permute.xlu1 %6364  ;;  %6921 = vmatprep.subr.bf16.mxu0 %v6249_v24  ;;  %7025 = vmatprep.subr.bf16.mxu1 %v11898_v53  ;;  %v6254_v53 = vsel %vm702_vm6, %v12230_v21, %v6239_v27  ;;  %v6368_v21 = vsel %vm823_vm7, %v12057_v34, %v12287_v25 }
 0xb41   :  { %6922 = vmatpush1.bf16.msra.mxu0 %v6248_v57  ;;  %7026 = vmatpush1.bf16.msra.mxu1 %v11896_v40  ;;  %v6469_v9 = vpop.permute.xlu0 %6468  ;;  %v6369_v40 = vsel %vm823_vm7, %v12287_v25, %v12289_v59 }
 0xb42   :  { %v6241_v7 = vpop.permute.xlu1 %6240  ;;  %7027 = vmatprep.subr.bf16.mxu1 %v6251_v37 }
 0xb43   :  { %v6255_v54 = vsel %vm702_vm6, %v6239_v27, %v6241_v7 }
 0xb44   :  { %6923 = vmatprep.subr.bf16.mxu0 %v6255_v54 }
 0xb45   :  { %6924 = vmatpush1.bf16.msra.mxu0 %v6254_v53  ;;  %7028 = vmatpush1.bf16.msra.mxu1 %v6250_v26  ;;  %v6243_v38 = vpop.permute.xlu0 %6242 }
 0xb46   :  { %v6467_v47 = vpop.permute.xlu1 %6466  ;;  %6925 = vmatprep.subr.bf16.mxu0 %v6369_v40  ;;  %v6257_v16 = vsel %vm702_vm6, %v6243_v38, %v12280_v31  ;;  %v6256_v50 = vsel %vm702_vm6, %v6241_v7, %v6243_v38 }
 0xb47   :  { %7029 = vmatprep.subr.bf16.mxu1 %v6257_v16  ;;  %v6489_v34 = vsel %vm944_vm8, %v6465_v43, %v6467_v47  ;;  %v6490_v51 = vsel %vm944_vm8, %v6467_v47, %v6469_v9 }
 0xb49   :  { %6926 = vmatpush1.bf16.msra.mxu0 %v6368_v21  ;;  %7030 = vmatpush1.bf16.msra.mxu1 %v6256_v50  ;;  %v6359_v63 = vpop.permute.xlu0 %6358 }
 0xb4a   :  { %v6361_v49 = vpop.permute.xlu1 %6360  ;;  %7031 = vmatprep.subr.bf16.mxu1 %v6371_v55  ;;  %v6374_v32 = vsel %vm823_vm7, %v12245_v29, %v6359_v63  ;;  %v6488_v29 = vsel %vm944_vm8, %v12065_v1, %v6465_v43 }
 0xb4b   :  { %v6375_v31 = vsel %vm823_vm7, %v6359_v63, %v6361_v49 }
 0xb4c   :  { %6927 = vmatprep.subr.bf16.mxu0 %v6375_v31 }
 0xb4d   :  { %6928 = vmatpush1.bf16.msra.mxu0 %v6374_v32  ;;  %7032 = vmatpush1.bf16.msra.mxu1 %v6370_v35  ;;  %v6363_v25 = vpop.permute.xlu0 %6362 }
 0xb4e   :  { %v6471_v33 = vpop.permute.xlu1 %6470  ;;  %6929 = vmatprep.subr.bf16.mxu0 %v6489_v34  ;;  %v6377_v2 = vsel %vm823_vm7, %v6363_v25, %v6365_v22  ;;  %v6376_v15 = vsel %vm823_vm7, %v6361_v49, %v6363_v25 }
 0xb4f   :  { %7033 = vmatprep.subr.bf16.mxu1 %v6377_v2  ;;  %v6491_v42 = vsel %vm944_vm8, %v6469_v9, %v6471_v33 }
 0xb51   :  { %6930 = vmatpush1.bf16.msra.mxu0 %v6488_v29  ;;  %7034 = vmatpush1.bf16.msra.mxu1 %v6376_v15  ;;  %v6479_v59 = vpop.permute.xlu0 %6478 }
 0xb52   :  { %v6481_v44 = vpop.permute.xlu1 %6480  ;;  %7035 = vmatprep.subr.bf16.mxu1 %v6491_v42  ;;  %v6494_v61 = vsel %vm944_vm8, %v12260_v41, %v6479_v59 }
 0xb53   :  { %v6495_v58 = vsel %vm944_vm8, %v6479_v59, %v6481_v44 }
 0xb54   :  { %6931 = vmatprep.subr.bf16.mxu0 %v6495_v58 }
 0xb55   :  { %6932 = vmatpush1.bf16.msra.mxu0 %v6494_v61  ;;  %7036 = vmatpush1.bf16.msra.mxu1 %v6490_v51  ;;  %v6483_v5 = vpop.permute.xlu0 %6482 }
 0xb56   :  { %v6485_v62 = vpop.permute.xlu1 %6484  ;;  %v6496_v1 = vsel %vm944_vm8, %v6481_v44, %v6483_v5 }
 0xb57   :  { %v6497_v3 = vsel %vm944_vm8, %v6483_v5, %v6485_v62 }
 0xb58   :  { %6934 = vmatmul.mubr.bf16.vlgmr.msra.gmra.mrb[40].mxu0 %v12268_v8  ;;  %7037 = vmatprep.subr.bf16.mxu1 %v6497_v3 }
 0xb59   :  { %7038 = vmatpush1.bf16.msra.mxu1 %v6496_v1  ;;  %v6585_v60 = vpop.permute.xlu0 %6584  ;;  %6943 = vmatprep.mubr.bf16.mxu0 %v12276_v4 }
 0xb5a   :  { %v6587_v41 = vpop.permute.xlu1 %6586  ;;  %v6608_v39 = vsel %vm1065_vm4, %v12073_v6, %v6585_v60 }
 0xb5b   :  { %v6609_v12 = vsel %vm1065_vm4, %v6585_v60, %v6587_v41 }
 0xb5c   :  { %6954 = vmatprep.subr.bf16.mxu0 %v6609_v12  ;;  %7040 = vmatmul.mubr.bf16.vlgmr.msra.gmra.mrb[56].mxu1 %v12268_v8 }
 0xb5d   :  { %6955 = vmatpush1.bf16.msra.mxu0 %v6608_v39  ;;  %v6589_v19 = vpop.permute.xlu0 %6588  ;;  %7049 = vmatprep.mubr.bf16.mxu1 %v12276_v4 }
 0xb5e   :  { %v6591_v52 = vpop.permute.xlu1 %6590  ;;  %v6610_v36 = vsel %vm1065_vm4, %v6587_v41, %v6589_v19 }
 0xb5f   :  { %v6611_v17 = vsel %vm1065_vm4, %v6589_v19, %v6591_v52 }
 0xb60   :  { %6944 = vmatmul.mubr.bf16.gmra.mrb[44].mxu0 %v12294_v11  ;;  %7060 = vmatprep.subr.bf16.mxu1 %v6611_v17  ;;  %v13355_v17 = vld [vmem:[#allocation8_spill] sm:$0xff] }
 0xb61   :  { %7061 = vmatpush1.bf16.msra.mxu1 %v6610_v36  ;;  %v6599_v56 = vpop.permute.xlu0 %6598  ;;  %6986 = vmatprep.mubr.bf16.mxu0 %v13341_v10 }
 0xb62   :  { %v6601_v6 = vpop.permute.xlu1 %6600  ;;  %v6614_v8 = vsel %vm1065_vm4, %v12300_v28, %v6599_v56 }
 0xb63   :  { %v6615_v18 = vsel %vm1065_vm4, %v6599_v56, %v6601_v6 }
 0xb64   :  { %6956 = vmatprep.subr.bf16.mxu0 %v6615_v18  ;;  %7050 = vmatmul.mubr.bf16.gmra.mrb[60].mxu1 %v12294_v11 }
 0xb65   :  { %6957 = vmatpush1.bf16.msra.mxu0 %v6614_v8  ;;  %v6603_v4 = vpop.permute.xlu0 %6602  ;;  %7092 = vmatprep.mubr.bf16.mxu1 %v13341_v10 }
 0xb66   :  { %v6605_v0 = vpop.permute.xlu1 %6604  ;;  %v6616_v23 = vsel %vm1065_vm4, %v6601_v6, %v6603_v4  ;;  %v13356_v6 = vld [vmem:[#allocation9_spill] sm:$0xff] }
 0xb67   :  { %v6617_v43 = vsel %vm1065_vm4, %v6603_v4, %v6605_v0 }
 0xb68   :  { %9022 = vmatmul.mubr.msk.bf16.vlgmr.msra.gmra.mrb[40].mxu0 %vm13351_vm14, %v12308_v14  ;;  %7062 = vmatprep.subr.bf16.mxu1 %v6617_v43 }
 0xb69   :  { %7063 = vmatpush1.bf16.msra.mxu1 %v6616_v23  ;;  %6996 = vmatprep.mubr.bf16.mxu0 %v13341_v10 }
 0xb6c   :  { %9024 = vmatmul.mubr.msk.bf16.vlgmr.msra.gmra.mrb[56].mxu1 %vm13352_vm15, %v12308_v14 }
 0xb6d   :  { %7102 = vmatprep.mubr.bf16.mxu1 %v13341_v10 }
 0xb70   :  { %9023 = vmatmul.mubr.msk.bf16.gmra.mrb[44].mxu0 %vm13353_vm5, %v12330_v30 }
 0xb74   :  { %9025 = vmatmul.mubr.msk.bf16.gmra.mrb[60].mxu1 %vm13354_vm9, %v12330_v30 }
 0xb75   :  { %8675 = vmatprep.mubr.bf16.mxu1 %v13341_v10 }
 0xbee   :  { %v12464_v11 = vpop.f32.mrb[48].mxu1 }
 0xbef   :  { %v7113_v28 = vmul.f32 %v12464_v11, %v9906_v45  ;;  %v12468_v13 = vpop.f32.mrb[49].mxu1 }
 0xbf0   :  { %v7114_v14 = vmul.f32 %v12468_v13, %v9909_v46  ;;  %v12472_v24 = vpop.f32.mrb[50].mxu1 }
 0xbf1   :  { %v7165_v27 = vmul.f32 %v7113_v28, %v12464_v11  ;;  %v7119_v22 = vmul.f32 %v12472_v24, %v9906_v45  ;;  %v12477_v30 = vpop.f32.mrb[51].mxu1 }
 0xbf2   :  { %v7137_v57 = vadd.f32 %v7114_v14, %v7113_v28  ;;  %v7166_v37 = vmul.f32 %v7114_v14, %v12468_v13  ;;  %v7120_v9 = vmul.f32 %v12477_v30, %v9909_v46 }
 0xbf3   :  { %v7171_v7 = vmul.f32 %v7119_v22, %v12472_v24 }
 0xbf4   :  { %v7189_v54 = vadd.f32 %v7166_v37, %v7165_v27  ;;  %v7144_v53 = vadd.f32 %v7120_v9, %v7119_v22  ;;  %v7172_v26 = vmul.f32 %v7120_v9, %v12477_v30 }
 0xbf6   :  { %v7196_v40 = vadd.f32 %v7172_v26, %v7171_v7  ;;  %v12484_v38 = vpop.f32.mrb[52].mxu1 }
 0xbf7   :  { %v7125_v47 = vmul.f32 %v12484_v38, %v9906_v45  ;;  %v12488_v16 = vpop.f32.mrb[53].mxu1 }
 0xbf8   :  { %v7126_v50 = vmul.f32 %v12488_v16, %v9909_v46  ;;  %v12492_v21 = vpop.f32.mrb[54].mxu1 }
 0xbf9   :  { %v7177_v55 = vmul.f32 %v7125_v47, %v12484_v38  ;;  %v7131_v63 = vmul.f32 %v12492_v21, %v9906_v45  ;;  %v12497_v49 = vpop.f32.mrb[55].mxu1 }
 0xbfa   :  { %v7151_v32 = vadd.f32 %v7126_v50, %v7125_v47  ;;  %v7178_v31 = vmul.f32 %v7126_v50, %v12488_v16  ;;  %v7132_v35 = vmul.f32 %v12497_v49, %v9909_v46 }
 0xbfb   :  { %v7183_v34 = vmul.f32 %v7131_v63, %v12492_v21 }
 0xbfc   :  { %v7203_v25 = vadd.f32 %v7178_v31, %v7177_v55  ;;  %v7158_v33 = vadd.f32 %v7132_v35, %v7131_v63  ;;  %v7184_v2 = vmul.f32 %v7132_v35, %v12497_v49 }
 0xbfe   :  { %v12504_v15 = vadd.f32 %v7184_v2, %v7183_v34 }
 0xc3b   :  { %v12506_v29 = vpop.f32.mrb[40].mxu0 }
 0xc3c   :  { %v7115_v42 = vmul.f32 %v12506_v29, %v13335_v20  ;;  %v12510_v59 = vpop.f32.mrb[41].mxu0 }
 0xc3d   :  { %v7116_v44 = vmul.f32 %v12510_v59, %v13336_v48  ;;  %v12514_v61 = vpop.f32.mrb[42].mxu0 }
 0xc3e   :  { %v7138_v58 = vadd.f32 %v7137_v57, %v7115_v42  ;;  %v7167_v51 = vmul.f32 %v7115_v42, %v12506_v29  ;;  %v7121_v5 = vmul.f32 %v12514_v61, %v13335_v20  ;;  %v12519_v62 = vpop.f32.mrb[43].mxu0 }
 0xc3f   :  { %v7168_v1 = vmul.f32 %v7116_v44, %v12510_v59  ;;  %v7122_v3 = vmul.f32 %v12519_v62, %v13336_v48  ;;  %v12524_v60 = vpop.f32.mrb[56].mxu1 }
 0xc40   :  { %v7190_v41 = vadd.f32 %v7189_v54, %v7167_v51  ;;  %v7139_v39 = vadd.f32 %v7138_v58, %v7116_v44  ;;  %v7145_v12 = vadd.f32 %v7144_v53, %v7121_v5  ;;  %v7173_v19 = vmul.f32 %v7121_v5, %v12514_v61  ;;  %v12527_v52 = vpop.f32.mrb[57].mxu1 }
 0xc41   :  { %v7174_v36 = vmul.f32 %v7122_v3, %v12519_v62  ;;  %v7117_v56 = vmul.f32 %v12524_v60, %v13355_v17  ;;  %v7118_v8 = vmul.f32 %v12527_v52, %v13356_v6  ;;  %v12534_v18 = vpop.f32.mrb[58].mxu1 }
 0xc42   :  { %v7191_v4 = vadd.f32 %v7190_v41, %v7168_v1  ;;  %v7197_v0 = vadd.f32 %v7196_v40, %v7173_v19  ;;  %v7146_v23 = vadd.f32 %v7145_v12, %v7122_v3  ;;  %v7123_v43 = vmul.f32 %v12534_v18, %v13355_v17  ;;  %v12538_v28 = vpop.f32.mrb[59].mxu1 }
 0xc43   :  { %v7140_v14 = vadd.f32 %v7139_v39, %v7117_v56  ;;  %v7169_v27 = vmul.f32 %v7117_v56, %v12524_v60  ;;  %v7170_v22 = vmul.f32 %v7118_v8, %v12527_v52  ;;  %v7124_v57 = vmul.f32 %v12538_v28, %v13356_v6  ;;  %v12544_v37 = vpop.f32.mrb[44].mxu0 }
 0xc44   :  { %v7198_v9 = vadd.f32 %v7197_v0, %v7174_v36  ;;  %v7147_v7 = vadd.f32 %v7146_v23, %v7123_v43  ;;  %v7175_v54 = vmul.f32 %v7123_v43, %v12534_v18  ;;  %v7127_v53 = vmul.f32 %v12544_v37, %v13335_v20  ;;  %v12549_v26 = vpop.f32.mrb[45].mxu0 }
 0xc45   :  { %v7192_v40 = vadd.f32 %v7191_v4, %v7169_v27  ;;  %v7176_v47 = vmul.f32 %v7124_v57, %v12538_v28  ;;  %v7128_v50 = vmul.f32 %v12549_v26, %v13336_v48  ;;  %v12554_v55 = vpop.f32.mrb[46].mxu0  ;;  %v7141_v63 = vadd.f32 %v7140_v14, %v7118_v8 }
 0xc46   :  { %v7199_v31 = vadd.f32 %v7198_v9, %v7175_v54  ;;  %v7152_v35 = vadd.f32 %v7151_v32, %v7127_v53  ;;  %v7179_v34 = vmul.f32 %v7127_v53, %v12544_v37  ;;  %v7133_v2 = vmul.f32 %v12554_v55, %v13335_v20  ;;  %v12559_v42 = vpop.f32.mrb[47].mxu0 }
 0xc47   :  { %v7180_v44 = vmul.f32 %v7128_v50, %v12549_v26  ;;  %v7134_v58 = vmul.f32 %v12559_v42, %v13336_v48  ;;  %7142 = vadd.xlane.f32.xlu0 %v7141_v63  ;;  %v12564_v51 = vpop.f32.mrb[60].mxu1  ;;  %v7148_v5 = vadd.f32 %v7147_v7, %v7124_v57  ;;  %v7193_v1 = vadd.f32 %v7192_v40, %v7170_v22 }
 0xc48   :  { %v7204_v3 = vadd.f32 %v7203_v25, %v7179_v34  ;;  %v7153_v41 = vadd.f32 %v7152_v35, %v7128_v50  ;;  %v7159_v32 = vadd.f32 %v7158_v33, %v7133_v2  ;;  %v7185_v39 = vmul.f32 %v7133_v2, %v12554_v55  ;;  %v12567_v12 = vpop.f32.mrb[61].mxu1 }
 0xc49   :  { %v7186_v19 = vmul.f32 %v7134_v58, %v12559_v42  ;;  %v7129_v36 = vmul.f32 %v12564_v51, %v13355_v17  ;;  %7149 = vadd.xlane.f32.xlu1 %v7148_v5  ;;  %v7130_v56 = vmul.f32 %v12567_v12, %v13356_v6  ;;  %v12574_v8 = vpop.f32.mrb[62].mxu1  ;;  %v7200_v4 = vadd.f32 %v7199_v31, %v7176_v47 }
 0xc4a   :  { %v7205_v0 = vadd.f32 %v7204_v3, %v7180_v44  ;;  %v7211_v25 = vadd.f32 %v12504_v15, %v7185_v39  ;;  %v7160_v33 = vadd.f32 %v7159_v32, %v7134_v58  ;;  %v7135_v23 = vmul.f32 %v12574_v8, %v13355_v17  ;;  %v12579_v43 = vpop.f32.mrb[63].mxu1 }
 0xc4b   :  { %v7154_v14 = vadd.f32 %v7153_v41, %v7129_v36  ;;  %v7181_v27 = vmul.f32 %v7129_v36, %v12564_v51  ;;  %v7182_v22 = vmul.f32 %v7130_v56, %v12567_v12  ;;  %7194 = vadd.xlane.f32.xlu0 %v7193_v1  ;;  %v7136_v57 = vmul.f32 %v12579_v43, %v13356_v6 }
 0xc4c   :  { %v7212_v9 = vadd.f32 %v7211_v25, %v7186_v19  ;;  %v7161_v7 = vadd.f32 %v7160_v33, %v7135_v23  ;;  %v7187_v54 = vmul.f32 %v7135_v23, %v12574_v8  ;;  %v13357_v35 = vmov 0.0|0.0  }
 0xc4d   :  { %v7206_v15 = vadd.f32 %v7205_v0, %v7181_v27  ;;  %v7188_v53 = vmul.f32 %v7136_v57, %v12579_v43  ;;  %v7155_v40 = vadd.f32 %v7154_v14, %v7130_v56 }
 0xc4e   :  { %v7213_v47 = vadd.f32 %v7212_v9, %v7187_v54  ;;  %v7162_v50 = vadd.f32 %v7161_v7, %v7136_v57 }
 0xc4f   :  { %7201 = vadd.xlane.f32.xlu0 %v7200_v4  ;;  %7156 = vadd.xlane.f32.xlu1 %v7155_v40  ;;  %v7207_v63 = vadd.f32 %v7206_v15, %v7182_v22  ;;  %v9026_v40 = vld [vmem:[%s13293_s2 + $0x60] sm:$0xff] }
 0xc50   :  { %v7214_v31 = vadd.f32 %v7213_v47, %v7188_v53 }
 0xc53   :  { %7208 = vadd.xlane.f32.xlu1 %v7207_v63  ;;  %7163 = vadd.xlane.f32.xlu0 %v7162_v50 }
 0xc57   :  { %7215 = vadd.xlane.f32.xlu0 %v7214_v31  ;;  %v9030_v31 = vld [vmem:[%s13294_s3 + $0x60] sm:$0xff] }
 0xc64   :  { %7541 = vrot.lane.b32.xlu1 %v13357_v35, %s9217_s24 }
 0xc68   :  { %7661 = vrot.lane.b32.xlu1 %v13357_v35, %s9218_s18 }
 0xc6c   :  { %7781 = vrot.lane.b32.xlu1 %v13357_v35, %s9219_s19 }
 0xc6d   :  { %7527 = vrot.lane.b32.xlu0 %v13357_v35, %s9217_s24 }
 0xc70   :  { %7901 = vrot.lane.b32.xlu1 %v13357_v35, %s9220_s25 }
 0xc71   :  { %7647 = vrot.lane.b32.xlu0 %v13357_v35, %s9218_s18 }
 0xc75   :  { %7767 = vrot.lane.b32.xlu0 %v13357_v35, %s9219_s19 }
 0xc79   :  { %7887 = vrot.lane.b32.xlu0 %v13357_v35, %s9220_s25 }
 0xcd4   :  { %v7143_v34 = vpop.xlane.xlu0 %7142 }
 0xcd5   :  { %v7217_v2 = vmul.f32 0.001953125, %v7143_v34  ;;  %v9027_v34 = vld [vmem:[%s13293_s2 + $0x68] sm:$0xff] }
 0xcd6   :  { %v7150_v44 = vpop.xlane.xlu1 %7149 }
 0xcd7   :  { %v7225_v5 = vmul.f32 %v7217_v2, %v7217_v2  ;;  %v7218_v1 = vmul.f32 0.001953125, %v7150_v44 }
 0xcd8   :  { %v7195_v58 = vpop.xlane.xlu0 %7194 }
 0xcd9   :  { %v7221_v3 = vmul.f32 0.001953125, %v7195_v58  ;;  %v7226_v19 = vmul.f32 %v7218_v1, %v7218_v1 }
 0xcdb   :  { %v7229_v41 = vsub.f32 %v7221_v3, %v7225_v5 }
 0xcdc   :  { %v7202_v32 = vpop.xlane.xlu0 %7201  ;;  %v7157_v39 = vpop.xlane.xlu1 %7156 }
 0xcdd   :  { %v7238_v36 = vadd.f32 1e-05, %v7229_v41  ;;  %v7222_v56 = vmul.f32 0.001953125, %v7202_v32  ;;  %v7219_v4 = vmul.f32 0.001953125, %v7157_v39  ;;  %v9031_v41 = vld [vmem:[%s13294_s3 + $0x68] sm:$0xff]  ;;  %v9028_v32 = vld [vmem:[%s13293_s2 + $0x70] sm:$0xff] }
 0xcdf   :  { %9208 = vrsqrt.f32 %v7238_v36  ;;  %v7230_v0 = vsub.f32 %v7222_v56, %v7226_v19  ;;  %v7227_v14 = vmul.f32 %v7219_v4, %v7219_v4 }
 0xce0   :  { %v7209_v25 = vpop.xlane.xlu1 %7208  ;;  %v7164_v33 = vpop.xlane.xlu0 %7163 }
 0xce1   :  { %v7239_v23 = vadd.f32 1e-05, %v7230_v0  ;;  %v7223_v27 = vmul.f32 0.001953125, %v7209_v25  ;;  %v7220_v22 = vmul.f32 0.001953125, %v7164_v33  ;;  %v9029_v0 = vld [vmem:[%s13293_s2 + $0x78] sm:$0xff] }
 0xce3   :  { %9210 = vrsqrt.f32 %v7239_v23  ;;  %v7231_v57 = vsub.f32 %v7223_v27, %v7227_v14  ;;  %v7228_v54 = vmul.f32 %v7220_v22, %v7220_v22 }
 0xce4   :  { %v7216_v9 = vpop.xlane.xlu0 %7215 }
 0xce5   :  { %v7240_v7 = vadd.f32 1e-05, %v7231_v57  ;;  %v7224_v15 = vmul.f32 0.001953125, %v7216_v9  ;;  %v12627_v9 = vpop.permute.xlu1 %7541 }
 0xce7   :  { %9212 = vrsqrt.f32 %v7240_v7  ;;  %v7232_v53 = vsub.f32 %v7224_v15, %v7228_v54 }
 0xce8   :  { %v12631_v54 = vpop.permute.xlu0 %7527 }
 0xce9   :  { %v9209_v47 = vpop.eup %9208  ;;  %v7241_v50 = vadd.f32 1e-05, %v7232_v53  ;;  %v12629_v7 = vpop.permute.xlu1 %7661 }
 0xcea   :  { %v7246_v63 = vmul.f32 %v9209_v47, %v9026_v40 }
 0xceb   :  { %9214 = vrsqrt.f32 %v7241_v50 }
 0xcec   :  { %7265 = vperm.xlu1 %9147, %v7246_v63   ;;  %v7255_v44 = vmul.f32 %v7246_v63, %v7217_v2  ;;  %v9032_v2 = vld [vmem:[%s13294_s3 + $0x70] sm:$0xff] }
 0xced   :  { %v9211_v58 = vpop.eup %9210  ;;  %v12633_v15 = vpop.permute.xlu1 %7781 }
 0xcee   :  { %v7259_v5 = vsub.f32 %v9030_v31, %v7255_v44  ;;  %v7247_v3 = vmul.f32 %v9211_v58, %v9027_v34 }
 0xcf0   :  { %7309 = vperm.xlu1 %9147, %v7259_v5   ;;  %7270 = vperm.xlu0 %9148, %v7247_v3   ;;  %v7256_v39 = vmul.f32 %v7247_v3, %v7218_v1  ;;  %v9033_v1 = vld [vmem:[%s13294_s3 + $0x78] sm:$0xff] }
 0xcf1   :  { %v9213_v19 = vpop.eup %9212  ;;  %v12637_v53 = vpop.permute.xlu1 %7901 }
 0xcf2   :  { %v7260_v36 = vsub.f32 %v9031_v41, %v7256_v39  ;;  %v7248_v56 = vmul.f32 %v9213_v19, %v9028_v32 }
 0xcf4   :  { %7314 = vperm.xlu1 %9147, %v7260_v36   ;;  %7275 = vperm.xlu0 %9148, %v7248_v56   ;;  %v7257_v25 = vmul.f32 %v7248_v56, %v7219_v4  ;;  %v12635_v4 = vpop.permute.xlu0 %7647 }
 0xcf5   :  { %v9215_v33 = vpop.eup %9214 }
 0xcf6   :  { %v7261_v23 = vsub.f32 %v9032_v2, %v7257_v25  ;;  %v7249_v14 = vmul.f32 %v9215_v33, %v9029_v0 }
 0xcf8   :  { %7319 = vperm.xlu0 %9148, %v7261_v23   ;;  %7280 = vperm.xlu1 %9147, %v7249_v14   ;;  %v7258_v27 = vmul.f32 %v7249_v14, %v7220_v22  ;;  %v12639_v40 = vpop.permute.xlu0 %7767 }
 0xcfa   :  { %v7262_v57 = vsub.f32 %v9033_v1, %v7258_v27 }
 0xcfc   :  { %7324 = vperm.xlu1 %9147, %v7262_v57   ;;  %v12641_v50 = vpop.permute.xlu0 %7887 }
 0xd6b   :  { %v7266_v47 = vpop.permute.xlu1 %7265 }
 0xd6c   :  { %v7283_v22 = vmul.f32 %v7266_v47, %v12464_v11  ;;  %v7284_v63 = vmul.f32 %v7266_v47, %v12468_v13  ;;  %v7285_v31 = vmul.f32 %v7266_v47, %v12506_v29  ;;  %v7286_v34 = vmul.f32 %v7266_v47, %v12510_v59 }
 0xd6d   :  { %v7287_v44 = vmul.f32 %v7266_v47, %v12524_v60  ;;  %v7288_v58 = vmul.f32 %v7266_v47, %v12527_v52 }
 0xd6f   :  { %v7310_v5 = vpop.permute.xlu1 %7309  ;;  %v7271_v56 = vpop.permute.xlu0 %7270 }
 0xd70   :  { %v7327_v3 = vadd.f32 %v7310_v5, %v7283_v22  ;;  %v7328_v41 = vadd.f32 %v7310_v5, %v7284_v63  ;;  %v7329_v32 = vadd.f32 %v7310_v5, %v7285_v31  ;;  %v7330_v39 = vadd.f32 %v7310_v5, %v7286_v34 }
 0xd71   :  { %v7331_v19 = vadd.f32 %v7310_v5, %v7287_v44  ;;  %v7332_v36 = vadd.f32 %v7310_v5, %v7288_v58  ;;  %v7289_v52 = vmul.f32 %v7271_v56, %v12472_v24  ;;  %v7290_v33 = vmul.f32 %v7271_v56, %v12477_v30 }
 0xd72   :  { %vm7351_vm10 = vcmp.ge.f32.partialorder %v7327_v3, 0.0  ;;  %vm7352_vm11 = vcmp.ge.f32.partialorder %v7328_v41, 0.0  ;;  %vm7353_vm12 = vcmp.ge.f32.partialorder %v7329_v32, 0.0  ;;  %vm7354_vm13 = vcmp.ge.f32.partialorder %v7330_v39, 0.0 }
 0xd73   :  { %vm7355_vm14 = vcmp.ge.f32.partialorder %v7331_v19, 0.0  ;;  %vm7356_vm15 = vcmp.ge.f32.partialorder %v7332_v36, 0.0  ;;  %v7375_v11 = vmul.f32 0.2, %v7327_v3  ;;  %v7376_v13 = vmul.f32 0.2, %v7328_v41  ;;  %v7315_v57 = vpop.permute.xlu1 %7314 }
 0xd74   :  { %v7377_v29 = vmul.f32 0.2, %v7329_v32  ;;  %v7378_v59 = vmul.f32 0.2, %v7330_v39  ;;  %v7379_v60 = vmul.f32 0.2, %v7331_v19  ;;  %v7291_v1 = vmul.f32 %v7271_v56, %v12514_v61 }
 0xd75   :  { %v7380_v2 = vmul.f32 0.2, %v7332_v36  ;;  %v7399_v0 = vsel %vm7351_vm10, %v7327_v3, %v7375_v11  ;;  %v7400_v25 = vsel %vm7352_vm11, %v7328_v41, %v7376_v13  ;;  %v7292_v27 = vmul.f32 %v7271_v56, %v12519_v62 }
 0xd76   :  { %v7401_v23 = vsel %vm7353_vm12, %v7329_v32, %v7377_v29  ;;  %v7402_v14 = vsel %vm7354_vm13, %v7330_v39, %v7378_v59  ;;  %v7403_v47 = vsel %vm7355_vm14, %v7331_v19, %v7379_v60  ;;  %v7423_v63 = vmul.f32 %v7399_v0, %v9906_v45  ;;  %v7276_v19 = vpop.permute.xlu0 %7275 }
 0xd77   :  { %v7404_v22 = vsel %vm7356_vm15, %v7332_v36, %v7380_v2  ;;  %v7424_v24 = vmul.f32 %v7400_v25, %v9909_v46  ;;  %v7425_v31 = vmul.f32 %v7401_v23, %v13335_v20  ;;  %v7426_v34 = vmul.f32 %v7402_v14, %v13336_v48  ;;  %v7281_v29 = vpop.permute.xlu1 %7280 }
 0xd78   :  { %v7293_v30 = vmul.f32 %v7271_v56, %v12534_v18  ;;  %v7294_v44 = vmul.f32 %v7271_v56, %v12538_v28  ;;  %v7333_v61 = vadd.f32 %v7315_v57, %v7289_v52  ;;  %v7334_v58 = vadd.f32 %v7315_v57, %v7290_v33 }
 0xd79   :  { %v7335_v62 = vadd.f32 %v7315_v57, %v7291_v1  ;;  %v7336_v5 = vadd.f32 %v7315_v57, %v7292_v27  ;;  %v7427_v3 = vmul.f32 %v7403_v47, %v13355_v17  ;;  %v7428_v41 = vmul.f32 %v7404_v22, %v13356_v6 }
 0xd7a   :  { %v7337_v32 = vadd.f32 %v7315_v57, %v7293_v30  ;;  %v7338_v39 = vadd.f32 %v7315_v57, %v7294_v44  ;;  %vm7357_vm5 = vcmp.ge.f32.partialorder %v7333_v61, 0.0  ;;  %vm7358_vm9 = vcmp.ge.f32.partialorder %v7334_v58, 0.0 }
 0xd7b   :  { %vm7359_vm10 = vcmp.ge.f32.partialorder %v7335_v62, 0.0  ;;  %vm7360_vm11 = vcmp.ge.f32.partialorder %v7336_v5, 0.0  ;;  %v7381_v18 = vmul.f32 0.2, %v7333_v61  ;;  %v7382_v36 = vmul.f32 0.2, %v7334_v58 }
 0xd7c   :  { %vm7361_vm12 = vcmp.ge.f32.partialorder %v7337_v32, 0.0  ;;  %vm7362_vm13 = vcmp.ge.f32.partialorder %v7338_v39, 0.0  ;;  %v7383_v28 = vmul.f32 0.2, %v7335_v62  ;;  %v7384_v56 = vmul.f32 0.2, %v7336_v5 }
 0xd7d   :  { %v7385_v11 = vmul.f32 0.2, %v7337_v32  ;;  %v7295_v13 = vmul.f32 %v7276_v19, %v12484_v38  ;;  %v7386_v59 = vmul.f32 0.2, %v7338_v39  ;;  %v7405_v60 = vsel %vm7357_vm5, %v7333_v61, %v7381_v18  ;;  %v7325_v18 = vpop.permute.xlu1 %7324 }
 0xd7e   :  { %v7406_v52 = vsel %vm7358_vm9, %v7334_v58, %v7382_v36  ;;  %v7296_v2 = vmul.f32 %v7276_v19, %v12488_v16  ;;  %v7407_v0 = vsel %vm7359_vm10, %v7335_v62, %v7383_v28  ;;  %v7408_v25 = vsel %vm7360_vm11, %v7336_v5, %v7384_v56  ;;  %v7320_v62 = vpop.permute.xlu0 %7319 }
 0xd7f   :  { %v7409_v33 = vsel %vm7361_vm12, %v7337_v32, %v7385_v11  ;;  %v7429_v23 = vmul.f32 %v7405_v60, %v9906_v45  ;;  %v7410_v14 = vsel %vm7362_vm13, %v7338_v39, %v7386_v59  ;;  %v7430_v1 = vmul.f32 %v7406_v52, %v9909_v46 }
 0xd80   :  { %v7431_v27 = vmul.f32 %v7407_v0, %v13335_v20  ;;  %v7432_v57 = vmul.f32 %v7408_v25, %v13336_v48  ;;  %v7433_v38 = vmul.f32 %v7409_v33, %v13355_v17  ;;  %v7434_v47 = vmul.f32 %v7410_v14, %v13356_v6 }
 0xd81   :  { %v12672_v22 = vpack.c.bf16 %v7429_v23, %v7423_v63  ;;  %v7297_v16 = vmul.f32 %v7276_v19, %v12544_v37  ;;  %v12675_v30 = vpack.c.bf16 %v7430_v1, %v7424_v24  ;;  %v7298_v58 = vmul.f32 %v7276_v19, %v12549_v26 }
 0xd82   :  { %v12677_v44 = vpack.c.bf16 %v7431_v27, %v7425_v31  ;;  %v12679_v61 = vpack.c.bf16 %v7432_v57, %v7426_v34  ;;  %v12682_v5 = vpack.c.bf16 %v7433_v38, %v7427_v3  ;;  %v12684_v32 = vpack.c.bf16 %v7434_v47, %v7428_v41 }
 0xd83   :  { %v7299_v39 = vmul.f32 %v7276_v19, %v12564_v51  ;;  %v7300_v63 = vmul.f32 %v7276_v19, %v12567_v12  ;;  %7529 = vrot.lane.b32.xlu0 %v12672_v22, %s9217_s24  ;;  %v7301_v37 = vmul.f32 %v7281_v29, %v12492_v21  ;;  %v7302_v24 = vmul.f32 %v7281_v29, %v12497_v49 }
 0xd84   :  { %13358 = vst [vmem:[#allocation6_spill] sm:$0xff] %v12682_v5  ;;  %13359 = vst [vmem:[#allocation7_spill] sm:$0xff] %v12684_v32  ;;  %v7303_v31 = vmul.f32 %v7281_v29, %v12554_v55  ;;  %v7304_v26 = vmul.f32 %v7281_v29, %v12559_v42  ;;  %7531 = vrot.lane.b32.xlu1 %v12675_v30, %s9217_s24  ;;  %v7339_v34 = vadd.f32 %v7320_v62, %v7295_v13 }
 0xd85   :  { %v7340_v3 = vadd.f32 %v7320_v62, %v7296_v2  ;;  %v7341_v51 = vadd.f32 %v7320_v62, %v7297_v16  ;;  %v7342_v41 = vadd.f32 %v7320_v62, %v7298_v58  ;;  %v7343_v12 = vadd.f32 %v7320_v62, %v7299_v39 }
 0xd86   :  { %v7344_v19 = vadd.f32 %v7320_v62, %v7300_v63  ;;  %v7345_v36 = vadd.f32 %v7325_v18, %v7301_v37  ;;  %v7346_v28 = vadd.f32 %v7325_v18, %v7302_v24  ;;  %vm7363_vm14 = vcmp.ge.f32.partialorder %v7339_v34, 0.0 }
 0xd87   :  { %vm7364_vm15 = vcmp.ge.f32.partialorder %v7340_v3, 0.0  ;;  %vm7365_vm5 = vcmp.ge.f32.partialorder %v7341_v51, 0.0  ;;  %vm7366_vm9 = vcmp.ge.f32.partialorder %v7342_v41, 0.0  ;;  %7649 = vrot.lane.b32.xlu0 %v12672_v22, %s9218_s18  ;;  %vm7367_vm10 = vcmp.ge.f32.partialorder %v7343_v12, 0.0 }
 0xd88   :  { %vm7368_vm11 = vcmp.ge.f32.partialorder %v7344_v19, 0.0  ;;  %v7387_v21 = vmul.f32 0.2, %v7339_v34  ;;  %v7388_v49 = vmul.f32 0.2, %v7340_v3  ;;  %7651 = vrot.lane.b32.xlu1 %v12675_v30, %s9218_s18  ;;  %v7347_v11 = vadd.f32 %v7325_v18, %v7303_v31 }
 0xd89   :  { %v7389_v55 = vmul.f32 0.2, %v7341_v51  ;;  %v7390_v42 = vmul.f32 0.2, %v7342_v41  ;;  %v7391_v56 = vmul.f32 0.2, %v7343_v12  ;;  %v7348_v52 = vadd.f32 %v7325_v18, %v7304_v26 }
 0xd8a   :  { %v7392_v13 = vmul.f32 0.2, %v7344_v19  ;;  %v7411_v59 = vsel %vm7363_vm14, %v7339_v34, %v7387_v21  ;;  %v7412_v60 = vsel %vm7364_vm15, %v7340_v3, %v7388_v49  ;;  %v7305_v2 = vmul.f32 %v7281_v29, %v12574_v8 }
 0xd8b   :  { %v7306_v0 = vmul.f32 %v7281_v29, %v12579_v43  ;;  %v7413_v25 = vsel %vm7365_vm5, %v7341_v51, %v7389_v55  ;;  %7769 = vrot.lane.b32.xlu0 %v12672_v22, %s9219_s19  ;;  %v7414_v33 = vsel %vm7366_vm9, %v7342_v41, %v7390_v42  ;;  %v7415_v23 = vsel %vm7367_vm10, %v7343_v12, %v7391_v56 }
 0xd8c   :  { %v7416_v14 = vsel %vm7368_vm11, %v7344_v19, %v7392_v13  ;;  %v7435_v1 = vmul.f32 %v7411_v59, %v9906_v45  ;;  %7771 = vrot.lane.b32.xlu1 %v12675_v30, %s9219_s19  ;;  %v7436_v8 = vmul.f32 %v7412_v60, %v9909_v46  ;;  %v7437_v43 = vmul.f32 %v7413_v25, %v13335_v20  ;;  %v12874_v60 = vld [vmem:[%s13296_s4] sm:$0xff] }
 0xd8d   :  { %v7349_v29 = vadd.f32 %v7325_v18, %v7305_v2  ;;  %v7350_v27 = vadd.f32 %v7325_v18, %v7306_v0  ;;  %vm7369_vm12 = vcmp.ge.f32.partialorder %v7345_v36, 0.0  ;;  %vm7370_vm13 = vcmp.ge.f32.partialorder %v7346_v28, 0.0 }
 0xd8e   :  { %vm7371_vm14 = vcmp.ge.f32.partialorder %v7347_v11, 0.0  ;;  %vm7372_vm15 = vcmp.ge.f32.partialorder %v7348_v52, 0.0  ;;  %v7393_v57 = vmul.f32 0.2, %v7345_v36  ;;  %v7394_v38 = vmul.f32 0.2, %v7346_v28 }
 0xd8f   :  { %vm7373_vm5 = vcmp.ge.f32.partialorder %v7349_v29, 0.0  ;;  %vm7374_vm9 = vcmp.ge.f32.partialorder %v7350_v27, 0.0  ;;  %7889 = vrot.lane.b32.xlu0 %v12672_v22, %s9220_s25  ;;  %v7438_v47 = vmul.f32 %v7414_v33, %v13336_v48  ;;  %v7395_v16 = vmul.f32 0.2, %v7347_v11 }
 0xd90   :  { %v7396_v58 = vmul.f32 0.2, %v7348_v52  ;;  %v7397_v62 = vmul.f32 0.2, %v7349_v29  ;;  %7891 = vrot.lane.b32.xlu1 %v12675_v30, %s9220_s25  ;;  %v7439_v39 = vmul.f32 %v7415_v23, %v13355_v17  ;;  %v7398_v63 = vmul.f32 0.2, %v7350_v27 }
 0xd91   :  { %v7417_v18 = vsel %vm7369_vm12, %v7345_v36, %v7393_v57  ;;  %v7418_v37 = vsel %vm7370_vm13, %v7346_v28, %v7394_v38  ;;  %v7419_v24 = vsel %vm7371_vm14, %v7347_v11, %v7395_v16  ;;  %v7440_v19 = vmul.f32 %v7416_v14, %v13356_v6 }
 0xd92   :  { %v7420_v31 = vsel %vm7372_vm15, %v7348_v52, %v7396_v58  ;;  %v7421_v26 = vsel %vm7373_vm5, %v7349_v29, %v7397_v62  ;;  %v7441_v34 = vmul.f32 %v7417_v18, %v9906_v45  ;;  %v7422_v3 = vsel %vm7374_vm9, %v7350_v27, %v7398_v63 }
 0xd93   :  { %v7442_v51 = vmul.f32 %v7418_v37, %v9909_v46  ;;  %v7443_v41 = vmul.f32 %v7419_v24, %v13335_v20  ;;  %v7444_v12 = vmul.f32 %v7420_v31, %v13336_v48  ;;  %8057 = vrot.lane.b32.xlu0 %v12675_v30, %s9223_s16  ;;  %v7445_v36 = vmul.f32 %v7421_v26, %v13355_v17 }
 0xd94   :  { %v7446_v28 = vmul.f32 %v7422_v3, %v13356_v6  ;;  %v12734_v21 = vpack.c.bf16 %v7441_v34, %v7435_v1  ;;  %8059 = vrot.lane.b32.xlu1 %v12677_v44, %s9223_s16  ;;  %v12_v17 = vstv %s13295_s5  ;;  %v12880_v52 = vcombine.high %v12874_v60, %v12874_v60 }
 0xd95   :  { %v12738_v45 = vpack.c.bf16 %v7442_v51, %v7436_v8  ;;  %v12740_v46 = vpack.c.bf16 %v7443_v41, %v7437_v43  ;;  %v12742_v20 = vpack.c.bf16 %v7444_v12, %v7438_v47  ;;  %v12744_v48 = vpack.c.bf16 %v7445_v36, %v7439_v39  ;;  %13 = vst [vmem:[#allocation4] sm:$0x1] %v12_v17 }
 0xd96   :  { %v12746_v49 = vpack.c.bf16 %v7446_v28, %v7440_v19  ;;  %8634 = vmatprep.mubr.bf16.mxu0 %v12880_v52  ;;  %vm13362_vm10 = vcmask 261120  }
 0xd97   :  { %13360 = vst [vmem:[#allocation8_spill] sm:$0xff] %v12740_v46  ;;  %13361 = vst [vmem:[#allocation9_spill] sm:$0xff] %v12744_v48  ;;  %8055 = vrot.lane.b32.xlu0 %v12672_v22, %s9223_s16 }
 0xd98   :  { %8179 = vrot.lane.b32.xlu1 %v12677_v44, %s9224_s17  ;;  %vm13363_vm11 = vmmov %vm13362_vm10 }
 0xd9b   :  { %8177 = vrot.lane.b32.xlu0 %v12675_v30, %s9224_s17 }
 0xd9c   :  { %8299 = vrot.lane.b32.xlu1 %v12677_v44, %s9225_s20 }
 0xd9f   :  { %8175 = vrot.lane.b32.xlu0 %v12672_v22, %s9224_s17 }
 0xda0   :  { %8419 = vrot.lane.b32.xlu1 %v12677_v44, %s9221_s26 }
 0xda3   :  { %8297 = vrot.lane.b32.xlu0 %v12675_v30, %s9225_s20 }
 0xda4   :  { %8415 = vrot.lane.b32.xlu1 %v12672_v22, %s9221_s26 }
 0xda7   :  { %8417 = vrot.lane.b32.xlu0 %v12675_v30, %s9221_s26 }
 0xda8   :  { %7535 = vrot.lane.b32.xlu1 %v12679_v61, %s9217_s24 }
 0xdab   :  { %8295 = vrot.lane.b32.xlu0 %v12672_v22, %s9225_s20 }
 0xdac   :  { %8423 = vrot.lane.b32.xlu1 %v12682_v5, %s9221_s26 }
 0xdaf   :  { %7533 = vrot.lane.b32.xlu0 %v12677_v44, %s9217_s24 }
 0xdb0   :  { %7539 = vrot.lane.b32.xlu1 %v12684_v32, %s9217_s24 }
 0xdb3   :  { %8421 = vrot.lane.b32.xlu0 %v12679_v61, %s9221_s26 }
 0xdb4   :  { %7655 = vrot.lane.b32.xlu1 %v12679_v61, %s9218_s18 }
 0xdb7   :  { %7537 = vrot.lane.b32.xlu0 %v12682_v5, %s9217_s24 }
 0xdb8   :  { %7659 = vrot.lane.b32.xlu1 %v12684_v32, %s9218_s18 }
 0xdbb   :  { %7653 = vrot.lane.b32.xlu0 %v12677_v44, %s9218_s18 }
 0xdbc   :  { %7775 = vrot.lane.b32.xlu1 %v12679_v61, %s9219_s19 }
 0xdbf   :  { %7657 = vrot.lane.b32.xlu0 %v12682_v5, %s9218_s18 }
 0xdc0   :  { %7779 = vrot.lane.b32.xlu1 %v12684_v32, %s9219_s19 }
 0xdc3   :  { %7773 = vrot.lane.b32.xlu0 %v12677_v44, %s9219_s19 }
 0xdc4   :  { %7895 = vrot.lane.b32.xlu1 %v12679_v61, %s9220_s25 }
 0xdc7   :  { %7777 = vrot.lane.b32.xlu0 %v12682_v5, %s9219_s19 }
 0xdc8   :  { %7543 = vrot.lane.b32.xlu1 %v12734_v21, %s9217_s24 }
 0xdcb   :  { %7893 = vrot.lane.b32.xlu0 %v12677_v44, %s9220_s25 }
 0xdcc   :  { %7899 = vrot.lane.b32.xlu1 %v12684_v32, %s9220_s25 }
 0xdcf   :  { %7545 = vrot.lane.b32.xlu0 %v12738_v45, %s9217_s24 }
 0xdd0   :  { %7663 = vrot.lane.b32.xlu1 %v12734_v21, %s9218_s18 }
 0xdd3   :  { %7897 = vrot.lane.b32.xlu0 %v12682_v5, %s9220_s25 }
 0xdd4   :  { %8063 = vrot.lane.b32.xlu1 %v12682_v5, %s9223_s16 }
 0xdd7   :  { %7665 = vrot.lane.b32.xlu0 %v12738_v45, %s9218_s18 }
 0xdd8   :  { %7783 = vrot.lane.b32.xlu1 %v12734_v21, %s9219_s19 }
 0xddb   :  { %8061 = vrot.lane.b32.xlu0 %v12679_v61, %s9223_s16 }
 0xddc   :  { %8067 = vrot.lane.b32.xlu1 %v13357_v35, %s9223_s16 }
 0xddf   :  { %7785 = vrot.lane.b32.xlu0 %v12738_v45, %s9219_s19 }
 0xde0   :  { %7903 = vrot.lane.b32.xlu1 %v12734_v21, %s9220_s25 }
 0xde3   :  { %8065 = vrot.lane.b32.xlu0 %v12684_v32, %s9223_s16 }
 0xde4   :  { %8183 = vrot.lane.b32.xlu1 %v12682_v5, %s9224_s17 }
 0xde7   :  { %7905 = vrot.lane.b32.xlu0 %v12738_v45, %s9220_s25 }
 0xde8   :  { %8081 = vrot.lane.b32.xlu1 %v13357_v35, %s9223_s16 }
 0xdeb   :  { %8181 = vrot.lane.b32.xlu0 %v12679_v61, %s9224_s17 }
 0xdec   :  { %8187 = vrot.lane.b32.xlu1 %v13357_v35, %s9224_s17 }
 0xdef   :  { %8185 = vrot.lane.b32.xlu0 %v12684_v32, %s9224_s17 }
 0xdf0   :  { %8071 = vrot.lane.b32.xlu1 %v12738_v45, %s9223_s16 }
 0xdf3   :  { %8301 = vrot.lane.b32.xlu0 %v12679_v61, %s9225_s20 }
 0xdf4   :  { %8069 = vrot.lane.b32.xlu1 %v12734_v21, %s9223_s16 }
 0xdf5   :  { %v7530_v6 = vpop.permute.xlu0 %7529 }
 0xdf6   :  { %v12847_v55 = vpop.permute.xlu1 %7531  ;;  %v7555_v42 = vsel %vm170_vm0, %v12631_v54, %v7530_v6 }
 0xdf7   :  { %8073 = vrot.lane.b32.xlu0 %v12740_v46, %s9223_s16  ;;  %v7556_v56 = vsel %vm170_vm0, %v7530_v6, %v12847_v55 }
 0xdf8   :  { %8191 = vrot.lane.b32.xlu1 %v12738_v45, %s9224_s17  ;;  %8602 = vmatprep.subr.bf16.mxu0 %v7556_v56 }
 0xdf9   :  { %8603 = vmatpush1.bf16.msra.mxu0 %v7555_v42  ;;  %v12857_v11 = vpop.permute.xlu0 %7649 }
 0xdfa   :  { %v12859_v13 = vpop.permute.xlu1 %7651 }
 0xdfb   :  { %8193 = vrot.lane.b32.xlu0 %v12740_v46, %s9224_s17 }
 0xdfc   :  { %8189 = vrot.lane.b32.xlu1 %v12734_v21, %s9224_s17 }
 0xdfd   :  { %v12865_v54 = vpop.permute.xlu0 %7769 }
 0xdfe   :  { %v12867_v59 = vpop.permute.xlu1 %7771 }
 0xdff   :  { %8311 = vrot.lane.b32.xlu0 %v12738_v45, %s9225_s20 }
 0xe00   :  { %8313 = vrot.lane.b32.xlu1 %v12740_v46, %s9225_s20 }
 0xe01   :  { %v12882_v2 = vpop.permute.xlu0 %7889 }
 0xe02   :  { %v12884_v0 = vpop.permute.xlu1 %7891 }
 0xe03   :  { %8431 = vrot.lane.b32.xlu0 %v12738_v45, %s9221_s26 }
 0xe04   :  { %8433 = vrot.lane.b32.xlu1 %v12740_v46, %s9221_s26 }
 0xe05   :  { %v12891_v25 = vpop.permute.xlu0 %8057 }
 0xe06   :  { %v12893_v33 = vpop.permute.xlu1 %8059 }
 0xe07   :  { %8309 = vrot.lane.b32.xlu0 %v12734_v21, %s9225_s20 }
 0xe08   :  { %8429 = vrot.lane.b32.xlu1 %v12734_v21, %s9221_s26 }
 0xe09   :  { %v8056_v23 = vpop.permute.xlu0 %8055 }
 0xe0a   :  { %v12899_v14 = vpop.permute.xlu1 %8179  ;;  %v12903_v1 = vsel %vm702_vm6, %v8056_v23, %v12891_v25 }
 0xe0b   :  { %7547 = vrot.lane.b32.xlu0 %v12740_v46, %s9217_s24 }
 0xe0c   :  { %7549 = vrot.lane.b32.xlu1 %v12742_v20, %s9217_s24 }
 0xe0d   :  { %v12909_v8 = vpop.permute.xlu0 %8177 }
 0xe0e   :  { %v12911_v43 = vpop.permute.xlu1 %8299 }
 0xe0f   :  { %8435 = vrot.lane.b32.xlu0 %v12742_v20, %s9221_s26 }
 0xe10   :  { %8437 = vrot.lane.b32.xlu1 %v12744_v48, %s9221_s26 }
 0xe11   :  { %v8176_v29 = vpop.permute.xlu0 %8175 }
 0xe12   :  { %v8420_v27 = vpop.permute.xlu1 %8419  ;;  %v12919_v57 = vsel %vm823_vm7, %v8176_v29, %v12909_v8 }
 0xe13   :  { %7551 = vrot.lane.b32.xlu0 %v12744_v48, %s9217_s24 }
 0xe14   :  { %7553 = vrot.lane.b32.xlu1 %v12746_v49, %s9217_s24 }
 0xe15   :  { %v12925_v38 = vpop.permute.xlu0 %8297 }
 0xe16   :  { %v8416_v47 = vpop.permute.xlu1 %8415 }
 0xe17   :  { %7667 = vrot.lane.b32.xlu0 %v12740_v46, %s9218_s18 }
 0xe18   :  { %7669 = vrot.lane.b32.xlu1 %v12742_v20, %s9218_s18 }
 0xe19   :  { %v8418_v16 = vpop.permute.xlu0 %8417 }
 0xe1a   :  { %v7536_v58 = vpop.permute.xlu1 %7535  ;;  %v8443_v62 = vsel %vm1065_vm4, %v8416_v47, %v8418_v16  ;;  %v8444_v39 = vsel %vm1065_vm4, %v8418_v16, %v8420_v27 }
 0xe1b   :  { %7671 = vrot.lane.b32.xlu0 %v12744_v48, %s9218_s18  ;;  %8643 = vmatprep.subr.bf16.mxu1 %v8444_v39 }
 0xe1c   :  { %7673 = vrot.lane.b32.xlu1 %v12746_v49, %s9218_s18  ;;  %8644 = vmatpush1.bf16.msra.mxu1 %v8443_v62 }
 0xe1d   :  { %v8296_v63 = vpop.permute.xlu0 %8295 }
 0xe1e   :  { %v12937_v18 = vpop.permute.xlu1 %8423  ;;  %v12941_v37 = vsel %vm944_vm8, %v8296_v63, %v12925_v38 }
 0xe1f   :  { %7787 = vrot.lane.b32.xlu0 %v12740_v46, %s9219_s19 }
 0xe20   :  { %7789 = vrot.lane.b32.xlu1 %v12742_v20, %s9219_s19 }
 0xe21   :  { %v12947_v24 = vpop.permute.xlu0 %7533 }
 0xe22   :  { %v7540_v31 = vpop.permute.xlu1 %7539  ;;  %v12951_v26 = vsel %vm170_vm0, %v12947_v24, %v7536_v58 }
 0xe23   :  { %7791 = vrot.lane.b32.xlu0 %v12744_v48, %s9219_s19 }
 0xe24   :  { %7793 = vrot.lane.b32.xlu1 %v12746_v49, %s9219_s19 }
 0xe25   :  { %v12957_v34 = vpop.permute.xlu0 %8421 }
 0xe26   :  { %v7656_v3 = vpop.permute.xlu1 %7655  ;;  %v12961_v51 = vsel %vm1065_vm4, %v8420_v27, %v12957_v34 }
 0xe27   :  { %7907 = vrot.lane.b32.xlu0 %v12740_v46, %s9220_s25 }
 0xe28   :  { %7909 = vrot.lane.b32.xlu1 %v12742_v20, %s9220_s25 }
 0xe29   :  { %v7538_v41 = vpop.permute.xlu0 %7537 }
 0xe2a   :  { %v7660_v12 = vpop.permute.xlu1 %7659  ;;  %v12968_v19 = vsel %vm170_vm0, %v7536_v58, %v7538_v41  ;;  %v12971_v36 = vsel %vm170_vm0, %v7538_v41, %v7540_v31 }
 0xe2b   :  { %7911 = vrot.lane.b32.xlu0 %v12744_v48, %s9220_s25 }
 0xe2c   :  { %8303 = vrot.lane.b32.xlu1 %v12682_v5, %s9225_s20 }
 0xe2d   :  { %v12977_v28 = vpop.permute.xlu0 %7653 }
 0xe2e   :  { %v7776_v17 = vpop.permute.xlu1 %7775  ;;  %v12981_v6 = vsel %vm291_vm1, %v12977_v28, %v7656_v3 }
 0xe2f   :  { %8305 = vrot.lane.b32.xlu0 %v12684_v32, %s9225_s20 }
 0xe30   :  { %7913 = vrot.lane.b32.xlu1 %v12746_v49, %s9220_s25 }
 0xe31   :  { %v7658_v42 = vpop.permute.xlu0 %7657 }
 0xe32   :  { %v7780_v56 = vpop.permute.xlu1 %7779  ;;  %v12988_v23 = vsel %vm291_vm1, %v7656_v3, %v7658_v42  ;;  %v12991_v29 = vsel %vm291_vm1, %v7658_v42, %v7660_v12 }
 0xe33   :  { %8075 = vrot.lane.b32.xlu0 %v12742_v20, %s9223_s16 }
 0xe34   :  { %8201 = vrot.lane.b32.xlu1 %v13357_v35, %s9224_s17 }
 0xe35   :  { %v12997_v27 = vpop.permute.xlu0 %7773 }
 0xe36   :  { %v7896_v47 = vpop.permute.xlu1 %7895  ;;  %v13001_v16 = vsel %vm412_vm2, %v12997_v27, %v7776_v17 }
 0xe37   :  { %8425 = vrot.lane.b32.xlu0 %v12684_v32, %s9221_s26 }
 0xe38   :  { %8077 = vrot.lane.b32.xlu1 %v12744_v48, %s9223_s16 }
 0xe39   :  { %v7778_v58 = vpop.permute.xlu0 %7777 }
 0xe3a   :  { %v7544_v62 = vpop.permute.xlu1 %7543  ;;  %v13008_v39 = vsel %vm412_vm2, %v7776_v17, %v7778_v58  ;;  %v13011_v63 = vsel %vm412_vm2, %v7778_v58, %v7780_v56 }
 0xe3b   :  { %8079 = vrot.lane.b32.xlu0 %v12746_v49, %s9223_s16  ;;  %v7561_v58 = vsel %vm170_vm0, %v12627_v9, %v7544_v62 }
 0xe3c   :  { %8307 = vrot.lane.b32.xlu1 %v13357_v35, %s9225_s20 }
 0xe3d   :  { %v7894_v31 = vpop.permute.xlu0 %7893 }
 0xe3e   :  { %v7900_v3 = vpop.permute.xlu1 %7899  ;;  %v13019_v41 = vsel %vm533_vm3, %v12884_v0, %v7894_v31  ;;  %v13022_v12 = vsel %vm533_vm3, %v7894_v31, %v7896_v47  ;;  %v7676_v31 = vsel %vm291_vm1, %v12857_v11, %v12859_v13 }
 0xe3f   :  { %8195 = vrot.lane.b32.xlu0 %v12742_v20, %s9224_s17 }
 0xe40   :  { %8197 = vrot.lane.b32.xlu1 %v12744_v48, %s9224_s17 }
 0xe41   :  { %v13028_v17 = vpop.permute.xlu0 %7545 }
 0xe42   :  { %v7664_v42 = vpop.permute.xlu1 %7663  ;;  %v7562_v56 = vsel %vm170_vm0, %v7544_v62, %v13028_v17  ;;  %v7675_v62 = vsel %vm291_vm1, %v12635_v4, %v12857_v11  ;;  %v7796_v4 = vsel %vm412_vm2, %v12865_v54, %v12867_v59 }
 0xe43   :  { %8199 = vrot.lane.b32.xlu0 %v12746_v49, %s9224_s17  ;;  %8604 = vmatprep.subr.bf16.mxu0 %v7562_v56 }
 0xe44   :  { %8427 = vrot.lane.b32.xlu1 %v13357_v35, %s9221_s26  ;;  %8605 = vmatpush1.bf16.msra.mxu0 %v7561_v58 }
 0xe45   :  { %8606 = vmatprep.subr.bf16.mxu0 %v7676_v31  ;;  %v7898_v5 = vpop.permute.xlu0 %7897 }
 0xe46   :  { %v8064_v32 = vpop.permute.xlu1 %8063  ;;  %v13042_v46 = vsel %vm533_vm3, %v7896_v47, %v7898_v5  ;;  %v13045_v9 = vsel %vm533_vm3, %v7898_v5, %v7900_v3  ;;  %v7681_v5 = vsel %vm291_vm1, %v12629_v7, %v7664_v42  ;;  %v7795_v7 = vsel %vm412_vm2, %v12639_v40, %v12865_v54 }
 0xe47   :  { %8315 = vrot.lane.b32.xlu0 %v12742_v20, %s9225_s20  ;;  %v7916_v40 = vsel %vm533_vm3, %v12882_v2, %v12884_v0 }
 0xe48   :  { %8317 = vrot.lane.b32.xlu1 %v12744_v48, %s9225_s20  ;;  %8607 = vmatpush1.bf16.msra.mxu0 %v7675_v62 }
 0xe49   :  { %v13054_v56 = vpop.permute.xlu0 %7665 }
 0xe4a   :  { %v7784_v58 = vpop.permute.xlu1 %7783  ;;  %v7682_v47 = vsel %vm291_vm1, %v7664_v42, %v13054_v56  ;;  %v8848_v42 = vld [vmem:[#allocation4] sm:$0x1] }
 0xe4b   :  { %8319 = vrot.lane.b32.xlu0 %v12746_v49, %s9225_s20  ;;  %8608 = vmatprep.subr.bf16.mxu0 %v7682_v47 }
 0xe4c   :  { %8321 = vrot.lane.b32.xlu1 %v13357_v35, %s9225_s20  ;;  %8609 = vmatpush1.bf16.msra.mxu0 %v7681_v5 }
 0xe4d   :  { %8610 = vmatprep.subr.bf16.mxu0 %v7796_v4  ;;  %v13067_v11 = vpop.permute.xlu0 %8061  ;;  %v7801_v4 = vsel %vm412_vm2, %v12633_v15, %v7784_v58  ;;  %v7915_v15 = vsel %vm533_vm3, %v12641_v50, %v12882_v2 }
 0xe4e   :  { %v8068_v3 = vpop.permute.xlu1 %8067  ;;  %v13071_v31 = vsel %vm702_vm6, %v13067_v11, %v8064_v32 }
 0xe4f   :  { %8439 = vrot.lane.b32.xlu0 %v12746_v49, %s9221_s26 }
 0xe50   :  { %8441 = vrot.lane.b32.xlu1 %v13357_v35, %s9221_s26  ;;  %8611 = vmatpush1.bf16.msra.mxu0 %v7795_v7 }
 0xe51   :  { %v13080_v62 = vpop.permute.xlu0 %7785 }
 0xe52   :  { %v7904_v47 = vpop.permute.xlu1 %7903  ;;  %v7802_v5 = vsel %vm412_vm2, %v7784_v58, %v13080_v62 }
 0xe53   :  { %8851 = vperm.xlu0 %9148, %v8848_v42   ;;  %8612 = vmatprep.subr.bf16.mxu0 %v7802_v5  ;;  %v7921_v5 = vsel %vm533_vm3, %v12637_v53, %v7904_v47 }
 0xe54   :  { %8613 = vmatpush1.bf16.msra.mxu0 %v7801_v4 }
 0xe55   :  { %8614 = vmatprep.subr.bf16.mxu0 %v7916_v40  ;;  %v8066_v35 = vpop.permute.xlu0 %8065 }
 0xe56   :  { %v8184_v54 = vpop.permute.xlu1 %8183  ;;  %v13090_v7 = vsel %vm702_vm6, %v8064_v32, %v8066_v35  ;;  %v13093_v48 = vsel %vm702_vm6, %v8066_v35, %v8068_v3 }
 0xe58   :  { %8615 = vmatpush1.bf16.msra.mxu0 %v7915_v15 }
 0xe59   :  { %v13098_v58 = vpop.permute.xlu0 %7905 }
 0xe5a   :  { %v13100_v42 = vpop.permute.xlu1 %8081  ;;  %v7922_v0 = vsel %vm533_vm3, %v7904_v47, %v13098_v58 }
 0xe5b   :  { %8616 = vmatprep.subr.bf16.mxu0 %v7922_v0 }
 0xe5c   :  { %8617 = vmatpush1.bf16.msra.mxu0 %v7921_v5 }
 0xe5d   :  { %8618 = vmatprep.subr.bf16.mxu0 %v12675_v30  ;;  %v13107_v32 = vpop.permute.xlu0 %8181  ;;  %v8084_v30 = vsel %vm702_vm6, %v12891_v25, %v12893_v33 }
 0xe5e   :  { %v8188_v3 = vpop.permute.xlu1 %8187  ;;  %v13111_v50 = vsel %vm823_vm7, %v13107_v32, %v8184_v54 }
 0xe60   :  { %8619 = vmatpush1.bf16.msra.mxu0 %v12672_v22 }
 0xe61   :  { %8620 = vmatprep.subr.bf16.mxu0 %v12738_v45  ;;  %v8186_v2 = vpop.permute.xlu0 %8185 }
 0xe62   :  { %v8072_v4 = vpop.permute.xlu1 %8071  ;;  %v13116_v40 = vsel %vm823_vm7, %v8184_v54, %v8186_v2  ;;  %v13119_v53 = vsel %vm823_vm7, %v8186_v2, %v8188_v3 }
 0xe64   :  { %8621 = vmatpush1.bf16.msra.mxu0 %v12734_v21  ;;  %v8204_v21 = vsel %vm823_vm7, %v12909_v8, %v12899_v14  ;;  %v8324_v8 = vsel %vm944_vm8, %v12925_v38, %v12911_v43  ;;  %v13155_v38 = vcombine.low %v12874_v60, %v12874_v60  ;;  %v7557_v60 = vsel %vm170_vm0, %v12847_v55, %v12947_v24 }
 0xe65   :  { %8622 = vmatprep.subr.bf16.mxu0 %v8084_v30  ;;  %v13125_v47 = vpop.permute.xlu0 %8301 }
 0xe66   :  { %v8070_v22 = vpop.permute.xlu1 %8069 }
 0xe67   :  { %v8089_v15 = vsel %vm702_vm6, %v8070_v22, %v8072_v4 }
 0xe68   :  { %8623 = vmatpush1.bf16.msra.mxu0 %v12903_v1 }
 0xe69   :  { %v13128_v45 = vpop.permute.xlu0 %8073 }
 0xe6a   :  { %v8192_v35 = vpop.permute.xlu1 %8191  ;;  %v8090_v54 = vsel %vm702_vm6, %v8072_v4, %v13128_v45 }
 0xe6b   :  { %8624 = vmatprep.subr.bf16.mxu0 %v8090_v54 }
 0xe6c   :  { %8625 = vmatpush1.bf16.msra.mxu0 %v8089_v15 }
 0xe6d   :  { %8626 = vmatprep.subr.bf16.mxu0 %v8204_v21  ;;  %v13136_v25 = vpop.permute.xlu0 %8193 }
 0xe6e   :  { %v8190_v0 = vpop.permute.xlu1 %8189  ;;  %v8210_v1 = vsel %vm823_vm7, %v8192_v35, %v13136_v25 }
 0xe6f   :  { %v8209_v2 = vsel %vm823_vm7, %v8190_v0, %v8192_v35  ;;  %v13160_v0 = vld [vmem:[%s13296_s4 + $0x8] ss:$0 sps:$4 sm:$0xff]  }
 0xe70   :  { %8627 = vmatpush1.bf16.msra.mxu0 %v12919_v57 }
 0xe71   :  { %8628 = vmatprep.subr.bf16.mxu0 %v8210_v1  ;;  %v8312_v5 = vpop.permute.xlu0 %8311 }
 0xe72   :  { %v13141_v3 = vpop.permute.xlu1 %8313 }
 0xe73   :  { %v8330_v57 = vsel %vm944_vm8, %v8312_v5, %v13141_v3 }
 0xe74   :  { %8629 = vmatpush1.bf16.msra.mxu0 %v8209_v2 }
 0xe75   :  { %8630 = vmatprep.subr.bf16.mxu0 %v8324_v8  ;;  %v8432_v4 = vpop.permute.xlu0 %8431 }
 0xe76   :  { %v8434_v30 = vpop.permute.xlu1 %8433 }
 0xe77   :  { %v8450_v22 = vsel %vm1065_vm4, %v8432_v4, %v8434_v30 }
 0xe78   :  { %8645 = vmatprep.subr.bf16.mxu1 %v8450_v22  ;;  %8631 = vmatpush1.bf16.msra.mxu0 %v12941_v37  ;;  %v8446_v37 = vsel %vm1065_vm4, %v12957_v34, %v12937_v18 }
 0xe79   :  { %8632 = vmatprep.subr.bf16.mxu0 %v8330_v57  ;;  %v8310_v54 = vpop.permute.xlu0 %8309 }
 0xe7a   :  { %v8430_v15 = vpop.permute.xlu1 %8429  ;;  %v8329_v35 = vsel %vm944_vm8, %v8310_v54, %v8312_v5 }
 0xe7b   :  { %v8449_v21 = vsel %vm1065_vm4, %v8430_v15, %v8432_v4 }
 0xe7c   :  { %8646 = vmatpush1.bf16.msra.mxu1 %v8449_v21  ;;  %8633 = vmatpush1.bf16.msra.mxu0 %v8329_v35 }
 0xe7d   :  { %8684 = vmatprep.subr.bf16.mxu1 %v12951_v26  ;;  %8725 = vmatprep.subr.bf16.mxu0 %v8446_v37  ;;  %v7548_v1 = vpop.permute.xlu0 %7547 }
 0xe7e   :  { %v7550_v5 = vpop.permute.xlu1 %7549  ;;  %v7563_v55 = vsel %vm170_vm0, %v13028_v17, %v7548_v1 }
 0xe7f   :  { %8635 = vmatmul.mubr.bf16.vlgmr.msra.gmra.mrb[48].mxu0 %v13155_v38  ;;  %9037 = vmatmul.mubr.msk.bf16.vlgmr.msra.gmra.mrb[64].mxu1 %vm13362_vm10, %v13160_v0  ;;  %v7564_v2 = vsel %vm170_vm0, %v7548_v1, %v7550_v5 }
 0xe80   :  { %8685 = vmatpush1.bf16.msra.mxu1 %v7557_v60  ;;  %8726 = vmatpush1.bf16.msra.mxu0 %v12961_v51 }
 0xe81   :  { %8686 = vmatprep.subr.bf16.mxu1 %v7564_v2  ;;  %v8436_v34 = vpop.permute.xlu0 %8435  ;;  %8757 = vmatprep.mubr.bf16.mxu0 %v13341_v10  ;;  %v13364_v2 = vld [vmem:[#allocation8_spill] sm:$0xff] }
 0xe82   :  { %v13175_v26 = vpop.permute.xlu1 %8437  ;;  %v8451_v8 = vsel %vm1065_vm4, %v8434_v30, %v8436_v34  ;;  %8716 = vmatprep.mubr.bf16.mxu1 %v12880_v52  ;;  %v7677_v30 = vsel %vm291_vm1, %v12859_v13, %v12977_v28 }
 0xe83   :  { %v8452_v24 = vsel %vm1065_vm4, %v8436_v34, %v13175_v26 }
 0xe84   :  { %8687 = vmatpush1.bf16.msra.mxu1 %v7563_v55  ;;  %8727 = vmatprep.subr.bf16.mxu0 %v8452_v24 }
 0xe85   :  { %8688 = vmatprep.subr.bf16.mxu1 %v12981_v6  ;;  %8728 = vmatpush1.bf16.msra.mxu0 %v8451_v8  ;;  %v7552_v51 = vpop.permute.xlu0 %7551 }
 0xe86   :  { %v7554_v4 = vpop.permute.xlu1 %7553  ;;  %8766 = vmatprep.subr.bf16.mxu0 %v12971_v36  ;;  %v7565_v13 = vsel %vm170_vm0, %v7550_v5, %v7552_v51 }
 0xe87   :  { %v7566_v17 = vsel %vm170_vm0, %v7552_v51, %v7554_v4  ;;  %vm13368_vm0 = vmmov %vm13362_vm10 }
 0xe88   :  { %8689 = vmatpush1.bf16.msra.mxu1 %v7677_v30  ;;  %9038 = vmatmul.mubr.msk.bf16.vlgmr.msra.gmra.mrb[52].mxu0 %vm13363_vm11, %v13160_v0 }
 0xe89   :  { %8767 = vmatpush1.bf16.msra.mxu0 %v12968_v19  ;;  %v7668_v22 = vpop.permute.xlu0 %7667  ;;  %8798 = vmatprep.mubr.bf16.mxu0 %v12880_v52  ;;  %v7797_v52 = vsel %vm412_vm2, %v12867_v59, %v12997_v27 }
 0xe8a   :  { %v7670_v6 = vpop.permute.xlu1 %7669  ;;  %8768 = vmatprep.subr.bf16.mxu0 %v7566_v17  ;;  %v7683_v36 = vsel %vm291_vm1, %v13054_v56, %v7668_v22 }
 0xe8b   :  { %v7684_v57 = vsel %vm291_vm1, %v7668_v22, %v7670_v6 }
 0xe8c   :  { %8690 = vmatprep.subr.bf16.mxu1 %v7684_v57 }
 0xe8d   :  { %8691 = vmatpush1.bf16.msra.mxu1 %v7683_v36  ;;  %8769 = vmatpush1.bf16.msra.mxu0 %v7565_v13  ;;  %v7672_v28 = vpop.permute.xlu0 %7671 }
 0xe8e   :  { %v7674_v54 = vpop.permute.xlu1 %7673  ;;  %8692 = vmatprep.subr.bf16.mxu1 %v13001_v16  ;;  %8770 = vmatprep.subr.bf16.mxu0 %v12991_v29  ;;  %v7685_v16 = vsel %vm291_vm1, %v7670_v6, %v7672_v28 }
 0xe8f   :  { %v7686_v19 = vsel %vm291_vm1, %v7672_v28, %v7674_v54 }
 0xe91   :  { %8693 = vmatpush1.bf16.msra.mxu1 %v7797_v52  ;;  %8771 = vmatpush1.bf16.msra.mxu0 %v12988_v23  ;;  %v7788_v56 = vpop.permute.xlu0 %7787 }
 0xe92   :  { %v7790_v15 = vpop.permute.xlu1 %7789  ;;  %8772 = vmatprep.subr.bf16.mxu0 %v7686_v19  ;;  %v7803_v35 = vsel %vm412_vm2, %v13080_v62, %v7788_v56 }
 0xe93   :  { %v7804_v21 = vsel %vm412_vm2, %v7788_v56, %v7790_v15 }
 0xe94   :  { %8694 = vmatprep.subr.bf16.mxu1 %v7804_v21 }
 0xe95   :  { %8695 = vmatpush1.bf16.msra.mxu1 %v7803_v35  ;;  %8773 = vmatpush1.bf16.msra.mxu0 %v7685_v16  ;;  %v7792_v29 = vpop.permute.xlu0 %7791  ;;  %v13369_v16 = vld [vmem:[#allocation5_spill] sm:$0xff] }
 0xe96   :  { %v7794_v59 = vpop.permute.xlu1 %7793  ;;  %8696 = vmatprep.subr.bf16.mxu1 %v13022_v12  ;;  %8774 = vmatprep.subr.bf16.mxu0 %v13011_v63  ;;  %v7805_v5 = vsel %vm412_vm2, %v7790_v15, %v7792_v29 }
 0xe97   :  { %v7806_v23 = vsel %vm412_vm2, %v7792_v29, %v7794_v59  ;;  %v13370_v29 = vsub.s32 0, %v13369_v16 }
 0xe99   :  { %8697 = vmatpush1.bf16.msra.mxu1 %v13019_v41  ;;  %8775 = vmatpush1.bf16.msra.mxu0 %v13008_v39  ;;  %v7908_v27 = vpop.permute.xlu0 %7907 }
 0xe9a   :  { %v7910_v62 = vpop.permute.xlu1 %7909  ;;  %8776 = vmatprep.subr.bf16.mxu0 %v7806_v23  ;;  %v7923_v37 = vsel %vm533_vm3, %v13098_v58, %v7908_v27 }
 0xe9b   :  { %v7924_v1 = vsel %vm533_vm3, %v7908_v27, %v7910_v62 }
 0xe9c   :  { %8698 = vmatprep.subr.bf16.mxu1 %v7924_v1 }
 0xe9d   :  { %8699 = vmatpush1.bf16.msra.mxu1 %v7923_v37  ;;  %8777 = vmatpush1.bf16.msra.mxu0 %v7805_v5  ;;  %v7912_v63 = vpop.permute.xlu0 %7911 }
 0xe9e   :  { %v13217_v12 = vpop.permute.xlu1 %8303  ;;  %8700 = vmatprep.subr.bf16.mxu1 %v12679_v61  ;;  %8778 = vmatprep.subr.bf16.mxu0 %v13045_v9  ;;  %v7925_v60 = vsel %vm533_vm3, %v7910_v62, %v7912_v63 }
 0xea1   :  { %8701 = vmatpush1.bf16.msra.mxu1 %v12677_v44  ;;  %8779 = vmatpush1.bf16.msra.mxu0 %v13042_v46  ;;  %v13223_v39 = vpop.permute.xlu0 %8305  ;;  %v13365_v44 = vld [vmem:[#allocation7_spill] sm:$0xff]  ;;  %v8085_v46 = vsel %vm702_vm6, %v12893_v33, %v13067_v11  ;;  %v8205_v33 = vsel %vm823_vm7, %v12899_v14, %v13107_v32  ;;  %v8326_v14 = vsel %vm944_vm8, %v13125_v47, %v13217_v12 }
 0xea2   :  { %v7914_v41 = vpop.permute.xlu1 %7913  ;;  %8702 = vmatprep.subr.bf16.mxu1 %v12742_v20  ;;  %v13366_v20 = vld [vmem:[#allocation6_spill] sm:$0xff] }
 0xea3   :  { %v7926_v58 = vsel %vm533_vm3, %v7912_v63, %v7914_v41 }
 0xea4   :  { %8780 = vmatprep.subr.bf16.mxu0 %v7926_v58 }
 0xea5   :  { %8703 = vmatpush1.bf16.msra.mxu1 %v13364_v2  ;;  %8781 = vmatpush1.bf16.msra.mxu0 %v7925_v60  ;;  %v8076_v61 = vpop.permute.xlu0 %8075 }
 0xea6   :  { %v8202_v34 = vpop.permute.xlu1 %8201  ;;  %8704 = vmatprep.subr.bf16.mxu1 %v13071_v31  ;;  %8782 = vmatprep.subr.bf16.mxu0 %v13365_v44  ;;  %v8091_v24 = vsel %vm702_vm6, %v13128_v45, %v8076_v61  ;;  %v13367_v31 = vld [vmem:[#allocation9_spill] sm:$0xff]  ;;  %v9226_v44 = vmov 1966171168  }
 0xea9   :  { %8705 = vmatpush1.bf16.msra.mxu1 %v8085_v46  ;;  %8783 = vmatpush1.bf16.msra.mxu0 %v13366_v20  ;;  %v8426_v9 = vpop.permute.xlu0 %8425  ;;  %v8892_v46 = vunpack.c.l.s4 %v9226_v44 }
 0xeaa   :  { %v8078_v8 = vpop.permute.xlu1 %8077  ;;  %8784 = vmatprep.subr.bf16.mxu0 %v12746_v49  ;;  %v8447_v13 = vsel %vm1065_vm4, %v12937_v18, %v8426_v9 }
 0xeab   :  { %v8092_v55 = vsel %vm702_vm6, %v8076_v61, %v8078_v8 }
 0xeac   :  { %8706 = vmatprep.subr.bf16.mxu1 %v8092_v55 }
 0xead   :  { %8707 = vmatpush1.bf16.msra.mxu1 %v8091_v24  ;;  %8785 = vmatpush1.bf16.msra.mxu0 %v13367_v31  ;;  %v8080_v51 = vpop.permute.xlu0 %8079  ;;  %v8893_v31 = vunpack.c.0.s8 %v8892_v46 }
 0xeae   :  { %v8308_v4 = vpop.permute.xlu1 %8307  ;;  %8708 = vmatprep.subr.bf16.mxu1 %v13111_v50  ;;  %8786 = vmatprep.subr.bf16.mxu0 %v13093_v48  ;;  %v8094_v49 = vsel %vm702_vm6, %v8080_v51, %v13100_v42  ;;  %v8093_v48 = vsel %vm702_vm6, %v8078_v8, %v8080_v51  ;;  %v8325_v42 = vsel %vm944_vm8, %v12911_v43, %v13125_v47 }
 0xeaf   :  { %v8328_v43 = vsel %vm944_vm8, %v13223_v39, %v8308_v4 }
 0xeb1   :  { %8709 = vmatpush1.bf16.msra.mxu1 %v8205_v33  ;;  %8787 = vmatpush1.bf16.msra.mxu0 %v13090_v7  ;;  %v8196_v11 = vpop.permute.xlu0 %8195 }
 0xeb2   :  { %v8198_v45 = vpop.permute.xlu1 %8197  ;;  %8788 = vmatprep.subr.bf16.mxu0 %v8094_v49  ;;  %v8211_v30 = vsel %vm823_vm7, %v13136_v25, %v8196_v11 }
 0xeb3   :  { %v8212_v50 = vsel %vm823_vm7, %v8196_v11, %v8198_v45 }
 0xeb4   :  { %8710 = vmatprep.subr.bf16.mxu1 %v8212_v50 }
 0xeb5   :  { %8711 = vmatpush1.bf16.msra.mxu1 %v8211_v30  ;;  %8789 = vmatpush1.bf16.msra.mxu0 %v8093_v48  ;;  %v8200_v7 = vpop.permute.xlu0 %8199 }
 0xeb6   :  { %v8428_v32 = vpop.permute.xlu1 %8427  ;;  %8712 = vmatprep.subr.bf16.mxu1 %v8326_v14  ;;  %8790 = vmatprep.subr.bf16.mxu0 %v13119_v53  ;;  %v8214_v25 = vsel %vm823_vm7, %v8200_v7, %v8202_v34  ;;  %v8213_v57 = vsel %vm823_vm7, %v8198_v45, %v8200_v7  ;;  %v8896_v45 = vsub.s32 %v8893_v31, %v13369_v16 }
 0xeb9   :  { %8713 = vmatpush1.bf16.msra.mxu1 %v8325_v42  ;;  %8791 = vmatpush1.bf16.msra.mxu0 %v13116_v40  ;;  %v8316_v17 = vpop.permute.xlu0 %8315  ;;  %v8448_v40 = vsel %vm1065_vm4, %v8426_v9, %v8428_v32 }
 0xeba   :  { %v8318_v22 = vpop.permute.xlu1 %8317  ;;  %8792 = vmatprep.subr.bf16.mxu0 %v8214_v25  ;;  %v8331_v6 = vsel %vm944_vm8, %v13141_v3, %v8316_v17  ;;  %v8327_v3 = vsel %vm944_vm8, %v13217_v12, %v13223_v39 }
 0xebb   :  { %v8332_v36 = vsel %vm944_vm8, %v8316_v17, %v8318_v22 }
 0xebc   :  { %8714 = vmatprep.subr.bf16.mxu1 %v8332_v36 }
 0xebd   :  { %8715 = vmatpush1.bf16.msra.mxu1 %v8331_v6  ;;  %8793 = vmatpush1.bf16.msra.mxu0 %v8213_v57  ;;  %v8320_v53 = vpop.permute.xlu0 %8319 }
 0xebe   :  { %v8322_v47 = vpop.permute.xlu1 %8321  ;;  %8794 = vmatprep.subr.bf16.mxu0 %v8328_v43  ;;  %8807 = vmatprep.subr.bf16.mxu1 %v8448_v40  ;;  %v8333_v15 = vsel %vm944_vm8, %v8318_v22, %v8320_v53 }
 0xebf   :  { %v8334_v28 = vsel %vm944_vm8, %v8320_v53, %v8322_v47 }
 0xec0   :  { %8717 = vmatmul.mubr.bf16.vlgmr.msra.gmra.mrb[68].mxu1 %v13155_v38 }
 0xec1   :  { %8795 = vmatpush1.bf16.msra.mxu0 %v8327_v3  ;;  %8808 = vmatpush1.bf16.msra.mxu1 %v8447_v13  ;;  %v8440_v54 = vpop.permute.xlu0 %8439 }
 0xec2   :  { %v8442_v52 = vpop.permute.xlu1 %8441  ;;  %8796 = vmatprep.subr.bf16.mxu0 %v8334_v28  ;;  %v8453_v19 = vsel %vm1065_vm4, %v13175_v26, %v8440_v54  ;;  %8839 = vmatprep.mubr.bf16.mxu1 %v13341_v10 }
 0xec3   :  { %v8454_v56 = vsel %vm1065_vm4, %v8440_v54, %v8442_v52 }
 0xec4   :  { %8809 = vmatprep.subr.bf16.mxu1 %v8454_v56 }
 0xec5   :  { %8797 = vmatpush1.bf16.msra.mxu0 %v8333_v15  ;;  %8810 = vmatpush1.bf16.msra.mxu1 %v8453_v19 }
 0xec8   :  { %8799 = vmatmul.mubr.bf16.vlgmr.msra.gmra.mrb[56].mxu0 %v13155_v38  ;;  %9039 = vmatmul.mubr.msk.bf16.vlgmr.msra.gmra.mrb[72].mxu1 %vm13368_vm0, %v13160_v0 }
 0xed2   :  { %v8852_v18 = vpop.permute.xlu0 %8851 }
 0xed3   :  { %v8857_v26 = vrot.slane %v8852_v18, %v13370_v29 }
 0xf52   :  { %v8636_v35 = vpop.f32.mrb[48].mxu0  ;;  %v8677_v21 = vpop.f32.mrb[64].mxu1 }
 0xf53   :  { %v8678_v59 = vadd.f32 %v8677_v21, %v8636_v35  ;;  %v8638_v10 = vpop.f32.mrb[49].mxu0  ;;  %v8679_v23 = vpop.f32.mrb[65].mxu1  ;;  %v13371_v35 = vlaneseq }
 0xf54   :  { %v8680_v27 = vadd.f32 %v8679_v23, %v8638_v10  ;;  %v8681_v62 = vpop.f32.mrb[66].mxu1  ;;  %v8640_v37 = vpop.f32.mrb[50].mxu0 }
 0xf55   :  { %v8858_v1 = vadd.f32 %v8857_v26, %v8678_v59  ;;  %v8682_v5 = vpop.f32.mrb[67].mxu1  ;;  %v8641_v63 = vpop.f32.mrb[51].mxu0  ;;  %vm8931_vm8 = vcmp.lt.s32.totalorder %v13371_v35, 768 }
 0xf56   :  { %v8859_v12 = vadd.f32 %v8857_v26, %v8680_v27 }
 0xf57   :  { %vm8864_vm1 = vcmp.ge.f32.partialorder %v8858_v1, 0.0  ;;  %v8870_v38 = vmul.f32 0.2, %v8858_v1 }
 0xf58   :  { %vm8865_vm2 = vcmp.ge.f32.partialorder %v8859_v12, 0.0  ;;  %v8871_v0 = vmul.f32 0.2, %v8859_v12 }
 0xf59   :  { %v8876_v39 = vsel %vm8864_vm1, %v8858_v1, %v8870_v38 }
 0xf5a   :  { %v8877_v41 = vsel %vm8865_vm2, %v8859_v12, %v8871_v0 }
 0xf5b   :  { %v8888_v58 = vcombine.low %v8876_v39, %v8877_v41  ;;  %v8759_v60 = vpop.f32.mrb[52].mxu0 }
 0xf5c   :  { %v8761_v2 = vpop.f32.mrb[53].mxu0 }
 0xf5d   :  { %v8763_v61 = vpop.f32.mrb[54].mxu0  ;;  %v8897_v36 = vrot.slane %v8888_v58, %v8896_v45 }
 0xf5e   :  { %v8764_v34 = vpop.f32.mrb[55].mxu0 }
 0xf93   :  { %v8718_v20 = vpop.f32.mrb[68].mxu1 }
 0xf94   :  { %v8760_v9 = vadd.f32 %v8759_v60, %v8718_v20  ;;  %v8720_v8 = vpop.f32.mrb[69].mxu1 }
 0xf95   :  { %v8762_v55 = vadd.f32 %v8761_v2, %v8720_v8  ;;  %v8722_v24 = vpop.f32.mrb[70].mxu1 }
 0xf96   :  { %v8860_v51 = vadd.f32 %v8857_v26, %v8760_v9  ;;  %v8723_v4 = vpop.f32.mrb[71].mxu1 }
 0xf97   :  { %v8861_v33 = vadd.f32 %v8857_v26, %v8762_v55 }
 0xf98   :  { %vm8866_vm3 = vcmp.ge.f32.partialorder %v8860_v51, 0.0  ;;  %v8872_v49 = vmul.f32 0.2, %v8860_v51 }
 0xf99   :  { %vm8867_vm4 = vcmp.ge.f32.partialorder %v8861_v33, 0.0  ;;  %v8873_v11 = vmul.f32 0.2, %v8861_v33 }
 0xf9a   :  { %v8878_v30 = vsel %vm8866_vm3, %v8860_v51, %v8872_v49 }
 0xf9b   :  { %v8879_v50 = vsel %vm8867_vm4, %v8861_v33, %v8873_v11  ;;  %v8800_v48 = vpop.f32.mrb[56].mxu0  ;;  %v8841_v14 = vpop.f32.mrb[72].mxu1 }
 0xf9c   :  { %v8889_v7 = vcombine.low %v8878_v30, %v8879_v50  ;;  %v8842_v32 = vadd.f32 %v8841_v14, %v8800_v48  ;;  %v8802_v42 = vpop.f32.mrb[57].mxu0  ;;  %v8843_v25 = vpop.f32.mrb[73].mxu1 }
 0xf9d   :  { %v8844_v17 = vadd.f32 %v8843_v25, %v8802_v42  ;;  %v8804_v22 = vpop.f32.mrb[58].mxu0  ;;  %v8845_v6 = vpop.f32.mrb[74].mxu1 }
 0xf9e   :  { %v8904_v57 = vrot.slane %v8889_v7, %v8896_v45  ;;  %v8862_v43 = vadd.f32 %v8857_v26, %v8842_v32  ;;  %v8805_v40 = vpop.f32.mrb[59].mxu0  ;;  %v8846_v53 = vpop.f32.mrb[75].mxu1 }
 0xf9f   :  { %v8863_v47 = vadd.f32 %v8857_v26, %v8844_v17 }
 0xfa0   :  { %v8912_v3 = vcombine.low %v8897_v36, %v8904_v57  ;;  %vm8868_vm6 = vcmp.ge.f32.partialorder %v8862_v43, 0.0  ;;  %v8874_v13 = vmul.f32 0.2, %v8862_v43 }
 0xfa1   :  { %vm8869_vm7 = vcmp.ge.f32.partialorder %v8863_v47, 0.0  ;;  %v8875_v28 = vmul.f32 0.2, %v8863_v47 }
 0xfa2   :  { %v8880_v54 = vsel %vm8868_vm6, %v8862_v43, %v8874_v13  ;;  %v8919_v15 = vrot.slane %v8912_v3, %v8896_v45 }
 0xfa3   :  { %v8881_v52 = vsel %vm8869_vm7, %v8863_v47, %v8875_v28 }
 0xfa4   :  { %v8890_v19 = vcombine.low %v8880_v54, %v8881_v52 }
 0xfa6   :  { %v8911_v56 = vrot.slane %v8890_v19, %v8896_v45 }
 0xfa8   :  { %v8926_v18 = vrot.slane %v8911_v56, %v8896_v45 }
 0xfaa   :  { %v8927_v21 = vcombine.low %v8919_v15, %v8926_v18 }
 0xfac   :  { %8933 = vst.msk [vmem:[%s13297_s7] sm:$0x3f] %vm8931_vm8, %v8927_v21 }

</bundles_post_ra>
